<compile_context>
chip_gen: v7x
topology: tpu7x:2x2x1
jax: 0.10.0
libtpu: 0.0.40
codegen_flags: <defaults>
</compile_context>

<pallas_src>
import functools

import jax
import jax.numpy as jnp
from jax.experimental import pallas as pl
from jax.experimental.pallas import tpu as pltpu


# ----------------------------------------------------------------------------
# Pallas kernels
# ----------------------------------------------------------------------------
def _apply_act(y, act):
    if act == "leaky":
        return jnp.where(y > 0, y, 0.1 * y)
    if act == "sigmoid":
        return 1.0 / (1.0 + jnp.exp(-y))      # exact: keeps output <= 1.0
    return y


def _conv_kernel(x_ref, w_ref, b_ref, o_ref, *, act):
    # bf16 operands in VMEM, cast to f32 in-register -> F32xF32=F32 dot
    # (bf16xbf16->f32 is rejected by the interpret/CPU dot executor).
    x = x_ref[...].astype(jnp.float32)
    w = w_ref[...].astype(jnp.float32)
    y = jnp.dot(w, x, preferred_element_type=jnp.float32) + b_ref[...]
    o_ref[...] = _apply_act(y, act).astype(o_ref.dtype)


def _convt_res_kernel(x_ref, w_ref, b_ref, wr_ref, br_ref, o_ref):
    # ConvTranspose (sub-pixel matmul) + BN (folded) + LeakyReLU(0.1), then the
    # 1x1 residual conv fused in the epilogue: out = z + blockdiag(Wres) @ z + b_res.
    x = x_ref[...].astype(jnp.float32)
    w = w_ref[...].astype(jnp.float32)
    z = jnp.dot(w, x, preferred_element_type=jnp.float32) + b_ref[...]
    z = jnp.where(z > 0, z, 0.1 * z)
    wr = wr_ref[...].astype(jnp.float32)
    y = z + jnp.dot(wr, z, preferred_element_type=jnp.float32) + br_ref[...]
    o_ref[...] = y.astype(o_ref.dtype)


# ----------------------------------------------------------------------------
# pallas_call wrappers
# ----------------------------------------------------------------------------
_COMPILER_PARAMS = pltpu.CompilerParams(
    dimension_semantics=("parallel",),
    vmem_limit_bytes=32 * 1024 * 1024,
)


def _round_up(x, m):
    return ((x + m - 1) // m) * m


def _pad_cols(xT, tm):
    K, M = xT.shape
    Mp = _round_up(M, tm)
    if Mp != M:
        xT = jnp.pad(xT, ((0, 0), (0, Mp - M)))
    return xT, Mp


def fused_conv_matmul(xT, wT, bias, act, out_dtype=jnp.bfloat16):
    """out(Cout, M) = act(wT(Cout,K) @ xT(K,M) + bias)."""
    K, M = xT.shape
    Cout = wT.shape[0]
    TM = min(512, _round_up(M, 128))            # grid>=2 on the M=2048 layers
    xT, Mp = _pad_cols(xT.astype(jnp.bfloat16), TM)
    wT = wT.astype(jnp.bfloat16)
    b2 = bias.reshape(Cout, 1).astype(jnp.float32)

    out = pl.pallas_call(
        functools.partial(_conv_kernel, act=act),
        out_shape=jax.ShapeDtypeStruct((Cout, Mp), out_dtype),
        grid_spec=pltpu.PrefetchScalarGridSpec(
            num_scalar_prefetch=0,
            grid=(Mp // TM,),
            in_specs=[
                pl.BlockSpec((K, TM), lambda i: (0, i)),     # patches^T tile
                pl.BlockSpec((Cout, K), lambda i: (0, 0)),   # weight (resident)
                pl.BlockSpec((Cout, 1), lambda i: (0, 0)),   # bias (resident)
            ],
            out_specs=pl.BlockSpec((Cout, TM), lambda i: (0, i)),
        ),
        compiler_params=_COMPILER_PARAMS,
    )(xT, wT, b2)
    return out[:, :M]


def fused_convt_res_matmul(xT, wT, bias, wres, bres, out_dtype=jnp.bfloat16):
    """ConvT sub-pixel matmul + activation + fused 1x1 residual conv."""
    K, M = xT.shape            # K = 4*Cin
    C4 = wT.shape[0]           # 4*Cout
    TM = min(512, _round_up(M, 128))
    xT, Mp = _pad_cols(xT.astype(jnp.bfloat16), TM)
    wT = wT.astype(jnp.bfloat16)
    wres = wres.astype(jnp.bfloat16)
    b2 = bias.reshape(C4, 1).astype(jnp.float32)
    br2 = bres.reshape(C4, 1).astype(jnp.float32)

    out = pl.pallas_call(
        _convt_res_kernel,
        out_shape=jax.ShapeDtypeStruct((C4, Mp), out_dtype),
        grid_spec=pltpu.PrefetchScalarGridSpec(
            num_scalar_prefetch=0,
            grid=(Mp // TM,),
            in_specs=[
                pl.BlockSpec((K, TM), lambda i: (0, i)),     # 4-shift patches^T
                pl.BlockSpec((C4, K), lambda i: (0, 0)),     # sub-pixel weight
                pl.BlockSpec((C4, 1), lambda i: (0, 0)),     # bias (BN folded)
                pl.BlockSpec((C4, C4), lambda i: (0, 0)),    # block-diag residual W
                pl.BlockSpec((C4, 1), lambda i: (0, 0)),     # residual bias
            ],
            out_specs=pl.BlockSpec((C4, TM), lambda i: (0, i)),
        ),
        compiler_params=_COMPILER_PARAMS,
    )(xT, wT, b2, wres, br2)
    return out[:, :M]


# ----------------------------------------------------------------------------
# Layer lowerings (im2col / sub-pixel glue in XLA; matmul+epilogue in Pallas)
# ----------------------------------------------------------------------------
# TODO(synk): move this gather into the kernel (9-tap reduction grid axis or a
# resident padded-input block) to cut the patch-matrix HBM round trip.
def im2col_cm(x_cm, kh, kw, stride, pad):
    """x_cm: (C,N,H,W) -> patches^T (kh*kw*C, N*Ho*Wo), row order (kh,kw,C)."""
    C, N, H, W = x_cm.shape
    xp = jnp.pad(x_cm, ((0, 0), (0, 0), (pad, pad), (pad, pad)))
    Hp, Wp = H + 2 * pad, W + 2 * pad
    Ho = (Hp - kh) // stride + 1
    Wo = (Wp - kw) // stride + 1
    rows = []
    for i in range(kh):
        for j in range(kw):
            sl = xp[:, :, i:i + stride * (Ho - 1) + 1:stride,
                    j:j + stride * (Wo - 1) + 1:stride]
            rows.append(sl.reshape(C, N * Ho * Wo))
    return jnp.concatenate(rows, axis=0), (N, Ho, Wo)


def _fold_bn(b, bn, cout):
    if bn is None:
        return jnp.ones((cout,), jnp.float32), b
    gamma, beta, mean, var = bn
    s = gamma / jnp.sqrt(var + 1e-5)
    return s, (b - mean) * s + beta


def conv_layer(x_cm, p, act, stride, pad, out_dtype=jnp.bfloat16):
    """Conv2d(+BN folded)+activation.  p['w']: HWIO (kh,kw,cin,cout)."""
    w, b, bn = p["w"], p["b"], p["bn"]
    kh, kw, cin, cout = w.shape
    s, bias = _fold_bn(b, bn, cout)
    wT = (w.reshape(kh * kw * cin, cout) * s[None, :]).T          # (Cout, K)
    if kh == 1 and kw == 1 and stride == 1 and pad == 0:
        C, N, H, W = x_cm.shape
        patT, shape = x_cm.reshape(C, N * H * W), (N, H, W)
    else:
        patT, shape = im2col_cm(x_cm, kh, kw, stride, pad)
    out = fused_conv_matmul(patT, wT, bias, act, out_dtype=out_dtype)
    N, Ho, Wo = shape
    return out.reshape(cout, N, Ho, Wo)


def _subpixel_weight(w_t):
    """ConvTranspose2d weight (Cin,Cout,3,3) -> (4*Cin, 4*Cout) sub-pixel matrix.
       Row blocks = input shifts [x00,x01,x10,x11]; col blocks = parities [ee,eo,oe,oo]."""
    cin, cout = w_t.shape[:2]
    W = lambda i, j: w_t[:, :, i, j]
    Z = jnp.zeros((cin, cout), w_t.dtype)
    rows = [
        jnp.concatenate([W(1, 1), W(1, 2), W(2, 1), W(2, 2)], axis=1),  # x[m,n]
        jnp.concatenate([Z,       W(1, 0), Z,       W(2, 0)], axis=1),  # x[m,n+1]
        jnp.concatenate([Z,       Z,       W(0, 1), W(0, 2)], axis=1),  # x[m+1,n]
        jnp.concatenate([Z,       Z,       Z,       W(0, 0)], axis=1),  # x[m+1,n+1]
    ]
    return jnp.concatenate(rows, axis=0)


def conv_transpose_residual_layer(x_cm, pt, pres):
    """ConvTranspose2d(k=3,s=2,p=1,op=1)+BN+LeakyReLU, with y + Conv1x1(y) fused."""
    w_t, b = pt["w"], pt["b"]                  # (Cin, Cout, 3, 3) — PyTorch layout
    gamma, beta, mean, var = pt["bn"]
    cin, cout = w_t.shape[:2]
    s = gamma / jnp.sqrt(var + 1e-5)
    bias = (b - mean) * s + beta
    Wbig = _subpixel_weight(w_t)               # (4Cin, 4Cout)
    wT = (Wbig * jnp.tile(s, 4)[None, :]).T    # (4Cout, 4Cin)
    bias_big = jnp.tile(bias, 4)

    # 1x1 residual conv, applied per parity block (exactly equivalent since it
    # is per-pixel): block-diagonal (4Cout, 4Cout) matrix.
    wres_mat = pres["w"].reshape(cout, cout).T                     # (Cout, Cin)
    wres_big = jnp.kron(jnp.eye(4, dtype=wres_mat.dtype), wres_mat)
    bres_big = jnp.tile(pres["b"], 4)

    C, N, H, W = x_cm.shape
    xp = jnp.pad(x_cm, ((0, 0), (0, 0), (0, 1), (0, 1)))
    shifts = (xp[:, :, 0:H, 0:W], xp[:, :, 0:H, 1:W + 1],
              xp[:, :, 1:H + 1, 0:W], xp[:, :, 1:H + 1, 1:W + 1])
    patT = jnp.concatenate([t.reshape(C, N * H * W) for t in shifts], axis=0)

    out = fused_convt_res_matmul(patT, wT, bias_big, wres_big, bres_big)
    # TODO(synk): chain parity blocks straight into the next stage instead of
    # interleaving to HBM between conv-transpose stages.
    out = out.reshape(2, 2, cout, N, H, W)                 # (r, s, Cout, N, H, W)
    out = jnp.transpose(out, (2, 3, 4, 0, 5, 1)).reshape(cout, N, 2 * H, 2 * W)
    return out


# ----------------------------------------------------------------------------
# Deterministic parameter init (shapes from the PyTorch module, inference-mode BN)
# ----------------------------------------------------------------------------
def _conv_params(key, kh, kw, cin, cout):
    k1, k2 = jax.random.split(key)
    w = jax.random.normal(k1, (kh, kw, cin, cout), jnp.float32) / jnp.sqrt(kh * kw * cin)
    b = 0.01 * jax.random.normal(k2, (cout,), jnp.float32)
    return w, b


def _convT_params(key, cin, cout, k=3):
    k1, k2 = jax.random.split(key)
    w = jax.random.normal(k1, (cin, cout, k, k), jnp.float32) / jnp.sqrt(k * k * cin)
    b = 0.01 * jax.random.normal(k2, (cout,), jnp.float32)
    return w, b


def _bn_params(key, c):
    k1, k2, k3 = jax.random.split(key, 3)
    gamma = 1.0 + 0.1 * jax.random.normal(k1, (c,), jnp.float32)
    beta = 0.1 * jax.random.normal(k2, (c,), jnp.float32)
    mean = 0.05 * jax.random.normal(k3, (c,), jnp.float32)
    var = jnp.ones((c,), jnp.float32)
    return (gamma, beta, mean, var)


def init_params(key):
    ks = jax.random.split(key, 24)
    P = {}
    P["enc1"]   = dict(zip(("w", "b"), _conv_params(ks[0], 3, 3, 3, 16)),  bn=_bn_params(ks[1], 16))
    P["enc2a"]  = dict(zip(("w", "b"), _conv_params(ks[2], 3, 3, 16, 24)), bn=_bn_params(ks[3], 24))
    P["enc2b"]  = dict(zip(("w", "b"), _conv_params(ks[4], 3, 3, 24, 24)), bn=_bn_params(ks[5], 24))
    P["dec1"]   = dict(zip(("w", "b"), _convT_params(ks[6], 24, 48)),      bn=_bn_params(ks[7], 48))
    P["res1"]   = dict(zip(("w", "b"), _conv_params(ks[8], 1, 1, 48, 48)), bn=None)
    P["dec2"]   = dict(zip(("w", "b"), _convT_params(ks[9], 48, 32)),      bn=_bn_params(ks[10], 32))
    P["res2"]   = dict(zip(("w", "b"), _conv_params(ks[11], 1, 1, 32, 32)), bn=None)
    P["dec3"]   = dict(zip(("w", "b"), _convT_params(ks[12], 32, 64)),     bn=_bn_params(ks[13], 64))
    P["res3"]   = dict(zip(("w", "b"), _conv_params(ks[14], 1, 1, 64, 64)), bn=None)
    P["dec4_1"] = dict(zip(("w", "b"), _conv_params(ks[15], 3, 3, 64, 64)), bn=_bn_params(ks[16], 64))
    P["dec4_2"] = dict(zip(("w", "b"), _conv_params(ks[17], 3, 3, 64, 64)), bn=_bn_params(ks[18], 64))
    P["dec5"]   = dict(zip(("w", "b"), _conv_params(ks[19], 3, 3, 64, 3)),  bn=None)
    return P


# ----------------------------------------------------------------------------
# Forward pass (matches TestNew.forward; BN in inference mode, nn.Dropout unused)
# ----------------------------------------------------------------------------
def forward(x_nchw, P, random_drop=None, drop_key=None):
    x = jnp.transpose(x_nchw, (1, 0, 2, 3)).astype(jnp.bfloat16)  # NCHW -> (C,N,H,W)

    # encoder
    x = conv_layer(x, P["enc1"], "leaky", 2, 1)
    x = conv_layer(x, P["enc2a"], "leaky", 2, 1)
    latent = conv_layer(x, P["enc2b"], "leaky", 2, 1)

    if random_drop is not None:   # per-channel Bernoulli mask on the latent
        mask = (jax.random.uniform(drop_key, (latent.shape[0],)) > random_drop)
        latent = latent * mask.astype(latent.dtype)[:, None, None, None]

    # decoder (conv-transpose stages have the 1x1 residual fused in-kernel)
    y1 = conv_transpose_residual_layer(latent, P["dec1"], P["res1"])
    y2 = conv_transpose_residual_layer(y1, P["dec2"], P["res2"])
    y3 = conv_transpose_residual_layer(y2, P["dec3"], P["res3"])
    y4 = conv_layer(y3, P["dec4_1"], "leaky", 1, 1)
    y4 = conv_layer(y4, P["dec4_2"], "leaky", 1, 1)
    y5 = conv_layer(y4, P["dec5"], "sigmoid", 1, 1, out_dtype=jnp.float32)

    return jnp.transpose(y5, (1, 0, 2, 3))   # (C,N,H,W) -> NCHW


if __name__ == "__main__":
    key = jax.random.PRNGKey(0)
    kp, kx = jax.random.split(key)
    params = init_params(kp)

    # NCHW input: batch=2, channels=3, spatial=32 (3 stride-2 downs / 3 ups)
    x = jax.random.normal(kx, (2, 3, 32, 32), jnp.float32)

    out = jax.jit(forward)(x, params)
    out = jax.block_until_ready(out)

    assert out.shape == (2, 3, 32, 32), out.shape
    assert bool(jnp.all(jnp.isfinite(out)))
    assert bool(jnp.all((out >= 0.0) & (out <= 1.0)))   # sigmoid output range
    print("KERNEL_OK")
</pallas_src>

<mosaic_0001>
module attributes {stable_mosaic.version = 11 : i64} {
  func.func @_conv_kernel(%arg0: i32, %arg1: memref<27x512xbf16, #tpu.memory_space<vmem>>, %arg2: memref<16x27xbf16, #tpu.memory_space<vmem>>, %arg3: memref<16x1xf32, #tpu.memory_space<vmem>>, %arg4: memref<16x512xbf16, #tpu.memory_space<vmem>>) attributes {dimension_semantics = [#tpu.dimension_semantics<parallel>], iteration_bounds = array<i64: 1>, scalar_prefetch = 0 : i64, scratch_operands = 0 : i64, tpu.core_type = #tpu.core_type<tc>, window_params = [{transform_indices = @transform_0, window_bounds = array<i64: 27, 512>}, {pipeline_mode = #tpu.pipeline_mode<synchronous>, transform_indices = @transform_1, window_bounds = array<i64: 16, 27>}, {pipeline_mode = #tpu.pipeline_mode<synchronous>, transform_indices = @transform_2, window_bounds = array<i64: 16, 1>}, {transform_indices = @transform_3, window_bounds = array<i64: 16, 512>}]} {
    %c0 = arith.constant 0 : index
    %c0_0 = arith.constant 0 : index
    %0 = vector.load %arg1[%c0, %c0_0] : memref<27x512xbf16, #tpu.memory_space<vmem>>, vector<27x512xbf16>
    %1 = arith.extf %0 : vector<27x512xbf16> to vector<27x512xf32>
    %c0_1 = arith.constant 0 : index
    %c0_2 = arith.constant 0 : index
    %2 = vector.load %arg2[%c0_1, %c0_2] : memref<16x27xbf16, #tpu.memory_space<vmem>>, vector<16x27xbf16>
    %3 = arith.extf %2 : vector<16x27xbf16> to vector<16x27xf32>
    %cst = arith.constant dense<0.000000e+00> : vector<16x512xf32>
    %4 = tpu.matmul %3, %1, %cst {dimension_numbers = #tpu.dot_dimension_numbers<[1], [0], [0], [1], [0, 0, 1, 1], [], []>} : vector<16x27xf32>, vector<27x512xf32>, vector<16x512xf32> -> vector<16x512xf32>
    %c0_3 = arith.constant 0 : index
    %c0_4 = arith.constant 0 : index
    %5 = vector.load %arg3[%c0_3, %c0_4] : memref<16x1xf32, #tpu.memory_space<vmem>>, vector<16x1xf32>
    %6 = vector.broadcast %5 : vector<16x1xf32> to vector<16x512xf32>
    %7 = arith.addf %4, %6 : vector<16x512xf32>
    %cst_5 = arith.constant 0.000000e+00 : f32
    %8 = vector.broadcast %cst_5 : f32 to vector<16x512xf32>
    %9 = arith.cmpf ogt, %7, %8 : vector<16x512xf32>
    %cst_6 = arith.constant 1.000000e-01 : f32
    %10 = vector.broadcast %cst_6 : f32 to vector<16x512xf32>
    %11 = arith.mulf %10, %7 : vector<16x512xf32>
    %12 = arith.select %9, %7, %11 : vector<16x512xi1>, vector<16x512xf32>
    %13 = arith.truncf %12 : vector<16x512xf32> to vector<16x512xbf16>
    %c0_7 = arith.constant 0 : index
    %c0_8 = arith.constant 0 : index
    %14 = vector.load %arg4[%c0_7, %c0_8] : memref<16x512xbf16, #tpu.memory_space<vmem>>, vector<16x512xbf16>
    tpu.vector_store %arg4[%c0_7, %c0_8], %13 {strides = array<i32>} : memref<16x512xbf16, #tpu.memory_space<vmem>>, vector<16x512xbf16>,
    return
  }
  func.func @transform_0(%arg0: i32) -> (i32, i32) {
    %c0_i32 = arith.constant 0 : i32
    %c0_i32_0 = arith.constant 0 : i32
    return %c0_i32, %arg0 : i32, i32
  }
  func.func @transform_1(%arg0: i32) -> (i32, i32) {
    %c0_i32 = arith.constant 0 : i32
    %c0_i32_0 = arith.constant 0 : i32
    %c0_i32_1 = arith.constant 0 : i32
    return %c0_i32, %c0_i32_0 : i32, i32
  }
  func.func @transform_2(%arg0: i32) -> (i32, i32) {
    %c0_i32 = arith.constant 0 : i32
    %c0_i32_0 = arith.constant 0 : i32
    %c0_i32_1 = arith.constant 0 : i32
    return %c0_i32, %c0_i32_0 : i32, i32
  }
  func.func @transform_3(%arg0: i32) -> (i32, i32) {
    %c0_i32 = arith.constant 0 : i32
    %c0_i32_0 = arith.constant 0 : i32
    return %c0_i32, %arg0 : i32, i32
  }
}

module attributes {stable_mosaic.version = 11 : i64} {
  func.func @_conv_kernel(%arg0: i32, %arg1: memref<144x128xbf16, #tpu.memory_space<vmem>>, %arg2: memref<24x144xbf16, #tpu.memory_space<vmem>>, %arg3: memref<24x1xf32, #tpu.memory_space<vmem>>, %arg4: memref<24x128xbf16, #tpu.memory_space<vmem>>) attributes {dimension_semantics = [#tpu.dimension_semantics<parallel>], iteration_bounds = array<i64: 1>, scalar_prefetch = 0 : i64, scratch_operands = 0 : i64, tpu.core_type = #tpu.core_type<tc>, window_params = [{transform_indices = @transform_0, window_bounds = array<i64: 144, 128>}, {pipeline_mode = #tpu.pipeline_mode<synchronous>, transform_indices = @transform_1, window_bounds = array<i64: 24, 144>}, {pipeline_mode = #tpu.pipeline_mode<synchronous>, transform_indices = @transform_2, window_bounds = array<i64: 24, 1>}, {transform_indices = @transform_3, window_bounds = array<i64: 24, 128>}]} {
    %c0 = arith.constant 0 : index
    %c0_0 = arith.constant 0 : index
    %0 = vector.load %arg1[%c0, %c0_0] : memref<144x128xbf16, #tpu.memory_space<vmem>>, vector<144x128xbf16>
    %1 = arith.extf %0 : vector<144x128xbf16> to vector<144x128xf32>
    %c0_1 = arith.constant 0 : index
    %c0_2 = arith.constant 0 : index
    %2 = vector.load %arg2[%c0_1, %c0_2] : memref<24x144xbf16, #tpu.memory_space<vmem>>, vector<24x144xbf16>
    %3 = arith.extf %2 : vector<24x144xbf16> to vector<24x144xf32>
    %cst = arith.constant dense<0.000000e+00> : vector<24x128xf32>
    %4 = tpu.matmul %3, %1, %cst {dimension_numbers = #tpu.dot_dimension_numbers<[1], [0], [0], [1], [0, 0, 1, 1], [], []>} : vector<24x144xf32>, vector<144x128xf32>, vector<24x128xf32> -> vector<24x128xf32>
    %c0_3 = arith.constant 0 : index
    %c0_4 = arith.constant 0 : index
    %5 = vector.load %arg3[%c0_3, %c0_4] : memref<24x1xf32, #tpu.memory_space<vmem>>, vector<24x1xf32>
    %6 = vector.broadcast %5 : vector<24x1xf32> to vector<24x128xf32>
    %7 = arith.addf %4, %6 : vector<24x128xf32>
    %cst_5 = arith.constant 0.000000e+00 : f32
    %8 = vector.broadcast %cst_5 : f32 to vector<24x128xf32>
    %9 = arith.cmpf ogt, %7, %8 : vector<24x128xf32>
    %cst_6 = arith.constant 1.000000e-01 : f32
    %10 = vector.broadcast %cst_6 : f32 to vector<24x128xf32>
    %11 = arith.mulf %10, %7 : vector<24x128xf32>
    %12 = arith.select %9, %7, %11 : vector<24x128xi1>, vector<24x128xf32>
    %13 = arith.truncf %12 : vector<24x128xf32> to vector<24x128xbf16>
    %c0_7 = arith.constant 0 : index
    %c0_8 = arith.constant 0 : index
    %14 = vector.load %arg4[%c0_7, %c0_8] : memref<24x128xbf16, #tpu.memory_space<vmem>>, vector<24x128xbf16>
    tpu.vector_store %arg4[%c0_7, %c0_8], %13 {strides = array<i32>} : memref<24x128xbf16, #tpu.memory_space<vmem>>, vector<24x128xbf16>,
    return
  }
  func.func @transform_0(%arg0: i32) -> (i32, i32) {
    %c0_i32 = arith.constant 0 : i32
    %c0_i32_0 = arith.constant 0 : i32
    return %c0_i32, %arg0 : i32, i32
  }
  func.func @transform_1(%arg0: i32) -> (i32, i32) {
    %c0_i32 = arith.constant 0 : i32
    %c0_i32_0 = arith.constant 0 : i32
    %c0_i32_1 = arith.constant 0 : i32
    return %c0_i32, %c0_i32_0 : i32, i32
  }
  func.func @transform_2(%arg0: i32) -> (i32, i32) {
    %c0_i32 = arith.constant 0 : i32
    %c0_i32_0 = arith.constant 0 : i32
    %c0_i32_1 = arith.constant 0 : i32
    return %c0_i32, %c0_i32_0 : i32, i32
  }
  func.func @transform_3(%arg0: i32) -> (i32, i32) {
    %c0_i32 = arith.constant 0 : i32
    %c0_i32_0 = arith.constant 0 : i32
    return %c0_i32, %arg0 : i32, i32
  }
}

module attributes {stable_mosaic.version = 11 : i64} {
  func.func @_conv_kernel(%arg0: i32, %arg1: memref<216x128xbf16, #tpu.memory_space<vmem>>, %arg2: memref<24x216xbf16, #tpu.memory_space<vmem>>, %arg3: memref<24x1xf32, #tpu.memory_space<vmem>>, %arg4: memref<24x128xbf16, #tpu.memory_space<vmem>>) attributes {dimension_semantics = [#tpu.dimension_semantics<parallel>], iteration_bounds = array<i64: 1>, scalar_prefetch = 0 : i64, scratch_operands = 0 : i64, tpu.core_type = #tpu.core_type<tc>, window_params = [{transform_indices = @transform_0, window_bounds = array<i64: 216, 128>}, {pipeline_mode = #tpu.pipeline_mode<synchronous>, transform_indices = @transform_1, window_bounds = array<i64: 24, 216>}, {pipeline_mode = #tpu.pipeline_mode<synchronous>, transform_indices = @transform_2, window_bounds = array<i64: 24, 1>}, {transform_indices = @transform_3, window_bounds = array<i64: 24, 128>}]} {
    %c0 = arith.constant 0 : index
    %c0_0 = arith.constant 0 : index
    %0 = vector.load %arg1[%c0, %c0_0] : memref<216x128xbf16, #tpu.memory_space<vmem>>, vector<216x128xbf16>
    %1 = arith.extf %0 : vector<216x128xbf16> to vector<216x128xf32>
    %c0_1 = arith.constant 0 : index
    %c0_2 = arith.constant 0 : index
    %2 = vector.load %arg2[%c0_1, %c0_2] : memref<24x216xbf16, #tpu.memory_space<vmem>>, vector<24x216xbf16>
    %3 = arith.extf %2 : vector<24x216xbf16> to vector<24x216xf32>
    %cst = arith.constant dense<0.000000e+00> : vector<24x128xf32>
    %4 = tpu.matmul %3, %1, %cst {dimension_numbers = #tpu.dot_dimension_numbers<[1], [0], [0], [1], [0, 0, 1, 1], [], []>} : vector<24x216xf32>, vector<216x128xf32>, vector<24x128xf32> -> vector<24x128xf32>
    %c0_3 = arith.constant 0 : index
    %c0_4 = arith.constant 0 : index
    %5 = vector.load %arg3[%c0_3, %c0_4] : memref<24x1xf32, #tpu.memory_space<vmem>>, vector<24x1xf32>
    %6 = vector.broadcast %5 : vector<24x1xf32> to vector<24x128xf32>
    %7 = arith.addf %4, %6 : vector<24x128xf32>
    %cst_5 = arith.constant 0.000000e+00 : f32
    %8 = vector.broadcast %cst_5 : f32 to vector<24x128xf32>
    %9 = arith.cmpf ogt, %7, %8 : vector<24x128xf32>
    %cst_6 = arith.constant 1.000000e-01 : f32
    %10 = vector.broadcast %cst_6 : f32 to vector<24x128xf32>
    %11 = arith.mulf %10, %7 : vector<24x128xf32>
    %12 = arith.select %9, %7, %11 : vector<24x128xi1>, vector<24x128xf32>
    %13 = arith.truncf %12 : vector<24x128xf32> to vector<24x128xbf16>
    %c0_7 = arith.constant 0 : index
    %c0_8 = arith.constant 0 : index
    %14 = vector.load %arg4[%c0_7, %c0_8] : memref<24x128xbf16, #tpu.memory_space<vmem>>, vector<24x128xbf16>
    tpu.vector_store %arg4[%c0_7, %c0_8], %13 {strides = array<i32>} : memref<24x128xbf16, #tpu.memory_space<vmem>>, vector<24x128xbf16>,
    return
  }
  func.func @transform_0(%arg0: i32) -> (i32, i32) {
    %c0_i32 = arith.constant 0 : i32
    %c0_i32_0 = arith.constant 0 : i32
    return %c0_i32, %arg0 : i32, i32
  }
  func.func @transform_1(%arg0: i32) -> (i32, i32) {
    %c0_i32 = arith.constant 0 : i32
    %c0_i32_0 = arith.constant 0 : i32
    %c0_i32_1 = arith.constant 0 : i32
    return %c0_i32, %c0_i32_0 : i32, i32
  }
  func.func @transform_2(%arg0: i32) -> (i32, i32) {
    %c0_i32 = arith.constant 0 : i32
    %c0_i32_0 = arith.constant 0 : i32
    %c0_i32_1 = arith.constant 0 : i32
    return %c0_i32, %c0_i32_0 : i32, i32
  }
  func.func @transform_3(%arg0: i32) -> (i32, i32) {
    %c0_i32 = arith.constant 0 : i32
    %c0_i32_0 = arith.constant 0 : i32
    return %c0_i32, %arg0 : i32, i32
  }
}

module attributes {stable_mosaic.version = 11 : i64} {
  func.func @_convt_res_kernel(%arg0: i32, %arg1: memref<96x128xbf16, #tpu.memory_space<vmem>>, %arg2: memref<192x96xbf16, #tpu.memory_space<vmem>>, %arg3: memref<192x1xf32, #tpu.memory_space<vmem>>, %arg4: memref<192x192xbf16, #tpu.memory_space<vmem>>, %arg5: memref<192x1xf32, #tpu.memory_space<vmem>>, %arg6: memref<192x128xbf16, #tpu.memory_space<vmem>>) attributes {dimension_semantics = [#tpu.dimension_semantics<parallel>], iteration_bounds = array<i64: 1>, scalar_prefetch = 0 : i64, scratch_operands = 0 : i64, tpu.core_type = #tpu.core_type<tc>, window_params = [{transform_indices = @transform_0, window_bounds = array<i64: 96, 128>}, {pipeline_mode = #tpu.pipeline_mode<synchronous>, transform_indices = @transform_1, window_bounds = array<i64: 192, 96>}, {pipeline_mode = #tpu.pipeline_mode<synchronous>, transform_indices = @transform_2, window_bounds = array<i64: 192, 1>}, {pipeline_mode = #tpu.pipeline_mode<synchronous>, transform_indices = @transform_3, window_bounds = array<i64: 192, 192>}, {pipeline_mode = #tpu.pipeline_mode<synchronous>, transform_indices = @transform_4, window_bounds = array<i64: 192, 1>}, {transform_indices = @transform_5, window_bounds = array<i64: 192, 128>}]} {
    %c0 = arith.constant 0 : index
    %c0_0 = arith.constant 0 : index
    %0 = vector.load %arg1[%c0, %c0_0] : memref<96x128xbf16, #tpu.memory_space<vmem>>, vector<96x128xbf16>
    %1 = arith.extf %0 : vector<96x128xbf16> to vector<96x128xf32>
    %c0_1 = arith.constant 0 : index
    %c0_2 = arith.constant 0 : index
    %2 = vector.load %arg2[%c0_1, %c0_2] : memref<192x96xbf16, #tpu.memory_space<vmem>>, vector<192x96xbf16>
    %3 = arith.extf %2 : vector<192x96xbf16> to vector<192x96xf32>
    %cst = arith.constant dense<0.000000e+00> : vector<192x128xf32>
    %4 = tpu.matmul %3, %1, %cst {dimension_numbers = #tpu.dot_dimension_numbers<[1], [0], [0], [1], [0, 0, 1, 1], [], []>} : vector<192x96xf32>, vector<96x128xf32>, vector<192x128xf32> -> vector<192x128xf32>
    %c0_3 = arith.constant 0 : index
    %c0_4 = arith.constant 0 : index
    %5 = vector.load %arg3[%c0_3, %c0_4] : memref<192x1xf32, #tpu.memory_space<vmem>>, vector<192x1xf32>
    %6 = vector.broadcast %5 : vector<192x1xf32> to vector<192x128xf32>
    %7 = arith.addf %4, %6 : vector<192x128xf32>
    %cst_5 = arith.constant 0.000000e+00 : f32
    %8 = vector.broadcast %cst_5 : f32 to vector<192x128xf32>
    %9 = arith.cmpf ogt, %7, %8 : vector<192x128xf32>
    %cst_6 = arith.constant 1.000000e-01 : f32
    %10 = vector.broadcast %cst_6 : f32 to vector<192x128xf32>
    %11 = arith.mulf %10, %7 : vector<192x128xf32>
    %12 = arith.select %9, %7, %11 : vector<192x128xi1>, vector<192x128xf32>
    %c0_7 = arith.constant 0 : index
    %c0_8 = arith.constant 0 : index
    %13 = vector.load %arg4[%c0_7, %c0_8] : memref<192x192xbf16, #tpu.memory_space<vmem>>, vector<192x192xbf16>
    %14 = arith.extf %13 : vector<192x192xbf16> to vector<192x192xf32>
    %cst_9 = arith.constant dense<0.000000e+00> : vector<192x128xf32>
    %15 = tpu.matmul %14, %12, %cst_9 {dimension_numbers = #tpu.dot_dimension_numbers<[1], [0], [0], [1], [0, 0, 1, 1], [], []>} : vector<192x192xf32>, vector<192x128xf32>, vector<192x128xf32> -> vector<192x128xf32>
    %16 = arith.addf %12, %15 : vector<192x128xf32>
    %c0_10 = arith.constant 0 : index
    %c0_11 = arith.constant 0 : index
    %17 = vector.load %arg5[%c0_10, %c0_11] : memref<192x1xf32, #tpu.memory_space<vmem>>, vector<192x1xf32>
    %18 = vector.broadcast %17 : vector<192x1xf32> to vector<192x128xf32>
    %19 = arith.addf %16, %18 : vector<192x128xf32>
    %20 = arith.truncf %19 : vector<192x128xf32> to vector<192x128xbf16>
    %c0_12 = arith.constant 0 : index
    %c0_13 = arith.constant 0 : index
    %21 = vector.load %arg6[%c0_12, %c0_13] : memref<192x128xbf16, #tpu.memory_space<vmem>>, vector<192x128xbf16>
    tpu.vector_store %arg6[%c0_12, %c0_13], %20 {strides = array<i32>} : memref<192x128xbf16, #tpu.memory_space<vmem>>, vector<192x128xbf16>,
    return
  }
  func.func @transform_0(%arg0: i32) -> (i32, i32) {
    %c0_i32 = arith.constant 0 : i32
    %c0_i32_0 = arith.constant 0 : i32
    return %c0_i32, %arg0 : i32, i32
  }
  func.func @transform_1(%arg0: i32) -> (i32, i32) {
    %c0_i32 = arith.constant 0 : i32
    %c0_i32_0 = arith.constant 0 : i32
    %c0_i32_1 = arith.constant 0 : i32
    return %c0_i32, %c0_i32_0 : i32, i32
  }
  func.func @transform_2(%arg0: i32) -> (i32, i32) {
    %c0_i32 = arith.constant 0 : i32
    %c0_i32_0 = arith.constant 0 : i32
    %c0_i32_1 = arith.constant 0 : i32
    return %c0_i32, %c0_i32_0 : i32, i32
  }
  func.func @transform_3(%arg0: i32) -> (i32, i32) {
    %c0_i32 = arith.constant 0 : i32
    %c0_i32_0 = arith.constant 0 : i32
    %c0_i32_1 = arith.constant 0 : i32
    return %c0_i32, %c0_i32_0 : i32, i32
  }
  func.func @transform_4(%arg0: i32) -> (i32, i32) {
    %c0_i32 = arith.constant 0 : i32
    %c0_i32_0 = arith.constant 0 : i32
    %c0_i32_1 = arith.constant 0 : i32
    return %c0_i32, %c0_i32_0 : i32, i32
  }
  func.func @transform_5(%arg0: i32) -> (i32, i32) {
    %c0_i32 = arith.constant 0 : i32
    %c0_i32_0 = arith.constant 0 : i32
    return %c0_i32, %arg0 : i32, i32
  }
}

module attributes {stable_mosaic.version = 11 : i64} {
  func.func @_convt_res_kernel(%arg0: i32, %arg1: memref<192x128xbf16, #tpu.memory_space<vmem>>, %arg2: memref<128x192xbf16, #tpu.memory_space<vmem>>, %arg3: memref<128x1xf32, #tpu.memory_space<vmem>>, %arg4: memref<128x128xbf16, #tpu.memory_space<vmem>>, %arg5: memref<128x1xf32, #tpu.memory_space<vmem>>, %arg6: memref<128x128xbf16, #tpu.memory_space<vmem>>) attributes {dimension_semantics = [#tpu.dimension_semantics<parallel>], iteration_bounds = array<i64: 1>, scalar_prefetch = 0 : i64, scratch_operands = 0 : i64, tpu.core_type = #tpu.core_type<tc>, window_params = [{transform_indices = @transform_0, window_bounds = array<i64: 192, 128>}, {pipeline_mode = #tpu.pipeline_mode<synchronous>, transform_indices = @transform_1, window_bounds = array<i64: 128, 192>}, {pipeline_mode = #tpu.pipeline_mode<synchronous>, transform_indices = @transform_2, window_bounds = array<i64: 128, 1>}, {pipeline_mode = #tpu.pipeline_mode<synchronous>, transform_indices = @transform_3, window_bounds = array<i64: 128, 128>}, {pipeline_mode = #tpu.pipeline_mode<synchronous>, transform_indices = @transform_4, window_bounds = array<i64: 128, 1>}, {transform_indices = @transform_5, window_bounds = array<i64: 128, 128>}]} {
    %c0 = arith.constant 0 : index
    %c0_0 = arith.constant 0 : index
    %0 = vector.load %arg1[%c0, %c0_0] : memref<192x128xbf16, #tpu.memory_space<vmem>>, vector<192x128xbf16>
    %1 = arith.extf %0 : vector<192x128xbf16> to vector<192x128xf32>
    %c0_1 = arith.constant 0 : index
    %c0_2 = arith.constant 0 : index
    %2 = vector.load %arg2[%c0_1, %c0_2] : memref<128x192xbf16, #tpu.memory_space<vmem>>, vector<128x192xbf16>
    %3 = arith.extf %2 : vector<128x192xbf16> to vector<128x192xf32>
    %cst = arith.constant dense<0.000000e+00> : vector<128x128xf32>
    %4 = tpu.matmul %3, %1, %cst {dimension_numbers = #tpu.dot_dimension_numbers<[1], [0], [0], [1], [0, 0, 1, 1], [], []>} : vector<128x192xf32>, vector<192x128xf32>, vector<128x128xf32> -> vector<128x128xf32>
    %c0_3 = arith.constant 0 : index
    %c0_4 = arith.constant 0 : index
    %5 = vector.load %arg3[%c0_3, %c0_4] : memref<128x1xf32, #tpu.memory_space<vmem>>, vector<128x1xf32>
    %6 = vector.broadcast %5 : vector<128x1xf32> to vector<128x128xf32>
    %7 = arith.addf %4, %6 : vector<128x128xf32>
    %cst_5 = arith.constant 0.000000e+00 : f32
    %8 = vector.broadcast %cst_5 : f32 to vector<128x128xf32>
    %9 = arith.cmpf ogt, %7, %8 : vector<128x128xf32>
    %cst_6 = arith.constant 1.000000e-01 : f32
    %10 = vector.broadcast %cst_6 : f32 to vector<128x128xf32>
    %11 = arith.mulf %10, %7 : vector<128x128xf32>
    %12 = arith.select %9, %7, %11 : vector<128x128xi1>, vector<128x128xf32>
    %c0_7 = arith.constant 0 : index
    %c0_8 = arith.constant 0 : index
    %13 = vector.load %arg4[%c0_7, %c0_8] : memref<128x128xbf16, #tpu.memory_space<vmem>>, vector<128x128xbf16>
    %14 = arith.extf %13 : vector<128x128xbf16> to vector<128x128xf32>
    %cst_9 = arith.constant dense<0.000000e+00> : vector<128x128xf32>
    %15 = tpu.matmul %14, %12, %cst_9 {dimension_numbers = #tpu.dot_dimension_numbers<[1], [0], [0], [1], [0, 0, 1, 1], [], []>} : vector<128x128xf32>, vector<128x128xf32>, vector<128x128xf32> -> vector<128x128xf32>
    %16 = arith.addf %12, %15 : vector<128x128xf32>
    %c0_10 = arith.constant 0 : index
    %c0_11 = arith.constant 0 : index
    %17 = vector.load %arg5[%c0_10, %c0_11] : memref<128x1xf32, #tpu.memory_space<vmem>>, vector<128x1xf32>
    %18 = vector.broadcast %17 : vector<128x1xf32> to vector<128x128xf32>
    %19 = arith.addf %16, %18 : vector<128x128xf32>
    %20 = arith.truncf %19 : vector<128x128xf32> to vector<128x128xbf16>
    %c0_12 = arith.constant 0 : index
    %c0_13 = arith.constant 0 : index
    %21 = vector.load %arg6[%c0_12, %c0_13] : memref<128x128xbf16, #tpu.memory_space<vmem>>, vector<128x128xbf16>
    tpu.vector_store %arg6[%c0_12, %c0_13], %20 {strides = array<i32>} : memref<128x128xbf16, #tpu.memory_space<vmem>>, vector<128x128xbf16>,
    return
  }
  func.func @transform_0(%arg0: i32) -> (i32, i32) {
    %c0_i32 = arith.constant 0 : i32
    %c0_i32_0 = arith.constant 0 : i32
    return %c0_i32, %arg0 : i32, i32
  }
  func.func @transform_1(%arg0: i32) -> (i32, i32) {
    %c0_i32 = arith.constant 0 : i32
    %c0_i32_0 = arith.constant 0 : i32
    %c0_i32_1 = arith.constant 0 : i32
    return %c0_i32, %c0_i32_0 : i32, i32
  }
  func.func @transform_2(%arg0: i32) -> (i32, i32) {
    %c0_i32 = arith.constant 0 : i32
    %c0_i32_0 = arith.constant 0 : i32
    %c0_i32_1 = arith.constant 0 : i32
    return %c0_i32, %c0_i32_0 : i32, i32
  }
  func.func @transform_3(%arg0: i32) -> (i32, i32) {
    %c0_i32 = arith.constant 0 : i32
    %c0_i32_0 = arith.constant 0 : i32
    %c0_i32_1 = arith.constant 0 : i32
    return %c0_i32, %c0_i32_0 : i32, i32
  }
  func.func @transform_4(%arg0: i32) -> (i32, i32) {
    %c0_i32 = arith.constant 0 : i32
    %c0_i32_0 = arith.constant 0 : i32
    %c0_i32_1 = arith.constant 0 : i32
    return %c0_i32, %c0_i32_0 : i32, i32
  }
  func.func @transform_5(%arg0: i32) -> (i32, i32) {
    %c0_i32 = arith.constant 0 : i32
    %c0_i32_0 = arith.constant 0 : i32
    return %c0_i32, %arg0 : i32, i32
  }
}

module attributes {stable_mosaic.version = 11 : i64} {
  func.func @_convt_res_kernel(%arg0: i32, %arg1: memref<128x512xbf16, #tpu.memory_space<vmem>>, %arg2: memref<256x128xbf16, #tpu.memory_space<vmem>>, %arg3: memref<256x1xf32, #tpu.memory_space<vmem>>, %arg4: memref<256x256xbf16, #tpu.memory_space<vmem>>, %arg5: memref<256x1xf32, #tpu.memory_space<vmem>>, %arg6: memref<256x512xbf16, #tpu.memory_space<vmem>>) attributes {dimension_semantics = [#tpu.dimension_semantics<parallel>], iteration_bounds = array<i64: 1>, scalar_prefetch = 0 : i64, scratch_operands = 0 : i64, tpu.core_type = #tpu.core_type<tc>, window_params = [{transform_indices = @transform_0, window_bounds = array<i64: 128, 512>}, {pipeline_mode = #tpu.pipeline_mode<synchronous>, transform_indices = @transform_1, window_bounds = array<i64: 256, 128>}, {pipeline_mode = #tpu.pipeline_mode<synchronous>, transform_indices = @transform_2, window_bounds = array<i64: 256, 1>}, {pipeline_mode = #tpu.pipeline_mode<synchronous>, transform_indices = @transform_3, window_bounds = array<i64: 256, 256>}, {pipeline_mode = #tpu.pipeline_mode<synchronous>, transform_indices = @transform_4, window_bounds = array<i64: 256, 1>}, {transform_indices = @transform_5, window_bounds = array<i64: 256, 512>}]} {
    %c0 = arith.constant 0 : index
    %c0_0 = arith.constant 0 : index
    %0 = vector.load %arg1[%c0, %c0_0] : memref<128x512xbf16, #tpu.memory_space<vmem>>, vector<128x512xbf16>
    %1 = arith.extf %0 : vector<128x512xbf16> to vector<128x512xf32>
    %c0_1 = arith.constant 0 : index
    %c0_2 = arith.constant 0 : index
    %2 = vector.load %arg2[%c0_1, %c0_2] : memref<256x128xbf16, #tpu.memory_space<vmem>>, vector<256x128xbf16>
    %3 = arith.extf %2 : vector<256x128xbf16> to vector<256x128xf32>
    %cst = arith.constant dense<0.000000e+00> : vector<256x512xf32>
    %4 = tpu.matmul %3, %1, %cst {dimension_numbers = #tpu.dot_dimension_numbers<[1], [0], [0], [1], [0, 0, 1, 1], [], []>} : vector<256x128xf32>, vector<128x512xf32>, vector<256x512xf32> -> vector<256x512xf32>
    %c0_3 = arith.constant 0 : index
    %c0_4 = arith.constant 0 : index
    %5 = vector.load %arg3[%c0_3, %c0_4] : memref<256x1xf32, #tpu.memory_space<vmem>>, vector<256x1xf32>
    %6 = vector.broadcast %5 : vector<256x1xf32> to vector<256x512xf32>
    %7 = arith.addf %4, %6 : vector<256x512xf32>
    %cst_5 = arith.constant 0.000000e+00 : f32
    %8 = vector.broadcast %cst_5 : f32 to vector<256x512xf32>
    %9 = arith.cmpf ogt, %7, %8 : vector<256x512xf32>
    %cst_6 = arith.constant 1.000000e-01 : f32
    %10 = vector.broadcast %cst_6 : f32 to vector<256x512xf32>
    %11 = arith.mulf %10, %7 : vector<256x512xf32>
    %12 = arith.select %9, %7, %11 : vector<256x512xi1>, vector<256x512xf32>
    %c0_7 = arith.constant 0 : index
    %c0_8 = arith.constant 0 : index
    %13 = vector.load %arg4[%c0_7, %c0_8] : memref<256x256xbf16, #tpu.memory_space<vmem>>, vector<256x256xbf16>
    %14 = arith.extf %13 : vector<256x256xbf16> to vector<256x256xf32>
    %cst_9 = arith.constant dense<0.000000e+00> : vector<256x512xf32>
    %15 = tpu.matmul %14, %12, %cst_9 {dimension_numbers = #tpu.dot_dimension_numbers<[1], [0], [0], [1], [0, 0, 1, 1], [], []>} : vector<256x256xf32>, vector<256x512xf32>, vector<256x512xf32> -> vector<256x512xf32>
    %16 = arith.addf %12, %15 : vector<256x512xf32>
    %c0_10 = arith.constant 0 : index
    %c0_11 = arith.constant 0 : index
    %17 = vector.load %arg5[%c0_10, %c0_11] : memref<256x1xf32, #tpu.memory_space<vmem>>, vector<256x1xf32>
    %18 = vector.broadcast %17 : vector<256x1xf32> to vector<256x512xf32>
    %19 = arith.addf %16, %18 : vector<256x512xf32>
    %20 = arith.truncf %19 : vector<256x512xf32> to vector<256x512xbf16>
    %c0_12 = arith.constant 0 : index
    %c0_13 = arith.constant 0 : index
    %21 = vector.load %arg6[%c0_12, %c0_13] : memref<256x512xbf16, #tpu.memory_space<vmem>>, vector<256x512xbf16>
    tpu.vector_store %arg6[%c0_12, %c0_13], %20 {strides = array<i32>} : memref<256x512xbf16, #tpu.memory_space<vmem>>, vector<256x512xbf16>,
    return
  }
  func.func @transform_0(%arg0: i32) -> (i32, i32) {
    %c0_i32 = arith.constant 0 : i32
    %c0_i32_0 = arith.constant 0 : i32
    return %c0_i32, %arg0 : i32, i32
  }
  func.func @transform_1(%arg0: i32) -> (i32, i32) {
    %c0_i32 = arith.constant 0 : i32
    %c0_i32_0 = arith.constant 0 : i32
    %c0_i32_1 = arith.constant 0 : i32
    return %c0_i32, %c0_i32_0 : i32, i32
  }
  func.func @transform_2(%arg0: i32) -> (i32, i32) {
    %c0_i32 = arith.constant 0 : i32
    %c0_i32_0 = arith.constant 0 : i32
    %c0_i32_1 = arith.constant 0 : i32
    return %c0_i32, %c0_i32_0 : i32, i32
  }
  func.func @transform_3(%arg0: i32) -> (i32, i32) {
    %c0_i32 = arith.constant 0 : i32
    %c0_i32_0 = arith.constant 0 : i32
    %c0_i32_1 = arith.constant 0 : i32
    return %c0_i32, %c0_i32_0 : i32, i32
  }
  func.func @transform_4(%arg0: i32) -> (i32, i32) {
    %c0_i32 = arith.constant 0 : i32
    %c0_i32_0 = arith.constant 0 : i32
    %c0_i32_1 = arith.constant 0 : i32
    return %c0_i32, %c0_i32_0 : i32, i32
  }
  func.func @transform_5(%arg0: i32) -> (i32, i32) {
    %c0_i32 = arith.constant 0 : i32
    %c0_i32_0 = arith.constant 0 : i32
    return %c0_i32, %arg0 : i32, i32
  }
}

module attributes {stable_mosaic.version = 11 : i64} {
  func.func @_conv_kernel(%arg0: i32, %arg1: memref<576x512xbf16, #tpu.memory_space<vmem>>, %arg2: memref<64x576xbf16, #tpu.memory_space<vmem>>, %arg3: memref<64x1xf32, #tpu.memory_space<vmem>>, %arg4: memref<64x512xbf16, #tpu.memory_space<vmem>>) attributes {dimension_semantics = [#tpu.dimension_semantics<parallel>], iteration_bounds = array<i64: 4>, scalar_prefetch = 0 : i64, scratch_operands = 0 : i64, tpu.core_type = #tpu.core_type<tc>, window_params = [{transform_indices = @transform_0, window_bounds = array<i64: 576, 512>}, {pipeline_mode = #tpu.pipeline_mode<synchronous>, transform_indices = @transform_1, window_bounds = array<i64: 64, 576>}, {pipeline_mode = #tpu.pipeline_mode<synchronous>, transform_indices = @transform_2, window_bounds = array<i64: 64, 1>}, {transform_indices = @transform_3, window_bounds = array<i64: 64, 512>}]} {
    %c0 = arith.constant 0 : index
    %c0_0 = arith.constant 0 : index
    %0 = vector.load %arg1[%c0, %c0_0] : memref<576x512xbf16, #tpu.memory_space<vmem>>, vector<576x512xbf16>
    %1 = arith.extf %0 : vector<576x512xbf16> to vector<576x512xf32>
    %c0_1 = arith.constant 0 : index
    %c0_2 = arith.constant 0 : index
    %2 = vector.load %arg2[%c0_1, %c0_2] : memref<64x576xbf16, #tpu.memory_space<vmem>>, vector<64x576xbf16>
    %3 = arith.extf %2 : vector<64x576xbf16> to vector<64x576xf32>
    %cst = arith.constant dense<0.000000e+00> : vector<64x512xf32>
    %4 = tpu.matmul %3, %1, %cst {dimension_numbers = #tpu.dot_dimension_numbers<[1], [0], [0], [1], [0, 0, 1, 1], [], []>} : vector<64x576xf32>, vector<576x512xf32>, vector<64x512xf32> -> vector<64x512xf32>
    %c0_3 = arith.constant 0 : index
    %c0_4 = arith.constant 0 : index
    %5 = vector.load %arg3[%c0_3, %c0_4] : memref<64x1xf32, #tpu.memory_space<vmem>>, vector<64x1xf32>
    %6 = vector.broadcast %5 : vector<64x1xf32> to vector<64x512xf32>
    %7 = arith.addf %4, %6 : vector<64x512xf32>
    %cst_5 = arith.constant 0.000000e+00 : f32
    %8 = vector.broadcast %cst_5 : f32 to vector<64x512xf32>
    %9 = arith.cmpf ogt, %7, %8 : vector<64x512xf32>
    %cst_6 = arith.constant 1.000000e-01 : f32
    %10 = vector.broadcast %cst_6 : f32 to vector<64x512xf32>
    %11 = arith.mulf %10, %7 : vector<64x512xf32>
    %12 = arith.select %9, %7, %11 : vector<64x512xi1>, vector<64x512xf32>
    %13 = arith.truncf %12 : vector<64x512xf32> to vector<64x512xbf16>
    %c0_7 = arith.constant 0 : index
    %c0_8 = arith.constant 0 : index
    %14 = vector.load %arg4[%c0_7, %c0_8] : memref<64x512xbf16, #tpu.memory_space<vmem>>, vector<64x512xbf16>
    tpu.vector_store %arg4[%c0_7, %c0_8], %13 {strides = array<i32>} : memref<64x512xbf16, #tpu.memory_space<vmem>>, vector<64x512xbf16>,
    return
  }
  func.func @transform_0(%arg0: i32) -> (i32, i32) {
    %c0_i32 = arith.constant 0 : i32
    %c0_i32_0 = arith.constant 0 : i32
    return %c0_i32, %arg0 : i32, i32
  }
  func.func @transform_1(%arg0: i32) -> (i32, i32) {
    %c0_i32 = arith.constant 0 : i32
    %c0_i32_0 = arith.constant 0 : i32
    %c0_i32_1 = arith.constant 0 : i32
    return %c0_i32, %c0_i32_0 : i32, i32
  }
  func.func @transform_2(%arg0: i32) -> (i32, i32) {
    %c0_i32 = arith.constant 0 : i32
    %c0_i32_0 = arith.constant 0 : i32
    %c0_i32_1 = arith.constant 0 : i32
    return %c0_i32, %c0_i32_0 : i32, i32
  }
  func.func @transform_3(%arg0: i32) -> (i32, i32) {
    %c0_i32 = arith.constant 0 : i32
    %c0_i32_0 = arith.constant 0 : i32
    return %c0_i32, %arg0 : i32, i32
  }
}

module attributes {stable_mosaic.version = 11 : i64} {
  func.func @_conv_kernel(%arg0: i32, %arg1: memref<576x512xbf16, #tpu.memory_space<vmem>>, %arg2: memref<3x576xbf16, #tpu.memory_space<vmem>>, %arg3: memref<3x1xf32, #tpu.memory_space<vmem>>, %arg4: memref<3x512xf32, #tpu.memory_space<vmem>>) attributes {dimension_semantics = [#tpu.dimension_semantics<parallel>], iteration_bounds = array<i64: 4>, scalar_prefetch = 0 : i64, scratch_operands = 0 : i64, tpu.core_type = #tpu.core_type<tc>, window_params = [{transform_indices = @transform_0, window_bounds = array<i64: 576, 512>}, {pipeline_mode = #tpu.pipeline_mode<synchronous>, transform_indices = @transform_1, window_bounds = array<i64: 3, 576>}, {pipeline_mode = #tpu.pipeline_mode<synchronous>, transform_indices = @transform_2, window_bounds = array<i64: 3, 1>}, {transform_indices = @transform_3, window_bounds = array<i64: 3, 512>}]} {
    %c0 = arith.constant 0 : index
    %c0_0 = arith.constant 0 : index
    %0 = vector.load %arg1[%c0, %c0_0] : memref<576x512xbf16, #tpu.memory_space<vmem>>, vector<576x512xbf16>
    %1 = arith.extf %0 : vector<576x512xbf16> to vector<576x512xf32>
    %c0_1 = arith.constant 0 : index
    %c0_2 = arith.constant 0 : index
    %2 = vector.load %arg2[%c0_1, %c0_2] : memref<3x576xbf16, #tpu.memory_space<vmem>>, vector<3x576xbf16>
    %3 = arith.extf %2 : vector<3x576xbf16> to vector<3x576xf32>
    %cst = arith.constant dense<0.000000e+00> : vector<3x512xf32>
    %4 = tpu.matmul %3, %1, %cst {dimension_numbers = #tpu.dot_dimension_numbers<[1], [0], [0], [1], [0, 0, 1, 1], [], []>} : vector<3x576xf32>, vector<576x512xf32>, vector<3x512xf32> -> vector<3x512xf32>
    %c0_3 = arith.constant 0 : index
    %c0_4 = arith.constant 0 : index
    %5 = vector.load %arg3[%c0_3, %c0_4] : memref<3x1xf32, #tpu.memory_space<vmem>>, vector<3x1xf32>
    %6 = vector.broadcast %5 : vector<3x1xf32> to vector<3x512xf32>
    %7 = arith.addf %4, %6 : vector<3x512xf32>
    %cst_5 = arith.constant 0.000000e+00 : f32
    %8 = vector.broadcast %cst_5 : f32 to vector<3x512xf32>
    %9 = arith.subf %8, %7 : vector<3x512xf32>
    %10 = math.exp %9 : vector<3x512xf32>
    %cst_6 = arith.constant 1.000000e+00 : f32
    %11 = vector.broadcast %cst_6 : f32 to vector<3x512xf32>
    %12 = arith.addf %11, %10 : vector<3x512xf32>
    %cst_7 = arith.constant 1.000000e+00 : f32
    %13 = vector.broadcast %cst_7 : f32 to vector<3x512xf32>
    %14 = arith.divf %13, %12 : vector<3x512xf32>
    %c0_8 = arith.constant 0 : index
    %c0_9 = arith.constant 0 : index
    %15 = vector.load %arg4[%c0_8, %c0_9] : memref<3x512xf32, #tpu.memory_space<vmem>>, vector<3x512xf32>
    tpu.vector_store %arg4[%c0_8, %c0_9], %14 {strides = array<i32>} : memref<3x512xf32, #tpu.memory_space<vmem>>, vector<3x512xf32>,
    return
  }
  func.func @transform_0(%arg0: i32) -> (i32, i32) {
    %c0_i32 = arith.constant 0 : i32
    %c0_i32_0 = arith.constant 0 : i32
    return %c0_i32, %arg0 : i32, i32
  }
  func.func @transform_1(%arg0: i32) -> (i32, i32) {
    %c0_i32 = arith.constant 0 : i32
    %c0_i32_0 = arith.constant 0 : i32
    %c0_i32_1 = arith.constant 0 : i32
    return %c0_i32, %c0_i32_0 : i32, i32
  }
  func.func @transform_2(%arg0: i32) -> (i32, i32) {
    %c0_i32 = arith.constant 0 : i32
    %c0_i32_0 = arith.constant 0 : i32
    %c0_i32_1 = arith.constant 0 : i32
    return %c0_i32, %c0_i32_0 : i32, i32
  }
  func.func @transform_3(%arg0: i32) -> (i32, i32) {
    %c0_i32 = arith.constant 0 : i32
    %c0_i32_0 = arith.constant 0 : i32
    return %c0_i32, %arg0 : i32, i32
  }
}

</mosaic_0001>

<bundles_post_ra>
// kernel: tile.68
= control target key start
LH: loop header
LB: loop body
LE: loop exit
PB: predicated region body
PF: predicated region fallthrough
CT: control target
= control target key end

     0   :  { %s22_s0 = inlined_call_operand.vmem [shape: f32[32], index: 0, kind: input, shape index: {}]   ;;  %s23_s1 = inlined_call_operand.vmem [shape: f32[4,32], index: 1, kind: output, shape index: {}]  }
   0x1   :  { %v4_v0 = vld [vmem:[%s22_s0] ss:$0 sm:$0xff] }
   0x2   :  { %5 = vst [vmem:[%s23_s1] sm:$0xf] %v4_v0 }

// kernel: tile.53
= control target key start
LH: loop header
LB: loop body
LE: loop exit
PB: predicated region body
PF: predicated region fallthrough
CT: control target
= control target key end

     0   :  { %s22_s0 = inlined_call_operand.vmem [shape: f32[48], index: 0, kind: input, shape index: {}]   ;;  %s23_s1 = inlined_call_operand.vmem [shape: f32[4,48], index: 1, kind: output, shape index: {}]  }
   0x1   :  { %v4_v0 = vld [vmem:[%s22_s0] ss:$0 sm:$0xff] }
   0x2   :  { %5 = vst [vmem:[%s23_s1] sm:$0xf] %v4_v0 }

// kernel: tile.83
= control target key start
LH: loop header
LB: loop body
LE: loop exit
PB: predicated region body
PF: predicated region fallthrough
CT: control target
= control target key end

     0   :  { %s22_s0 = inlined_call_operand.vmem [shape: f32[64], index: 0, kind: input, shape index: {}]   ;;  %s23_s1 = inlined_call_operand.vmem [shape: f32[4,64], index: 1, kind: output, shape index: {}]  }
   0x1   :  { %v4_v0 = vld [vmem:[%s22_s0] ss:$0 sm:$0xff] }
   0x2   :  { %5 = vst [vmem:[%s23_s1] sm:$0xf] %v4_v0 }

// kernel: mul.104
= control target key start
LH: loop header
LB: loop body
LE: loop exit
PB: predicated region body
PF: predicated region fallthrough
CT: control target
= control target key end

     0   :  { %vm7_vm0 = vcmask 261120   ;;  %s37_s8 = smov 32   ;;  %s38_s9 = smov 64   ;;  %vm13_vm1 = vcmask 1048320   ;;  %vm19_vm2 = vcmask 785920   ;;  %vm25_vm3 = vcmask 523520   ;;  %s55_s0 = inlined_call_operand.vmem [shape: f32[4,32], index: 0, kind: input, shape index: {}]   ;;  %s56_s1 = inlined_call_operand.vmem [shape: f32[128], index: 1, kind: output, shape index: {}]  }
   0x1   :  { %v4_v0 = vld [vmem:[%s55_s0] sm:$0xf]  ;;  %s36_s0 = smov 96  }
   0x2   :  { %5 = vst [vmem:[#allocation1] sm:$0xf] %v4_v0 }
   0x9   :  { %v10_v1 = vld [vmem:[#allocation1 + $0x3] sm:$0x1]   ;;  %v22_v2 = vld [vmem:[#allocation1 + $0x1] sm:$0x1]   ;;  %v6_v3 = vld [vmem:[#allocation1] sm:$0x1]  }
   0xa   :  { %11 = vrot.lane.b32.xlu0 %v10_v1, %s36_s0  ;;  %23 = vrot.lane.b32.xlu1 %v22_v2, %s37_s8  ;;  %v16_v4 = vld [vmem:[#allocation1 + $0x2] sm:$0x1]   ;;  %8 = vst.msk [vmem:[#allocation0] sm:$0x1] %vm7_vm0, %v6_v3  }
   0xe   :  { %17 = vrot.lane.b32.xlu0 %v16_v4, %s38_s9 }
  0x7c   :  { %v12_v5 = vpop.permute.xlu0 %11   ;;  %v24_v6 = vpop.permute.xlu1 %23  }
  0x7d   :  { %14 = vst.msk [vmem:[#allocation0] sm:$0x1] %vm13_vm1, %v12_v5  }
  0x80   :  { %v18_v7 = vpop.permute.xlu0 %17  }
  0x81   :  { %20 = vst.msk [vmem:[#allocation0] sm:$0x1] %vm19_vm2, %v18_v7  }
  0x82   :  { %26 = vst.msk [vmem:[#allocation0] sm:$0x1] %vm25_vm3, %v24_v6  }
  0x89   :  { %v30_v8 = vld [vmem:[#allocation0] sm:$0x1] }
  0x8a   :  { %32 = vst [vmem:[%s56_s1] sm:$0x1] %v30_v8 }

// kernel: mul.109
= control target key start
LH: loop header
LB: loop body
LE: loop exit
PB: predicated region body
PF: predicated region fallthrough
CT: control target
= control target key end

     0   :  { %s6_s8 = smov 3  ;;  %vm8_vm0 = vcmask 523264   ;;  %s24_s9 = smov 64   ;;  %vm15_vm1 = vcmask 1048064   ;;  %s41_s0 = inlined_call_operand.vmem [shape: f32[4,64], index: 0, kind: input, shape index: {}]   ;;  %s42_s1 = inlined_call_operand.vmem [shape: f32[256], index: 1, kind: output, shape index: {}]  }
   0x1   :  { %v4_v0 = vld [vmem:[%s41_s0] sm:$0xf]  ;;  %s11_s0 = smov 3 }
   0x2   :  { %5 = vst [vmem:[#allocation1] sm:$0xf] %v4_v0 }
   0x9   :  { %v12_v1 = vld [vmem:[#allocation1 + $0x1] ss:$2 sm:%s11_s0]   ;;  %v7_v2 = vld [vmem:[#allocation1] ss:$2 sm:%s6_s8]  }
   0xa   :  { %13 = vrot.lane.b32.xlu0 %v12_v1, %s24_s9  ;;  %9 = vst.msk [vmem:[#allocation0] sm:$0x3] %vm8_vm0, %v7_v2  }
  0x7c   :  { %v14_v3 = vpop.permute.xlu0 %13  }
  0x7d   :  { %16 = vst.msk [vmem:[#allocation0] sm:$0x3] %vm15_vm1, %v14_v3  }
  0x84   :  { %v20_v4 = vld [vmem:[#allocation0] sm:$0x3] }
  0x85   :  { %22 = vst [vmem:[%s42_s1] sm:$0x3] %v20_v4 }

// kernel: mul.99
= control target key start
LH: loop header
LB: loop body
LE: loop exit
PB: predicated region body
PF: predicated region fallthrough
CT: control target
= control target key end

     0   :  { %vm13_vm0 = vcmask 261120   ;;  %vm7_vm1 = vcmask 392192   ;;  %s45_s8 = smov 96   ;;  %s46_s9 = smov 48   ;;  %vm17_vm2 = vcmask 130048   ;;  %vm20_vm3 = vcmask 1048320   ;;  %s63_s0 = inlined_call_operand.vmem [shape: f32[4,48], index: 0, kind: input, shape index: {}]   ;;  %s64_s1 = inlined_call_operand.vmem [shape: f32[192], index: 1, kind: output, shape index: {}]  }
   0x1   :  { %v4_v0 = vld [vmem:[%s63_s0] sm:$0xf]  ;;  %s44_s0 = smov 16   ;;  %vm32_vm4 = vcmask 523392   ;;  %vm26_vm5 = vcmask 785792  }
   0x2   :  { %5 = vst [vmem:[#allocation1] sm:$0xf] %v4_v0 }
   0x9   :  { %v10_v1 = vld [vmem:[#allocation1 + $0x2] sm:$0x1]   ;;  %v29_v3 = vld [vmem:[#allocation1 + $0x3] sm:$0x1]   ;;  %v6_v5 = vld [vmem:[#allocation1] sm:$0x1]  }
   0xa   :  { %v12_v2 = vld [vmem:[#allocation1 + $0x2] sm:$0x1]   ;;  %30 = vrot.lane.b32.xlu1 %v29_v3, %s44_s0  ;;  %8 = vst.msk [vmem:[#allocation0] sm:$0x1] %vm7_vm1, %v6_v5   ;;  %v23_v6 = vld [vmem:[#allocation1 + $0x1] sm:$0x1]  }
   0xb   :  { %v14_v4 = vsel %vm13_vm0, %v12_v2, %v10_v1 }
   0xc   :  { %15 = vrot.lane.b32.xlu0 %v14_v4, %s45_s8 }
  0x10   :  { %24 = vrot.lane.b32.xlu0 %v23_v6, %s46_s9 }
  0x7c   :  { %v31_v7 = vpop.permute.xlu1 %30  }
  0x7e   :  { %v16_v8 = vpop.permute.xlu0 %15  }
  0x7f   :  { %19 = vst.msk [vmem:[#allocation0 + $0x1] sm:$0x1] %vm17_vm2, %v16_v8  }
  0x80   :  { %21 = vst.msk [vmem:[#allocation0] sm:$0x1] %vm20_vm3, %v16_v8  }
  0x81   :  { %34 = vst.msk [vmem:[#allocation0 + $0x1] sm:$0x1] %vm32_vm4, %v31_v7  }
  0x82   :  { %v25_v9 = vpop.permute.xlu0 %24  }
  0x83   :  { %27 = vst.msk [vmem:[#allocation0] sm:$0x1] %vm26_vm5, %v25_v9  }
  0x8a   :  { %v38_v10 = vld [vmem:[#allocation0] sm:$0x3] }
  0x8b   :  { %40 = vst [vmem:[%s64_s1] sm:$0x3] %v38_v10 }

// kernel: tile.57
= control target key start
LH: loop header
LB: loop body
LE: loop exit
PB: predicated region body
PF: predicated region fallthrough
CT: control target
= control target key end

     0   :  { %2 = vsyncpa [#allocation1], 0  ;;  %s44_s6 = smov [#allocation0]   ;;  %s70_s0 = inlined_call_operand.hbm [shape: f32[48], index: 0, kind: input, shape index: {}]   ;;  %s71_s1 = inlined_call_operand.vmem [shape: f32[4,48], index: 1, kind: output, shape index: {}]  }
   0x1   :  { %s9_s7 = sshll.u32 %s44_s6, 4  ;;  %s20_s10 = scalar_lea.hbm %s70_s0, 16  ;;  %s10_s7 = int_to_ptr.vmem [resolvable:$true] %s9_s7 }
   0x2   :  { %p21_p0 = scmp.ne.s32.totalorder %s70_s0, %s20_s10  ;;  %p24_p1 = scmp.lt.u32.totalorder %s20_s10, %s70_s0 }
   0x4   :  { %p26_p2 = pnand %p24_p1, %p21_p0 }
   0x6   :  { %29 = shalt.err (!%p26_p2)
}
   0x7   :  { %s30_s15 = scalar_lea.vmem %s10_s7, 16  ;;  %s34_s16 = scalar_lea.vmem %s10_s7, 32 }
   0x8   :  { %p31_p3 = scmp.ne.s32.totalorder %s10_s7, %s30_s15  ;;  %p35_p4 = scmp.lt.s32.totalorder %s10_s7, %s10_s7 }
   0x9   :  { %p36_p5 = scmp.lt.s32.totalorder %s34_s16, %s30_s15 }
   0xb   :  { %p37_p6 = por %p36_p5, %p35_p4 }
   0xd   :  { %p38_p7 = pnand %p37_p6, %p31_p3 }
   0xf   :  { %41 = shalt.err (!%p38_p7)
}
  0x10   :  { %12 = dma.hbm_to_vmem [thread:$0]  %s70_s0, 16, %s10_s7, [#allocation1]  }
  0x11   :  { %42 = dma.done.wait [#allocation1], 16  }
  0x12   :  { %43 = vsyncadd [#allocation1], 4294967280  ;;  %v16_v0 = vld [vmem:[#allocation0] ss:$0 sm:$0xff] }
  0x13   :  { %17 = vst [vmem:[%s71_s1] sm:$0xf] %v16_v0 }
  0x14   :  { %18 = vsyncpa [#allocation1], 1 }

// kernel: tile.72
= control target key start
LH: loop header
LB: loop body
LE: loop exit
PB: predicated region body
PF: predicated region fallthrough
CT: control target
= control target key end

     0   :  { %2 = vsyncpa [#allocation1], 0  ;;  %s44_s6 = smov [#allocation0]   ;;  %s70_s0 = inlined_call_operand.hbm [shape: f32[32], index: 0, kind: input, shape index: {}]   ;;  %s71_s1 = inlined_call_operand.vmem [shape: f32[4,32], index: 1, kind: output, shape index: {}]  }
   0x1   :  { %s9_s7 = sshll.u32 %s44_s6, 4  ;;  %s20_s10 = scalar_lea.hbm %s70_s0, 16  ;;  %s10_s7 = int_to_ptr.vmem [resolvable:$true] %s9_s7 }
   0x2   :  { %p21_p0 = scmp.ne.s32.totalorder %s70_s0, %s20_s10  ;;  %p24_p1 = scmp.lt.u32.totalorder %s20_s10, %s70_s0 }
   0x4   :  { %p26_p2 = pnand %p24_p1, %p21_p0 }
   0x6   :  { %29 = shalt.err (!%p26_p2)
}
   0x7   :  { %s30_s15 = scalar_lea.vmem %s10_s7, 16  ;;  %s34_s16 = scalar_lea.vmem %s10_s7, 32 }
   0x8   :  { %p31_p3 = scmp.ne.s32.totalorder %s10_s7, %s30_s15  ;;  %p35_p4 = scmp.lt.s32.totalorder %s10_s7, %s10_s7 }
   0x9   :  { %p36_p5 = scmp.lt.s32.totalorder %s34_s16, %s30_s15 }
   0xb   :  { %p37_p6 = por %p36_p5, %p35_p4 }
   0xd   :  { %p38_p7 = pnand %p37_p6, %p31_p3 }
   0xf   :  { %41 = shalt.err (!%p38_p7)
}
  0x10   :  { %12 = dma.hbm_to_vmem [thread:$0]  %s70_s0, 16, %s10_s7, [#allocation1]  }
  0x11   :  { %42 = dma.done.wait [#allocation1], 16  }
  0x12   :  { %43 = vsyncadd [#allocation1], 4294967280  ;;  %v16_v0 = vld [vmem:[#allocation0] ss:$0 sm:$0xff] }
  0x13   :  { %17 = vst [vmem:[%s71_s1] sm:$0xf] %v16_v0 }
  0x14   :  { %18 = vsyncpa [#allocation1], 1 }

// kernel: tile.87
= control target key start
LH: loop header
LB: loop body
LE: loop exit
PB: predicated region body
PF: predicated region fallthrough
CT: control target
= control target key end

     0   :  { %2 = vsyncpa [#allocation1], 0  ;;  %s44_s6 = smov [#allocation0]   ;;  %s70_s0 = inlined_call_operand.hbm [shape: f32[64], index: 0, kind: input, shape index: {}]   ;;  %s71_s1 = inlined_call_operand.vmem [shape: f32[4,64], index: 1, kind: output, shape index: {}]  }
   0x1   :  { %s9_s7 = sshll.u32 %s44_s6, 4  ;;  %s20_s10 = scalar_lea.hbm %s70_s0, 16  ;;  %s10_s7 = int_to_ptr.vmem [resolvable:$true] %s9_s7 }
   0x2   :  { %p21_p0 = scmp.ne.s32.totalorder %s70_s0, %s20_s10  ;;  %p24_p1 = scmp.lt.u32.totalorder %s20_s10, %s70_s0 }
   0x4   :  { %p26_p2 = pnand %p24_p1, %p21_p0 }
   0x6   :  { %29 = shalt.err (!%p26_p2)
}
   0x7   :  { %s30_s15 = scalar_lea.vmem %s10_s7, 16  ;;  %s34_s16 = scalar_lea.vmem %s10_s7, 32 }
   0x8   :  { %p31_p3 = scmp.ne.s32.totalorder %s10_s7, %s30_s15  ;;  %p35_p4 = scmp.lt.s32.totalorder %s10_s7, %s10_s7 }
   0x9   :  { %p36_p5 = scmp.lt.s32.totalorder %s34_s16, %s30_s15 }
   0xb   :  { %p37_p6 = por %p36_p5, %p35_p4 }
   0xd   :  { %p38_p7 = pnand %p37_p6, %p31_p3 }
   0xf   :  { %41 = shalt.err (!%p38_p7)
}
  0x10   :  { %12 = dma.hbm_to_vmem [thread:$0]  %s70_s0, 16, %s10_s7, [#allocation1]  }
  0x11   :  { %42 = dma.done.wait [#allocation1], 16  }
  0x12   :  { %43 = vsyncadd [#allocation1], 4294967280  ;;  %v16_v0 = vld [vmem:[#allocation0] ss:$0 sm:$0xff] }
  0x13   :  { %17 = vst [vmem:[%s71_s1] sm:$0xf] %v16_v0 }
  0x14   :  { %18 = vsyncpa [#allocation1], 1 }

// kernel: tile.3
= control target key start
LH: loop header
LB: loop body
LE: loop exit
PB: predicated region body
PF: predicated region fallthrough
CT: control target
= control target key end

     0   :  { %s546_s8 = smov 125   ;;  %s547_s9 = smov 126   ;;  %vm7_vm0 = vcmask 7168   ;;  %s1101_s0 = inlined_call_operand.vmem [shape: f32[4,32], index: 0, kind: input, shape index: {}]   ;;  %s1102_s1 = inlined_call_operand.vmem [shape: f32[128,1], index: 1, kind: output, shape index: {}]  }
   0x1   :  { %v4_v0 = vld [vmem:[%s1101_s0] sm:$0xf]  ;;  %s545_s0 = smov 127   ;;  %s548_s10 = smov 124  }
   0x2   :  { %5 = vst [vmem:[#allocation0] sm:$0xf] %v4_v0  ;;  %s549_s11 = smov 123   ;;  %s550_s12 = smov 122  }
   0x3   :  { %s551_s13 = smov 121   ;;  %s552_s14 = smov 120  }
   0x4   :  { %s553_s15 = smov 119   ;;  %s554_s16 = smov 118  }
   0x5   :  { %s555_s17 = smov 117   ;;  %s556_s18 = smov 116  }
   0x6   :  { %s557_s19 = smov 115   ;;  %s558_s20 = smov 114  }
   0x7   :  { %s559_s21 = smov 113   ;;  %s560_s22 = smov 112  }
   0x8   :  { %s561_s23 = smov 111   ;;  %s562_s24 = smov 110  }
   0x9   :  { %v15_v1 = vld [vmem:[#allocation0] sm:$0xf]   ;;  %s563_s25 = smov 109   ;;  %s564_s26 = smov 108  }
   0xa   :  { %v39_v2 = vld [vmem:[#allocation0] sm:$0xf]   ;;  %16 = vrot.lane.b32.xlu0 %v15_v1, %s545_s0  ;;  %s565_s27 = smov 107   ;;  %s566_s28 = smov 106  }
   0xb   :  { %40 = vrot.lane.b32.xlu1 %v39_v2, %s546_s8  ;;  %v27_v3 = vld [vmem:[#allocation0] sm:$0xf]   ;;  %s567_s29 = smov 105   ;;  %s568_s30 = smov 104  }
   0xc   :  { %v51_v4 = vld [vmem:[#allocation0] sm:$0xf]  }
   0xd   :  { %v63_v5 = vld [vmem:[#allocation0] sm:$0xf]  }
   0xe   :  { %28 = vrot.lane.b32.xlu0 %v27_v3, %s547_s9  ;;  %v75_v6 = vld [vmem:[#allocation0] sm:$0xf]   ;;  %s569_s9 = smov 103  }
   0xf   :  { %52 = vrot.lane.b32.xlu1 %v51_v4, %s548_s10  ;;  %v87_v7 = vld [vmem:[#allocation0] sm:$0xf]   ;;  %s570_s10 = smov 102  }
  0x10   :  { %v99_v8 = vld [vmem:[#allocation0] sm:$0xf]  }
  0x11   :  { %v111_v9 = vld [vmem:[#allocation0] sm:$0xf]  }
  0x12   :  { %64 = vrot.lane.b32.xlu0 %v63_v5, %s549_s11  ;;  %v123_v10 = vld [vmem:[#allocation0] sm:$0xf]   ;;  %s571_s11 = smov 101  }
  0x13   :  { %76 = vrot.lane.b32.xlu1 %v75_v6, %s550_s12  ;;  %v135_v11 = vld [vmem:[#allocation0] sm:$0xf]   ;;  %s572_s12 = smov 100  }
  0x14   :  { %v147_v12 = vld [vmem:[#allocation0] sm:$0xf]  }
  0x15   :  { %v159_v13 = vld [vmem:[#allocation0] sm:$0xf]  }
  0x16   :  { %88 = vrot.lane.b32.xlu0 %v87_v7, %s551_s13  ;;  %v171_v14 = vld [vmem:[#allocation0] sm:$0xf]   ;;  %s573_s13 = smov 99  }
  0x17   :  { %100 = vrot.lane.b32.xlu1 %v99_v8, %s552_s14  ;;  %v183_v15 = vld [vmem:[#allocation0] sm:$0xf]   ;;  %s574_s14 = smov 98  }
  0x18   :  { %v195_v16 = vld [vmem:[#allocation0] sm:$0xf]  }
  0x19   :  { %v207_v17 = vld [vmem:[#allocation0] sm:$0xf]  }
  0x1a   :  { %112 = vrot.lane.b32.xlu0 %v111_v9, %s553_s15  ;;  %v219_v18 = vld [vmem:[#allocation0] sm:$0xf]   ;;  %s575_s15 = smov 97  }
  0x1b   :  { %124 = vrot.lane.b32.xlu1 %v123_v10, %s554_s16  ;;  %v231_v19 = vld [vmem:[#allocation0] sm:$0xf]  }
  0x1c   :  { %v243_v20 = vld [vmem:[#allocation0] sm:$0xf]  }
  0x1d   :  { %v255_v21 = vld [vmem:[#allocation0] sm:$0xf]  }
  0x1e   :  { %136 = vrot.lane.b32.xlu0 %v135_v11, %s555_s17  ;;  %v267_v22 = vld [vmem:[#allocation0] sm:$0xf]  }
  0x1f   :  { %148 = vrot.lane.b32.xlu1 %v147_v12, %s556_s18  ;;  %v279_v23 = vld [vmem:[#allocation0] sm:$0xf]  }
  0x20   :  { %v291_v24 = vld [vmem:[#allocation0] sm:$0xf]  }
  0x21   :  { %v303_v25 = vld [vmem:[#allocation0] sm:$0xf]  }
  0x22   :  { %160 = vrot.lane.b32.xlu0 %v159_v13, %s557_s19  ;;  %v315_v26 = vld [vmem:[#allocation0] sm:$0xf]  }
  0x23   :  { %172 = vrot.lane.b32.xlu1 %v171_v14, %s558_s20  ;;  %v6_v27 = vld [vmem:[#allocation0] sm:$0xf]  }
  0x24   :  { %8 = vst.msk [vmem:[%s1102_s1] sm:$0x1] %vm7_vm0, %v6_v27   ;;  %387 = vst.msk [vmem:[%s1102_s1 + $0x1f] sm:$0x2] %vm7_vm0, %v6_v27   ;;  %v327_v28 = vld [vmem:[#allocation0] sm:$0xf]  }
  0x25   :  { %388 = vst.msk [vmem:[%s1102_s1 + $0x3e] sm:$0x4] %vm7_vm0, %v6_v27   ;;  %389 = vst.msk [vmem:[%s1102_s1 + $0x5d] sm:$0x8] %vm7_vm0, %v6_v27   ;;  %v339_v29 = vld [vmem:[#allocation0] sm:$0xf]  }
  0x26   :  { %184 = vrot.lane.b32.xlu0 %v183_v15, %s559_s21  ;;  %v351_v30 = vld [vmem:[#allocation0] sm:$0xf]  }
  0x27   :  { %196 = vrot.lane.b32.xlu1 %v195_v16, %s560_s22  ;;  %v363_v31 = vld [vmem:[#allocation0] sm:$0xf]  }
  0x28   :  { %v375_v32 = vld [vmem:[#allocation0] sm:$0xf]  }
  0x2a   :  { %208 = vrot.lane.b32.xlu0 %v207_v17, %s561_s23 }
  0x2b   :  { %220 = vrot.lane.b32.xlu1 %v219_v18, %s562_s24 }
  0x2e   :  { %232 = vrot.lane.b32.xlu0 %v231_v19, %s563_s25 }
  0x2f   :  { %244 = vrot.lane.b32.xlu1 %v243_v20, %s564_s26 }
  0x32   :  { %256 = vrot.lane.b32.xlu0 %v255_v21, %s565_s27 }
  0x33   :  { %268 = vrot.lane.b32.xlu1 %v267_v22, %s566_s28 }
  0x36   :  { %280 = vrot.lane.b32.xlu0 %v279_v23, %s567_s29 }
  0x37   :  { %292 = vrot.lane.b32.xlu1 %v291_v24, %s568_s30 }
  0x3a   :  { %304 = vrot.lane.b32.xlu0 %v303_v25, %s569_s9 }
  0x3b   :  { %316 = vrot.lane.b32.xlu1 %v315_v26, %s570_s10 }
  0x3e   :  { %328 = vrot.lane.b32.xlu0 %v327_v28, %s571_s11 }
  0x3f   :  { %340 = vrot.lane.b32.xlu1 %v339_v29, %s572_s12 }
  0x42   :  { %352 = vrot.lane.b32.xlu0 %v351_v30, %s573_s13 }
  0x43   :  { %364 = vrot.lane.b32.xlu1 %v363_v31, %s574_s14 }
  0x46   :  { %376 = vrot.lane.b32.xlu0 %v375_v32, %s575_s15 }
  0x7c   :  { %v17_v33 = vpop.permute.xlu0 %16  }
  0x7d   :  { %v41_v34 = vpop.permute.xlu1 %40   ;;  %390 = vst.msk [vmem:[%s1102_s1 + $0x1] sm:$0x1] %vm7_vm0, %v17_v33   ;;  %391 = vst.msk [vmem:[%s1102_s1 + $0x20] sm:$0x2] %vm7_vm0, %v17_v33  }
  0x7e   :  { %392 = vst.msk [vmem:[%s1102_s1 + $0x3f] sm:$0x4] %vm7_vm0, %v17_v33   ;;  %393 = vst.msk [vmem:[%s1102_s1 + $0x5e] sm:$0x8] %vm7_vm0, %v17_v33  }
  0x7f   :  { %398 = vst.msk [vmem:[%s1102_s1 + $0x3] sm:$0x1] %vm7_vm0, %v41_v34   ;;  %399 = vst.msk [vmem:[%s1102_s1 + $0x22] sm:$0x2] %vm7_vm0, %v41_v34  }
  0x80   :  { %400 = vst.msk [vmem:[%s1102_s1 + $0x41] sm:$0x4] %vm7_vm0, %v41_v34   ;;  %401 = vst.msk [vmem:[%s1102_s1 + $0x60] sm:$0x8] %vm7_vm0, %v41_v34   ;;  %v29_v35 = vpop.permute.xlu0 %28  }
  0x81   :  { %v53_v36 = vpop.permute.xlu1 %52   ;;  %394 = vst.msk [vmem:[%s1102_s1 + $0x2] sm:$0x1] %vm7_vm0, %v29_v35   ;;  %395 = vst.msk [vmem:[%s1102_s1 + $0x21] sm:$0x2] %vm7_vm0, %v29_v35  }
  0x82   :  { %396 = vst.msk [vmem:[%s1102_s1 + $0x40] sm:$0x4] %vm7_vm0, %v29_v35   ;;  %397 = vst.msk [vmem:[%s1102_s1 + $0x5f] sm:$0x8] %vm7_vm0, %v29_v35  }
  0x83   :  { %402 = vst.msk [vmem:[%s1102_s1 + $0x4] sm:$0x1] %vm7_vm0, %v53_v36   ;;  %403 = vst.msk [vmem:[%s1102_s1 + $0x23] sm:$0x2] %vm7_vm0, %v53_v36  }
  0x84   :  { %404 = vst.msk [vmem:[%s1102_s1 + $0x42] sm:$0x4] %vm7_vm0, %v53_v36   ;;  %405 = vst.msk [vmem:[%s1102_s1 + $0x61] sm:$0x8] %vm7_vm0, %v53_v36   ;;  %v65_v37 = vpop.permute.xlu0 %64  }
  0x85   :  { %v77_v38 = vpop.permute.xlu1 %76   ;;  %406 = vst.msk [vmem:[%s1102_s1 + $0x5] sm:$0x1] %vm7_vm0, %v65_v37   ;;  %407 = vst.msk [vmem:[%s1102_s1 + $0x24] sm:$0x2] %vm7_vm0, %v65_v37  }
  0x86   :  { %408 = vst.msk [vmem:[%s1102_s1 + $0x43] sm:$0x4] %vm7_vm0, %v65_v37   ;;  %409 = vst.msk [vmem:[%s1102_s1 + $0x62] sm:$0x8] %vm7_vm0, %v65_v37  }
  0x87   :  { %410 = vst.msk [vmem:[%s1102_s1 + $0x6] sm:$0x1] %vm7_vm0, %v77_v38   ;;  %411 = vst.msk [vmem:[%s1102_s1 + $0x25] sm:$0x2] %vm7_vm0, %v77_v38  }
  0x88   :  { %412 = vst.msk [vmem:[%s1102_s1 + $0x44] sm:$0x4] %vm7_vm0, %v77_v38   ;;  %413 = vst.msk [vmem:[%s1102_s1 + $0x63] sm:$0x8] %vm7_vm0, %v77_v38   ;;  %v89_v39 = vpop.permute.xlu0 %88  }
  0x89   :  { %v101_v40 = vpop.permute.xlu1 %100   ;;  %414 = vst.msk [vmem:[%s1102_s1 + $0x7] sm:$0x1] %vm7_vm0, %v89_v39   ;;  %415 = vst.msk [vmem:[%s1102_s1 + $0x26] sm:$0x2] %vm7_vm0, %v89_v39  }
  0x8a   :  { %416 = vst.msk [vmem:[%s1102_s1 + $0x45] sm:$0x4] %vm7_vm0, %v89_v39   ;;  %417 = vst.msk [vmem:[%s1102_s1 + $0x64] sm:$0x8] %vm7_vm0, %v89_v39  }
  0x8b   :  { %418 = vst.msk [vmem:[%s1102_s1 + $0x8] sm:$0x1] %vm7_vm0, %v101_v40   ;;  %419 = vst.msk [vmem:[%s1102_s1 + $0x27] sm:$0x2] %vm7_vm0, %v101_v40  }
  0x8c   :  { %420 = vst.msk [vmem:[%s1102_s1 + $0x46] sm:$0x4] %vm7_vm0, %v101_v40   ;;  %421 = vst.msk [vmem:[%s1102_s1 + $0x65] sm:$0x8] %vm7_vm0, %v101_v40   ;;  %v113_v41 = vpop.permute.xlu0 %112  }
  0x8d   :  { %v125_v42 = vpop.permute.xlu1 %124   ;;  %422 = vst.msk [vmem:[%s1102_s1 + $0x9] sm:$0x1] %vm7_vm0, %v113_v41   ;;  %423 = vst.msk [vmem:[%s1102_s1 + $0x28] sm:$0x2] %vm7_vm0, %v113_v41  }
  0x8e   :  { %424 = vst.msk [vmem:[%s1102_s1 + $0x47] sm:$0x4] %vm7_vm0, %v113_v41   ;;  %425 = vst.msk [vmem:[%s1102_s1 + $0x66] sm:$0x8] %vm7_vm0, %v113_v41  }
  0x8f   :  { %426 = vst.msk [vmem:[%s1102_s1 + $0xa] sm:$0x1] %vm7_vm0, %v125_v42   ;;  %427 = vst.msk [vmem:[%s1102_s1 + $0x29] sm:$0x2] %vm7_vm0, %v125_v42  }
  0x90   :  { %428 = vst.msk [vmem:[%s1102_s1 + $0x48] sm:$0x4] %vm7_vm0, %v125_v42   ;;  %429 = vst.msk [vmem:[%s1102_s1 + $0x67] sm:$0x8] %vm7_vm0, %v125_v42   ;;  %v137_v43 = vpop.permute.xlu0 %136  }
  0x91   :  { %v149_v44 = vpop.permute.xlu1 %148   ;;  %430 = vst.msk [vmem:[%s1102_s1 + $0xb] sm:$0x1] %vm7_vm0, %v137_v43   ;;  %431 = vst.msk [vmem:[%s1102_s1 + $0x2a] sm:$0x2] %vm7_vm0, %v137_v43  }
  0x92   :  { %432 = vst.msk [vmem:[%s1102_s1 + $0x49] sm:$0x4] %vm7_vm0, %v137_v43   ;;  %433 = vst.msk [vmem:[%s1102_s1 + $0x68] sm:$0x8] %vm7_vm0, %v137_v43  }
  0x93   :  { %434 = vst.msk [vmem:[%s1102_s1 + $0xc] sm:$0x1] %vm7_vm0, %v149_v44   ;;  %435 = vst.msk [vmem:[%s1102_s1 + $0x2b] sm:$0x2] %vm7_vm0, %v149_v44  }
  0x94   :  { %436 = vst.msk [vmem:[%s1102_s1 + $0x4a] sm:$0x4] %vm7_vm0, %v149_v44   ;;  %437 = vst.msk [vmem:[%s1102_s1 + $0x69] sm:$0x8] %vm7_vm0, %v149_v44   ;;  %v161_v45 = vpop.permute.xlu0 %160  }
  0x95   :  { %v173_v46 = vpop.permute.xlu1 %172   ;;  %438 = vst.msk [vmem:[%s1102_s1 + $0xd] sm:$0x1] %vm7_vm0, %v161_v45   ;;  %439 = vst.msk [vmem:[%s1102_s1 + $0x2c] sm:$0x2] %vm7_vm0, %v161_v45  }
  0x96   :  { %440 = vst.msk [vmem:[%s1102_s1 + $0x4b] sm:$0x4] %vm7_vm0, %v161_v45   ;;  %441 = vst.msk [vmem:[%s1102_s1 + $0x6a] sm:$0x8] %vm7_vm0, %v161_v45  }
  0x97   :  { %442 = vst.msk [vmem:[%s1102_s1 + $0xe] sm:$0x1] %vm7_vm0, %v173_v46   ;;  %443 = vst.msk [vmem:[%s1102_s1 + $0x2d] sm:$0x2] %vm7_vm0, %v173_v46  }
  0x98   :  { %444 = vst.msk [vmem:[%s1102_s1 + $0x4c] sm:$0x4] %vm7_vm0, %v173_v46   ;;  %445 = vst.msk [vmem:[%s1102_s1 + $0x6b] sm:$0x8] %vm7_vm0, %v173_v46   ;;  %v185_v47 = vpop.permute.xlu0 %184  }
  0x99   :  { %v197_v48 = vpop.permute.xlu1 %196   ;;  %446 = vst.msk [vmem:[%s1102_s1 + $0xf] sm:$0x1] %vm7_vm0, %v185_v47   ;;  %447 = vst.msk [vmem:[%s1102_s1 + $0x2e] sm:$0x2] %vm7_vm0, %v185_v47  }
  0x9a   :  { %448 = vst.msk [vmem:[%s1102_s1 + $0x4d] sm:$0x4] %vm7_vm0, %v185_v47   ;;  %449 = vst.msk [vmem:[%s1102_s1 + $0x6c] sm:$0x8] %vm7_vm0, %v185_v47  }
  0x9b   :  { %450 = vst.msk [vmem:[%s1102_s1 + $0x10] sm:$0x1] %vm7_vm0, %v197_v48   ;;  %451 = vst.msk [vmem:[%s1102_s1 + $0x2f] sm:$0x2] %vm7_vm0, %v197_v48  }
  0x9c   :  { %452 = vst.msk [vmem:[%s1102_s1 + $0x4e] sm:$0x4] %vm7_vm0, %v197_v48   ;;  %453 = vst.msk [vmem:[%s1102_s1 + $0x6d] sm:$0x8] %vm7_vm0, %v197_v48   ;;  %v209_v49 = vpop.permute.xlu0 %208  }
  0x9d   :  { %v221_v50 = vpop.permute.xlu1 %220   ;;  %454 = vst.msk [vmem:[%s1102_s1 + $0x11] sm:$0x1] %vm7_vm0, %v209_v49   ;;  %455 = vst.msk [vmem:[%s1102_s1 + $0x30] sm:$0x2] %vm7_vm0, %v209_v49  }
  0x9e   :  { %456 = vst.msk [vmem:[%s1102_s1 + $0x4f] sm:$0x4] %vm7_vm0, %v209_v49   ;;  %457 = vst.msk [vmem:[%s1102_s1 + $0x6e] sm:$0x8] %vm7_vm0, %v209_v49  }
  0x9f   :  { %458 = vst.msk [vmem:[%s1102_s1 + $0x12] sm:$0x1] %vm7_vm0, %v221_v50   ;;  %459 = vst.msk [vmem:[%s1102_s1 + $0x31] sm:$0x2] %vm7_vm0, %v221_v50  }
  0xa0   :  { %460 = vst.msk [vmem:[%s1102_s1 + $0x50] sm:$0x4] %vm7_vm0, %v221_v50   ;;  %461 = vst.msk [vmem:[%s1102_s1 + $0x6f] sm:$0x8] %vm7_vm0, %v221_v50   ;;  %v233_v51 = vpop.permute.xlu0 %232  }
  0xa1   :  { %v245_v52 = vpop.permute.xlu1 %244   ;;  %462 = vst.msk [vmem:[%s1102_s1 + $0x13] sm:$0x1] %vm7_vm0, %v233_v51   ;;  %463 = vst.msk [vmem:[%s1102_s1 + $0x32] sm:$0x2] %vm7_vm0, %v233_v51  }
  0xa2   :  { %464 = vst.msk [vmem:[%s1102_s1 + $0x51] sm:$0x4] %vm7_vm0, %v233_v51   ;;  %465 = vst.msk [vmem:[%s1102_s1 + $0x70] sm:$0x8] %vm7_vm0, %v233_v51  }
  0xa3   :  { %466 = vst.msk [vmem:[%s1102_s1 + $0x14] sm:$0x1] %vm7_vm0, %v245_v52   ;;  %467 = vst.msk [vmem:[%s1102_s1 + $0x33] sm:$0x2] %vm7_vm0, %v245_v52  }
  0xa4   :  { %468 = vst.msk [vmem:[%s1102_s1 + $0x52] sm:$0x4] %vm7_vm0, %v245_v52   ;;  %469 = vst.msk [vmem:[%s1102_s1 + $0x71] sm:$0x8] %vm7_vm0, %v245_v52   ;;  %v257_v53 = vpop.permute.xlu0 %256  }
  0xa5   :  { %v269_v54 = vpop.permute.xlu1 %268   ;;  %470 = vst.msk [vmem:[%s1102_s1 + $0x15] sm:$0x1] %vm7_vm0, %v257_v53   ;;  %471 = vst.msk [vmem:[%s1102_s1 + $0x34] sm:$0x2] %vm7_vm0, %v257_v53  }
  0xa6   :  { %472 = vst.msk [vmem:[%s1102_s1 + $0x53] sm:$0x4] %vm7_vm0, %v257_v53   ;;  %473 = vst.msk [vmem:[%s1102_s1 + $0x72] sm:$0x8] %vm7_vm0, %v257_v53  }
  0xa7   :  { %474 = vst.msk [vmem:[%s1102_s1 + $0x16] sm:$0x1] %vm7_vm0, %v269_v54   ;;  %475 = vst.msk [vmem:[%s1102_s1 + $0x35] sm:$0x2] %vm7_vm0, %v269_v54  }
  0xa8   :  { %476 = vst.msk [vmem:[%s1102_s1 + $0x54] sm:$0x4] %vm7_vm0, %v269_v54   ;;  %477 = vst.msk [vmem:[%s1102_s1 + $0x73] sm:$0x8] %vm7_vm0, %v269_v54   ;;  %v281_v55 = vpop.permute.xlu0 %280  }
  0xa9   :  { %v293_v56 = vpop.permute.xlu1 %292   ;;  %478 = vst.msk [vmem:[%s1102_s1 + $0x17] sm:$0x1] %vm7_vm0, %v281_v55   ;;  %479 = vst.msk [vmem:[%s1102_s1 + $0x36] sm:$0x2] %vm7_vm0, %v281_v55  }
  0xaa   :  { %480 = vst.msk [vmem:[%s1102_s1 + $0x55] sm:$0x4] %vm7_vm0, %v281_v55   ;;  %481 = vst.msk [vmem:[%s1102_s1 + $0x74] sm:$0x8] %vm7_vm0, %v281_v55  }
  0xab   :  { %482 = vst.msk [vmem:[%s1102_s1 + $0x18] sm:$0x1] %vm7_vm0, %v293_v56   ;;  %483 = vst.msk [vmem:[%s1102_s1 + $0x37] sm:$0x2] %vm7_vm0, %v293_v56  }
  0xac   :  { %484 = vst.msk [vmem:[%s1102_s1 + $0x56] sm:$0x4] %vm7_vm0, %v293_v56   ;;  %485 = vst.msk [vmem:[%s1102_s1 + $0x75] sm:$0x8] %vm7_vm0, %v293_v56   ;;  %v305_v57 = vpop.permute.xlu0 %304  }
  0xad   :  { %v317_v58 = vpop.permute.xlu1 %316   ;;  %486 = vst.msk [vmem:[%s1102_s1 + $0x19] sm:$0x1] %vm7_vm0, %v305_v57   ;;  %487 = vst.msk [vmem:[%s1102_s1 + $0x38] sm:$0x2] %vm7_vm0, %v305_v57  }
  0xae   :  { %488 = vst.msk [vmem:[%s1102_s1 + $0x57] sm:$0x4] %vm7_vm0, %v305_v57   ;;  %489 = vst.msk [vmem:[%s1102_s1 + $0x76] sm:$0x8] %vm7_vm0, %v305_v57  }
  0xaf   :  { %490 = vst.msk [vmem:[%s1102_s1 + $0x1a] sm:$0x1] %vm7_vm0, %v317_v58   ;;  %491 = vst.msk [vmem:[%s1102_s1 + $0x39] sm:$0x2] %vm7_vm0, %v317_v58  }
  0xb0   :  { %492 = vst.msk [vmem:[%s1102_s1 + $0x58] sm:$0x4] %vm7_vm0, %v317_v58   ;;  %493 = vst.msk [vmem:[%s1102_s1 + $0x77] sm:$0x8] %vm7_vm0, %v317_v58   ;;  %v329_v59 = vpop.permute.xlu0 %328  }
  0xb1   :  { %v341_v60 = vpop.permute.xlu1 %340   ;;  %494 = vst.msk [vmem:[%s1102_s1 + $0x1b] sm:$0x1] %vm7_vm0, %v329_v59   ;;  %495 = vst.msk [vmem:[%s1102_s1 + $0x3a] sm:$0x2] %vm7_vm0, %v329_v59  }
  0xb2   :  { %496 = vst.msk [vmem:[%s1102_s1 + $0x59] sm:$0x4] %vm7_vm0, %v329_v59   ;;  %497 = vst.msk [vmem:[%s1102_s1 + $0x78] sm:$0x8] %vm7_vm0, %v329_v59  }
  0xb3   :  { %498 = vst.msk [vmem:[%s1102_s1 + $0x1c] sm:$0x1] %vm7_vm0, %v341_v60   ;;  %499 = vst.msk [vmem:[%s1102_s1 + $0x3b] sm:$0x2] %vm7_vm0, %v341_v60  }
  0xb4   :  { %500 = vst.msk [vmem:[%s1102_s1 + $0x5a] sm:$0x4] %vm7_vm0, %v341_v60   ;;  %501 = vst.msk [vmem:[%s1102_s1 + $0x79] sm:$0x8] %vm7_vm0, %v341_v60   ;;  %v353_v61 = vpop.permute.xlu0 %352  }
  0xb5   :  { %v365_v62 = vpop.permute.xlu1 %364   ;;  %502 = vst.msk [vmem:[%s1102_s1 + $0x1d] sm:$0x1] %vm7_vm0, %v353_v61   ;;  %503 = vst.msk [vmem:[%s1102_s1 + $0x3c] sm:$0x2] %vm7_vm0, %v353_v61  }
  0xb6   :  { %504 = vst.msk [vmem:[%s1102_s1 + $0x5b] sm:$0x4] %vm7_vm0, %v353_v61   ;;  %505 = vst.msk [vmem:[%s1102_s1 + $0x7a] sm:$0x8] %vm7_vm0, %v353_v61  }
  0xb7   :  { %506 = vst.msk [vmem:[%s1102_s1 + $0x1e] sm:$0x1] %vm7_vm0, %v365_v62   ;;  %507 = vst.msk [vmem:[%s1102_s1 + $0x3d] sm:$0x2] %vm7_vm0, %v365_v62  }
  0xb8   :  { %508 = vst.msk [vmem:[%s1102_s1 + $0x5c] sm:$0x4] %vm7_vm0, %v365_v62   ;;  %509 = vst.msk [vmem:[%s1102_s1 + $0x7b] sm:$0x8] %vm7_vm0, %v365_v62   ;;  %v377_v63 = vpop.permute.xlu0 %376  }
  0xb9   :  { %510 = vst.msk [vmem:[%s1102_s1 + $0x1f] sm:$0x1] %vm7_vm0, %v377_v63   ;;  %511 = vst.msk [vmem:[%s1102_s1 + $0x3e] sm:$0x2] %vm7_vm0, %v377_v63  }
  0xba   :  { %512 = vst.msk [vmem:[%s1102_s1 + $0x5d] sm:$0x4] %vm7_vm0, %v377_v63   ;;  %513 = vst.msk [vmem:[%s1102_s1 + $0x7c] sm:$0x8] %vm7_vm0, %v377_v63  }

// kernel: tile.1
= control target key start
LH: loop header
LB: loop body
LE: loop exit
PB: predicated region body
PF: predicated region fallthrough
CT: control target
= control target key end

     0   :  { %s528_s8 = smov 125   ;;  %s529_s9 = smov 126   ;;  %vm7_vm0 = vcmask 7168   ;;  %s971_s0 = inlined_call_operand.vmem [shape: f32[4,48], index: 0, kind: input, shape index: {}]   ;;  %s972_s1 = inlined_call_operand.vmem [shape: f32[192,1], index: 1, kind: output, shape index: {}]  }
   0x1   :  { %v4_v0 = vld [vmem:[%s971_s0] sm:$0xf]  ;;  %s527_s0 = smov 127   ;;  %s530_s10 = smov 124  }
   0x2   :  { %5 = vst [vmem:[#allocation0] sm:$0xf] %v4_v0  ;;  %s531_s11 = smov 123   ;;  %s532_s12 = smov 122  }
   0x3   :  { %s533_s13 = smov 121   ;;  %s534_s14 = smov 120  }
   0x4   :  { %s535_s15 = smov 119   ;;  %s536_s16 = smov 118  }
   0x5   :  { %s537_s17 = smov 117   ;;  %s538_s18 = smov 116  }
   0x6   :  { %s539_s19 = smov 115   ;;  %s540_s20 = smov 114  }
   0x7   :  { %s541_s21 = smov 113   ;;  %s542_s22 = smov 112  }
   0x8   :  { %s543_s23 = smov 111   ;;  %s544_s24 = smov 110  }
   0x9   :  { %v10_v1 = vld [vmem:[#allocation0] sm:$0xf]   ;;  %s545_s25 = smov 109   ;;  %s546_s26 = smov 108  }
   0xa   :  { %v26_v2 = vld [vmem:[#allocation0] sm:$0xf]   ;;  %11 = vrot.lane.b32.xlu0 %v10_v1, %s527_s0  ;;  %s547_s27 = smov 107   ;;  %s548_s28 = smov 106  }
   0xb   :  { %27 = vrot.lane.b32.xlu1 %v26_v2, %s528_s8  ;;  %v18_v3 = vld [vmem:[#allocation0] sm:$0xf]   ;;  %s549_s29 = smov 105   ;;  %s550_s30 = smov 104  }
   0xc   :  { %v34_v4 = vld [vmem:[#allocation0] sm:$0xf]   ;;  %s551_s2 = smov 103   ;;  %s552_s3 = smov 102  }
   0xd   :  { %v42_v5 = vld [vmem:[#allocation0] sm:$0xf]   ;;  %s553_s4 = smov 101   ;;  %s554_s5 = smov 100  }
   0xe   :  { %19 = vrot.lane.b32.xlu0 %v18_v3, %s529_s9  ;;  %v50_v6 = vld [vmem:[#allocation0] sm:$0xf]   ;;  %s555_s6 = smov 99   ;;  %s556_s7 = smov 98  }
   0xf   :  { %35 = vrot.lane.b32.xlu1 %v34_v4, %s530_s10  ;;  %v58_v7 = vld [vmem:[#allocation0] sm:$0xf]   ;;  %s557_s0 = smov 97   ;;  %s558_s8 = smov 96  }
  0x10   :  { %v66_v8 = vld [vmem:[#allocation0] sm:$0xf]   ;;  %s559_s9 = smov 95   ;;  %s560_s10 = smov 94  }
  0x11   :  { %v74_v9 = vld [vmem:[#allocation0] sm:$0xf]  }
  0x12   :  { %43 = vrot.lane.b32.xlu0 %v42_v5, %s531_s11  ;;  %v82_v10 = vld [vmem:[#allocation0] sm:$0xf]   ;;  %s561_s11 = smov 93  }
  0x13   :  { %51 = vrot.lane.b32.xlu1 %v50_v6, %s532_s12  ;;  %v90_v11 = vld [vmem:[#allocation0] sm:$0xf]   ;;  %s562_s12 = smov 92  }
  0x14   :  { %v98_v12 = vld [vmem:[#allocation0] sm:$0xf]  }
  0x15   :  { %v106_v13 = vld [vmem:[#allocation0] sm:$0xf]  }
  0x16   :  { %59 = vrot.lane.b32.xlu0 %v58_v7, %s533_s13  ;;  %v114_v14 = vld [vmem:[#allocation0] sm:$0xf]   ;;  %s563_s13 = smov 91  }
  0x17   :  { %67 = vrot.lane.b32.xlu1 %v66_v8, %s534_s14  ;;  %v122_v15 = vld [vmem:[#allocation0] sm:$0xf]   ;;  %s564_s14 = smov 90  }
  0x18   :  { %v130_v16 = vld.sshfl [vmem:[#allocation0] sm:$0xff pattern:$0x22222301]  }
  0x19   :  { %v258_v17 = vld [vmem:[#allocation0] sm:$0xf]  }
  0x1a   :  { %75 = vrot.lane.b32.xlu0 %v74_v9, %s535_s15  ;;  %v266_v18 = vld [vmem:[#allocation0] sm:$0xf]   ;;  %s565_s15 = smov 89  }
  0x1b   :  { %83 = vrot.lane.b32.xlu1 %v82_v10, %s536_s16  ;;  %v274_v19 = vld [vmem:[#allocation0] sm:$0xf]   ;;  %s566_s16 = smov 88  }
  0x1c   :  { %v282_v20 = vld [vmem:[#allocation0] sm:$0xf]  }
  0x1d   :  { %v290_v21 = vld [vmem:[#allocation0] sm:$0xf]  }
  0x1e   :  { %91 = vrot.lane.b32.xlu0 %v90_v11, %s537_s17  ;;  %v298_v22 = vld [vmem:[#allocation0] sm:$0xf]  }
  0x1f   :  { %99 = vrot.lane.b32.xlu1 %v98_v12, %s538_s18  ;;  %v306_v23 = vld [vmem:[#allocation0] sm:$0xf]  }
  0x20   :  { %v314_v24 = vld [vmem:[#allocation0] sm:$0xf]  }
  0x21   :  { %v322_v25 = vld [vmem:[#allocation0] sm:$0xf]  }
  0x22   :  { %107 = vrot.lane.b32.xlu0 %v106_v13, %s539_s19  ;;  %v330_v26 = vld [vmem:[#allocation0] sm:$0xf]  }
  0x23   :  { %115 = vrot.lane.b32.xlu1 %v114_v14, %s540_s20  ;;  %v338_v27 = vld [vmem:[#allocation0] sm:$0xf]  }
  0x24   :  { %v6_v28 = vld [vmem:[#allocation0] sm:$0xf]  }
  0x25   :  { %8 = vst.msk [vmem:[%s972_s1] ss:$48 sm:$0x3] %vm7_vm0, %v6_v28   ;;  %9 = vst.msk [vmem:[%s972_s1] ss:$48 sm:$0xc] %vm7_vm0, %v6_v28  }
  0x26   :  { %123 = vrot.lane.b32.xlu0 %v122_v15, %s541_s21  ;;  %s567_s21 = smov 87   ;;  %v346_v29 = vld [vmem:[#allocation0] sm:$0xf]  }
  0x27   :  { %131 = vrot.lane.b32.xlu1 %v130_v16, %s542_s22  ;;  %s568_s22 = smov 86   ;;  %v354_v30 = vld [vmem:[#allocation0] sm:$0xf]  }
  0x28   :  { %v362_v31 = vld [vmem:[#allocation0] sm:$0xf]  }
  0x29   :  { %v370_v32 = vld [vmem:[#allocation0] sm:$0xf]  }
  0x2a   :  { %139 = vrot.lane.b32.xlu0 %v130_v16, %s543_s23  ;;  %s569_s23 = smov 85   ;;  %v378_v33 = vld [vmem:[#allocation0] sm:$0xf]  }
  0x2b   :  { %147 = vrot.lane.b32.xlu1 %v130_v16, %s544_s24  ;;  %s570_s24 = smov 84  }
  0x2e   :  { %155 = vrot.lane.b32.xlu0 %v130_v16, %s545_s25  ;;  %s571_s25 = smov 83  }
  0x2f   :  { %163 = vrot.lane.b32.xlu1 %v130_v16, %s546_s26  ;;  %s572_s26 = smov 82  }
  0x32   :  { %171 = vrot.lane.b32.xlu0 %v130_v16, %s547_s27  ;;  %s573_s27 = smov 81  }
  0x33   :  { %179 = vrot.lane.b32.xlu1 %v130_v16, %s548_s28 }
  0x36   :  { %187 = vrot.lane.b32.xlu0 %v130_v16, %s549_s29 }
  0x37   :  { %195 = vrot.lane.b32.xlu1 %v130_v16, %s550_s30 }
  0x3a   :  { %203 = vrot.lane.b32.xlu0 %v130_v16, %s551_s2 }
  0x3b   :  { %211 = vrot.lane.b32.xlu1 %v130_v16, %s552_s3 }
  0x3e   :  { %219 = vrot.lane.b32.xlu0 %v130_v16, %s553_s4 }
  0x3f   :  { %227 = vrot.lane.b32.xlu1 %v130_v16, %s554_s5 }
  0x42   :  { %235 = vrot.lane.b32.xlu0 %v130_v16, %s555_s6 }
  0x43   :  { %243 = vrot.lane.b32.xlu1 %v130_v16, %s556_s7 }
  0x46   :  { %251 = vrot.lane.b32.xlu0 %v130_v16, %s557_s0 }
  0x47   :  { %259 = vrot.lane.b32.xlu1 %v258_v17, %s558_s8 }
  0x4a   :  { %267 = vrot.lane.b32.xlu0 %v266_v18, %s559_s9 }
  0x4b   :  { %275 = vrot.lane.b32.xlu1 %v274_v19, %s560_s10 }
  0x4e   :  { %283 = vrot.lane.b32.xlu0 %v282_v20, %s561_s11 }
  0x4f   :  { %291 = vrot.lane.b32.xlu1 %v290_v21, %s562_s12 }
  0x52   :  { %299 = vrot.lane.b32.xlu0 %v298_v22, %s563_s13 }
  0x53   :  { %307 = vrot.lane.b32.xlu1 %v306_v23, %s564_s14 }
  0x56   :  { %315 = vrot.lane.b32.xlu0 %v314_v24, %s565_s15 }
  0x57   :  { %323 = vrot.lane.b32.xlu1 %v322_v25, %s566_s16 }
  0x5a   :  { %331 = vrot.lane.b32.xlu0 %v330_v26, %s567_s21 }
  0x5b   :  { %339 = vrot.lane.b32.xlu1 %v338_v27, %s568_s22 }
  0x5e   :  { %347 = vrot.lane.b32.xlu0 %v346_v29, %s569_s23 }
  0x5f   :  { %355 = vrot.lane.b32.xlu1 %v354_v30, %s570_s24 }
  0x62   :  { %363 = vrot.lane.b32.xlu0 %v362_v31, %s571_s25 }
  0x63   :  { %371 = vrot.lane.b32.xlu1 %v370_v32, %s572_s26 }
  0x66   :  { %379 = vrot.lane.b32.xlu0 %v378_v33, %s573_s27 }
  0x7c   :  { %v12_v34 = vpop.permute.xlu0 %11  }
  0x7d   :  { %v28_v35 = vpop.permute.xlu1 %27   ;;  %386 = vst.msk [vmem:[%s972_s1 + $0x1] ss:$48 sm:$0x3] %vm7_vm0, %v12_v34   ;;  %387 = vst.msk [vmem:[%s972_s1 + $0x1] ss:$48 sm:$0xc] %vm7_vm0, %v12_v34  }
  0x7e   :  { %390 = vst.msk [vmem:[%s972_s1 + $0x3] ss:$48 sm:$0x3] %vm7_vm0, %v28_v35   ;;  %391 = vst.msk [vmem:[%s972_s1 + $0x3] ss:$48 sm:$0xc] %vm7_vm0, %v28_v35  }
  0x80   :  { %v20_v36 = vpop.permute.xlu0 %19  }
  0x81   :  { %v36_v37 = vpop.permute.xlu1 %35   ;;  %388 = vst.msk [vmem:[%s972_s1 + $0x2] ss:$48 sm:$0x3] %vm7_vm0, %v20_v36   ;;  %389 = vst.msk [vmem:[%s972_s1 + $0x2] ss:$48 sm:$0xc] %vm7_vm0, %v20_v36  }
  0x82   :  { %392 = vst.msk [vmem:[%s972_s1 + $0x4] ss:$48 sm:$0x3] %vm7_vm0, %v36_v37   ;;  %393 = vst.msk [vmem:[%s972_s1 + $0x4] ss:$48 sm:$0xc] %vm7_vm0, %v36_v37  }
  0x84   :  { %v44_v38 = vpop.permute.xlu0 %43  }
  0x85   :  { %v52_v39 = vpop.permute.xlu1 %51   ;;  %394 = vst.msk [vmem:[%s972_s1 + $0x5] ss:$48 sm:$0x3] %vm7_vm0, %v44_v38   ;;  %395 = vst.msk [vmem:[%s972_s1 + $0x5] ss:$48 sm:$0xc] %vm7_vm0, %v44_v38  }
  0x86   :  { %396 = vst.msk [vmem:[%s972_s1 + $0x6] ss:$48 sm:$0x3] %vm7_vm0, %v52_v39   ;;  %397 = vst.msk [vmem:[%s972_s1 + $0x6] ss:$48 sm:$0xc] %vm7_vm0, %v52_v39  }
  0x88   :  { %v60_v40 = vpop.permute.xlu0 %59  }
  0x89   :  { %v68_v41 = vpop.permute.xlu1 %67   ;;  %398 = vst.msk [vmem:[%s972_s1 + $0x7] ss:$48 sm:$0x3] %vm7_vm0, %v60_v40   ;;  %399 = vst.msk [vmem:[%s972_s1 + $0x7] ss:$48 sm:$0xc] %vm7_vm0, %v60_v40  }
  0x8a   :  { %400 = vst.msk [vmem:[%s972_s1 + $0x8] ss:$48 sm:$0x3] %vm7_vm0, %v68_v41   ;;  %401 = vst.msk [vmem:[%s972_s1 + $0x8] ss:$48 sm:$0xc] %vm7_vm0, %v68_v41  }
  0x8c   :  { %v76_v42 = vpop.permute.xlu0 %75  }
  0x8d   :  { %v84_v43 = vpop.permute.xlu1 %83   ;;  %402 = vst.msk [vmem:[%s972_s1 + $0x9] ss:$48 sm:$0x3] %vm7_vm0, %v76_v42   ;;  %403 = vst.msk [vmem:[%s972_s1 + $0x9] ss:$48 sm:$0xc] %vm7_vm0, %v76_v42  }
  0x8e   :  { %404 = vst.msk [vmem:[%s972_s1 + $0xa] ss:$48 sm:$0x3] %vm7_vm0, %v84_v43   ;;  %405 = vst.msk [vmem:[%s972_s1 + $0xa] ss:$48 sm:$0xc] %vm7_vm0, %v84_v43  }
  0x90   :  { %v92_v44 = vpop.permute.xlu0 %91  }
  0x91   :  { %v100_v45 = vpop.permute.xlu1 %99   ;;  %406 = vst.msk [vmem:[%s972_s1 + $0xb] ss:$48 sm:$0x3] %vm7_vm0, %v92_v44   ;;  %407 = vst.msk [vmem:[%s972_s1 + $0xb] ss:$48 sm:$0xc] %vm7_vm0, %v92_v44  }
  0x92   :  { %408 = vst.msk [vmem:[%s972_s1 + $0xc] ss:$48 sm:$0x3] %vm7_vm0, %v100_v45   ;;  %409 = vst.msk [vmem:[%s972_s1 + $0xc] ss:$48 sm:$0xc] %vm7_vm0, %v100_v45  }
  0x94   :  { %v108_v46 = vpop.permute.xlu0 %107  }
  0x95   :  { %v116_v47 = vpop.permute.xlu1 %115   ;;  %410 = vst.msk [vmem:[%s972_s1 + $0xd] ss:$48 sm:$0x3] %vm7_vm0, %v108_v46   ;;  %411 = vst.msk [vmem:[%s972_s1 + $0xd] ss:$48 sm:$0xc] %vm7_vm0, %v108_v46  }
  0x96   :  { %412 = vst.msk [vmem:[%s972_s1 + $0xe] ss:$48 sm:$0x3] %vm7_vm0, %v116_v47   ;;  %413 = vst.msk [vmem:[%s972_s1 + $0xe] ss:$48 sm:$0xc] %vm7_vm0, %v116_v47  }
  0x98   :  { %v124_v48 = vpop.permute.xlu0 %123  }
  0x99   :  { %v132_v49 = vpop.permute.xlu1 %131   ;;  %414 = vst.msk [vmem:[%s972_s1 + $0xf] ss:$48 sm:$0x3] %vm7_vm0, %v124_v48   ;;  %415 = vst.msk [vmem:[%s972_s1 + $0xf] ss:$48 sm:$0xc] %vm7_vm0, %v124_v48  }
  0x9a   :  { %416 = vst.msk [vmem:[%s972_s1 + $0x40] ss:$-48 sm:$0x3] %vm7_vm0, %v132_v49   ;;  %417 = vst.msk [vmem:[%s972_s1 + $0x100] ss:$-48 sm:$0xc] %vm7_vm0, %v132_v49  }
  0x9c   :  { %v140_v50 = vpop.permute.xlu0 %139  }
  0x9d   :  { %v148_v51 = vpop.permute.xlu1 %147   ;;  %418 = vst.msk [vmem:[%s972_s1 + $0x41] ss:$-48 sm:$0x3] %vm7_vm0, %v140_v50   ;;  %419 = vst.msk [vmem:[%s972_s1 + $0x101] ss:$-48 sm:$0xc] %vm7_vm0, %v140_v50  }
  0x9e   :  { %420 = vst.msk [vmem:[%s972_s1 + $0x42] ss:$-48 sm:$0x3] %vm7_vm0, %v148_v51   ;;  %421 = vst.msk [vmem:[%s972_s1 + $0x102] ss:$-48 sm:$0xc] %vm7_vm0, %v148_v51  }
  0xa0   :  { %v156_v52 = vpop.permute.xlu0 %155  }
  0xa1   :  { %v164_v53 = vpop.permute.xlu1 %163   ;;  %422 = vst.msk [vmem:[%s972_s1 + $0x43] ss:$-48 sm:$0x3] %vm7_vm0, %v156_v52   ;;  %423 = vst.msk [vmem:[%s972_s1 + $0x103] ss:$-48 sm:$0xc] %vm7_vm0, %v156_v52  }
  0xa2   :  { %424 = vst.msk [vmem:[%s972_s1 + $0x44] ss:$-48 sm:$0x3] %vm7_vm0, %v164_v53   ;;  %425 = vst.msk [vmem:[%s972_s1 + $0x104] ss:$-48 sm:$0xc] %vm7_vm0, %v164_v53  }
  0xa4   :  { %v172_v54 = vpop.permute.xlu0 %171  }
  0xa5   :  { %v180_v55 = vpop.permute.xlu1 %179   ;;  %426 = vst.msk [vmem:[%s972_s1 + $0x45] ss:$-48 sm:$0x3] %vm7_vm0, %v172_v54   ;;  %427 = vst.msk [vmem:[%s972_s1 + $0x105] ss:$-48 sm:$0xc] %vm7_vm0, %v172_v54  }
  0xa6   :  { %428 = vst.msk [vmem:[%s972_s1 + $0x46] ss:$-48 sm:$0x3] %vm7_vm0, %v180_v55   ;;  %429 = vst.msk [vmem:[%s972_s1 + $0x106] ss:$-48 sm:$0xc] %vm7_vm0, %v180_v55  }
  0xa8   :  { %v188_v56 = vpop.permute.xlu0 %187  }
  0xa9   :  { %v196_v57 = vpop.permute.xlu1 %195   ;;  %430 = vst.msk [vmem:[%s972_s1 + $0x47] ss:$-48 sm:$0x3] %vm7_vm0, %v188_v56   ;;  %431 = vst.msk [vmem:[%s972_s1 + $0x107] ss:$-48 sm:$0xc] %vm7_vm0, %v188_v56  }
  0xaa   :  { %432 = vst.msk [vmem:[%s972_s1 + $0x48] ss:$-48 sm:$0x3] %vm7_vm0, %v196_v57   ;;  %433 = vst.msk [vmem:[%s972_s1 + $0x108] ss:$-48 sm:$0xc] %vm7_vm0, %v196_v57  }
  0xac   :  { %v204_v58 = vpop.permute.xlu0 %203  }
  0xad   :  { %v212_v59 = vpop.permute.xlu1 %211   ;;  %434 = vst.msk [vmem:[%s972_s1 + $0x49] ss:$-48 sm:$0x3] %vm7_vm0, %v204_v58   ;;  %435 = vst.msk [vmem:[%s972_s1 + $0x109] ss:$-48 sm:$0xc] %vm7_vm0, %v204_v58  }
  0xae   :  { %436 = vst.msk [vmem:[%s972_s1 + $0x4a] ss:$-48 sm:$0x3] %vm7_vm0, %v212_v59   ;;  %437 = vst.msk [vmem:[%s972_s1 + $0x10a] ss:$-48 sm:$0xc] %vm7_vm0, %v212_v59  }
  0xb0   :  { %v220_v60 = vpop.permute.xlu0 %219  }
  0xb1   :  { %v228_v61 = vpop.permute.xlu1 %227   ;;  %438 = vst.msk [vmem:[%s972_s1 + $0x4b] ss:$-48 sm:$0x3] %vm7_vm0, %v220_v60   ;;  %439 = vst.msk [vmem:[%s972_s1 + $0x10b] ss:$-48 sm:$0xc] %vm7_vm0, %v220_v60  }
  0xb2   :  { %440 = vst.msk [vmem:[%s972_s1 + $0x4c] ss:$-48 sm:$0x3] %vm7_vm0, %v228_v61   ;;  %441 = vst.msk [vmem:[%s972_s1 + $0x10c] ss:$-48 sm:$0xc] %vm7_vm0, %v228_v61  }
  0xb4   :  { %v236_v62 = vpop.permute.xlu0 %235  }
  0xb5   :  { %v244_v63 = vpop.permute.xlu1 %243   ;;  %442 = vst.msk [vmem:[%s972_s1 + $0x4d] ss:$-48 sm:$0x3] %vm7_vm0, %v236_v62   ;;  %443 = vst.msk [vmem:[%s972_s1 + $0x10d] ss:$-48 sm:$0xc] %vm7_vm0, %v236_v62  }
  0xb6   :  { %444 = vst.msk [vmem:[%s972_s1 + $0x4e] ss:$-48 sm:$0x3] %vm7_vm0, %v244_v63   ;;  %445 = vst.msk [vmem:[%s972_s1 + $0x10e] ss:$-48 sm:$0xc] %vm7_vm0, %v244_v63  }
  0xb8   :  { %v252_v0 = vpop.permute.xlu0 %251  }
  0xb9   :  { %v260_v1 = vpop.permute.xlu1 %259   ;;  %446 = vst.msk [vmem:[%s972_s1 + $0x4f] ss:$-48 sm:$0x3] %vm7_vm0, %v252_v0   ;;  %447 = vst.msk [vmem:[%s972_s1 + $0x10f] ss:$-48 sm:$0xc] %vm7_vm0, %v252_v0  }
  0xba   :  { %448 = vst.msk [vmem:[%s972_s1 + $0x20] ss:$48 sm:$0x3] %vm7_vm0, %v260_v1   ;;  %449 = vst.msk [vmem:[%s972_s1 + $0x20] ss:$48 sm:$0xc] %vm7_vm0, %v260_v1  }
  0xbc   :  { %v268_v2 = vpop.permute.xlu0 %267  }
  0xbd   :  { %v276_v3 = vpop.permute.xlu1 %275   ;;  %450 = vst.msk [vmem:[%s972_s1 + $0x21] ss:$48 sm:$0x3] %vm7_vm0, %v268_v2   ;;  %451 = vst.msk [vmem:[%s972_s1 + $0x21] ss:$48 sm:$0xc] %vm7_vm0, %v268_v2  }
  0xbe   :  { %452 = vst.msk [vmem:[%s972_s1 + $0x22] ss:$48 sm:$0x3] %vm7_vm0, %v276_v3   ;;  %453 = vst.msk [vmem:[%s972_s1 + $0x22] ss:$48 sm:$0xc] %vm7_vm0, %v276_v3  }
  0xc0   :  { %v284_v4 = vpop.permute.xlu0 %283  }
  0xc1   :  { %v292_v5 = vpop.permute.xlu1 %291   ;;  %454 = vst.msk [vmem:[%s972_s1 + $0x23] ss:$48 sm:$0x3] %vm7_vm0, %v284_v4   ;;  %455 = vst.msk [vmem:[%s972_s1 + $0x23] ss:$48 sm:$0xc] %vm7_vm0, %v284_v4  }
  0xc2   :  { %456 = vst.msk [vmem:[%s972_s1 + $0x24] ss:$48 sm:$0x3] %vm7_vm0, %v292_v5   ;;  %457 = vst.msk [vmem:[%s972_s1 + $0x24] ss:$48 sm:$0xc] %vm7_vm0, %v292_v5  }
  0xc4   :  { %v300_v6 = vpop.permute.xlu0 %299  }
  0xc5   :  { %v308_v7 = vpop.permute.xlu1 %307   ;;  %458 = vst.msk [vmem:[%s972_s1 + $0x25] ss:$48 sm:$0x3] %vm7_vm0, %v300_v6   ;;  %459 = vst.msk [vmem:[%s972_s1 + $0x25] ss:$48 sm:$0xc] %vm7_vm0, %v300_v6  }
  0xc6   :  { %460 = vst.msk [vmem:[%s972_s1 + $0x26] ss:$48 sm:$0x3] %vm7_vm0, %v308_v7   ;;  %461 = vst.msk [vmem:[%s972_s1 + $0x26] ss:$48 sm:$0xc] %vm7_vm0, %v308_v7  }
  0xc8   :  { %v316_v8 = vpop.permute.xlu0 %315  }
  0xc9   :  { %v324_v9 = vpop.permute.xlu1 %323   ;;  %462 = vst.msk [vmem:[%s972_s1 + $0x27] ss:$48 sm:$0x3] %vm7_vm0, %v316_v8   ;;  %463 = vst.msk [vmem:[%s972_s1 + $0x27] ss:$48 sm:$0xc] %vm7_vm0, %v316_v8  }
  0xca   :  { %464 = vst.msk [vmem:[%s972_s1 + $0x28] ss:$48 sm:$0x3] %vm7_vm0, %v324_v9   ;;  %465 = vst.msk [vmem:[%s972_s1 + $0x28] ss:$48 sm:$0xc] %vm7_vm0, %v324_v9  }
  0xcc   :  { %v332_v10 = vpop.permute.xlu0 %331  }
  0xcd   :  { %v340_v11 = vpop.permute.xlu1 %339   ;;  %466 = vst.msk [vmem:[%s972_s1 + $0x29] ss:$48 sm:$0x3] %vm7_vm0, %v332_v10   ;;  %467 = vst.msk [vmem:[%s972_s1 + $0x29] ss:$48 sm:$0xc] %vm7_vm0, %v332_v10  }
  0xce   :  { %468 = vst.msk [vmem:[%s972_s1 + $0x2a] ss:$48 sm:$0x3] %vm7_vm0, %v340_v11   ;;  %469 = vst.msk [vmem:[%s972_s1 + $0x2a] ss:$48 sm:$0xc] %vm7_vm0, %v340_v11  }
  0xd0   :  { %v348_v12 = vpop.permute.xlu0 %347  }
  0xd1   :  { %v356_v13 = vpop.permute.xlu1 %355   ;;  %470 = vst.msk [vmem:[%s972_s1 + $0x2b] ss:$48 sm:$0x3] %vm7_vm0, %v348_v12   ;;  %471 = vst.msk [vmem:[%s972_s1 + $0x2b] ss:$48 sm:$0xc] %vm7_vm0, %v348_v12  }
  0xd2   :  { %472 = vst.msk [vmem:[%s972_s1 + $0x2c] ss:$48 sm:$0x3] %vm7_vm0, %v356_v13   ;;  %473 = vst.msk [vmem:[%s972_s1 + $0x2c] ss:$48 sm:$0xc] %vm7_vm0, %v356_v13  }
  0xd4   :  { %v364_v14 = vpop.permute.xlu0 %363  }
  0xd5   :  { %v372_v15 = vpop.permute.xlu1 %371   ;;  %474 = vst.msk [vmem:[%s972_s1 + $0x2d] ss:$48 sm:$0x3] %vm7_vm0, %v364_v14   ;;  %475 = vst.msk [vmem:[%s972_s1 + $0x2d] ss:$48 sm:$0xc] %vm7_vm0, %v364_v14  }
  0xd6   :  { %476 = vst.msk [vmem:[%s972_s1 + $0x2e] ss:$48 sm:$0x3] %vm7_vm0, %v372_v15   ;;  %477 = vst.msk [vmem:[%s972_s1 + $0x2e] ss:$48 sm:$0xc] %vm7_vm0, %v372_v15  }
  0xd8   :  { %v380_v16 = vpop.permute.xlu0 %379  }
  0xd9   :  { %478 = vst.msk [vmem:[%s972_s1 + $0x2f] ss:$48 sm:$0x3] %vm7_vm0, %v380_v16   ;;  %479 = vst.msk [vmem:[%s972_s1 + $0x2f] ss:$48 sm:$0xc] %vm7_vm0, %v380_v16  }

// kernel: forward.9
= control target key start
LH: loop header
LB: loop body
LE: loop exit
PB: predicated region body
PF: predicated region fallthrough
CT: control target
= control target key end

     0   :  { %vm61_vm0 = vcmask 1042432   ;;  %v348_v1 = vmov 0.0   ;;  %v349_v3 = vmov 0   ;;  %vm350_vm1 = vmmov 1   ;;  %s416_s0 = inlined_call_operand.vmem [shape: bf16[27,512], index: 0, kind: input, shape index: {}]   ;;  %s417_s1 = inlined_call_operand.vmem [shape: bf16[16,27], index: 1, kind: input, shape index: {}]   ;;  %s418_s2 = inlined_call_operand.vmem [shape: f32[16,1], index: 2, kind: input, shape index: {}]   ;;  %s419_s3 = inlined_call_operand.vmem [shape: bf16[16,512], index: 3, kind: output, shape index: {}]  }
   0x1   :  { %v336_v0 = vld [vmem:[%s416_s0 + $0x4] ss:$16 sps:$4 sm:$0xff]   ;;  %138 = vmatprep.mubr.f32.mxu0 %v348_v1  ;;  %215 = vmatprep.mubr.f32.mxu1 %v348_v1  ;;  %v338_v2 = vld [vmem:[%s416_s0 + $0xc] ss:$16 sps:$4 sm:$0xff]   ;;  %v340_v4 = vld [vmem:[%s416_s0] ss:$16 sps:$4 sm:$0xff]  }
   0x2   :  { %335 = vset.pattern.permute.xlu0 %v349_v3  ;;  %305 = vmatprep.subr.bf16.mxu0 %v336_v0  ;;  %v341_v5 = vld [vmem:[%s416_s0 + $0x8] ss:$16 sps:$4 sm:$0xff]   ;;  %v342_v6 = vld [vmem:[%s416_s0 + $0x24] ss:$16 sps:$4 sm:$0x3f]   ;;  %vm309_vm2 = vmpackc.low %vm61_vm0, %vm350_vm1  ;;  %vm54_vm3 = vcmask 220160  }
   0x3   :  { %315 = vmatprep.subr.bf16.mxu1 %v338_v2  ;;  %307 = vmatpush1.bf16.msra.mxu0 %v340_v4  ;;  %v344_v7 = vld [vmem:[%s416_s0 + $0x2c] ss:$16 sps:$4 sm:$0x3f]   ;;  %v346_v8 = vld [vmem:[%s416_s0 + $0x20] ss:$16 sps:$4 sm:$0x3f]  }
   0x4   :  { %317 = vmatpush1.bf16.msra.mxu1 %v341_v5  ;;  %310 = vmatprep.subr.msk.bf16.mxu0 %vm309_vm2, %v342_v6  ;;  %v347_v9 = vld [vmem:[%s416_s0 + $0x28] ss:$16 sps:$4 sm:$0x3f]   ;;  %v301_v10 = vld [vmem:[%s417_s1] sm:$0xff]  }
   0x5   :  { %320 = vmatprep.subr.msk.bf16.mxu1 %vm309_vm2, %v344_v7  ;;  %v42_v11 = vld [vmem:[%s418_s2] sm:$0xff]  ;;  %v302_v12 = vunpack.c.l.bf16 %v301_v10  ;;  %v43_v13 = vld [vmem:[%s418_s2 + $0x8] sm:$0xff]  ;;  %v303_v14 = vunpack.c.h.bf16 %v301_v10 }
   0x6   :  { %46 = vperm.xlu0 %335, %v42_v11  }
   0x7   :  { %313 = vmatpush1.bf16.msk.msra.mxu0 %vm309_vm2, %v346_v8 }
   0x8   :  { %323 = vmatpush1.bf16.msk.msra.mxu1 %vm309_vm2, %v347_v9 }
   0xa   :  { %286 = vmatmul.mubr.msk.f32.vlgmr.msra.gmra.mrb[0].mxu0 %vm54_vm3, %v302_v12  ;;  %51 = vperm.xlu0 %335, %v43_v13  }
   0xb   :  { %290 = vmatmul.mubr.msk.f32.vlgmr.msra.gmra.mrb[0].mxu1 %vm54_vm3, %v302_v12  ;;  %144 = vmatprep.mubr.f32.mxu0 %v348_v1 }
   0xc   :  { %221 = vmatprep.mubr.f32.mxu1 %v348_v1 }
   0xe   :  { %287 = vmatmul.mubr.msk.f32.gmra.mrb[2].mxu0 %vm54_vm3, %v303_v14 }
   0xf   :  { %291 = vmatmul.mubr.msk.f32.gmra.mrb[2].mxu1 %vm54_vm3, %v303_v14 }
  0x85   :  { %v47_v15 = vpop.permute.xlu0 %46 }
  0x89   :  { %v52_v26 = vpop.permute.xlu0 %51 }
  0xdd   :  { %v140_v16 = vpop.f32.mrb[0].mxu0 }
  0xde   :  { %v217_v17 = vpop.f32.mrb[0].mxu1  ;;  %v141_v18 = vadd.f32 %v140_v16, %v47_v15  ;;  %v142_v20 = vpop.f32.mrb[1].mxu0 }
  0xdf   :  { %v218_v19 = vadd.f32 %v217_v17, %v47_v15  ;;  %v219_v21 = vpop.f32.mrb[1].mxu1  ;;  %v143_v22 = vadd.f32 %v142_v20, %v47_v15 }
  0xe0   :  { %v220_v23 = vadd.f32 %v219_v21, %v47_v15  ;;  %vm228_vm4 = vcmp.gt.f32.partialorder %v141_v18, 0.0  ;;  %v236_v24 = vmul.f32 0.1, %v141_v18 }
  0xe1   :  { %vm230_vm5 = vcmp.gt.f32.partialorder %v218_v19, 0.0  ;;  %v238_v25 = vmul.f32 0.1, %v218_v19  ;;  %vm229_vm6 = vcmp.gt.f32.partialorder %v143_v22, 0.0  ;;  %v237_v27 = vmul.f32 0.1, %v143_v22 }
  0xe2   :  { %vm231_vm7 = vcmp.gt.f32.partialorder %v220_v23, 0.0  ;;  %v239_v28 = vmul.f32 0.1, %v220_v23  ;;  %v244_v29 = vsel %vm228_vm4, %v141_v18, %v236_v24  ;;  %v146_v31 = vpop.f32.mrb[2].mxu0  ;;  %v223_v32 = vpop.f32.mrb[2].mxu1 }
  0xe3   :  { %v246_v30 = vsel %vm230_vm5, %v218_v19, %v238_v25  ;;  %v245_v33 = vsel %vm229_vm6, %v143_v22, %v237_v27  ;;  %v147_v35 = vadd.f32 %v146_v31, %v52_v26  ;;  %v224_v36 = vadd.f32 %v223_v32, %v52_v26  ;;  %v148_v37 = vpop.f32.mrb[3].mxu0  ;;  %v225_v38 = vpop.f32.mrb[3].mxu1 }
  0xe4   :  { %v247_v34 = vsel %vm231_vm7, %v220_v23, %v239_v28  ;;  %v296_v39 = vpack.c.bf16 %v245_v33, %v244_v29  ;;  %v149_v41 = vadd.f32 %v148_v37, %v52_v26  ;;  %v226_v42 = vadd.f32 %v225_v38, %v52_v26 }
  0xe5   :  { %v297_v40 = vpack.c.bf16 %v247_v34, %v246_v30  ;;  %vm232_vm8 = vcmp.gt.f32.partialorder %v147_v35, 0.0  ;;  %v240_v43 = vmul.f32 0.1, %v147_v35  ;;  %vm234_vm9 = vcmp.gt.f32.partialorder %v224_v36, 0.0 }
  0xe6   :  { %v242_v44 = vmul.f32 0.1, %v224_v36  ;;  %276 = vst [vmem:[%s419_s3] sm:$0xff] %v296_v39  ;;  %vm233_vm10 = vcmp.gt.f32.partialorder %v149_v41, 0.0  ;;  %v241_v45 = vmul.f32 0.1, %v149_v41  ;;  %vm235_vm11 = vcmp.gt.f32.partialorder %v226_v42, 0.0 }
  0xe7   :  { %277 = vst [vmem:[%s419_s3 + $0x8] sm:$0xff] %v297_v40  ;;  %v243_v46 = vmul.f32 0.1, %v226_v42  ;;  %v248_v47 = vsel %vm232_vm8, %v147_v35, %v240_v43 }
  0xe8   :  { %v250_v48 = vsel %vm234_vm9, %v224_v36, %v242_v44  ;;  %v249_v49 = vsel %vm233_vm10, %v149_v41, %v241_v45 }
  0xe9   :  { %v251_v50 = vsel %vm235_vm11, %v226_v42, %v243_v46  ;;  %v298_v51 = vpack.c.bf16 %v249_v49, %v248_v47 }
  0xea   :  { %v299_v52 = vpack.c.bf16 %v251_v50, %v250_v48 }
  0xeb   :  { %278 = vst [vmem:[%s419_s3 + $0x10] sm:$0xff] %v298_v51 }
  0xec   :  { %279 = vst [vmem:[%s419_s3 + $0x18] sm:$0xff] %v299_v52 }

// kernel: forward.10
= control target key start
LH: loop header
LB: loop body
LE: loop exit
PB: predicated region body
PF: predicated region fallthrough
CT: control target
= control target key end

     0   :  { %v303_v0 = vmov 0.0|0.0   ;;  %v304_v5 = vmov 0   ;;  %vm77_vm0 = vcmask 130048   ;;  %s379_s0 = inlined_call_operand.vmem [shape: bf16[144,128], index: 0, kind: input, shape index: {}]   ;;  %s380_s1 = inlined_call_operand.vmem [shape: bf16[24,144], index: 1, kind: input, shape index: {}]   ;;  %s381_s2 = inlined_call_operand.vmem [shape: f32[24,1], index: 2, kind: input, shape index: {}]   ;;  %s382_s3 = inlined_call_operand.vmem [shape: bf16[24,128], index: 3, kind: output, shape index: {}]  }
   0x1   :  { %254 = vmatprep.subr.bf16.mxu0 %v303_v0  ;;  %281 = vmatprep.subr.bf16.mxu1 %v303_v0  ;;  %v206_v1 = vld [vmem:[%s379_s0] sm:$0xff]   ;;  %v246_v2 = vld [vmem:[%s379_s0 + $0x8] sm:$0xff]   ;;  %v61_v9 = vld [vmem:[%s381_s2 + $0x10] sm:$0xff] }
   0x2   :  { %256 = vmatpush1.bf16.msra.mxu0 %v206_v1  ;;  %290 = vmatpush1.bf16.msra.mxu1 %v206_v1  ;;  %v50_v3 = vld [vmem:[%s380_s1] sm:$0xff]  ;;  %v51_v4 = vld [vmem:[%s380_s1 + $0x8] sm:$0xff]  ;;  %v247_v10 = vld [vmem:[%s379_s0 + $0x10] sm:$0xff]  }
   0x3   :  { %257 = vmatprep.subr.bf16.mxu0 %v303_v0  ;;  %282 = vmatprep.subr.bf16.mxu1 %v303_v0  ;;  %v54_v6 = vunpack.c.h.bf16 %v50_v3  ;;  %v56_v7 = vunpack.c.h.bf16 %v51_v4  ;;  %v59_v8 = vld [vmem:[%s381_s2] sm:$0xff]  ;;  %v60_v11 = vld [vmem:[%s381_s2 + $0x8] sm:$0xff]  ;;  %v248_v12 = vld [vmem:[%s379_s0 + $0x18] sm:$0xff]   ;;  %v53_v19 = vunpack.c.l.bf16 %v50_v3  ;;  %v55_v20 = vunpack.c.l.bf16 %v51_v4 }
   0x4   :  { %301 = vset.pattern.permute.xlu0 %v304_v5  ;;  %302 = vset.pattern.permute.xlu1 %v304_v5  ;;  %v249_v13 = vld [vmem:[%s379_s0 + $0x20] sm:$0xff]   ;;  %v250_v14 = vld [vmem:[%s379_s0 + $0x28] sm:$0xff]   ;;  %v251_v15 = vld [vmem:[%s379_s0 + $0x30] sm:$0xff]  }
   0x5   :  { %196 = vmatprep.mubr.msk.f32.mxu0 %vm77_vm0, %v54_v6  ;;  %197 = vmatprep.mubr.msk.f32.mxu1 %vm77_vm0, %v56_v7  ;;  %v252_v16 = vld [vmem:[%s379_s0 + $0x38] sm:$0xff]   ;;  %v253_v17 = vld [vmem:[%s379_s0 + $0x40] sm:$0xff]   ;;  %v52_v18 = vld [vmem:[%s380_s1 + $0x10] sm:$0xff] }
   0x6   :  { %259 = vmatpush1.bf16.msra.mxu0 %v246_v2  ;;  %291 = vmatpush1.bf16.msra.mxu1 %v246_v2  ;;  %v58_v21 = vunpack.c.h.bf16 %v52_v18  ;;  %v57_v22 = vunpack.c.l.bf16 %v52_v18 }
   0x7   :  { %260 = vmatprep.subr.bf16.mxu0 %v303_v0  ;;  %283 = vmatprep.subr.bf16.mxu1 %v303_v0 }
   0x8   :  { %64 = vperm.xlu0 %301, %v59_v8   ;;  %74 = vperm.xlu1 %302, %v61_v9  }
   0xa   :  { %262 = vmatpush1.bf16.msra.mxu0 %v247_v10  ;;  %292 = vmatpush1.bf16.msra.mxu1 %v247_v10 }
   0xb   :  { %263 = vmatprep.subr.bf16.mxu0 %v303_v0  ;;  %284 = vmatprep.subr.bf16.mxu1 %v303_v0 }
   0xc   :  { %69 = vperm.xlu0 %301, %v60_v11  }
   0xe   :  { %265 = vmatpush1.bf16.msra.mxu0 %v248_v12  ;;  %293 = vmatpush1.bf16.msra.mxu1 %v248_v12 }
   0xf   :  { %266 = vmatprep.subr.bf16.mxu0 %v303_v0  ;;  %285 = vmatprep.subr.bf16.mxu1 %v303_v0 }
  0x12   :  { %268 = vmatpush1.bf16.msra.mxu0 %v249_v13  ;;  %294 = vmatpush1.bf16.msra.mxu1 %v249_v13 }
  0x13   :  { %269 = vmatprep.subr.bf16.mxu0 %v303_v0  ;;  %286 = vmatprep.subr.bf16.mxu1 %v303_v0 }
  0x16   :  { %271 = vmatpush1.bf16.msra.mxu0 %v250_v14  ;;  %295 = vmatpush1.bf16.msra.mxu1 %v250_v14 }
  0x17   :  { %272 = vmatprep.subr.bf16.mxu0 %v303_v0  ;;  %287 = vmatprep.subr.bf16.mxu1 %v303_v0 }
  0x1a   :  { %274 = vmatpush1.bf16.msra.mxu0 %v251_v15  ;;  %296 = vmatpush1.bf16.msra.mxu1 %v251_v15 }
  0x1b   :  { %275 = vmatprep.subr.bf16.mxu0 %v303_v0  ;;  %288 = vmatprep.subr.bf16.mxu1 %v303_v0 }
  0x1e   :  { %277 = vmatpush1.bf16.msra.mxu0 %v252_v16  ;;  %297 = vmatpush1.bf16.msra.mxu1 %v252_v16 }
  0x1f   :  { %278 = vmatprep.subr.bf16.mxu0 %v303_v0  ;;  %289 = vmatprep.subr.bf16.mxu1 %v303_v0 }
  0x22   :  { %280 = vmatpush1.bf16.msra.mxu0 %v253_v17  ;;  %298 = vmatpush1.bf16.msra.mxu1 %v253_v17 }
  0x25   :  { %152 = vmatmul.mubr.f32.vlgmr.msra.gmra.mrb[0].mxu0 %v53_v19  ;;  %157 = vmatmul.mubr.f32.vlgmr.msra.gmra.mrb[0].mxu1 %v55_v20 }
  0x26   :  { %198 = vmatprep.mubr.msk.f32.mxu1 %vm77_vm0, %v58_v21 }
  0x29   :  { %162 = vmatmul.mubr.f32.gmra.mrb[2].mxu1 %v57_v22 }
  0x87   :  { %v65_v23 = vpop.permute.xlu0 %64  ;;  %v75_v31 = vpop.permute.xlu1 %74 }
  0x8b   :  { %v70_v24 = vpop.permute.xlu0 %69 }
  0xf8   :  { %v153_v25 = vpop.f32.mrb[0].mxu0  ;;  %v158_v26 = vpop.f32.mrb[0].mxu1 }
  0xf9   :  { %v154_v27 = vadd.f32 %v153_v25, %v65_v23  ;;  %v159_v28 = vadd.f32 %v158_v26, %v70_v24  ;;  %v160_v29 = vpop.f32.mrb[1].mxu1  ;;  %v155_v30 = vpop.f32.mrb[1].mxu0 }
  0xfb   :  { %vm167_vm1 = vcmp.gt.f32.partialorder %v154_v27, 0.0  ;;  %v170_v32 = vmul.f32 0.1, %v154_v27  ;;  %vm168_vm2 = vcmp.gt.f32.partialorder %v159_v28, 0.0  ;;  %v171_v33 = vmul.f32 0.1, %v159_v28 }
  0xfc   :  { %v163_v34 = vpop.f32.mrb[2].mxu1 }
  0xfd   :  { %v173_v35 = vsel %vm167_vm1, %v154_v27, %v170_v32  ;;  %v174_v36 = vsel %vm168_vm2, %v159_v28, %v171_v33  ;;  %v164_v37 = vadd.f32 %v163_v34, %v75_v31  ;;  %v165_v38 = vpop.f32.mrb[3].mxu1 }
  0xfe   :  { %v244_v39 = vpack.c.bf16 %v174_v36, %v173_v35 }
  0xff   :  { %vm169_vm3 = vcmp.gt.f32.partialorder %v164_v37, 0.0  ;;  %v172_v40 = vmul.f32 0.1, %v164_v37 }
 0x100   :  { %245 = vst [vmem:[%s382_s3] sm:$0xff] %v244_v39  }
 0x101   :  { %v175_v41 = vsel %vm169_vm3, %v164_v37, %v172_v40 }
 0x102   :  { %v204_v42 = vpack.c.bf16 %v175_v41, %v175_v41 }
 0x104   :  { %191 = vst [vmem:[%s382_s3 + $0x8] sm:$0xf] %v204_v42 }

// kernel: tile.5
= control target key start
LH: loop header
LB: loop body
LE: loop exit
PB: predicated region body
PF: predicated region fallthrough
CT: control target
= control target key end

     0   :  { %s1090_s8 = smov 125   ;;  %s1091_s9 = smov 126   ;;  %vm7_vm0 = vcmask 7168   ;;  %s2189_s0 = inlined_call_operand.vmem [shape: f32[4,64], index: 0, kind: input, shape index: {}]   ;;  %s2190_s1 = inlined_call_operand.vmem [shape: f32[256,1], index: 1, kind: output, shape index: {}]  }
   0x1   :  { %v4_v0 = vld [vmem:[%s2189_s0] sm:$0xf]  ;;  %s1089_s0 = smov 127   ;;  %s1092_s10 = smov 124  }
   0x2   :  { %5 = vst [vmem:[#allocation0] sm:$0xf] %v4_v0  ;;  %s1093_s11 = smov 123   ;;  %s1094_s12 = smov 122  }
   0x3   :  { %s1095_s13 = smov 121   ;;  %s1096_s14 = smov 120  }
   0x4   :  { %s1097_s15 = smov 119   ;;  %s1098_s16 = smov 118  }
   0x5   :  { %s1099_s17 = smov 117   ;;  %s1100_s18 = smov 116  }
   0x6   :  { %s1101_s19 = smov 115   ;;  %s1102_s20 = smov 114  }
   0x7   :  { %s1103_s21 = smov 113   ;;  %s1104_s22 = smov 112  }
   0x8   :  { %s1105_s23 = smov 111   ;;  %s1106_s24 = smov 110  }
   0x9   :  { %v15_v1 = vld [vmem:[#allocation0] sm:$0xf]   ;;  %s1107_s25 = smov 109   ;;  %s1108_s26 = smov 108  }
   0xa   :  { %v39_v2 = vld [vmem:[#allocation0] sm:$0xf]   ;;  %16 = vrot.lane.b32.xlu0 %v15_v1, %s1089_s0  ;;  %s1109_s27 = smov 107   ;;  %s1110_s28 = smov 106  }
   0xb   :  { %40 = vrot.lane.b32.xlu1 %v39_v2, %s1090_s8  ;;  %v27_v3 = vld [vmem:[#allocation0] sm:$0xf]   ;;  %s1111_s29 = smov 105   ;;  %s1112_s30 = smov 104  }
   0xc   :  { %v51_v4 = vld [vmem:[#allocation0] sm:$0xf]   ;;  %s1113_s2 = smov 103   ;;  %s1114_s3 = smov 102  }
   0xd   :  { %v63_v5 = vld [vmem:[#allocation0] sm:$0xf]   ;;  %s1115_s4 = smov 101   ;;  %s1116_s5 = smov 100  }
   0xe   :  { %28 = vrot.lane.b32.xlu0 %v27_v3, %s1091_s9  ;;  %v75_v6 = vld [vmem:[#allocation0] sm:$0xf]   ;;  %s1117_s6 = smov 99   ;;  %s1118_s7 = smov 98  }
   0xf   :  { %52 = vrot.lane.b32.xlu1 %v51_v4, %s1092_s10  ;;  %v87_v7 = vld [vmem:[#allocation0] sm:$0xf]   ;;  %s1119_s0 = smov 97   ;;  %s1120_s8 = smov 96  }
  0x10   :  { %v99_v8 = vld [vmem:[#allocation0] sm:$0xf]   ;;  %s1121_s9 = smov 95   ;;  %s1122_s10 = smov 94  }
  0x11   :  { %v111_v9 = vld [vmem:[#allocation0] sm:$0xf]  }
  0x12   :  { %64 = vrot.lane.b32.xlu0 %v63_v5, %s1093_s11  ;;  %v123_v10 = vld [vmem:[#allocation0] sm:$0xf]   ;;  %s1123_s11 = smov 93  }
  0x13   :  { %76 = vrot.lane.b32.xlu1 %v75_v6, %s1094_s12  ;;  %v135_v11 = vld [vmem:[#allocation0] sm:$0xf]   ;;  %s1124_s12 = smov 92  }
  0x14   :  { %v147_v12 = vld [vmem:[#allocation0] sm:$0xf]  }
  0x15   :  { %v159_v13 = vld [vmem:[#allocation0] sm:$0xf]  }
  0x16   :  { %88 = vrot.lane.b32.xlu0 %v87_v7, %s1095_s13  ;;  %v171_v14 = vld [vmem:[#allocation0] sm:$0xf]   ;;  %s1125_s13 = smov 91  }
  0x17   :  { %100 = vrot.lane.b32.xlu1 %v99_v8, %s1096_s14  ;;  %v183_v15 = vld [vmem:[#allocation0] sm:$0xf]   ;;  %s1126_s14 = smov 90  }
  0x18   :  { %v195_v16 = vld [vmem:[#allocation0] sm:$0xf]  }
  0x19   :  { %v207_v17 = vld [vmem:[#allocation0] sm:$0xf]  }
  0x1a   :  { %112 = vrot.lane.b32.xlu0 %v111_v9, %s1097_s15  ;;  %v219_v18 = vld [vmem:[#allocation0] sm:$0xf]   ;;  %s1127_s15 = smov 89  }
  0x1b   :  { %124 = vrot.lane.b32.xlu1 %v123_v10, %s1098_s16  ;;  %v231_v19 = vld [vmem:[#allocation0] sm:$0xf]   ;;  %s1128_s16 = smov 88  }
  0x1c   :  { %v243_v20 = vld [vmem:[#allocation0] sm:$0xf]  }
  0x1d   :  { %v255_v21 = vld [vmem:[#allocation0] sm:$0xf]  }
  0x1e   :  { %136 = vrot.lane.b32.xlu0 %v135_v11, %s1099_s17  ;;  %v267_v22 = vld [vmem:[#allocation0] sm:$0xf]   ;;  %s1129_s17 = smov 87  }
  0x1f   :  { %148 = vrot.lane.b32.xlu1 %v147_v12, %s1100_s18  ;;  %v279_v23 = vld [vmem:[#allocation0] sm:$0xf]   ;;  %s1130_s18 = smov 86  }
  0x20   :  { %v291_v24 = vld [vmem:[#allocation0] sm:$0xf]  }
  0x21   :  { %v303_v25 = vld [vmem:[#allocation0] sm:$0xf]  }
  0x22   :  { %160 = vrot.lane.b32.xlu0 %v159_v13, %s1101_s19  ;;  %v315_v26 = vld [vmem:[#allocation0] sm:$0xf]   ;;  %s1131_s19 = smov 85  }
  0x23   :  { %172 = vrot.lane.b32.xlu1 %v171_v14, %s1102_s20  ;;  %v327_v27 = vld [vmem:[#allocation0] sm:$0xf]   ;;  %s1132_s20 = smov 84  }
  0x24   :  { %v339_v28 = vld [vmem:[#allocation0] sm:$0xf]  }
  0x25   :  { %v351_v29 = vld [vmem:[#allocation0] sm:$0xf]  }
  0x26   :  { %184 = vrot.lane.b32.xlu0 %v183_v15, %s1103_s21  ;;  %v363_v30 = vld [vmem:[#allocation0] sm:$0xf]   ;;  %s1133_s21 = smov 83  }
  0x27   :  { %196 = vrot.lane.b32.xlu1 %v195_v16, %s1104_s22  ;;  %v375_v31 = vld [vmem:[#allocation0] sm:$0xf]   ;;  %s1134_s22 = smov 82  }
  0x28   :  { %v387_v32 = vld [vmem:[#allocation0] sm:$0xf]  }
  0x29   :  { %v399_v33 = vld [vmem:[#allocation0] sm:$0xf]  }
  0x2a   :  { %208 = vrot.lane.b32.xlu0 %v207_v17, %s1105_s23  ;;  %v411_v34 = vld [vmem:[#allocation0] sm:$0xf]   ;;  %s1135_s23 = smov 81  }
  0x2b   :  { %220 = vrot.lane.b32.xlu1 %v219_v18, %s1106_s24  ;;  %v423_v35 = vld [vmem:[#allocation0] sm:$0xf]   ;;  %s1136_s24 = smov 80  }
  0x2c   :  { %v435_v36 = vld [vmem:[#allocation0] sm:$0xf]  }
  0x2d   :  { %v447_v37 = vld [vmem:[#allocation0] sm:$0xf]  }
  0x2e   :  { %232 = vrot.lane.b32.xlu0 %v231_v19, %s1107_s25  ;;  %v459_v38 = vld [vmem:[#allocation0] sm:$0xf]   ;;  %s1137_s25 = smov 79  }
  0x2f   :  { %244 = vrot.lane.b32.xlu1 %v243_v20, %s1108_s26  ;;  %v471_v39 = vld [vmem:[#allocation0] sm:$0xf]   ;;  %s1138_s26 = smov 78  }
  0x30   :  { %v483_v40 = vld [vmem:[#allocation0] sm:$0xf]  }
  0x31   :  { %v495_v41 = vld [vmem:[#allocation0] sm:$0xf]  }
  0x32   :  { %256 = vrot.lane.b32.xlu0 %v255_v21, %s1109_s27  ;;  %v507_v42 = vld [vmem:[#allocation0] sm:$0xf]   ;;  %s1139_s27 = smov 77  }
  0x33   :  { %268 = vrot.lane.b32.xlu1 %v267_v22, %s1110_s28  ;;  %v519_v43 = vld [vmem:[#allocation0] sm:$0xf]   ;;  %s1140_s28 = smov 76  }
  0x34   :  { %v531_v44 = vld [vmem:[#allocation0] sm:$0xf]  }
  0x35   :  { %v543_v45 = vld [vmem:[#allocation0] sm:$0xf]  }
  0x36   :  { %280 = vrot.lane.b32.xlu0 %v279_v23, %s1111_s29  ;;  %v555_v46 = vld [vmem:[#allocation0] sm:$0xf]   ;;  %s1141_s29 = smov 75  }
  0x37   :  { %292 = vrot.lane.b32.xlu1 %v291_v24, %s1112_s30  ;;  %v567_v47 = vld [vmem:[#allocation0] sm:$0xf]   ;;  %s1142_s30 = smov 74  }
  0x38   :  { %v579_v48 = vld [vmem:[#allocation0] sm:$0xf]  }
  0x39   :  { %v591_v49 = vld [vmem:[#allocation0] sm:$0xf]  }
  0x3a   :  { %304 = vrot.lane.b32.xlu0 %v303_v25, %s1113_s2  ;;  %v603_v50 = vld [vmem:[#allocation0] sm:$0xf]   ;;  %s1143_s2 = smov 73  }
  0x3b   :  { %316 = vrot.lane.b32.xlu1 %v315_v26, %s1114_s3  ;;  %v615_v51 = vld [vmem:[#allocation0] sm:$0xf]   ;;  %s1144_s3 = smov 72  }
  0x3c   :  { %v627_v52 = vld [vmem:[#allocation0] sm:$0xf]  }
  0x3d   :  { %v639_v53 = vld [vmem:[#allocation0] sm:$0xf]  }
  0x3e   :  { %328 = vrot.lane.b32.xlu0 %v327_v27, %s1115_s4  ;;  %v651_v54 = vld [vmem:[#allocation0] sm:$0xf]  }
  0x3f   :  { %340 = vrot.lane.b32.xlu1 %v339_v28, %s1116_s5  ;;  %v663_v55 = vld [vmem:[#allocation0] sm:$0xf]  }
  0x40   :  { %v675_v56 = vld [vmem:[#allocation0] sm:$0xf]  }
  0x41   :  { %v687_v57 = vld [vmem:[#allocation0] sm:$0xf]  }
  0x42   :  { %352 = vrot.lane.b32.xlu0 %v351_v29, %s1117_s6  ;;  %v699_v58 = vld [vmem:[#allocation0] sm:$0xf]   ;;  %s1151_s6 = smov 65  }
  0x43   :  { %364 = vrot.lane.b32.xlu1 %v363_v30, %s1118_s7  ;;  %v6_v59 = vld [vmem:[#allocation0] sm:$0xf]  }
  0x44   :  { %8 = vst.msk [vmem:[%s2190_s1] sm:$0x1] %vm7_vm0, %v6_v59   ;;  %771 = vst.msk [vmem:[%s2190_s1 + $0x3f] sm:$0x2] %vm7_vm0, %v6_v59   ;;  %v711_v60 = vld [vmem:[#allocation0] sm:$0xf]  }
  0x45   :  { %772 = vst.msk [vmem:[%s2190_s1 + $0x7e] sm:$0x4] %vm7_vm0, %v6_v59   ;;  %773 = vst.msk [vmem:[%s2190_s1 + $0xbd] sm:$0x8] %vm7_vm0, %v6_v59   ;;  %v723_v61 = vld [vmem:[#allocation0] sm:$0xf]  }
  0x46   :  { %376 = vrot.lane.b32.xlu0 %v375_v31, %s1119_s0  ;;  %v735_v0 = vld [vmem:[#allocation0] sm:$0xf]  }
  0x47   :  { %388 = vrot.lane.b32.xlu1 %v387_v32, %s1120_s8  ;;  %v747_v1 = vld [vmem:[#allocation0] sm:$0xf]  }
  0x48   :  { %v759_v4 = vld [vmem:[#allocation0] sm:$0xf]  }
  0x4a   :  { %400 = vrot.lane.b32.xlu0 %v399_v33, %s1121_s9 }
  0x4b   :  { %412 = vrot.lane.b32.xlu1 %v411_v34, %s1122_s10 }
  0x4e   :  { %424 = vrot.lane.b32.xlu0 %v423_v35, %s1123_s11  ;;  %s1145_s11 = smov 71  }
  0x4f   :  { %436 = vrot.lane.b32.xlu1 %v435_v36, %s1124_s12  ;;  %s1146_s12 = smov 70  }
  0x52   :  { %448 = vrot.lane.b32.xlu0 %v447_v37, %s1125_s13 }
  0x53   :  { %460 = vrot.lane.b32.xlu1 %v459_v38, %s1126_s14 }
  0x56   :  { %472 = vrot.lane.b32.xlu0 %v471_v39, %s1127_s15 }
  0x57   :  { %484 = vrot.lane.b32.xlu1 %v483_v40, %s1128_s16 }
  0x5a   :  { %496 = vrot.lane.b32.xlu0 %v495_v41, %s1129_s17  ;;  %s1149_s17 = smov 67  }
  0x5b   :  { %508 = vrot.lane.b32.xlu1 %v507_v42, %s1130_s18  ;;  %s1150_s18 = smov 66  }
  0x5e   :  { %520 = vrot.lane.b32.xlu0 %v519_v43, %s1131_s19 }
  0x5f   :  { %532 = vrot.lane.b32.xlu1 %v531_v44, %s1132_s20 }
  0x62   :  { %544 = vrot.lane.b32.xlu0 %v543_v45, %s1133_s21 }
  0x63   :  { %556 = vrot.lane.b32.xlu1 %v555_v46, %s1134_s22 }
  0x66   :  { %568 = vrot.lane.b32.xlu0 %v567_v47, %s1135_s23 }
  0x67   :  { %580 = vrot.lane.b32.xlu1 %v579_v48, %s1136_s24 }
  0x6a   :  { %592 = vrot.lane.b32.xlu0 %v591_v49, %s1137_s25 }
  0x6b   :  { %604 = vrot.lane.b32.xlu1 %v603_v50, %s1138_s26 }
  0x6e   :  { %616 = vrot.lane.b32.xlu0 %v615_v51, %s1139_s27 }
  0x6f   :  { %628 = vrot.lane.b32.xlu1 %v627_v52, %s1140_s28 }
  0x72   :  { %640 = vrot.lane.b32.xlu0 %v639_v53, %s1141_s29  ;;  %s1147_s29 = smov 69  }
  0x73   :  { %652 = vrot.lane.b32.xlu1 %v651_v54, %s1142_s30  ;;  %s1148_s30 = smov 68  }
  0x76   :  { %664 = vrot.lane.b32.xlu0 %v663_v55, %s1143_s2 }
  0x77   :  { %676 = vrot.lane.b32.xlu1 %v675_v56, %s1144_s3 }
  0x7a   :  { %688 = vrot.lane.b32.xlu0 %v687_v57, %s1145_s11 }
  0x7b   :  { %700 = vrot.lane.b32.xlu1 %v699_v58, %s1146_s12 }
  0x7c   :  { %v17_v62 = vpop.permute.xlu0 %16  }
  0x7d   :  { %v41_v63 = vpop.permute.xlu1 %40   ;;  %774 = vst.msk [vmem:[%s2190_s1 + $0x1] sm:$0x1] %vm7_vm0, %v17_v62   ;;  %775 = vst.msk [vmem:[%s2190_s1 + $0x40] sm:$0x2] %vm7_vm0, %v17_v62  }
  0x7e   :  { %776 = vst.msk [vmem:[%s2190_s1 + $0x7f] sm:$0x4] %vm7_vm0, %v17_v62   ;;  %777 = vst.msk [vmem:[%s2190_s1 + $0xbe] sm:$0x8] %vm7_vm0, %v17_v62   ;;  %712 = vrot.lane.b32.xlu0 %v711_v60, %s1147_s29 }
  0x7f   :  { %782 = vst.msk [vmem:[%s2190_s1 + $0x3] sm:$0x1] %vm7_vm0, %v41_v63   ;;  %783 = vst.msk [vmem:[%s2190_s1 + $0x42] sm:$0x2] %vm7_vm0, %v41_v63   ;;  %724 = vrot.lane.b32.xlu1 %v723_v61, %s1148_s30 }
  0x80   :  { %784 = vst.msk [vmem:[%s2190_s1 + $0x81] sm:$0x4] %vm7_vm0, %v41_v63   ;;  %785 = vst.msk [vmem:[%s2190_s1 + $0xc0] sm:$0x8] %vm7_vm0, %v41_v63   ;;  %v29_v2 = vpop.permute.xlu0 %28  }
  0x81   :  { %v53_v3 = vpop.permute.xlu1 %52   ;;  %778 = vst.msk [vmem:[%s2190_s1 + $0x2] sm:$0x1] %vm7_vm0, %v29_v2   ;;  %779 = vst.msk [vmem:[%s2190_s1 + $0x41] sm:$0x2] %vm7_vm0, %v29_v2  }
  0x82   :  { %780 = vst.msk [vmem:[%s2190_s1 + $0x80] sm:$0x4] %vm7_vm0, %v29_v2   ;;  %781 = vst.msk [vmem:[%s2190_s1 + $0xbf] sm:$0x8] %vm7_vm0, %v29_v2   ;;  %736 = vrot.lane.b32.xlu0 %v735_v0, %s1149_s17 }
  0x83   :  { %786 = vst.msk [vmem:[%s2190_s1 + $0x4] sm:$0x1] %vm7_vm0, %v53_v3   ;;  %787 = vst.msk [vmem:[%s2190_s1 + $0x43] sm:$0x2] %vm7_vm0, %v53_v3   ;;  %748 = vrot.lane.b32.xlu1 %v747_v1, %s1150_s18 }
  0x84   :  { %788 = vst.msk [vmem:[%s2190_s1 + $0x82] sm:$0x4] %vm7_vm0, %v53_v3   ;;  %789 = vst.msk [vmem:[%s2190_s1 + $0xc1] sm:$0x8] %vm7_vm0, %v53_v3   ;;  %v65_v5 = vpop.permute.xlu0 %64  }
  0x85   :  { %v77_v6 = vpop.permute.xlu1 %76   ;;  %790 = vst.msk [vmem:[%s2190_s1 + $0x5] sm:$0x1] %vm7_vm0, %v65_v5   ;;  %791 = vst.msk [vmem:[%s2190_s1 + $0x44] sm:$0x2] %vm7_vm0, %v65_v5  }
  0x86   :  { %792 = vst.msk [vmem:[%s2190_s1 + $0x83] sm:$0x4] %vm7_vm0, %v65_v5   ;;  %793 = vst.msk [vmem:[%s2190_s1 + $0xc2] sm:$0x8] %vm7_vm0, %v65_v5   ;;  %760 = vrot.lane.b32.xlu0 %v759_v4, %s1151_s6 }
  0x87   :  { %794 = vst.msk [vmem:[%s2190_s1 + $0x6] sm:$0x1] %vm7_vm0, %v77_v6   ;;  %795 = vst.msk [vmem:[%s2190_s1 + $0x45] sm:$0x2] %vm7_vm0, %v77_v6  }
  0x88   :  { %796 = vst.msk [vmem:[%s2190_s1 + $0x84] sm:$0x4] %vm7_vm0, %v77_v6   ;;  %797 = vst.msk [vmem:[%s2190_s1 + $0xc3] sm:$0x8] %vm7_vm0, %v77_v6   ;;  %v89_v7 = vpop.permute.xlu0 %88  }
  0x89   :  { %v101_v8 = vpop.permute.xlu1 %100   ;;  %798 = vst.msk [vmem:[%s2190_s1 + $0x7] sm:$0x1] %vm7_vm0, %v89_v7   ;;  %799 = vst.msk [vmem:[%s2190_s1 + $0x46] sm:$0x2] %vm7_vm0, %v89_v7  }
  0x8a   :  { %800 = vst.msk [vmem:[%s2190_s1 + $0x85] sm:$0x4] %vm7_vm0, %v89_v7   ;;  %801 = vst.msk [vmem:[%s2190_s1 + $0xc4] sm:$0x8] %vm7_vm0, %v89_v7  }
  0x8b   :  { %802 = vst.msk [vmem:[%s2190_s1 + $0x8] sm:$0x1] %vm7_vm0, %v101_v8   ;;  %803 = vst.msk [vmem:[%s2190_s1 + $0x47] sm:$0x2] %vm7_vm0, %v101_v8  }
  0x8c   :  { %804 = vst.msk [vmem:[%s2190_s1 + $0x86] sm:$0x4] %vm7_vm0, %v101_v8   ;;  %805 = vst.msk [vmem:[%s2190_s1 + $0xc5] sm:$0x8] %vm7_vm0, %v101_v8   ;;  %v113_v9 = vpop.permute.xlu0 %112  }
  0x8d   :  { %v125_v10 = vpop.permute.xlu1 %124   ;;  %806 = vst.msk [vmem:[%s2190_s1 + $0x9] sm:$0x1] %vm7_vm0, %v113_v9   ;;  %807 = vst.msk [vmem:[%s2190_s1 + $0x48] sm:$0x2] %vm7_vm0, %v113_v9  }
  0x8e   :  { %808 = vst.msk [vmem:[%s2190_s1 + $0x87] sm:$0x4] %vm7_vm0, %v113_v9   ;;  %809 = vst.msk [vmem:[%s2190_s1 + $0xc6] sm:$0x8] %vm7_vm0, %v113_v9  }
  0x8f   :  { %810 = vst.msk [vmem:[%s2190_s1 + $0xa] sm:$0x1] %vm7_vm0, %v125_v10   ;;  %811 = vst.msk [vmem:[%s2190_s1 + $0x49] sm:$0x2] %vm7_vm0, %v125_v10  }
  0x90   :  { %812 = vst.msk [vmem:[%s2190_s1 + $0x88] sm:$0x4] %vm7_vm0, %v125_v10   ;;  %813 = vst.msk [vmem:[%s2190_s1 + $0xc7] sm:$0x8] %vm7_vm0, %v125_v10   ;;  %v137_v11 = vpop.permute.xlu0 %136  }
  0x91   :  { %v149_v12 = vpop.permute.xlu1 %148   ;;  %814 = vst.msk [vmem:[%s2190_s1 + $0xb] sm:$0x1] %vm7_vm0, %v137_v11   ;;  %815 = vst.msk [vmem:[%s2190_s1 + $0x4a] sm:$0x2] %vm7_vm0, %v137_v11  }
  0x92   :  { %816 = vst.msk [vmem:[%s2190_s1 + $0x89] sm:$0x4] %vm7_vm0, %v137_v11   ;;  %817 = vst.msk [vmem:[%s2190_s1 + $0xc8] sm:$0x8] %vm7_vm0, %v137_v11  }
  0x93   :  { %818 = vst.msk [vmem:[%s2190_s1 + $0xc] sm:$0x1] %vm7_vm0, %v149_v12   ;;  %819 = vst.msk [vmem:[%s2190_s1 + $0x4b] sm:$0x2] %vm7_vm0, %v149_v12  }
  0x94   :  { %820 = vst.msk [vmem:[%s2190_s1 + $0x8a] sm:$0x4] %vm7_vm0, %v149_v12   ;;  %821 = vst.msk [vmem:[%s2190_s1 + $0xc9] sm:$0x8] %vm7_vm0, %v149_v12   ;;  %v161_v13 = vpop.permute.xlu0 %160  }
  0x95   :  { %v173_v14 = vpop.permute.xlu1 %172   ;;  %822 = vst.msk [vmem:[%s2190_s1 + $0xd] sm:$0x1] %vm7_vm0, %v161_v13   ;;  %823 = vst.msk [vmem:[%s2190_s1 + $0x4c] sm:$0x2] %vm7_vm0, %v161_v13  }
  0x96   :  { %824 = vst.msk [vmem:[%s2190_s1 + $0x8b] sm:$0x4] %vm7_vm0, %v161_v13   ;;  %825 = vst.msk [vmem:[%s2190_s1 + $0xca] sm:$0x8] %vm7_vm0, %v161_v13  }
  0x97   :  { %826 = vst.msk [vmem:[%s2190_s1 + $0xe] sm:$0x1] %vm7_vm0, %v173_v14   ;;  %827 = vst.msk [vmem:[%s2190_s1 + $0x4d] sm:$0x2] %vm7_vm0, %v173_v14  }
  0x98   :  { %828 = vst.msk [vmem:[%s2190_s1 + $0x8c] sm:$0x4] %vm7_vm0, %v173_v14   ;;  %829 = vst.msk [vmem:[%s2190_s1 + $0xcb] sm:$0x8] %vm7_vm0, %v173_v14   ;;  %v185_v15 = vpop.permute.xlu0 %184  }
  0x99   :  { %v197_v16 = vpop.permute.xlu1 %196   ;;  %830 = vst.msk [vmem:[%s2190_s1 + $0xf] sm:$0x1] %vm7_vm0, %v185_v15   ;;  %831 = vst.msk [vmem:[%s2190_s1 + $0x4e] sm:$0x2] %vm7_vm0, %v185_v15  }
  0x9a   :  { %832 = vst.msk [vmem:[%s2190_s1 + $0x8d] sm:$0x4] %vm7_vm0, %v185_v15   ;;  %833 = vst.msk [vmem:[%s2190_s1 + $0xcc] sm:$0x8] %vm7_vm0, %v185_v15  }
  0x9b   :  { %834 = vst.msk [vmem:[%s2190_s1 + $0x10] sm:$0x1] %vm7_vm0, %v197_v16   ;;  %835 = vst.msk [vmem:[%s2190_s1 + $0x4f] sm:$0x2] %vm7_vm0, %v197_v16  }
  0x9c   :  { %836 = vst.msk [vmem:[%s2190_s1 + $0x8e] sm:$0x4] %vm7_vm0, %v197_v16   ;;  %837 = vst.msk [vmem:[%s2190_s1 + $0xcd] sm:$0x8] %vm7_vm0, %v197_v16   ;;  %v209_v17 = vpop.permute.xlu0 %208  }
  0x9d   :  { %v221_v18 = vpop.permute.xlu1 %220   ;;  %838 = vst.msk [vmem:[%s2190_s1 + $0x11] sm:$0x1] %vm7_vm0, %v209_v17   ;;  %839 = vst.msk [vmem:[%s2190_s1 + $0x50] sm:$0x2] %vm7_vm0, %v209_v17  }
  0x9e   :  { %840 = vst.msk [vmem:[%s2190_s1 + $0x8f] sm:$0x4] %vm7_vm0, %v209_v17   ;;  %841 = vst.msk [vmem:[%s2190_s1 + $0xce] sm:$0x8] %vm7_vm0, %v209_v17  }
  0x9f   :  { %842 = vst.msk [vmem:[%s2190_s1 + $0x12] sm:$0x1] %vm7_vm0, %v221_v18   ;;  %843 = vst.msk [vmem:[%s2190_s1 + $0x51] sm:$0x2] %vm7_vm0, %v221_v18  }
  0xa0   :  { %844 = vst.msk [vmem:[%s2190_s1 + $0x90] sm:$0x4] %vm7_vm0, %v221_v18   ;;  %845 = vst.msk [vmem:[%s2190_s1 + $0xcf] sm:$0x8] %vm7_vm0, %v221_v18   ;;  %v233_v19 = vpop.permute.xlu0 %232  }
  0xa1   :  { %v245_v20 = vpop.permute.xlu1 %244   ;;  %846 = vst.msk [vmem:[%s2190_s1 + $0x13] sm:$0x1] %vm7_vm0, %v233_v19   ;;  %847 = vst.msk [vmem:[%s2190_s1 + $0x52] sm:$0x2] %vm7_vm0, %v233_v19  }
  0xa2   :  { %848 = vst.msk [vmem:[%s2190_s1 + $0x91] sm:$0x4] %vm7_vm0, %v233_v19   ;;  %849 = vst.msk [vmem:[%s2190_s1 + $0xd0] sm:$0x8] %vm7_vm0, %v233_v19  }
  0xa3   :  { %850 = vst.msk [vmem:[%s2190_s1 + $0x14] sm:$0x1] %vm7_vm0, %v245_v20   ;;  %851 = vst.msk [vmem:[%s2190_s1 + $0x53] sm:$0x2] %vm7_vm0, %v245_v20  }
  0xa4   :  { %852 = vst.msk [vmem:[%s2190_s1 + $0x92] sm:$0x4] %vm7_vm0, %v245_v20   ;;  %853 = vst.msk [vmem:[%s2190_s1 + $0xd1] sm:$0x8] %vm7_vm0, %v245_v20   ;;  %v257_v21 = vpop.permute.xlu0 %256  }
  0xa5   :  { %v269_v22 = vpop.permute.xlu1 %268   ;;  %854 = vst.msk [vmem:[%s2190_s1 + $0x15] sm:$0x1] %vm7_vm0, %v257_v21   ;;  %855 = vst.msk [vmem:[%s2190_s1 + $0x54] sm:$0x2] %vm7_vm0, %v257_v21  }
  0xa6   :  { %856 = vst.msk [vmem:[%s2190_s1 + $0x93] sm:$0x4] %vm7_vm0, %v257_v21   ;;  %857 = vst.msk [vmem:[%s2190_s1 + $0xd2] sm:$0x8] %vm7_vm0, %v257_v21  }
  0xa7   :  { %858 = vst.msk [vmem:[%s2190_s1 + $0x16] sm:$0x1] %vm7_vm0, %v269_v22   ;;  %859 = vst.msk [vmem:[%s2190_s1 + $0x55] sm:$0x2] %vm7_vm0, %v269_v22  }
  0xa8   :  { %860 = vst.msk [vmem:[%s2190_s1 + $0x94] sm:$0x4] %vm7_vm0, %v269_v22   ;;  %861 = vst.msk [vmem:[%s2190_s1 + $0xd3] sm:$0x8] %vm7_vm0, %v269_v22   ;;  %v281_v23 = vpop.permute.xlu0 %280  }
  0xa9   :  { %v293_v24 = vpop.permute.xlu1 %292   ;;  %862 = vst.msk [vmem:[%s2190_s1 + $0x17] sm:$0x1] %vm7_vm0, %v281_v23   ;;  %863 = vst.msk [vmem:[%s2190_s1 + $0x56] sm:$0x2] %vm7_vm0, %v281_v23  }
  0xaa   :  { %864 = vst.msk [vmem:[%s2190_s1 + $0x95] sm:$0x4] %vm7_vm0, %v281_v23   ;;  %865 = vst.msk [vmem:[%s2190_s1 + $0xd4] sm:$0x8] %vm7_vm0, %v281_v23  }
  0xab   :  { %866 = vst.msk [vmem:[%s2190_s1 + $0x18] sm:$0x1] %vm7_vm0, %v293_v24   ;;  %867 = vst.msk [vmem:[%s2190_s1 + $0x57] sm:$0x2] %vm7_vm0, %v293_v24  }
  0xac   :  { %868 = vst.msk [vmem:[%s2190_s1 + $0x96] sm:$0x4] %vm7_vm0, %v293_v24   ;;  %869 = vst.msk [vmem:[%s2190_s1 + $0xd5] sm:$0x8] %vm7_vm0, %v293_v24   ;;  %v305_v25 = vpop.permute.xlu0 %304  }
  0xad   :  { %v317_v26 = vpop.permute.xlu1 %316   ;;  %870 = vst.msk [vmem:[%s2190_s1 + $0x19] sm:$0x1] %vm7_vm0, %v305_v25   ;;  %871 = vst.msk [vmem:[%s2190_s1 + $0x58] sm:$0x2] %vm7_vm0, %v305_v25  }
  0xae   :  { %872 = vst.msk [vmem:[%s2190_s1 + $0x97] sm:$0x4] %vm7_vm0, %v305_v25   ;;  %873 = vst.msk [vmem:[%s2190_s1 + $0xd6] sm:$0x8] %vm7_vm0, %v305_v25  }
  0xaf   :  { %874 = vst.msk [vmem:[%s2190_s1 + $0x1a] sm:$0x1] %vm7_vm0, %v317_v26   ;;  %875 = vst.msk [vmem:[%s2190_s1 + $0x59] sm:$0x2] %vm7_vm0, %v317_v26  }
  0xb0   :  { %876 = vst.msk [vmem:[%s2190_s1 + $0x98] sm:$0x4] %vm7_vm0, %v317_v26   ;;  %877 = vst.msk [vmem:[%s2190_s1 + $0xd7] sm:$0x8] %vm7_vm0, %v317_v26   ;;  %v329_v27 = vpop.permute.xlu0 %328  }
  0xb1   :  { %v341_v28 = vpop.permute.xlu1 %340   ;;  %878 = vst.msk [vmem:[%s2190_s1 + $0x1b] sm:$0x1] %vm7_vm0, %v329_v27   ;;  %879 = vst.msk [vmem:[%s2190_s1 + $0x5a] sm:$0x2] %vm7_vm0, %v329_v27  }
  0xb2   :  { %880 = vst.msk [vmem:[%s2190_s1 + $0x99] sm:$0x4] %vm7_vm0, %v329_v27   ;;  %881 = vst.msk [vmem:[%s2190_s1 + $0xd8] sm:$0x8] %vm7_vm0, %v329_v27  }
  0xb3   :  { %882 = vst.msk [vmem:[%s2190_s1 + $0x1c] sm:$0x1] %vm7_vm0, %v341_v28   ;;  %883 = vst.msk [vmem:[%s2190_s1 + $0x5b] sm:$0x2] %vm7_vm0, %v341_v28  }
  0xb4   :  { %884 = vst.msk [vmem:[%s2190_s1 + $0x9a] sm:$0x4] %vm7_vm0, %v341_v28   ;;  %885 = vst.msk [vmem:[%s2190_s1 + $0xd9] sm:$0x8] %vm7_vm0, %v341_v28   ;;  %v353_v29 = vpop.permute.xlu0 %352  }
  0xb5   :  { %v365_v30 = vpop.permute.xlu1 %364   ;;  %886 = vst.msk [vmem:[%s2190_s1 + $0x1d] sm:$0x1] %vm7_vm0, %v353_v29   ;;  %887 = vst.msk [vmem:[%s2190_s1 + $0x5c] sm:$0x2] %vm7_vm0, %v353_v29  }
  0xb6   :  { %888 = vst.msk [vmem:[%s2190_s1 + $0x9b] sm:$0x4] %vm7_vm0, %v353_v29   ;;  %889 = vst.msk [vmem:[%s2190_s1 + $0xda] sm:$0x8] %vm7_vm0, %v353_v29  }
  0xb7   :  { %890 = vst.msk [vmem:[%s2190_s1 + $0x1e] sm:$0x1] %vm7_vm0, %v365_v30   ;;  %891 = vst.msk [vmem:[%s2190_s1 + $0x5d] sm:$0x2] %vm7_vm0, %v365_v30  }
  0xb8   :  { %892 = vst.msk [vmem:[%s2190_s1 + $0x9c] sm:$0x4] %vm7_vm0, %v365_v30   ;;  %893 = vst.msk [vmem:[%s2190_s1 + $0xdb] sm:$0x8] %vm7_vm0, %v365_v30   ;;  %v377_v31 = vpop.permute.xlu0 %376  }
  0xb9   :  { %v389_v32 = vpop.permute.xlu1 %388   ;;  %894 = vst.msk [vmem:[%s2190_s1 + $0x1f] sm:$0x1] %vm7_vm0, %v377_v31   ;;  %895 = vst.msk [vmem:[%s2190_s1 + $0x5e] sm:$0x2] %vm7_vm0, %v377_v31  }
  0xba   :  { %896 = vst.msk [vmem:[%s2190_s1 + $0x9d] sm:$0x4] %vm7_vm0, %v377_v31   ;;  %897 = vst.msk [vmem:[%s2190_s1 + $0xdc] sm:$0x8] %vm7_vm0, %v377_v31  }
  0xbb   :  { %898 = vst.msk [vmem:[%s2190_s1 + $0x20] sm:$0x1] %vm7_vm0, %v389_v32   ;;  %899 = vst.msk [vmem:[%s2190_s1 + $0x5f] sm:$0x2] %vm7_vm0, %v389_v32  }
  0xbc   :  { %900 = vst.msk [vmem:[%s2190_s1 + $0x9e] sm:$0x4] %vm7_vm0, %v389_v32   ;;  %901 = vst.msk [vmem:[%s2190_s1 + $0xdd] sm:$0x8] %vm7_vm0, %v389_v32   ;;  %v401_v33 = vpop.permute.xlu0 %400  }
  0xbd   :  { %v413_v34 = vpop.permute.xlu1 %412   ;;  %902 = vst.msk [vmem:[%s2190_s1 + $0x21] sm:$0x1] %vm7_vm0, %v401_v33   ;;  %903 = vst.msk [vmem:[%s2190_s1 + $0x60] sm:$0x2] %vm7_vm0, %v401_v33  }
  0xbe   :  { %904 = vst.msk [vmem:[%s2190_s1 + $0x9f] sm:$0x4] %vm7_vm0, %v401_v33   ;;  %905 = vst.msk [vmem:[%s2190_s1 + $0xde] sm:$0x8] %vm7_vm0, %v401_v33  }
  0xbf   :  { %906 = vst.msk [vmem:[%s2190_s1 + $0x22] sm:$0x1] %vm7_vm0, %v413_v34   ;;  %907 = vst.msk [vmem:[%s2190_s1 + $0x61] sm:$0x2] %vm7_vm0, %v413_v34  }
  0xc0   :  { %908 = vst.msk [vmem:[%s2190_s1 + $0xa0] sm:$0x4] %vm7_vm0, %v413_v34   ;;  %909 = vst.msk [vmem:[%s2190_s1 + $0xdf] sm:$0x8] %vm7_vm0, %v413_v34   ;;  %v425_v35 = vpop.permute.xlu0 %424  }
  0xc1   :  { %v437_v36 = vpop.permute.xlu1 %436   ;;  %910 = vst.msk [vmem:[%s2190_s1 + $0x23] sm:$0x1] %vm7_vm0, %v425_v35   ;;  %911 = vst.msk [vmem:[%s2190_s1 + $0x62] sm:$0x2] %vm7_vm0, %v425_v35  }
  0xc2   :  { %912 = vst.msk [vmem:[%s2190_s1 + $0xa1] sm:$0x4] %vm7_vm0, %v425_v35   ;;  %913 = vst.msk [vmem:[%s2190_s1 + $0xe0] sm:$0x8] %vm7_vm0, %v425_v35  }
  0xc3   :  { %914 = vst.msk [vmem:[%s2190_s1 + $0x24] sm:$0x1] %vm7_vm0, %v437_v36   ;;  %915 = vst.msk [vmem:[%s2190_s1 + $0x63] sm:$0x2] %vm7_vm0, %v437_v36  }
  0xc4   :  { %916 = vst.msk [vmem:[%s2190_s1 + $0xa2] sm:$0x4] %vm7_vm0, %v437_v36   ;;  %917 = vst.msk [vmem:[%s2190_s1 + $0xe1] sm:$0x8] %vm7_vm0, %v437_v36   ;;  %v449_v37 = vpop.permute.xlu0 %448  }
  0xc5   :  { %v461_v38 = vpop.permute.xlu1 %460   ;;  %918 = vst.msk [vmem:[%s2190_s1 + $0x25] sm:$0x1] %vm7_vm0, %v449_v37   ;;  %919 = vst.msk [vmem:[%s2190_s1 + $0x64] sm:$0x2] %vm7_vm0, %v449_v37  }
  0xc6   :  { %920 = vst.msk [vmem:[%s2190_s1 + $0xa3] sm:$0x4] %vm7_vm0, %v449_v37   ;;  %921 = vst.msk [vmem:[%s2190_s1 + $0xe2] sm:$0x8] %vm7_vm0, %v449_v37  }
  0xc7   :  { %922 = vst.msk [vmem:[%s2190_s1 + $0x26] sm:$0x1] %vm7_vm0, %v461_v38   ;;  %923 = vst.msk [vmem:[%s2190_s1 + $0x65] sm:$0x2] %vm7_vm0, %v461_v38  }
  0xc8   :  { %924 = vst.msk [vmem:[%s2190_s1 + $0xa4] sm:$0x4] %vm7_vm0, %v461_v38   ;;  %925 = vst.msk [vmem:[%s2190_s1 + $0xe3] sm:$0x8] %vm7_vm0, %v461_v38   ;;  %v473_v39 = vpop.permute.xlu0 %472  }
  0xc9   :  { %v485_v40 = vpop.permute.xlu1 %484   ;;  %926 = vst.msk [vmem:[%s2190_s1 + $0x27] sm:$0x1] %vm7_vm0, %v473_v39   ;;  %927 = vst.msk [vmem:[%s2190_s1 + $0x66] sm:$0x2] %vm7_vm0, %v473_v39  }
  0xca   :  { %928 = vst.msk [vmem:[%s2190_s1 + $0xa5] sm:$0x4] %vm7_vm0, %v473_v39   ;;  %929 = vst.msk [vmem:[%s2190_s1 + $0xe4] sm:$0x8] %vm7_vm0, %v473_v39  }
  0xcb   :  { %930 = vst.msk [vmem:[%s2190_s1 + $0x28] sm:$0x1] %vm7_vm0, %v485_v40   ;;  %931 = vst.msk [vmem:[%s2190_s1 + $0x67] sm:$0x2] %vm7_vm0, %v485_v40  }
  0xcc   :  { %932 = vst.msk [vmem:[%s2190_s1 + $0xa6] sm:$0x4] %vm7_vm0, %v485_v40   ;;  %933 = vst.msk [vmem:[%s2190_s1 + $0xe5] sm:$0x8] %vm7_vm0, %v485_v40   ;;  %v497_v41 = vpop.permute.xlu0 %496  }
  0xcd   :  { %v509_v42 = vpop.permute.xlu1 %508   ;;  %934 = vst.msk [vmem:[%s2190_s1 + $0x29] sm:$0x1] %vm7_vm0, %v497_v41   ;;  %935 = vst.msk [vmem:[%s2190_s1 + $0x68] sm:$0x2] %vm7_vm0, %v497_v41  }
  0xce   :  { %936 = vst.msk [vmem:[%s2190_s1 + $0xa7] sm:$0x4] %vm7_vm0, %v497_v41   ;;  %937 = vst.msk [vmem:[%s2190_s1 + $0xe6] sm:$0x8] %vm7_vm0, %v497_v41  }
  0xcf   :  { %938 = vst.msk [vmem:[%s2190_s1 + $0x2a] sm:$0x1] %vm7_vm0, %v509_v42   ;;  %939 = vst.msk [vmem:[%s2190_s1 + $0x69] sm:$0x2] %vm7_vm0, %v509_v42  }
  0xd0   :  { %940 = vst.msk [vmem:[%s2190_s1 + $0xa8] sm:$0x4] %vm7_vm0, %v509_v42   ;;  %941 = vst.msk [vmem:[%s2190_s1 + $0xe7] sm:$0x8] %vm7_vm0, %v509_v42   ;;  %v521_v43 = vpop.permute.xlu0 %520  }
  0xd1   :  { %v533_v44 = vpop.permute.xlu1 %532   ;;  %942 = vst.msk [vmem:[%s2190_s1 + $0x2b] sm:$0x1] %vm7_vm0, %v521_v43   ;;  %943 = vst.msk [vmem:[%s2190_s1 + $0x6a] sm:$0x2] %vm7_vm0, %v521_v43  }
  0xd2   :  { %944 = vst.msk [vmem:[%s2190_s1 + $0xa9] sm:$0x4] %vm7_vm0, %v521_v43   ;;  %945 = vst.msk [vmem:[%s2190_s1 + $0xe8] sm:$0x8] %vm7_vm0, %v521_v43  }
  0xd3   :  { %946 = vst.msk [vmem:[%s2190_s1 + $0x2c] sm:$0x1] %vm7_vm0, %v533_v44   ;;  %947 = vst.msk [vmem:[%s2190_s1 + $0x6b] sm:$0x2] %vm7_vm0, %v533_v44  }
  0xd4   :  { %948 = vst.msk [vmem:[%s2190_s1 + $0xaa] sm:$0x4] %vm7_vm0, %v533_v44   ;;  %949 = vst.msk [vmem:[%s2190_s1 + $0xe9] sm:$0x8] %vm7_vm0, %v533_v44   ;;  %v545_v45 = vpop.permute.xlu0 %544  }
  0xd5   :  { %v557_v46 = vpop.permute.xlu1 %556   ;;  %950 = vst.msk [vmem:[%s2190_s1 + $0x2d] sm:$0x1] %vm7_vm0, %v545_v45   ;;  %951 = vst.msk [vmem:[%s2190_s1 + $0x6c] sm:$0x2] %vm7_vm0, %v545_v45  }
  0xd6   :  { %952 = vst.msk [vmem:[%s2190_s1 + $0xab] sm:$0x4] %vm7_vm0, %v545_v45   ;;  %953 = vst.msk [vmem:[%s2190_s1 + $0xea] sm:$0x8] %vm7_vm0, %v545_v45  }
  0xd7   :  { %954 = vst.msk [vmem:[%s2190_s1 + $0x2e] sm:$0x1] %vm7_vm0, %v557_v46   ;;  %955 = vst.msk [vmem:[%s2190_s1 + $0x6d] sm:$0x2] %vm7_vm0, %v557_v46  }
  0xd8   :  { %956 = vst.msk [vmem:[%s2190_s1 + $0xac] sm:$0x4] %vm7_vm0, %v557_v46   ;;  %957 = vst.msk [vmem:[%s2190_s1 + $0xeb] sm:$0x8] %vm7_vm0, %v557_v46   ;;  %v569_v47 = vpop.permute.xlu0 %568  }
  0xd9   :  { %v581_v48 = vpop.permute.xlu1 %580   ;;  %958 = vst.msk [vmem:[%s2190_s1 + $0x2f] sm:$0x1] %vm7_vm0, %v569_v47   ;;  %959 = vst.msk [vmem:[%s2190_s1 + $0x6e] sm:$0x2] %vm7_vm0, %v569_v47  }
  0xda   :  { %960 = vst.msk [vmem:[%s2190_s1 + $0xad] sm:$0x4] %vm7_vm0, %v569_v47   ;;  %961 = vst.msk [vmem:[%s2190_s1 + $0xec] sm:$0x8] %vm7_vm0, %v569_v47  }
  0xdb   :  { %962 = vst.msk [vmem:[%s2190_s1 + $0x30] sm:$0x1] %vm7_vm0, %v581_v48   ;;  %963 = vst.msk [vmem:[%s2190_s1 + $0x6f] sm:$0x2] %vm7_vm0, %v581_v48  }
  0xdc   :  { %964 = vst.msk [vmem:[%s2190_s1 + $0xae] sm:$0x4] %vm7_vm0, %v581_v48   ;;  %965 = vst.msk [vmem:[%s2190_s1 + $0xed] sm:$0x8] %vm7_vm0, %v581_v48   ;;  %v593_v49 = vpop.permute.xlu0 %592  }
  0xdd   :  { %v605_v50 = vpop.permute.xlu1 %604   ;;  %966 = vst.msk [vmem:[%s2190_s1 + $0x31] sm:$0x1] %vm7_vm0, %v593_v49   ;;  %967 = vst.msk [vmem:[%s2190_s1 + $0x70] sm:$0x2] %vm7_vm0, %v593_v49  }
  0xde   :  { %968 = vst.msk [vmem:[%s2190_s1 + $0xaf] sm:$0x4] %vm7_vm0, %v593_v49   ;;  %969 = vst.msk [vmem:[%s2190_s1 + $0xee] sm:$0x8] %vm7_vm0, %v593_v49  }
  0xdf   :  { %970 = vst.msk [vmem:[%s2190_s1 + $0x32] sm:$0x1] %vm7_vm0, %v605_v50   ;;  %971 = vst.msk [vmem:[%s2190_s1 + $0x71] sm:$0x2] %vm7_vm0, %v605_v50  }
  0xe0   :  { %972 = vst.msk [vmem:[%s2190_s1 + $0xb0] sm:$0x4] %vm7_vm0, %v605_v50   ;;  %973 = vst.msk [vmem:[%s2190_s1 + $0xef] sm:$0x8] %vm7_vm0, %v605_v50   ;;  %v617_v51 = vpop.permute.xlu0 %616  }
  0xe1   :  { %v629_v52 = vpop.permute.xlu1 %628   ;;  %974 = vst.msk [vmem:[%s2190_s1 + $0x33] sm:$0x1] %vm7_vm0, %v617_v51   ;;  %975 = vst.msk [vmem:[%s2190_s1 + $0x72] sm:$0x2] %vm7_vm0, %v617_v51  }
  0xe2   :  { %976 = vst.msk [vmem:[%s2190_s1 + $0xb1] sm:$0x4] %vm7_vm0, %v617_v51   ;;  %977 = vst.msk [vmem:[%s2190_s1 + $0xf0] sm:$0x8] %vm7_vm0, %v617_v51  }
  0xe3   :  { %978 = vst.msk [vmem:[%s2190_s1 + $0x34] sm:$0x1] %vm7_vm0, %v629_v52   ;;  %979 = vst.msk [vmem:[%s2190_s1 + $0x73] sm:$0x2] %vm7_vm0, %v629_v52  }
  0xe4   :  { %980 = vst.msk [vmem:[%s2190_s1 + $0xb2] sm:$0x4] %vm7_vm0, %v629_v52   ;;  %981 = vst.msk [vmem:[%s2190_s1 + $0xf1] sm:$0x8] %vm7_vm0, %v629_v52   ;;  %v641_v53 = vpop.permute.xlu0 %640  }
  0xe5   :  { %v653_v54 = vpop.permute.xlu1 %652   ;;  %982 = vst.msk [vmem:[%s2190_s1 + $0x35] sm:$0x1] %vm7_vm0, %v641_v53   ;;  %983 = vst.msk [vmem:[%s2190_s1 + $0x74] sm:$0x2] %vm7_vm0, %v641_v53  }
  0xe6   :  { %984 = vst.msk [vmem:[%s2190_s1 + $0xb3] sm:$0x4] %vm7_vm0, %v641_v53   ;;  %985 = vst.msk [vmem:[%s2190_s1 + $0xf2] sm:$0x8] %vm7_vm0, %v641_v53  }
  0xe7   :  { %986 = vst.msk [vmem:[%s2190_s1 + $0x36] sm:$0x1] %vm7_vm0, %v653_v54   ;;  %987 = vst.msk [vmem:[%s2190_s1 + $0x75] sm:$0x2] %vm7_vm0, %v653_v54  }
  0xe8   :  { %988 = vst.msk [vmem:[%s2190_s1 + $0xb4] sm:$0x4] %vm7_vm0, %v653_v54   ;;  %989 = vst.msk [vmem:[%s2190_s1 + $0xf3] sm:$0x8] %vm7_vm0, %v653_v54   ;;  %v665_v55 = vpop.permute.xlu0 %664  }
  0xe9   :  { %v677_v56 = vpop.permute.xlu1 %676   ;;  %990 = vst.msk [vmem:[%s2190_s1 + $0x37] sm:$0x1] %vm7_vm0, %v665_v55   ;;  %991 = vst.msk [vmem:[%s2190_s1 + $0x76] sm:$0x2] %vm7_vm0, %v665_v55  }
  0xea   :  { %992 = vst.msk [vmem:[%s2190_s1 + $0xb5] sm:$0x4] %vm7_vm0, %v665_v55   ;;  %993 = vst.msk [vmem:[%s2190_s1 + $0xf4] sm:$0x8] %vm7_vm0, %v665_v55  }
  0xeb   :  { %994 = vst.msk [vmem:[%s2190_s1 + $0x38] sm:$0x1] %vm7_vm0, %v677_v56   ;;  %995 = vst.msk [vmem:[%s2190_s1 + $0x77] sm:$0x2] %vm7_vm0, %v677_v56  }
  0xec   :  { %996 = vst.msk [vmem:[%s2190_s1 + $0xb6] sm:$0x4] %vm7_vm0, %v677_v56   ;;  %997 = vst.msk [vmem:[%s2190_s1 + $0xf5] sm:$0x8] %vm7_vm0, %v677_v56   ;;  %v689_v57 = vpop.permute.xlu0 %688  }
  0xed   :  { %v701_v58 = vpop.permute.xlu1 %700   ;;  %998 = vst.msk [vmem:[%s2190_s1 + $0x39] sm:$0x1] %vm7_vm0, %v689_v57   ;;  %999 = vst.msk [vmem:[%s2190_s1 + $0x78] sm:$0x2] %vm7_vm0, %v689_v57  }
  0xee   :  { %1000 = vst.msk [vmem:[%s2190_s1 + $0xb7] sm:$0x4] %vm7_vm0, %v689_v57   ;;  %1001 = vst.msk [vmem:[%s2190_s1 + $0xf6] sm:$0x8] %vm7_vm0, %v689_v57  }
  0xef   :  { %1002 = vst.msk [vmem:[%s2190_s1 + $0x3a] sm:$0x1] %vm7_vm0, %v701_v58   ;;  %1003 = vst.msk [vmem:[%s2190_s1 + $0x79] sm:$0x2] %vm7_vm0, %v701_v58  }
  0xf0   :  { %1004 = vst.msk [vmem:[%s2190_s1 + $0xb8] sm:$0x4] %vm7_vm0, %v701_v58   ;;  %1005 = vst.msk [vmem:[%s2190_s1 + $0xf7] sm:$0x8] %vm7_vm0, %v701_v58   ;;  %v713_v59 = vpop.permute.xlu0 %712  }
  0xf1   :  { %v725_v60 = vpop.permute.xlu1 %724   ;;  %1006 = vst.msk [vmem:[%s2190_s1 + $0x3b] sm:$0x1] %vm7_vm0, %v713_v59   ;;  %1007 = vst.msk [vmem:[%s2190_s1 + $0x7a] sm:$0x2] %vm7_vm0, %v713_v59  }
  0xf2   :  { %1008 = vst.msk [vmem:[%s2190_s1 + $0xb9] sm:$0x4] %vm7_vm0, %v713_v59   ;;  %1009 = vst.msk [vmem:[%s2190_s1 + $0xf8] sm:$0x8] %vm7_vm0, %v713_v59  }
  0xf3   :  { %1010 = vst.msk [vmem:[%s2190_s1 + $0x3c] sm:$0x1] %vm7_vm0, %v725_v60   ;;  %1011 = vst.msk [vmem:[%s2190_s1 + $0x7b] sm:$0x2] %vm7_vm0, %v725_v60  }
  0xf4   :  { %1012 = vst.msk [vmem:[%s2190_s1 + $0xba] sm:$0x4] %vm7_vm0, %v725_v60   ;;  %1013 = vst.msk [vmem:[%s2190_s1 + $0xf9] sm:$0x8] %vm7_vm0, %v725_v60   ;;  %v737_v61 = vpop.permute.xlu0 %736  }
  0xf5   :  { %v749_v62 = vpop.permute.xlu1 %748   ;;  %1014 = vst.msk [vmem:[%s2190_s1 + $0x3d] sm:$0x1] %vm7_vm0, %v737_v61   ;;  %1015 = vst.msk [vmem:[%s2190_s1 + $0x7c] sm:$0x2] %vm7_vm0, %v737_v61  }
  0xf6   :  { %1016 = vst.msk [vmem:[%s2190_s1 + $0xbb] sm:$0x4] %vm7_vm0, %v737_v61   ;;  %1017 = vst.msk [vmem:[%s2190_s1 + $0xfa] sm:$0x8] %vm7_vm0, %v737_v61  }
  0xf7   :  { %1018 = vst.msk [vmem:[%s2190_s1 + $0x3e] sm:$0x1] %vm7_vm0, %v749_v62   ;;  %1019 = vst.msk [vmem:[%s2190_s1 + $0x7d] sm:$0x2] %vm7_vm0, %v749_v62  }
  0xf8   :  { %1020 = vst.msk [vmem:[%s2190_s1 + $0xbc] sm:$0x4] %vm7_vm0, %v749_v62   ;;  %1021 = vst.msk [vmem:[%s2190_s1 + $0xfb] sm:$0x8] %vm7_vm0, %v749_v62   ;;  %v761_v63 = vpop.permute.xlu0 %760  }
  0xf9   :  { %1022 = vst.msk [vmem:[%s2190_s1 + $0x3f] sm:$0x1] %vm7_vm0, %v761_v63   ;;  %1023 = vst.msk [vmem:[%s2190_s1 + $0x7e] sm:$0x2] %vm7_vm0, %v761_v63  }
  0xfa   :  { %1024 = vst.msk [vmem:[%s2190_s1 + $0xbd] sm:$0x4] %vm7_vm0, %v761_v63   ;;  %1025 = vst.msk [vmem:[%s2190_s1 + $0xfc] sm:$0x8] %vm7_vm0, %v761_v63  }

// kernel: forward.11
= control target key start
LH: loop header
LB: loop body
LE: loop exit
PB: predicated region body
PF: predicated region fallthrough
CT: control target
= control target key end

     0   :  { %v364_v0 = vmov 0.0|0.0   ;;  %v365_v3 = vmov 0   ;;  %vm95_vm0 = vcmask 719872   ;;  %v366_v25 = vmov 0.0   ;;  %s490_s0 = inlined_call_operand.vmem [shape: bf16[216,128], index: 0, kind: input, shape index: {}]   ;;  %s491_s1 = inlined_call_operand.vmem [shape: bf16[24,216], index: 1, kind: input, shape index: {}]   ;;  %s492_s2 = inlined_call_operand.vmem [shape: f32[24,1], index: 2, kind: input, shape index: {}]   ;;  %s493_s3 = inlined_call_operand.vmem [shape: bf16[24,128], index: 3, kind: output, shape index: {}]  }
   0x1   :  { %292 = vmatprep.subr.bf16.mxu0 %v364_v0  ;;  %331 = vmatprep.subr.bf16.mxu1 %v364_v0  ;;  %v224_v1 = vld [vmem:[%s490_s0] sm:$0xff]   ;;  %v280_v2 = vld [vmem:[%s490_s0 + $0x8] sm:$0xff]   ;;  %v281_v8 = vld [vmem:[%s490_s0 + $0x10] sm:$0xff]  }
   0x2   :  { %294 = vmatpush1.bf16.msra.mxu0 %v224_v1  ;;  %345 = vmatpush1.bf16.msra.mxu1 %v224_v1  ;;  %v400_v4 = vld [vmem:[%s491_s1] sm:$0xff]  ;;  %v406_v6 = vld [vmem:[%s491_s1 + $0x8] sm:$0xff]  ;;  %v79_v10 = vld [vmem:[%s492_s2 + $0x10] sm:$0xff] }
   0x3   :  { %295 = vmatprep.subr.bf16.mxu0 %v364_v0  ;;  %332 = vmatprep.subr.bf16.mxu1 %v364_v0  ;;  %v72_v5 = vunpack.c.h.bf16 %v400_v4  ;;  %v77_v7 = vld [vmem:[%s492_s2] sm:$0xff]  ;;  %v74_v9 = vunpack.c.h.bf16 %v406_v6  ;;  %v78_v11 = vld [vmem:[%s492_s2 + $0x8] sm:$0xff]  ;;  %v282_v12 = vld [vmem:[%s490_s0 + $0x18] sm:$0xff]   ;;  %v71_v26 = vunpack.c.l.bf16 %v400_v4  ;;  %v73_v27 = vunpack.c.l.bf16 %v406_v6 }
   0x4   :  { %362 = vset.pattern.permute.xlu0 %v365_v3  ;;  %363 = vset.pattern.permute.xlu1 %v365_v3  ;;  %v283_v13 = vld [vmem:[%s490_s0 + $0x20] sm:$0xff]   ;;  %v284_v14 = vld [vmem:[%s490_s0 + $0x28] sm:$0xff]   ;;  %v285_v15 = vld [vmem:[%s490_s0 + $0x30] sm:$0xff]  }
   0x5   :  { %214 = vmatprep.mubr.msk.f32.mxu0 %vm95_vm0, %v72_v5  ;;  %82 = vperm.xlu0 %362, %v77_v7   ;;  %v286_v16 = vld [vmem:[%s490_s0 + $0x38] sm:$0xff]   ;;  %v287_v17 = vld [vmem:[%s490_s0 + $0x40] sm:$0xff]   ;;  %v288_v18 = vld [vmem:[%s490_s0 + $0x48] sm:$0xff]  }
   0x6   :  { %297 = vmatpush1.bf16.msra.mxu0 %v280_v2  ;;  %346 = vmatpush1.bf16.msra.mxu1 %v280_v2  ;;  %v289_v19 = vld [vmem:[%s490_s0 + $0x50] sm:$0xff]   ;;  %v290_v20 = vld [vmem:[%s490_s0 + $0x58] sm:$0xff]   ;;  %v291_v21 = vld [vmem:[%s490_s0 + $0x60] sm:$0xff]  }
   0x7   :  { %298 = vmatprep.subr.bf16.mxu0 %v364_v0  ;;  %333 = vmatprep.subr.bf16.mxu1 %v364_v0  ;;  %v40_v22 = vld [vmem:[%s490_s0 + $0x68] sm:$0xf]  ;;  %v70_v23 = vld [vmem:[%s491_s1 + $0x10] sm:$0xff] }
   0x8   :  { %215 = vmatprep.mubr.msk.f32.mxu1 %vm95_vm0, %v74_v9  ;;  %92 = vperm.xlu1 %363, %v79_v10   ;;  %v67_v24 = vunpack.c.l.bf16 %v40_v22  ;;  %v76_v28 = vunpack.c.h.bf16 %v70_v23  ;;  %v75_v29 = vunpack.c.l.bf16 %v70_v23 }
   0x9   :  { %87 = vperm.xlu0 %362, %v78_v11  }
   0xa   :  { %300 = vmatpush1.bf16.msra.mxu0 %v281_v8  ;;  %347 = vmatpush1.bf16.msra.mxu1 %v281_v8 }
   0xb   :  { %301 = vmatprep.subr.bf16.mxu0 %v364_v0  ;;  %334 = vmatprep.subr.bf16.mxu1 %v364_v0 }
   0xe   :  { %303 = vmatpush1.bf16.msra.mxu0 %v282_v12  ;;  %348 = vmatpush1.bf16.msra.mxu1 %v282_v12 }
   0xf   :  { %304 = vmatprep.subr.bf16.mxu0 %v364_v0  ;;  %335 = vmatprep.subr.bf16.mxu1 %v364_v0 }
  0x12   :  { %306 = vmatpush1.bf16.msra.mxu0 %v283_v13  ;;  %349 = vmatpush1.bf16.msra.mxu1 %v283_v13 }
  0x13   :  { %307 = vmatprep.subr.bf16.mxu0 %v364_v0  ;;  %336 = vmatprep.subr.bf16.mxu1 %v364_v0 }
  0x16   :  { %309 = vmatpush1.bf16.msra.mxu0 %v284_v14  ;;  %350 = vmatpush1.bf16.msra.mxu1 %v284_v14 }
  0x17   :  { %310 = vmatprep.subr.bf16.mxu0 %v364_v0  ;;  %337 = vmatprep.subr.bf16.mxu1 %v364_v0 }
  0x1a   :  { %312 = vmatpush1.bf16.msra.mxu0 %v285_v15  ;;  %351 = vmatpush1.bf16.msra.mxu1 %v285_v15 }
  0x1b   :  { %313 = vmatprep.subr.bf16.mxu0 %v364_v0  ;;  %338 = vmatprep.subr.bf16.mxu1 %v364_v0 }
  0x1e   :  { %315 = vmatpush1.bf16.msra.mxu0 %v286_v16  ;;  %352 = vmatpush1.bf16.msra.mxu1 %v286_v16 }
  0x1f   :  { %316 = vmatprep.subr.bf16.mxu0 %v364_v0  ;;  %339 = vmatprep.subr.bf16.mxu1 %v364_v0 }
  0x22   :  { %318 = vmatpush1.bf16.msra.mxu0 %v287_v17  ;;  %353 = vmatpush1.bf16.msra.mxu1 %v287_v17 }
  0x23   :  { %319 = vmatprep.subr.bf16.mxu0 %v364_v0  ;;  %340 = vmatprep.subr.bf16.mxu1 %v364_v0 }
  0x26   :  { %321 = vmatpush1.bf16.msra.mxu0 %v288_v18  ;;  %354 = vmatpush1.bf16.msra.mxu1 %v288_v18 }
  0x27   :  { %322 = vmatprep.subr.bf16.mxu0 %v364_v0  ;;  %341 = vmatprep.subr.bf16.mxu1 %v364_v0 }
  0x2a   :  { %324 = vmatpush1.bf16.msra.mxu0 %v289_v19  ;;  %355 = vmatpush1.bf16.msra.mxu1 %v289_v19 }
  0x2b   :  { %325 = vmatprep.subr.bf16.mxu0 %v364_v0  ;;  %342 = vmatprep.subr.bf16.mxu1 %v364_v0 }
  0x2e   :  { %327 = vmatpush1.bf16.msra.mxu0 %v290_v20  ;;  %356 = vmatpush1.bf16.msra.mxu1 %v290_v20 }
  0x2f   :  { %328 = vmatprep.subr.bf16.mxu0 %v364_v0  ;;  %343 = vmatprep.subr.bf16.mxu1 %v364_v0 }
  0x32   :  { %330 = vmatpush1.bf16.msra.mxu0 %v291_v21  ;;  %357 = vmatpush1.bf16.msra.mxu1 %v291_v21 }
  0x33   :  { %157 = vmatprep.subr.mxu0 %v366_v25  ;;  %344 = vmatprep.subr.mxu1 %v366_v25 }
  0x36   :  { %158 = vmatpush1.msra.mxu0 %v67_v24  ;;  %358 = vmatpush1.msra.mxu1 %v67_v24 }
  0x37   :  { %170 = vmatmul.mubr.f32.vlgmr.msra.gmra.mrb[0].mxu0 %v71_v26  ;;  %175 = vmatmul.mubr.f32.vlgmr.msra.gmra.mrb[0].mxu1 %v73_v27 }
  0x38   :  { %216 = vmatprep.mubr.msk.f32.mxu1 %vm95_vm0, %v76_v28 }
  0x3b   :  { %180 = vmatmul.mubr.f32.gmra.mrb[2].mxu1 %v75_v29 }
  0x84   :  { %v83_v30 = vpop.permute.xlu0 %82 }
  0x87   :  { %v93_v38 = vpop.permute.xlu1 %92 }
  0x88   :  { %v88_v31 = vpop.permute.xlu0 %87 }
 0x10a   :  { %v171_v32 = vpop.f32.mrb[0].mxu0  ;;  %v176_v33 = vpop.f32.mrb[0].mxu1 }
 0x10b   :  { %v172_v34 = vadd.f32 %v171_v32, %v83_v30  ;;  %v177_v35 = vadd.f32 %v176_v33, %v88_v31  ;;  %v178_v36 = vpop.f32.mrb[1].mxu1  ;;  %v173_v37 = vpop.f32.mrb[1].mxu0 }
 0x10d   :  { %vm185_vm1 = vcmp.gt.f32.partialorder %v172_v34, 0.0  ;;  %v188_v39 = vmul.f32 0.1, %v172_v34  ;;  %vm186_vm2 = vcmp.gt.f32.partialorder %v177_v35, 0.0  ;;  %v189_v40 = vmul.f32 0.1, %v177_v35 }
 0x10e   :  { %v181_v41 = vpop.f32.mrb[2].mxu1 }
 0x10f   :  { %v191_v42 = vsel %vm185_vm1, %v172_v34, %v188_v39  ;;  %v192_v43 = vsel %vm186_vm2, %v177_v35, %v189_v40  ;;  %v182_v44 = vadd.f32 %v181_v41, %v93_v38  ;;  %v183_v45 = vpop.f32.mrb[3].mxu1 }
 0x110   :  { %v278_v46 = vpack.c.bf16 %v192_v43, %v191_v42 }
 0x111   :  { %vm187_vm3 = vcmp.gt.f32.partialorder %v182_v44, 0.0  ;;  %v190_v47 = vmul.f32 0.1, %v182_v44 }
 0x112   :  { %279 = vst [vmem:[%s493_s3] sm:$0xff] %v278_v46  }
 0x113   :  { %v193_v48 = vsel %vm187_vm3, %v182_v44, %v190_v47 }
 0x114   :  { %v222_v49 = vpack.c.bf16 %v193_v48, %v193_v48 }
 0x116   :  { %209 = vst [vmem:[%s493_s3 + $0x8] sm:$0xf] %v222_v49 }

// kernel: forward.12
= control target key start
LH: loop header
LB: loop body
LE: loop exit
PB: predicated region body
PF: predicated region fallthrough
CT: control target
= control target key end

     0   :  { %v1651_v2 = vmov 0   ;;  %vm236_vm0 = vcmask 785408   ;;  %vm638_vm1 = vcmask 523264   ;;  %s2180_s0 = inlined_call_operand.vmem [shape: bf16[96,128], index: 0, kind: input, shape index: {}]   ;;  %s2181_s2 = inlined_call_operand.vmem [shape: f32[192,1], index: 2, kind: input, shape index: {}]   ;;  %s2182_s1 = inlined_call_operand.vmem [shape: bf16[192,96], index: 1, kind: input, shape index: {}]   ;;  %s2183_s4 = inlined_call_operand.vmem [shape: f32[192,1], index: 4, kind: input, shape index: {}]   ;;  %s2184_s3 = inlined_call_operand.vmem [shape: bf16[192,192], index: 3, kind: input, shape index: {}]   ;;  %s2185_s5 = inlined_call_operand.vmem [shape: bf16[192,128], index: 5, kind: output, shape index: {}]  }
   0x1   :  { %v1309_v0 = vld [vmem:[%s2180_s0] sm:$0xff]   ;;  %v1440_v1 = vld [vmem:[%s2180_s0 + $0x8] sm:$0xff]   ;;  %1649 = vset.pattern.permute.xlu0 %v1651_v2  ;;  %1650 = vset.pattern.permute.xlu1 %v1651_v2  ;;  %v94_v4 = vld [vmem:[%s2181_s2 + $0x10] sm:$0xff] }
   0x2   :  { %1564 = vmatprep.subr.bf16.mxu0 %v1309_v0  ;;  %v92_v3 = vld [vmem:[%s2181_s2] sm:$0xff]  ;;  %128 = vperm.xlu1 %1650, %v94_v4   ;;  %v93_v5 = vld [vmem:[%s2181_s2 + $0x8] sm:$0xff]  ;;  %v1441_v7 = vld [vmem:[%s2180_s0 + $0x10] sm:$0xff]  }
   0x3   :  { %1566 = vmatpush3.bf16.msra.mxu0 %v1309_v0  ;;  %118 = vperm.xlu0 %1649, %v92_v3   ;;  %v1333_v6 = vld [vmem:[%s2182_s1] sm:$0xff]   ;;  %v95_v8 = vld [vmem:[%s2181_s2 + $0x18] sm:$0xff]  ;;  %v97_v12 = vld [vmem:[%s2181_s2 + $0x28] sm:$0xff] }
   0x4   :  { %1568 = vmatprep.subr.bf16.mxu0 %v1440_v1  ;;  %v1334_v9 = vunpack.c.l.bf16 %v1333_v6  ;;  %v96_v10 = vld [vmem:[%s2181_s2 + $0x20] sm:$0xff]  ;;  %v1442_v11 = vld [vmem:[%s2180_s0 + $0x18] sm:$0xff]   ;;  %v98_v13 = vld [vmem:[%s2181_s2 + $0x30] sm:$0xff]  ;;  %v1335_v22 = vunpack.c.h.bf16 %v1333_v6 }
   0x5   :  { %v1443_v14 = vld [vmem:[%s2180_s0 + $0x20] sm:$0xff]   ;;  %v99_v15 = vld [vmem:[%s2181_s2 + $0x38] sm:$0xff]  ;;  %v1444_v17 = vld [vmem:[%s2180_s0 + $0x28] sm:$0xff]  }
   0x6   :  { %133 = vperm.xlu1 %1650, %v95_v8   ;;  %1527 = vmatprep.mubr.msk.f32.mxu0 %vm236_vm0, %v1334_v9  ;;  %v100_v16 = vld [vmem:[%s2181_s2 + $0x40] sm:$0xff]  ;;  %v101_v18 = vld [vmem:[%s2181_s2 + $0x48] sm:$0xff]  ;;  %v102_v20 = vld [vmem:[%s2181_s2 + $0x50] sm:$0xff] }
   0x7   :  { %1570 = vmatpush3.bf16.msra.mxu0 %v1440_v1  ;;  %123 = vperm.xlu0 %1649, %v93_v5   ;;  %v1445_v19 = vld [vmem:[%s2182_s1 + $0x8] sm:$0xff]   ;;  %v103_v21 = vld [vmem:[%s2181_s2 + $0x58] sm:$0xff]  ;;  %v1446_v24 = vld [vmem:[%s2182_s1 + $0x10] sm:$0xff]  }
   0x8   :  { %1572 = vmatprep.subr.bf16.mxu0 %v1441_v7  ;;  %v1338_v23 = vunpack.c.l.bf16 %v1445_v19  ;;  %v104_v25 = vld [vmem:[%s2181_s2 + $0x60] sm:$0xff]  ;;  %v105_v26 = vld [vmem:[%s2181_s2 + $0x68] sm:$0xff]  ;;  %v1339_v27 = vunpack.c.h.bf16 %v1445_v19  ;;  %v1342_v28 = vunpack.c.l.bf16 %v1446_v24  ;;  %v1447_v29 = vld [vmem:[%s2182_s1 + $0x18] sm:$0xff]   ;;  %v1343_v32 = vunpack.c.h.bf16 %v1446_v24 }
   0x9   :  { %v106_v30 = vld [vmem:[%s2181_s2 + $0x70] sm:$0xff]  ;;  %v107_v31 = vld [vmem:[%s2181_s2 + $0x78] sm:$0xff]  ;;  %v1346_v33 = vunpack.c.l.bf16 %v1447_v29  ;;  %v1448_v34 = vld [vmem:[%s2182_s1 + $0x20] sm:$0xff]   ;;  %v1347_v37 = vunpack.c.h.bf16 %v1447_v29 }
   0xa   :  { %143 = vperm.xlu1 %1650, %v97_v12   ;;  %v108_v35 = vld [vmem:[%s2181_s2 + $0x80] sm:$0xff]  ;;  %v109_v36 = vld [vmem:[%s2181_s2 + $0x88] sm:$0xff]  ;;  %v1350_v38 = vunpack.c.l.bf16 %v1448_v34  ;;  %v110_v40 = vld [vmem:[%s2181_s2 + $0x90] sm:$0xff]  ;;  %v1351_v42 = vunpack.c.h.bf16 %v1448_v34 }
   0xb   :  { %1574 = vmatpush3.bf16.msra.mxu0 %v1441_v7  ;;  %138 = vperm.xlu0 %1649, %v96_v10   ;;  %v1449_v39 = vld [vmem:[%s2182_s1 + $0x28] sm:$0xff]   ;;  %v111_v41 = vld [vmem:[%s2181_s2 + $0x98] sm:$0xff]  ;;  %v1450_v44 = vld [vmem:[%s2182_s1 + $0x30] sm:$0xff]  }
   0xc   :  { %1576 = vmatprep.subr.bf16.mxu0 %v1442_v11  ;;  %v1354_v43 = vunpack.c.l.bf16 %v1449_v39  ;;  %v112_v45 = vld [vmem:[%s2181_s2 + $0xa0] sm:$0xff]  ;;  %v113_v46 = vld [vmem:[%s2181_s2 + $0xa8] sm:$0xff]  ;;  %v1355_v47 = vunpack.c.h.bf16 %v1449_v39  ;;  %v1358_v48 = vunpack.c.l.bf16 %v1450_v44  ;;  %v1451_v49 = vld [vmem:[%s2182_s1 + $0x38] sm:$0xff]   ;;  %v1359_v52 = vunpack.c.h.bf16 %v1450_v44 }
   0xd   :  { %v114_v50 = vld [vmem:[%s2181_s2 + $0xb0] sm:$0xff]  ;;  %v115_v51 = vld [vmem:[%s2181_s2 + $0xb8] sm:$0xff]  ;;  %v1362_v53 = vunpack.c.l.bf16 %v1451_v49  ;;  %v1452_v54 = vld [vmem:[%s2182_s1 + $0x40] sm:$0xff]   ;;  %v1363_v57 = vunpack.c.h.bf16 %v1451_v49 }
   0xe   :  { %153 = vperm.xlu1 %1650, %v99_v15   ;;  %v920_v55 = vld [vmem:[%s2183_s4] sm:$0xff]  ;;  %v921_v56 = vld [vmem:[%s2183_s4 + $0x8] sm:$0xff]  ;;  %v1366_v58 = vunpack.c.l.bf16 %v1452_v54  ;;  %v922_v60 = vld [vmem:[%s2183_s4 + $0x10] sm:$0xff]  ;;  %v1367_v62 = vunpack.c.h.bf16 %v1452_v54 }
   0xf   :  { %1578 = vmatpush3.bf16.msra.mxu0 %v1442_v11  ;;  %148 = vperm.xlu0 %1649, %v98_v13   ;;  %v1453_v59 = vld [vmem:[%s2182_s1 + $0x48] sm:$0xff]   ;;  %v923_v61 = vld [vmem:[%s2183_s4 + $0x18] sm:$0xff]  ;;  %v1454_v0 = vld [vmem:[%s2182_s1 + $0x50] sm:$0xff]  }
  0x10   :  { %1580 = vmatprep.subr.bf16.mxu0 %v1443_v14  ;;  %v1370_v63 = vunpack.c.l.bf16 %v1453_v59  ;;  %v924_v1 = vld [vmem:[%s2183_s4 + $0x20] sm:$0xff]  ;;  %v925_v2 = vld [vmem:[%s2183_s4 + $0x28] sm:$0xff]  ;;  %v1371_v3 = vunpack.c.h.bf16 %v1453_v59  ;;  %v1374_v4 = vunpack.c.l.bf16 %v1454_v0  ;;  %v1455_v5 = vld [vmem:[%s2182_s1 + $0x58] sm:$0xff]   ;;  %v1375_v8 = vunpack.c.h.bf16 %v1454_v0 }
  0x11   :  { %v926_v6 = vld [vmem:[%s2183_s4 + $0x30] sm:$0xff]  ;;  %v927_v7 = vld [vmem:[%s2183_s4 + $0x38] sm:$0xff]  ;;  %v1378_v9 = vunpack.c.l.bf16 %v1455_v5  ;;  %v928_v10 = vld [vmem:[%s2183_s4 + $0x40] sm:$0xff]  ;;  %v1379_v12 = vunpack.c.h.bf16 %v1455_v5 }
  0x12   :  { %163 = vperm.xlu1 %1650, %v101_v18   ;;  %v929_v11 = vld [vmem:[%s2183_s4 + $0x48] sm:$0xff]  ;;  %v930_v13 = vld [vmem:[%s2183_s4 + $0x50] sm:$0xff]  ;;  %v932_v15 = vld [vmem:[%s2183_s4 + $0x60] sm:$0xff] }
  0x13   :  { %1582 = vmatpush3.bf16.msra.mxu0 %v1443_v14  ;;  %158 = vperm.xlu0 %1649, %v100_v16   ;;  %v931_v14 = vld [vmem:[%s2183_s4 + $0x58] sm:$0xff]  ;;  %v933_v16 = vld [vmem:[%s2183_s4 + $0x68] sm:$0xff]  ;;  %v936_v19 = vld [vmem:[%s2183_s4 + $0x80] sm:$0xff] }
  0x14   :  { %1584 = vmatprep.subr.bf16.mxu0 %v1444_v17  ;;  %v935_v18 = vld [vmem:[%s2183_s4 + $0x78] sm:$0xff]  ;;  %v941_v24 = vld [vmem:[%s2183_s4 + $0xa8] sm:$0xff] }
  0x15   :  { %v1915_v29 = vld [vmem:[%s2184_s3 + $0x48] sm:$0xff] }
  0x16   :  { %173 = vperm.xlu1 %1650, %v103_v21   ;;  %v938_v21 = vld [vmem:[%s2183_s4 + $0x90] sm:$0xff] }
  0x17   :  { %1586 = vmatpush3.bf16.msra.mxu0 %v1444_v17  ;;  %168 = vperm.xlu0 %1649, %v102_v20   ;;  %v934_v17 = vld [vmem:[%s2183_s4 + $0x70] sm:$0xff]  ;;  %v937_v20 = vld [vmem:[%s2183_s4 + $0x88] sm:$0xff] }
  0x1a   :  { %1528 = vmatmul.mubr.msk.f32.vlgmr.msra.gmra.mrb[0].mxu0 %vm236_vm0, %v1335_v22  ;;  %183 = vperm.xlu1 %1650, %v105_v26   ;;  %v939_v22 = vld [vmem:[%s2183_s4 + $0x98] sm:$0xff] }
  0x1b   :  { %1530 = vmatprep.mubr.msk.f32.mxu0 %vm236_vm0, %v1338_v23  ;;  %178 = vperm.xlu0 %1649, %v104_v25   ;;  %v940_v23 = vld [vmem:[%s2183_s4 + $0xa0] sm:$0xff]  ;;  %v942_v25 = vld [vmem:[%s2183_s4 + $0xb0] sm:$0xff]  ;;  %v943_v26 = vld [vmem:[%s2183_s4 + $0xb8] sm:$0xff] }
  0x1e   :  { %1531 = vmatmul.mubr.msk.f32.gmra.mrb[2].mxu0 %vm236_vm0, %v1339_v27  ;;  %193 = vperm.xlu1 %1650, %v107_v31   ;;  %v1652_v27 = vmov 0.0|0.0   ;;  %v609_v31 = vunpack.c.h.bf16 %v1915_v29 }
  0x1f   :  { %1533 = vmatprep.mubr.msk.f32.mxu0 %vm236_vm0, %v1342_v28  ;;  %188 = vperm.xlu0 %1649, %v106_v30   ;;  %v1910_v28 = vld [vmem:[%s2184_s3] sm:$0xff] }
  0x20   :  { %1587 = vmatprep.subr.bf16.mxu0 %v1652_v27  ;;  %1623 = vmatprep.subr.bf16.mxu1 %v1652_v27  ;;  %v591_v30 = vunpack.c.h.bf16 %v1910_v28 }
  0x21   :  { %1245 = vmatprep.mubr.msk.f32.mxu1 %vm638_vm1, %v609_v31 }
  0x22   :  { %1534 = vmatmul.mubr.msk.f32.gmra.mrb[4].mxu0 %vm236_vm0, %v1343_v32  ;;  %203 = vperm.xlu1 %1650, %v109_v36  }
  0x23   :  { %1536 = vmatprep.mubr.msk.f32.mxu0 %vm236_vm0, %v1346_v33  ;;  %198 = vperm.xlu0 %1649, %v108_v35  }
  0x26   :  { %1537 = vmatmul.mubr.msk.f32.gmra.mrb[6].mxu0 %vm236_vm0, %v1347_v37  ;;  %213 = vperm.xlu1 %1650, %v111_v41  }
  0x27   :  { %1539 = vmatprep.mubr.msk.f32.mxu0 %vm236_vm0, %v1350_v38  ;;  %208 = vperm.xlu0 %1649, %v110_v40  }
  0x2a   :  { %1540 = vmatmul.mubr.msk.f32.gmra.mrb[8].mxu0 %vm236_vm0, %v1351_v42  ;;  %223 = vperm.xlu1 %1650, %v113_v46  }
  0x2b   :  { %1542 = vmatprep.mubr.msk.f32.mxu0 %vm236_vm0, %v1354_v43  ;;  %218 = vperm.xlu0 %1649, %v112_v45  }
  0x2e   :  { %1543 = vmatmul.mubr.msk.f32.gmra.mrb[10].mxu0 %vm236_vm0, %v1355_v47  ;;  %233 = vperm.xlu1 %1650, %v115_v51  }
  0x2f   :  { %1545 = vmatprep.mubr.msk.f32.mxu0 %vm236_vm0, %v1358_v48  ;;  %228 = vperm.xlu0 %1649, %v114_v50  }
  0x32   :  { %1546 = vmatmul.mubr.msk.f32.gmra.mrb[12].mxu0 %vm236_vm0, %v1359_v52  ;;  %951 = vperm.xlu1 %1650, %v921_v56  }
  0x33   :  { %1548 = vmatprep.mubr.msk.f32.mxu0 %vm236_vm0, %v1362_v53  ;;  %946 = vperm.xlu0 %1649, %v920_v55  }
  0x36   :  { %1549 = vmatmul.mubr.msk.f32.gmra.mrb[14].mxu0 %vm236_vm0, %v1363_v57  ;;  %961 = vperm.xlu1 %1650, %v923_v61  }
  0x37   :  { %1551 = vmatprep.mubr.msk.f32.mxu0 %vm236_vm0, %v1366_v58  ;;  %956 = vperm.xlu0 %1649, %v922_v60  }
  0x3a   :  { %1552 = vmatmul.mubr.msk.f32.gmra.mrb[16].mxu0 %vm236_vm0, %v1367_v62  ;;  %971 = vperm.xlu1 %1650, %v925_v2  }
  0x3b   :  { %1554 = vmatprep.mubr.msk.f32.mxu0 %vm236_vm0, %v1370_v63  ;;  %966 = vperm.xlu0 %1649, %v924_v1  }
  0x3e   :  { %1555 = vmatmul.mubr.msk.f32.gmra.mrb[18].mxu0 %vm236_vm0, %v1371_v3  ;;  %981 = vperm.xlu1 %1650, %v927_v7  }
  0x3f   :  { %1557 = vmatprep.mubr.msk.f32.mxu0 %vm236_vm0, %v1374_v4  ;;  %976 = vperm.xlu0 %1649, %v926_v6  }
  0x42   :  { %1558 = vmatmul.mubr.msk.f32.gmra.mrb[20].mxu0 %vm236_vm0, %v1375_v8  ;;  %991 = vperm.xlu1 %1650, %v929_v11  }
  0x43   :  { %1560 = vmatprep.mubr.msk.f32.mxu0 %vm236_vm0, %v1378_v9  ;;  %986 = vperm.xlu0 %1649, %v928_v10  }
  0x46   :  { %1561 = vmatmul.mubr.msk.f32.gmra.mrb[22].mxu0 %vm236_vm0, %v1379_v12  ;;  %1001 = vperm.xlu1 %1650, %v931_v14  }
  0x47   :  { %996 = vperm.xlu0 %1649, %v930_v13   ;;  %1236 = vmatprep.mubr.msk.f32.mxu0 %vm638_vm1, %v591_v30 }
  0x4a   :  { %1011 = vperm.xlu1 %1650, %v933_v16  }
  0x4b   :  { %1006 = vperm.xlu0 %1649, %v932_v15  }
  0x4e   :  { %1021 = vperm.xlu1 %1650, %v935_v18  }
  0x4f   :  { %1016 = vperm.xlu0 %1649, %v934_v17  }
  0x52   :  { %1031 = vperm.xlu1 %1650, %v937_v20  }
  0x53   :  { %1026 = vperm.xlu0 %1649, %v936_v19  }
  0x56   :  { %1041 = vperm.xlu1 %1650, %v939_v22  }
  0x57   :  { %1036 = vperm.xlu0 %1649, %v938_v21  }
  0x5a   :  { %1051 = vperm.xlu1 %1650, %v941_v24  }
  0x5b   :  { %1046 = vperm.xlu0 %1649, %v940_v23  }
  0x5e   :  { %1061 = vperm.xlu1 %1650, %v943_v26  }
  0x5f   :  { %1056 = vperm.xlu0 %1649, %v942_v25  }
  0x81   :  { %v129_v32 = vpop.permute.xlu1 %128 }
  0x82   :  { %v119_v33 = vpop.permute.xlu0 %118 }
  0x85   :  { %v134_v34 = vpop.permute.xlu1 %133 }
  0x86   :  { %v124_v35 = vpop.permute.xlu0 %123 }
  0x89   :  { %v144_v36 = vpop.permute.xlu1 %143 }
  0x8a   :  { %v139_v37 = vpop.permute.xlu0 %138 }
  0x8d   :  { %v154_v38 = vpop.permute.xlu1 %153 }
  0x8e   :  { %v149_v39 = vpop.permute.xlu0 %148 }
  0x91   :  { %v164_v43 = vpop.permute.xlu1 %163 }
  0x92   :  { %v159_v45 = vpop.permute.xlu0 %158 }
  0x95   :  { %v174_v56 = vpop.permute.xlu1 %173 }
  0x96   :  { %v169_v59 = vpop.permute.xlu0 %168 }
  0x99   :  { %v184_v8 = vpop.permute.xlu1 %183 }
  0x9a   :  { %v179_v11 = vpop.permute.xlu0 %178 }
  0x9d   :  { %v194_v23 = vpop.permute.xlu1 %193 }
  0x9e   :  { %v189_v26 = vpop.permute.xlu0 %188 }
  0xed   :  { %v1529_v40 = vpop.f32.mrb[0].mxu0 }
  0xee   :  { %v381_v41 = vadd.f32 %v1529_v40, %v124_v35  ;;  %v375_v42 = vpop.f32.mrb[1].mxu0 }
  0xef   :  { %v376_v44 = vadd.f32 %v375_v42, %v119_v33  ;;  %v204_v42 = vpop.permute.xlu1 %203 }
  0xf0   :  { %vm495_vm2 = vcmp.gt.f32.partialorder %v381_v41, 0.0  ;;  %v519_v46 = vmul.f32 0.1, %v381_v41 }
  0xf1   :  { %vm494_vm3 = vcmp.gt.f32.partialorder %v376_v44, 0.0  ;;  %v518_v47 = vmul.f32 0.1, %v376_v44  ;;  %v1532_v48 = vpop.f32.mrb[2].mxu0 }
  0xf2   :  { %v1921_v49 = vsel %vm495_vm2, %v381_v41, %v519_v46  ;;  %v391_v50 = vadd.f32 %v1532_v48, %v134_v34  ;;  %v385_v51 = vpop.f32.mrb[3].mxu0 }
  0xf3   :  { %v1923_v52 = vsel %vm494_vm3, %v376_v44, %v518_v47  ;;  %v386_v53 = vadd.f32 %v385_v51, %v129_v32 }
  0xf4   :  { %v1588_v54 = vpack.c.bf16 %v1921_v49, %v1923_v52  ;;  %vm497_vm4 = vcmp.gt.f32.partialorder %v391_v50, 0.0  ;;  %v521_v55 = vmul.f32 0.1, %v391_v50 }
  0xf5   :  { %vm496_vm5 = vcmp.gt.f32.partialorder %v386_v53, 0.0  ;;  %v520_v57 = vmul.f32 0.1, %v386_v53  ;;  %v1535_v58 = vpop.f32.mrb[4].mxu0 }
  0xf6   :  { %v1927_v60 = vsel %vm497_vm4, %v391_v50, %v521_v55  ;;  %v401_v61 = vadd.f32 %v1535_v58, %v144_v36  ;;  %v395_v62 = vpop.f32.mrb[5].mxu0  ;;  %1589 = vmatpush1.bf16.msra.mxu0 %v1588_v54  ;;  %1635 = vmatpush1.bf16.msra.mxu1 %v1588_v54 }
  0xf7   :  { %v1929_v63 = vsel %vm496_vm5, %v386_v53, %v520_v57  ;;  %v396_v0 = vadd.f32 %v395_v62, %v139_v37  ;;  %1590 = vmatprep.subr.bf16.mxu0 %v1652_v27  ;;  %1624 = vmatprep.subr.bf16.mxu1 %v1652_v27 }
  0xf8   :  { %v1591_v1 = vpack.c.bf16 %v1927_v60, %v1929_v63  ;;  %vm499_vm6 = vcmp.gt.f32.partialorder %v401_v61, 0.0  ;;  %v523_v2 = vmul.f32 0.1, %v401_v61 }
  0xf9   :  { %vm498_vm7 = vcmp.gt.f32.partialorder %v396_v0, 0.0  ;;  %v522_v3 = vmul.f32 0.1, %v396_v0  ;;  %v1538_v4 = vpop.f32.mrb[6].mxu0 }
  0xfa   :  { %v1935_v5 = vsel %vm499_vm6, %v401_v61, %v523_v2  ;;  %v411_v6 = vadd.f32 %v1538_v4, %v154_v38  ;;  %v405_v7 = vpop.f32.mrb[7].mxu0  ;;  %1592 = vmatpush1.bf16.msra.mxu0 %v1591_v1  ;;  %1636 = vmatpush1.bf16.msra.mxu1 %v1591_v1 }
  0xfb   :  { %v1937_v9 = vsel %vm498_vm7, %v396_v0, %v522_v3  ;;  %v406_v10 = vadd.f32 %v405_v7, %v149_v39  ;;  %1593 = vmatprep.subr.bf16.mxu0 %v1652_v27  ;;  %1625 = vmatprep.subr.bf16.mxu1 %v1652_v27 }
  0xfc   :  { %v1594_v12 = vpack.c.bf16 %v1935_v5, %v1937_v9  ;;  %vm501_vm8 = vcmp.gt.f32.partialorder %v411_v6, 0.0  ;;  %v525_v13 = vmul.f32 0.1, %v411_v6 }
  0xfd   :  { %vm500_vm9 = vcmp.gt.f32.partialorder %v406_v10, 0.0  ;;  %v524_v14 = vmul.f32 0.1, %v406_v10  ;;  %v1541_v15 = vpop.f32.mrb[8].mxu0 }
  0xfe   :  { %v1943_v16 = vsel %vm501_vm8, %v411_v6, %v525_v13  ;;  %v421_v17 = vadd.f32 %v1541_v15, %v164_v43  ;;  %v415_v18 = vpop.f32.mrb[9].mxu0  ;;  %1595 = vmatpush1.bf16.msra.mxu0 %v1594_v12  ;;  %1637 = vmatpush1.bf16.msra.mxu1 %v1594_v12 }
  0xff   :  { %v1945_v19 = vsel %vm500_vm9, %v406_v10, %v524_v14  ;;  %v416_v20 = vadd.f32 %v415_v18, %v159_v45  ;;  %1596 = vmatprep.subr.bf16.mxu0 %v1652_v27  ;;  %1626 = vmatprep.subr.bf16.mxu1 %v1652_v27  ;;  %v199_v45 = vpop.permute.xlu0 %198 }
 0x100   :  { %v1597_v21 = vpack.c.bf16 %v1943_v16, %v1945_v19  ;;  %vm503_vm10 = vcmp.gt.f32.partialorder %v421_v17, 0.0  ;;  %v527_v22 = vmul.f32 0.1, %v421_v17 }
 0x101   :  { %vm502_vm11 = vcmp.gt.f32.partialorder %v416_v20, 0.0  ;;  %v526_v24 = vmul.f32 0.1, %v416_v20  ;;  %v1544_v25 = vpop.f32.mrb[10].mxu0 }
 0x102   :  { %v1951_v30 = vsel %vm503_vm10, %v421_v17, %v527_v22  ;;  %v431_v31 = vadd.f32 %v1544_v25, %v174_v56  ;;  %v425_v32 = vpop.f32.mrb[11].mxu0  ;;  %1598 = vmatpush1.bf16.msra.mxu0 %v1597_v21  ;;  %1638 = vmatpush1.bf16.msra.mxu1 %v1597_v21 }
 0x103   :  { %v1953_v33 = vsel %vm502_vm11, %v416_v20, %v526_v24  ;;  %v426_v34 = vadd.f32 %v425_v32, %v169_v59  ;;  %1599 = vmatprep.subr.bf16.mxu0 %v1652_v27  ;;  %1627 = vmatprep.subr.bf16.mxu1 %v1652_v27  ;;  %v214_v59 = vpop.permute.xlu1 %213  ;;  %v209_v0 = vpop.permute.xlu0 %208 }
 0x104   :  { %v1600_v35 = vpack.c.bf16 %v1951_v30, %v1953_v33  ;;  %vm505_vm12 = vcmp.gt.f32.partialorder %v431_v31, 0.0  ;;  %v529_v36 = vmul.f32 0.1, %v431_v31 }
 0x105   :  { %vm504_vm13 = vcmp.gt.f32.partialorder %v426_v34, 0.0  ;;  %v528_v37 = vmul.f32 0.1, %v426_v34  ;;  %v1547_v38 = vpop.f32.mrb[12].mxu0 }
 0x106   :  { %v1959_v39 = vsel %vm505_vm12, %v431_v31, %v529_v36  ;;  %v441_v40 = vadd.f32 %v1547_v38, %v184_v8  ;;  %v435_v41 = vpop.f32.mrb[13].mxu0  ;;  %1601 = vmatpush1.bf16.msra.mxu0 %v1600_v35  ;;  %1639 = vmatpush1.bf16.msra.mxu1 %v1600_v35 }
 0x107   :  { %v1961_v43 = vsel %vm504_vm13, %v426_v34, %v528_v37  ;;  %v436_v44 = vadd.f32 %v435_v41, %v179_v11  ;;  %1602 = vmatprep.subr.bf16.mxu0 %v1652_v27  ;;  %1628 = vmatprep.subr.bf16.mxu1 %v1652_v27  ;;  %v224_v15 = vpop.permute.xlu1 %223  ;;  %v219_v20 = vpop.permute.xlu0 %218 }
 0x108   :  { %v1603_v46 = vpack.c.bf16 %v1959_v39, %v1961_v43  ;;  %vm507_vm14 = vcmp.gt.f32.partialorder %v441_v40, 0.0  ;;  %v531_v47 = vmul.f32 0.1, %v441_v40 }
 0x109   :  { %vm506_vm15 = vcmp.gt.f32.partialorder %v436_v44, 0.0  ;;  %v530_v48 = vmul.f32 0.1, %v436_v44  ;;  %v1550_v50 = vpop.f32.mrb[14].mxu0 }
 0x10a   :  { %v1967_v51 = vsel %vm507_vm14, %v441_v40, %v531_v47  ;;  %v451_v53 = vadd.f32 %v1550_v50, %v194_v23  ;;  %v445_v54 = vpop.f32.mrb[15].mxu0  ;;  %1604 = vmatpush1.bf16.msra.mxu0 %v1603_v46  ;;  %1640 = vmatpush1.bf16.msra.mxu1 %v1603_v46 }
 0x10b   :  { %v1969_v55 = vsel %vm506_vm15, %v436_v44, %v530_v48  ;;  %v446_v56 = vadd.f32 %v445_v54, %v189_v26  ;;  %1605 = vmatprep.subr.bf16.mxu0 %v1652_v27  ;;  %1629 = vmatprep.subr.bf16.mxu1 %v1652_v27  ;;  %v234_v37 = vpop.permute.xlu1 %233  ;;  %v229_v41 = vpop.permute.xlu0 %228 }
 0x10c   :  { %v1606_v57 = vpack.c.bf16 %v1967_v51, %v1969_v55  ;;  %vm509_vm0 = vcmp.gt.f32.partialorder %v451_v53, 0.0  ;;  %v533_v58 = vmul.f32 0.1, %v451_v53 }
 0x10d   :  { %vm508_vm2 = vcmp.gt.f32.partialorder %v446_v56, 0.0  ;;  %v532_v61 = vmul.f32 0.1, %v446_v56  ;;  %v1553_v62 = vpop.f32.mrb[16].mxu0 }
 0x10e   :  { %v1975_v1 = vsel %vm509_vm0, %v451_v53, %v533_v58  ;;  %v461_v2 = vadd.f32 %v1553_v62, %v204_v42  ;;  %v455_v3 = vpop.f32.mrb[17].mxu0  ;;  %1607 = vmatpush1.bf16.msra.mxu0 %v1606_v57  ;;  %1641 = vmatpush1.bf16.msra.mxu1 %v1606_v57  ;;  %v567_v57 = vld [vmem:[%s2184_s3 + $0x8] sm:$0xff]  ;;  %v576_v58 = vld [vmem:[%s2184_s3 + $0x50] sm:$0xff]  ;;  %v608_v62 = vunpack.c.l.bf16 %v1915_v29 }
 0x10f   :  { %v1977_v4 = vsel %vm508_vm2, %v446_v56, %v532_v61  ;;  %v456_v6 = vadd.f32 %v455_v3, %v199_v45  ;;  %1608 = vmatprep.subr.bf16.mxu0 %v1652_v27  ;;  %1630 = vmatprep.subr.bf16.mxu1 %v1652_v27  ;;  %v590_v61 = vunpack.c.l.bf16 %v1910_v28  ;;  %v577_v3 = vld [vmem:[%s2184_s3 + $0x58] sm:$0xff] }
 0x110   :  { %v1609_v7 = vpack.c.bf16 %v1975_v1, %v1977_v4  ;;  %vm511_vm3 = vcmp.gt.f32.partialorder %v461_v2, 0.0  ;;  %v535_v8 = vmul.f32 0.1, %v461_v2  ;;  %v613_v29 = vunpack.c.h.bf16 %v577_v3 }
 0x111   :  { %vm510_vm4 = vcmp.gt.f32.partialorder %v456_v6, 0.0  ;;  %v534_v10 = vmul.f32 0.1, %v456_v6  ;;  %v1556_v11 = vpop.f32.mrb[18].mxu0 }
 0x112   :  { %v1983_v12 = vsel %vm511_vm3, %v461_v2, %v535_v8  ;;  %v471_v13 = vadd.f32 %v1556_v11, %v214_v59  ;;  %v465_v14 = vpop.f32.mrb[19].mxu0  ;;  %1610 = vmatpush1.bf16.msra.mxu0 %v1609_v7  ;;  %1642 = vmatpush1.bf16.msra.mxu1 %v1609_v7  ;;  %v611_v2 = vunpack.c.h.bf16 %v576_v58  ;;  %v610_v7 = vunpack.c.l.bf16 %v576_v58  ;;  %v569_v8 = vld [vmem:[%s2184_s3 + $0x18] sm:$0xff] }
 0x113   :  { %v1985_v17 = vsel %vm510_vm4, %v456_v6, %v534_v10  ;;  %v466_v18 = vadd.f32 %v465_v14, %v209_v0  ;;  %1611 = vmatprep.subr.bf16.mxu0 %v1652_v27  ;;  %1631 = vmatprep.subr.bf16.mxu1 %v1652_v27  ;;  %v593_v0 = vunpack.c.h.bf16 %v567_v57  ;;  %v592_v6 = vunpack.c.l.bf16 %v567_v57  ;;  %v578_v10 = vld [vmem:[%s2184_s3 + $0x60] sm:$0xff] }
 0x114   :  { %v1612_v21 = vpack.c.bf16 %v1983_v12, %v1985_v17  ;;  %vm513_vm5 = vcmp.gt.f32.partialorder %v471_v13, 0.0  ;;  %v537_v22 = vmul.f32 0.1, %v471_v13  ;;  %v597_v14 = vunpack.c.h.bf16 %v569_v8 }
 0x115   :  { %vm512_vm6 = vcmp.gt.f32.partialorder %v466_v18, 0.0  ;;  %v536_v23 = vmul.f32 0.1, %v466_v18  ;;  %v1559_v24 = vpop.f32.mrb[20].mxu0 }
 0x116   :  { %v1991_v25 = vsel %vm513_vm5, %v471_v13, %v537_v22  ;;  %v481_v26 = vadd.f32 %v1559_v24, %v224_v15  ;;  %v475_v31 = vpop.f32.mrb[21].mxu0  ;;  %1613 = vmatpush1.bf16.msra.mxu0 %v1612_v21  ;;  %1643 = vmatpush1.bf16.msra.mxu1 %v1612_v21  ;;  %v612_v13 = vunpack.c.l.bf16 %v577_v3  ;;  %v615_v15 = vunpack.c.h.bf16 %v578_v10 }
 0x117   :  { %v1993_v32 = vsel %vm512_vm6, %v466_v18, %v536_v23  ;;  %v476_v34 = vadd.f32 %v475_v31, %v219_v20  ;;  %1614 = vmatprep.subr.bf16.mxu0 %v1652_v27  ;;  %1632 = vmatprep.subr.bf16.mxu1 %v1652_v27  ;;  %v570_v18 = vld [vmem:[%s2184_s3 + $0x20] sm:$0xff]  ;;  %v579_v20 = vld [vmem:[%s2184_s3 + $0x68] sm:$0xff]  ;;  %v596_v21 = vunpack.c.l.bf16 %v569_v8  ;;  %v614_v22 = vunpack.c.l.bf16 %v578_v10  ;;  %v580_v31 = vld [vmem:[%s2184_s3 + $0x70] sm:$0xff] }
 0x118   :  { %v1615_v35 = vpack.c.bf16 %v1991_v25, %v1993_v32  ;;  %vm515_vm7 = vcmp.gt.f32.partialorder %v481_v26, 0.0  ;;  %v539_v36 = vmul.f32 0.1, %v481_v26  ;;  %v599_v23 = vunpack.c.h.bf16 %v570_v18  ;;  %v585_v8 = vld [vmem:[%s2184_s3 + $0x98] sm:$0xff] }
 0x119   :  { %vm514_vm8 = vcmp.gt.f32.partialorder %v476_v34, 0.0  ;;  %v538_v38 = vmul.f32 0.1, %v476_v34  ;;  %v1562_v40 = vpop.f32.mrb[22].mxu0  ;;  %v617_v24 = vunpack.c.h.bf16 %v579_v20 }
 0x11a   :  { %v1999_v42 = vsel %vm515_vm7, %v481_v26, %v539_v36  ;;  %v491_v44 = vadd.f32 %v1562_v40, %v234_v37  ;;  %v485_v45 = vpop.f32.mrb[23].mxu0  ;;  %1616 = vmatpush1.bf16.msra.mxu0 %v1615_v35  ;;  %1644 = vmatpush1.bf16.msra.mxu1 %v1615_v35  ;;  %v571_v26 = vld [vmem:[%s2184_s3 + $0x28] sm:$0xff]  ;;  %v616_v35 = vunpack.c.l.bf16 %v579_v20  ;;  %v619_v37 = vunpack.c.h.bf16 %v580_v31  ;;  %v581_v40 = vld [vmem:[%s2184_s3 + $0x78] sm:$0xff] }
 0x11b   :  { %v2001_v46 = vsel %vm514_vm8, %v476_v34, %v538_v38  ;;  %v486_v47 = vadd.f32 %v485_v45, %v229_v41  ;;  %1617 = vmatprep.subr.bf16.mxu0 %v1652_v27  ;;  %1633 = vmatprep.subr.bf16.mxu1 %v1652_v27  ;;  %v598_v34 = vunpack.c.l.bf16 %v570_v18  ;;  %v601_v36 = vunpack.c.h.bf16 %v571_v26  ;;  %v572_v38 = vld [vmem:[%s2184_s3 + $0x30] sm:$0xff]  ;;  %v587_v18 = vld [vmem:[%s2184_s3 + $0xa8] sm:$0xff] }
 0x11c   :  { %v1618_v48 = vpack.c.bf16 %v1999_v42, %v2001_v46  ;;  %vm517_vm9 = vcmp.gt.f32.partialorder %v491_v44, 0.0  ;;  %v541_v50 = vmul.f32 0.1, %v491_v44  ;;  %v600_v41 = vunpack.c.l.bf16 %v571_v26  ;;  %v589_v26 = vld [vmem:[%s2184_s3 + $0xb8] sm:$0xff] }
 0x11d   :  { %vm516_vm10 = vcmp.gt.f32.partialorder %v486_v47, 0.0  ;;  %v540_v53 = vmul.f32 0.1, %v486_v47  ;;  %v603_v45 = vunpack.c.h.bf16 %v572_v38  ;;  %v620_v57 = vunpack.c.l.bf16 %v581_v40 }
 0x11e   :  { %v2007_v54 = vsel %vm517_vm9, %v491_v44, %v541_v50  ;;  %1619 = vmatpush1.bf16.msra.mxu0 %v1618_v48  ;;  %1645 = vmatpush1.bf16.msra.mxu1 %v1618_v48  ;;  %v618_v44 = vunpack.c.l.bf16 %v580_v31  ;;  %v573_v48 = vld [vmem:[%s2184_s3 + $0x38] sm:$0xff]  ;;  %v582_v50 = vld [vmem:[%s2184_s3 + $0x80] sm:$0xff] }
 0x11f   :  { %v2009_v56 = vsel %vm516_vm10, %v486_v47, %v540_v53  ;;  %1620 = vmatprep.subr.bf16.mxu0 %v1652_v27  ;;  %1634 = vmatprep.subr.bf16.mxu1 %v1652_v27  ;;  %v568_v27 = vld [vmem:[%s2184_s3 + $0x10] sm:$0xff]  ;;  %v621_v47 = vunpack.c.h.bf16 %v581_v40  ;;  %v602_v53 = vunpack.c.l.bf16 %v572_v38  ;;  %v605_v58 = vunpack.c.h.bf16 %v573_v48 }
 0x120   :  { %v1621_v59 = vpack.c.bf16 %v2007_v54, %v2009_v56  ;;  %v595_v28 = vunpack.c.h.bf16 %v568_v27  ;;  %v594_v11 = vunpack.c.l.bf16 %v568_v27 }
 0x122   :  { %1622 = vmatpush1.bf16.msra.mxu0 %v1621_v59  ;;  %1646 = vmatpush1.bf16.msra.mxu1 %v1621_v59  ;;  %v623_v59 = vunpack.c.h.bf16 %v582_v50 }
 0x125   :  { %776 = vmatmul.mubr.f32.vlgmr.msra.gmra.mrb[24].mxu0 %v590_v61  ;;  %821 = vmatmul.mubr.f32.vlgmr.msra.gmra.mrb[0].mxu1 %v608_v62  ;;  %v574_v61 = vld [vmem:[%s2184_s3 + $0x40] sm:$0xff]  ;;  %v583_v62 = vld [vmem:[%s2184_s3 + $0x88] sm:$0xff] }
 0x126   :  { %1237 = vmatprep.mubr.msk.f32.mxu0 %vm638_vm1, %v593_v0  ;;  %1246 = vmatprep.mubr.msk.f32.mxu1 %vm638_vm1, %v611_v2  ;;  %v604_v0 = vunpack.c.l.bf16 %v573_v48  ;;  %v622_v2 = vunpack.c.l.bf16 %v582_v50  ;;  %v607_v27 = vunpack.c.h.bf16 %v574_v61  ;;  %v625_v3 = vunpack.c.h.bf16 %v583_v62 }
 0x129   :  { %781 = vmatmul.mubr.f32.gmra.mrb[26].mxu0 %v592_v6  ;;  %826 = vmatmul.mubr.f32.gmra.mrb[2].mxu1 %v610_v7  ;;  %v584_v6 = vld [vmem:[%s2184_s3 + $0x90] sm:$0xff]  ;;  %v606_v7 = vunpack.c.l.bf16 %v574_v61 }
 0x12a   :  { %1238 = vmatprep.mubr.msk.f32.mxu0 %vm638_vm1, %v595_v28  ;;  %1247 = vmatprep.mubr.msk.f32.mxu1 %vm638_vm1, %v613_v29  ;;  %v624_v28 = vunpack.c.l.bf16 %v583_v62  ;;  %v627_v29 = vunpack.c.h.bf16 %v584_v6  ;;  %v626_v10 = vunpack.c.l.bf16 %v584_v6 }
 0x12d   :  { %786 = vmatmul.mubr.f32.gmra.mrb[28].mxu0 %v594_v11  ;;  %831 = vmatmul.mubr.f32.gmra.mrb[4].mxu1 %v612_v13  ;;  %v629_v11 = vunpack.c.h.bf16 %v585_v8  ;;  %v586_v13 = vld [vmem:[%s2184_s3 + $0xa0] sm:$0xff] }
 0x12e   :  { %1239 = vmatprep.mubr.msk.f32.mxu0 %vm638_vm1, %v597_v14  ;;  %1248 = vmatprep.mubr.msk.f32.mxu1 %vm638_vm1, %v615_v15  ;;  %v628_v14 = vunpack.c.l.bf16 %v585_v8  ;;  %v631_v15 = vunpack.c.h.bf16 %v586_v13  ;;  %v630_v20 = vunpack.c.l.bf16 %v586_v13 }
 0x131   :  { %791 = vmatmul.mubr.f32.gmra.mrb[30].mxu0 %v596_v21  ;;  %836 = vmatmul.mubr.f32.gmra.mrb[6].mxu1 %v614_v22  ;;  %v633_v21 = vunpack.c.h.bf16 %v587_v18  ;;  %v588_v22 = vld [vmem:[%s2184_s3 + $0xb0] sm:$0xff] }
 0x132   :  { %1240 = vmatprep.mubr.msk.f32.mxu0 %vm638_vm1, %v599_v23  ;;  %1249 = vmatprep.mubr.msk.f32.mxu1 %vm638_vm1, %v617_v24  ;;  %v632_v23 = vunpack.c.l.bf16 %v587_v18  ;;  %v635_v24 = vunpack.c.h.bf16 %v588_v22  ;;  %v634_v31 = vunpack.c.l.bf16 %v588_v22 }
 0x135   :  { %796 = vmatmul.mubr.f32.gmra.mrb[32].mxu0 %v598_v34  ;;  %841 = vmatmul.mubr.f32.gmra.mrb[8].mxu1 %v616_v35  ;;  %v637_v34 = vunpack.c.h.bf16 %v589_v26  ;;  %v636_v35 = vunpack.c.l.bf16 %v589_v26 }
 0x136   :  { %1241 = vmatprep.mubr.msk.f32.mxu0 %vm638_vm1, %v601_v36  ;;  %1250 = vmatprep.mubr.msk.f32.mxu1 %vm638_vm1, %v619_v37  ;;  %v947_v36 = vpop.permute.xlu0 %946  ;;  %v952_v37 = vpop.permute.xlu1 %951 }
 0x139   :  { %801 = vmatmul.mubr.f32.gmra.mrb[34].mxu0 %v600_v41  ;;  %846 = vmatmul.mubr.f32.gmra.mrb[10].mxu1 %v618_v44 }
 0x13a   :  { %1242 = vmatprep.mubr.msk.f32.mxu0 %vm638_vm1, %v603_v45  ;;  %1251 = vmatprep.mubr.msk.f32.mxu1 %vm638_vm1, %v621_v47  ;;  %v957_v38 = vpop.permute.xlu0 %956  ;;  %v962_v40 = vpop.permute.xlu1 %961 }
 0x13d   :  { %806 = vmatmul.mubr.f32.gmra.mrb[36].mxu0 %v602_v53  ;;  %851 = vmatmul.mubr.f32.gmra.mrb[12].mxu1 %v620_v57 }
 0x13e   :  { %1243 = vmatprep.mubr.msk.f32.mxu0 %vm638_vm1, %v605_v58  ;;  %1252 = vmatprep.mubr.msk.f32.mxu1 %vm638_vm1, %v623_v59  ;;  %v967_v41 = vpop.permute.xlu0 %966  ;;  %v972_v44 = vpop.permute.xlu1 %971 }
 0x141   :  { %811 = vmatmul.mubr.f32.gmra.mrb[38].mxu0 %v604_v0  ;;  %856 = vmatmul.mubr.f32.gmra.mrb[14].mxu1 %v622_v2 }
 0x142   :  { %1244 = vmatprep.mubr.msk.f32.mxu0 %vm638_vm1, %v607_v27  ;;  %1253 = vmatprep.mubr.msk.f32.mxu1 %vm638_vm1, %v625_v3  ;;  %v2105_v45 = vpop.permute.xlu0 %976  ;;  %v2107_v47 = vpop.permute.xlu1 %981 }
 0x145   :  { %816 = vmatmul.mubr.f32.gmra.mrb[40].mxu0 %v606_v7  ;;  %861 = vmatmul.mubr.f32.gmra.mrb[16].mxu1 %v624_v28 }
 0x146   :  { %1254 = vmatprep.mubr.msk.f32.mxu1 %vm638_vm1, %v627_v29  ;;  %v2111_v58 = vpop.permute.xlu0 %986  ;;  %v2113_v59 = vpop.permute.xlu1 %991 }
 0x149   :  { %866 = vmatmul.mubr.f32.gmra.mrb[18].mxu1 %v626_v10 }
 0x14a   :  { %1255 = vmatprep.mubr.msk.f32.mxu1 %vm638_vm1, %v629_v11  ;;  %v1002_v18 = vpop.permute.xlu1 %1001 }
 0x14d   :  { %871 = vmatmul.mubr.f32.gmra.mrb[20].mxu1 %v628_v14 }
 0x14e   :  { %1256 = vmatprep.mubr.msk.f32.mxu1 %vm638_vm1, %v631_v15  ;;  %v997_v15 = vpop.permute.xlu0 %996 }
 0x151   :  { %876 = vmatmul.mubr.f32.gmra.mrb[22].mxu1 %v630_v20 }
 0x152   :  { %1257 = vmatprep.mubr.msk.f32.mxu1 %vm638_vm1, %v633_v21 }
 0x155   :  { %881 = vmatmul.mubr.f32.gmra.mrb[24].mxu1 %v632_v23 }
 0x156   :  { %1258 = vmatprep.mubr.msk.f32.mxu1 %vm638_vm1, %v635_v24 }
 0x159   :  { %886 = vmatmul.mubr.f32.gmra.mrb[26].mxu1 %v634_v31 }
 0x15a   :  { %1259 = vmatprep.mubr.msk.f32.mxu1 %vm638_vm1, %v637_v34 }
 0x15d   :  { %891 = vmatmul.mubr.f32.gmra.mrb[28].mxu1 %v636_v35 }
 0x1f8   :  { %v777_v48 = vpop.f32.mrb[24].mxu0  ;;  %v2109_v50 = vpop.f32.mrb[0].mxu1 }
 0x1f9   :  { %v824_v53 = vpop.f32.mrb[1].mxu1  ;;  %v779_v57 = vpop.f32.mrb[25].mxu0  ;;  %v896_v61 = vadd.f32 %v777_v48, %v1923_v52 }
 0x1fa   :  { %v1007_v57 = vpop.permute.xlu0 %1006 }
 0x1fb   :  { %v1064_v6 = vadd.f32 %v947_v36, %v896_v61  ;;  %v1012_v61 = vpop.permute.xlu1 %1011 }
 0x1fc   :  { %v782_v62 = vpop.f32.mrb[26].mxu0  ;;  %v827_v0 = vpop.f32.mrb[2].mxu1 }
 0x1fd   :  { %v897_v2 = vadd.f32 %v782_v62, %v1921_v49  ;;  %v829_v27 = vpop.f32.mrb[3].mxu1  ;;  %v784_v3 = vpop.f32.mrb[27].mxu0  ;;  %v906_v28 = vadd.f32 %v827_v0, %v1961_v43 }
 0x1ff   :  { %v1065_v7 = vadd.f32 %v952_v37, %v897_v2  ;;  %v1074_v49 = vadd.f32 %v997_v15, %v906_v28 }
 0x200   :  { %v787_v29 = vpop.f32.mrb[28].mxu0  ;;  %v832_v8 = vpop.f32.mrb[4].mxu1 }
 0x201   :  { %v1383_v10 = vpack.c.bf16 %v1065_v7, %v1064_v6  ;;  %v907_v11 = vadd.f32 %v832_v8, %v1959_v39  ;;  %v834_v13 = vpop.f32.mrb[5].mxu1  ;;  %v789_v14 = vpop.f32.mrb[29].mxu0  ;;  %v898_v52 = vadd.f32 %v787_v29, %v1929_v63 }
 0x202   :  { %v1017_v13 = vpop.permute.xlu0 %1016  ;;  %v1022_v14 = vpop.permute.xlu1 %1021 }
 0x203   :  { %1384 = vst [vmem:[%s2185_s5] sm:$0xff] %v1383_v10   ;;  %v1075_v20 = vadd.f32 %v1002_v18, %v907_v11  ;;  %v1066_v39 = vadd.f32 %v957_v38, %v898_v52 }
 0x204   :  { %v792_v21 = vpop.f32.mrb[30].mxu0  ;;  %v837_v22 = vpop.f32.mrb[6].mxu1 }
 0x205   :  { %v1408_v43 = vpack.c.bf16 %v1075_v20, %v1074_v49  ;;  %v899_v23 = vadd.f32 %v792_v21, %v1927_v60  ;;  %v839_v24 = vpop.f32.mrb[7].mxu1  ;;  %v794_v26 = vpop.f32.mrb[31].mxu0  ;;  %v908_v34 = vadd.f32 %v837_v22, %v1969_v55 }
 0x207   :  { %1460 = vst [vmem:[%s2185_s5 + $0x28] sm:$0xff] %v1408_v43   ;;  %v1067_v31 = vadd.f32 %v962_v40, %v899_v23  ;;  %v1076_v60 = vadd.f32 %v1007_v57, %v908_v34 }
 0x208   :  { %v797_v35 = vpop.f32.mrb[32].mxu0  ;;  %v842_v36 = vpop.f32.mrb[8].mxu1 }
 0x209   :  { %v1388_v37 = vpack.c.bf16 %v1067_v31, %v1066_v39  ;;  %v909_v63 = vadd.f32 %v842_v36, %v1967_v51  ;;  %v844_v48 = vpop.f32.mrb[9].mxu1  ;;  %v799_v53 = vpop.f32.mrb[33].mxu0  ;;  %v900_v38 = vadd.f32 %v797_v35, %v1937_v9 }
 0x20b   :  { %1456 = vst [vmem:[%s2185_s5 + $0x8] sm:$0xff] %v1388_v37   ;;  %v1077_v62 = vadd.f32 %v1012_v61, %v909_v63  ;;  %v1068_v51 = vadd.f32 %v967_v41, %v900_v38 }
 0x20c   :  { %v802_v40 = vpop.f32.mrb[34].mxu0  ;;  %v847_v0 = vpop.f32.mrb[10].mxu1 }
 0x20d   :  { %v1413_v55 = vpack.c.bf16 %v1077_v62, %v1076_v60  ;;  %v901_v2 = vadd.f32 %v802_v40, %v1935_v5  ;;  %v849_v27 = vpop.f32.mrb[11].mxu1  ;;  %v804_v3 = vpop.f32.mrb[35].mxu0  ;;  %v910_v7 = vadd.f32 %v847_v0, %v1977_v4 }
 0x20f   :  { %1461 = vst [vmem:[%s2185_s5 + $0x30] sm:$0xff] %v1413_v55   ;;  %v1069_v6 = vadd.f32 %v972_v44, %v901_v2  ;;  %v1078_v5 = vadd.f32 %v1017_v13, %v910_v7 }
 0x210   :  { %v807_v28 = vpop.f32.mrb[36].mxu0  ;;  %v852_v29 = vpop.f32.mrb[12].mxu1 }
 0x211   :  { %v1393_v8 = vpack.c.bf16 %v1069_v6, %v1068_v51  ;;  %v911_v9 = vadd.f32 %v852_v29, %v1975_v1  ;;  %v854_v10 = vpop.f32.mrb[13].mxu1  ;;  %v809_v11 = vpop.f32.mrb[37].mxu0  ;;  %v902_v41 = vadd.f32 %v807_v28, %v1945_v19  ;;  %v905_v1 = vadd.f32 %v2109_v50, %v1951_v30 }
 0x212   :  { %v1027_v30 = vpop.permute.xlu0 %1026  ;;  %v1032_v50 = vpop.permute.xlu1 %1031 }
 0x213   :  { %1457 = vst [vmem:[%s2185_s5 + $0x10] sm:$0xff] %v1393_v8   ;;  %v1079_v15 = vadd.f32 %v1022_v14, %v911_v9  ;;  %v1070_v21 = vadd.f32 %v2105_v45, %v902_v41  ;;  %v1073_v45 = vadd.f32 %v2113_v59, %v905_v1 }
 0x214   :  { %v812_v44 = vpop.f32.mrb[38].mxu0  ;;  %v857_v18 = vpop.f32.mrb[14].mxu1 }
 0x215   :  { %v1418_v4 = vpack.c.bf16 %v1079_v15, %v1078_v5  ;;  %v903_v49 = vadd.f32 %v812_v44, %v1943_v16  ;;  %v859_v52 = vpop.f32.mrb[15].mxu1  ;;  %v814_v20 = vpop.f32.mrb[39].mxu0  ;;  %v912_v19 = vadd.f32 %v857_v18, %v1985_v17 }
 0x216   :  { %v1042_v53 = vpop.permute.xlu1 %1041 }
 0x217   :  { %1462 = vst [vmem:[%s2185_s5 + $0x38] sm:$0xff] %v1418_v4   ;;  %v1071_v22 = vadd.f32 %v2107_v47, %v903_v49  ;;  %v1080_v47 = vadd.f32 %v1027_v30, %v912_v19 }
 0x218   :  { %v817_v43 = vpop.f32.mrb[40].mxu0  ;;  %v862_v23 = vpop.f32.mrb[16].mxu1 }
 0x219   :  { %v1398_v24 = vpack.c.bf16 %v1071_v22, %v1070_v21  ;;  %v904_v16 = vadd.f32 %v817_v43, %v1953_v33  ;;  %v913_v26 = vadd.f32 %v862_v23, %v1983_v12  ;;  %v864_v39 = vpop.f32.mrb[17].mxu1  ;;  %v819_v31 = vpop.f32.mrb[41].mxu0 }
 0x21b   :  { %1458 = vst [vmem:[%s2185_s5 + $0x18] sm:$0xff] %v1398_v24   ;;  %v1072_v17 = vadd.f32 %v2111_v58, %v904_v16  ;;  %v1081_v34 = vadd.f32 %v1032_v50, %v913_v26  ;;  %v1037_v58 = vpop.permute.xlu0 %1036 }
 0x21c   :  { %v867_v35 = vpop.f32.mrb[18].mxu1 }
 0x21d   :  { %v1403_v36 = vpack.c.bf16 %v1073_v45, %v1072_v17  ;;  %v1423_v37 = vpack.c.bf16 %v1081_v34, %v1080_v47  ;;  %v869_v33 = vpop.f32.mrb[19].mxu1  ;;  %v914_v12 = vadd.f32 %v867_v35, %v1993_v32 }
 0x21f   :  { %1459 = vst [vmem:[%s2185_s5 + $0x20] sm:$0xff] %v1403_v36   ;;  %1463 = vst [vmem:[%s2185_s5 + $0x40] sm:$0xff] %v1423_v37   ;;  %v1082_v57 = vadd.f32 %v1037_v58, %v914_v12  ;;  %v1047_v2 = vpop.permute.xlu0 %1046 }
 0x220   :  { %v872_v59 = vpop.f32.mrb[20].mxu1 }
 0x221   :  { %v915_v63 = vadd.f32 %v872_v59, %v1991_v25  ;;  %v874_v48 = vpop.f32.mrb[21].mxu1  ;;  %v1052_v25 = vpop.permute.xlu1 %1051 }
 0x223   :  { %v1083_v61 = vadd.f32 %v1042_v53, %v915_v63  ;;  %v1057_v9 = vpop.permute.xlu0 %1056 }
 0x224   :  { %v877_v60 = vpop.f32.mrb[22].mxu1 }
 0x225   :  { %v1428_v38 = vpack.c.bf16 %v1083_v61, %v1082_v57  ;;  %v879_v62 = vpop.f32.mrb[23].mxu1  ;;  %v916_v40 = vadd.f32 %v877_v60, %v2001_v46 }
 0x227   :  { %1464 = vst [vmem:[%s2185_s5 + $0x48] sm:$0xff] %v1428_v38   ;;  %v1084_v27 = vadd.f32 %v1047_v2, %v916_v40 }
 0x228   :  { %v882_v0 = vpop.f32.mrb[24].mxu1 }
 0x229   :  { %v917_v32 = vadd.f32 %v882_v0, %v1999_v42  ;;  %v884_v55 = vpop.f32.mrb[25].mxu1  ;;  %v1062_v42 = vpop.permute.xlu1 %1061 }
 0x22b   :  { %v1085_v3 = vadd.f32 %v1052_v25, %v917_v32 }
 0x22c   :  { %v887_v51 = vpop.f32.mrb[26].mxu1 }
 0x22d   :  { %v1433_v6 = vpack.c.bf16 %v1085_v3, %v1084_v27  ;;  %v889_v7 = vpop.f32.mrb[27].mxu1  ;;  %v918_v28 = vadd.f32 %v887_v51, %v2009_v56 }
 0x22f   :  { %1465 = vst [vmem:[%s2185_s5 + $0x50] sm:$0xff] %v1433_v6   ;;  %v1086_v10 = vadd.f32 %v1057_v9, %v918_v28 }
 0x230   :  { %v892_v29 = vpop.f32.mrb[28].mxu1 }
 0x231   :  { %v919_v46 = vadd.f32 %v892_v29, %v2007_v54  ;;  %v894_v8 = vpop.f32.mrb[29].mxu1 }
 0x233   :  { %v1087_v11 = vadd.f32 %v1062_v42, %v919_v46 }
 0x235   :  { %v1438_v13 = vpack.c.bf16 %v1087_v11, %v1086_v10 }
 0x237   :  { %1466 = vst [vmem:[%s2185_s5 + $0x58] sm:$0xff] %v1438_v13  }

// kernel: forward.13
= control target key start
LH: loop header
LB: loop body
LE: loop exit
PB: predicated region body
PF: predicated region fallthrough
CT: control target
= control target key end

     0   :  { %v1196_v0 = vmov 0.0|0.0   ;;  %v1197_v2 = vmov 0   ;;  %vm212_vm0 = vcmask 523264   ;;  %s1556_s0 = inlined_call_operand.vmem [shape: bf16[192,128], index: 0, kind: input, shape index: {}]   ;;  %s1557_s1 = inlined_call_operand.vmem [shape: bf16[128,192], index: 1, kind: input, shape index: {}]   ;;  %s1558_s2 = inlined_call_operand.vmem [shape: f32[128,1], index: 2, kind: input, shape index: {}]   ;;  %s1559_s4 = inlined_call_operand.vmem [shape: f32[128,1], index: 4, kind: input, shape index: {}]   ;;  %s1560_s3 = inlined_call_operand.vmem [shape: bf16[128,128], index: 3, kind: input, shape index: {}]   ;;  %s1561_s5 = inlined_call_operand.vmem [shape: bf16[128,128], index: 5, kind: output, shape index: {}]  }
   0x1   :  { %1124 = vmatprep.subr.bf16.mxu0 %v1196_v0  ;;  %v892_v1 = vld [vmem:[%s1556_s0] sm:$0xff]   ;;  %1194 = vset.pattern.permute.xlu0 %v1197_v2  ;;  %v1011_v3 = vld [vmem:[%s1556_s0 + $0x8] sm:$0xff]   ;;  %v1012_v6 = vld [vmem:[%s1556_s0 + $0x10] sm:$0xff]  }
   0x2   :  { %1126 = vmatpush1.bf16.msra.mxu0 %v892_v1  ;;  %1195 = vset.pattern.permute.xlu1 %v1197_v2  ;;  %v1239_v4 = vld [vmem:[%s1557_s1] sm:$0xff]  ;;  %v118_v8 = vld [vmem:[%s1558_s2 + $0x10] sm:$0xff]  ;;  %v1013_v9 = vld [vmem:[%s1556_s0 + $0x18] sm:$0xff]  }
   0x3   :  { %1127 = vmatprep.subr.bf16.mxu0 %v1196_v0  ;;  %v85_v5 = vunpack.c.h.bf16 %v1239_v4  ;;  %v116_v7 = vld [vmem:[%s1558_s2] sm:$0xff]  ;;  %144 = vperm.xlu1 %1195, %v118_v8   ;;  %v117_v10 = vld [vmem:[%s1558_s2 + $0x8] sm:$0xff]  ;;  %v119_v11 = vld [vmem:[%s1558_s2 + $0x18] sm:$0xff]  ;;  %v84_v37 = vunpack.c.l.bf16 %v1239_v4 }
   0x4   :  { %134 = vperm.xlu0 %1194, %v116_v7   ;;  %v1014_v12 = vld [vmem:[%s1556_s0 + $0x20] sm:$0xff]   ;;  %v121_v14 = vld [vmem:[%s1558_s2 + $0x28] sm:$0xff]  ;;  %v122_v16 = vld [vmem:[%s1558_s2 + $0x30] sm:$0xff] }
   0x5   :  { %843 = vmatprep.mubr.msk.f32.mxu0 %vm212_vm0, %v85_v5  ;;  %v120_v13 = vld [vmem:[%s1558_s2 + $0x20] sm:$0xff]  ;;  %v1015_v15 = vld [vmem:[%s1556_s0 + $0x28] sm:$0xff]   ;;  %v123_v17 = vld [vmem:[%s1558_s2 + $0x38] sm:$0xff] }
   0x6   :  { %1129 = vmatpush1.bf16.msra.mxu0 %v1011_v3  ;;  %v1016_v18 = vld [vmem:[%s1556_s0 + $0x30] sm:$0xff]   ;;  %v124_v19 = vld [vmem:[%s1558_s2 + $0x40] sm:$0xff]  ;;  %v125_v20 = vld [vmem:[%s1558_s2 + $0x48] sm:$0xff] }
   0x7   :  { %1130 = vmatprep.subr.bf16.mxu0 %v1196_v0  ;;  %149 = vperm.xlu1 %1195, %v119_v11   ;;  %v1017_v21 = vld [vmem:[%s1556_s0 + $0x38] sm:$0xff]   ;;  %v126_v22 = vld [vmem:[%s1558_s2 + $0x50] sm:$0xff]  ;;  %v1018_v24 = vld [vmem:[%s1556_s0 + $0x40] sm:$0xff]  }
   0x8   :  { %139 = vperm.xlu0 %1194, %v117_v10   ;;  %v127_v23 = vld [vmem:[%s1558_s2 + $0x58] sm:$0xff]  ;;  %v128_v25 = vld [vmem:[%s1558_s2 + $0x60] sm:$0xff]  ;;  %v129_v26 = vld [vmem:[%s1558_s2 + $0x68] sm:$0xff] }
   0x9   :  { %v1019_v27 = vld [vmem:[%s1556_s0 + $0x48] sm:$0xff]   ;;  %v130_v28 = vld [vmem:[%s1558_s2 + $0x70] sm:$0xff]  ;;  %v131_v29 = vld [vmem:[%s1558_s2 + $0x78] sm:$0xff] }
   0xa   :  { %1132 = vmatpush1.bf16.msra.mxu0 %v1012_v6  ;;  %v1020_v30 = vld [vmem:[%s1556_s0 + $0x50] sm:$0xff]   ;;  %v647_v31 = vld [vmem:[%s1559_s4] sm:$0xff]  ;;  %v648_v32 = vld [vmem:[%s1559_s4 + $0x8] sm:$0xff] }
   0xb   :  { %1133 = vmatprep.subr.bf16.mxu0 %v1196_v0  ;;  %159 = vperm.xlu1 %1195, %v121_v14   ;;  %v1021_v33 = vld [vmem:[%s1556_s0 + $0x58] sm:$0xff]   ;;  %v69_v34 = vld [vmem:[%s1557_s1 + $0x8] sm:$0xff]  ;;  %v649_v35 = vld [vmem:[%s1559_s4 + $0x10] sm:$0xff] }
   0xc   :  { %154 = vperm.xlu0 %1194, %v120_v13   ;;  %v650_v36 = vld [vmem:[%s1559_s4 + $0x18] sm:$0xff]  ;;  %v87_v38 = vunpack.c.h.bf16 %v69_v34  ;;  %v70_v39 = vld [vmem:[%s1557_s1 + $0x10] sm:$0xff]  ;;  %v651_v40 = vld [vmem:[%s1559_s4 + $0x20] sm:$0xff]  ;;  %v86_v42 = vunpack.c.l.bf16 %v69_v34 }
   0xd   :  { %v652_v41 = vld [vmem:[%s1559_s4 + $0x28] sm:$0xff]  ;;  %v89_v43 = vunpack.c.h.bf16 %v70_v39  ;;  %v71_v44 = vld [vmem:[%s1557_s1 + $0x18] sm:$0xff]  ;;  %v653_v45 = vld [vmem:[%s1559_s4 + $0x30] sm:$0xff]  ;;  %v88_v47 = vunpack.c.l.bf16 %v70_v39 }
   0xe   :  { %1135 = vmatpush1.bf16.msra.mxu0 %v1013_v9  ;;  %v654_v46 = vld [vmem:[%s1559_s4 + $0x38] sm:$0xff]  ;;  %v91_v48 = vunpack.c.h.bf16 %v71_v44  ;;  %v72_v49 = vld [vmem:[%s1557_s1 + $0x20] sm:$0xff]  ;;  %v656_v51 = vld [vmem:[%s1559_s4 + $0x48] sm:$0xff]  ;;  %v90_v52 = vunpack.c.l.bf16 %v71_v44 }
   0xf   :  { %1136 = vmatprep.subr.bf16.mxu0 %v1196_v0  ;;  %169 = vperm.xlu1 %1195, %v123_v17   ;;  %v655_v50 = vld [vmem:[%s1559_s4 + $0x40] sm:$0xff]  ;;  %v93_v53 = vunpack.c.h.bf16 %v72_v49  ;;  %v73_v54 = vld [vmem:[%s1557_s1 + $0x28] sm:$0xff]  ;;  %v657_v55 = vld [vmem:[%s1559_s4 + $0x50] sm:$0xff]  ;;  %v92_v57 = vunpack.c.l.bf16 %v72_v49 }
  0x10   :  { %164 = vperm.xlu0 %1194, %v122_v16   ;;  %v658_v56 = vld [vmem:[%s1559_s4 + $0x58] sm:$0xff]  ;;  %v95_v58 = vunpack.c.h.bf16 %v73_v54  ;;  %v74_v59 = vld [vmem:[%s1557_s1 + $0x30] sm:$0xff]  ;;  %v659_v60 = vld [vmem:[%s1559_s4 + $0x60] sm:$0xff]  ;;  %v94_v62 = vunpack.c.l.bf16 %v73_v54 }
  0x11   :  { %v660_v61 = vld [vmem:[%s1559_s4 + $0x68] sm:$0xff]  ;;  %v97_v63 = vunpack.c.h.bf16 %v74_v59  ;;  %v661_v1 = vld [vmem:[%s1559_s4 + $0x70] sm:$0xff]  ;;  %v662_v2 = vld [vmem:[%s1559_s4 + $0x78] sm:$0xff]  ;;  %v96_v3 = vunpack.c.l.bf16 %v74_v59 }
  0x12   :  { %1138 = vmatpush1.bf16.msra.mxu0 %v1014_v12  ;;  %v76_v5 = vld [vmem:[%s1557_s1 + $0x40] sm:$0xff]  ;;  %v77_v8 = vld [vmem:[%s1557_s1 + $0x48] sm:$0xff]  ;;  %v78_v11 = vld [vmem:[%s1557_s1 + $0x50] sm:$0xff] }
  0x13   :  { %1139 = vmatprep.subr.bf16.mxu0 %v1196_v0  ;;  %179 = vperm.xlu1 %1195, %v125_v20   ;;  %v101_v7 = vunpack.c.h.bf16 %v76_v5  ;;  %v100_v9 = vunpack.c.l.bf16 %v76_v5  ;;  %v103_v10 = vunpack.c.h.bf16 %v77_v8  ;;  %v102_v12 = vunpack.c.l.bf16 %v77_v8  ;;  %v79_v14 = vld [vmem:[%s1557_s1 + $0x58] sm:$0xff]  ;;  %v80_v17 = vld [vmem:[%s1557_s1 + $0x60] sm:$0xff]  ;;  %v81_v20 = vld [vmem:[%s1557_s1 + $0x68] sm:$0xff] }
  0x14   :  { %174 = vperm.xlu0 %1194, %v124_v19   ;;  %v105_v13 = vunpack.c.h.bf16 %v78_v11  ;;  %v107_v16 = vunpack.c.h.bf16 %v79_v14  ;;  %v109_v19 = vunpack.c.h.bf16 %v80_v17 }
  0x16   :  { %1141 = vmatpush1.bf16.msra.mxu0 %v1015_v15  ;;  %v104_v15 = vunpack.c.l.bf16 %v78_v11 }
  0x17   :  { %1142 = vmatprep.subr.bf16.mxu0 %v1196_v0  ;;  %189 = vperm.xlu1 %1195, %v127_v23   ;;  %v82_v23 = vld [vmem:[%s1557_s1 + $0x70] sm:$0xff] }
  0x18   :  { %184 = vperm.xlu0 %1194, %v126_v22   ;;  %v111_v22 = vunpack.c.h.bf16 %v81_v20 }
  0x1a   :  { %1144 = vmatpush1.bf16.msra.mxu0 %v1016_v18  ;;  %v106_v18 = vunpack.c.l.bf16 %v79_v14 }
  0x1b   :  { %1145 = vmatprep.subr.bf16.mxu0 %v1196_v0  ;;  %199 = vperm.xlu1 %1195, %v129_v26   ;;  %v83_v26 = vld [vmem:[%s1557_s1 + $0x78] sm:$0xff] }
  0x1c   :  { %194 = vperm.xlu0 %1194, %v128_v25   ;;  %v113_v25 = vunpack.c.h.bf16 %v82_v23 }
  0x1e   :  { %1147 = vmatpush1.bf16.msra.mxu0 %v1017_v21  ;;  %v108_v21 = vunpack.c.l.bf16 %v80_v17 }
  0x1f   :  { %1148 = vmatprep.subr.bf16.mxu0 %v1196_v0  ;;  %209 = vperm.xlu1 %1195, %v131_v29   ;;  %v114_v29 = vunpack.c.l.bf16 %v83_v26 }
  0x20   :  { %204 = vperm.xlu0 %1194, %v130_v28   ;;  %v115_v28 = vunpack.c.h.bf16 %v83_v26 }
  0x22   :  { %1150 = vmatpush1.bf16.msra.mxu0 %v1018_v24  ;;  %v110_v24 = vunpack.c.l.bf16 %v81_v20 }
  0x23   :  { %1151 = vmatprep.subr.bf16.mxu0 %v1196_v0  ;;  %670 = vperm.xlu1 %1195, %v648_v32  }
  0x24   :  { %665 = vperm.xlu0 %1194, %v647_v31  }
  0x26   :  { %1153 = vmatpush1.bf16.msra.mxu0 %v1019_v27  ;;  %v112_v27 = vunpack.c.l.bf16 %v82_v23 }
  0x27   :  { %1154 = vmatprep.subr.bf16.mxu0 %v1196_v0  ;;  %680 = vperm.xlu1 %1195, %v650_v36  }
  0x28   :  { %675 = vperm.xlu0 %1194, %v649_v35  }
  0x2a   :  { %1156 = vmatpush1.bf16.msra.mxu0 %v1020_v30  ;;  %v1443_v30 = vld [vmem:[%s1560_s3] sm:$0xff]  }
  0x2b   :  { %1157 = vmatprep.subr.bf16.mxu0 %v1196_v0  ;;  %690 = vperm.xlu1 %1195, %v652_v41   ;;  %v75_v0 = vld [vmem:[%s1557_s1 + $0x38] sm:$0xff]  ;;  %v941_v31 = vunpack.c.l.bf16 %v1443_v30 }
  0x2c   :  { %685 = vperm.xlu0 %1194, %v651_v40   ;;  %v99_v4 = vunpack.c.h.bf16 %v75_v0  ;;  %v98_v6 = vunpack.c.l.bf16 %v75_v0 }
  0x2d   :  { %1100 = vmatprep.mubr.f32.mxu1 %v941_v31 }
  0x2e   :  { %1159 = vmatpush1.bf16.msra.mxu0 %v1021_v33 }
  0x2f   :  { %700 = vperm.xlu1 %1195, %v654_v46  }
  0x30   :  { %695 = vperm.xlu0 %1194, %v653_v45  }
  0x31   :  { %326 = vmatmul.mubr.f32.vlgmr.msra.gmra.mrb[0].mxu0 %v84_v37 }
  0x32   :  { %844 = vmatprep.mubr.msk.f32.mxu0 %vm212_vm0, %v87_v38 }
  0x33   :  { %710 = vperm.xlu1 %1195, %v656_v51  }
  0x34   :  { %705 = vperm.xlu0 %1194, %v655_v50  }
  0x35   :  { %331 = vmatmul.mubr.f32.gmra.mrb[2].mxu0 %v86_v42 }
  0x36   :  { %845 = vmatprep.mubr.msk.f32.mxu0 %vm212_vm0, %v89_v43 }
  0x37   :  { %720 = vperm.xlu1 %1195, %v658_v56  }
  0x38   :  { %715 = vperm.xlu0 %1194, %v657_v55  }
  0x39   :  { %336 = vmatmul.mubr.f32.gmra.mrb[4].mxu0 %v88_v47 }
  0x3a   :  { %846 = vmatprep.mubr.msk.f32.mxu0 %vm212_vm0, %v91_v48 }
  0x3b   :  { %730 = vperm.xlu1 %1195, %v660_v61  }
  0x3c   :  { %725 = vperm.xlu0 %1194, %v659_v60  }
  0x3d   :  { %341 = vmatmul.mubr.f32.gmra.mrb[6].mxu0 %v90_v52 }
  0x3e   :  { %847 = vmatprep.mubr.msk.f32.mxu0 %vm212_vm0, %v93_v53 }
  0x3f   :  { %740 = vperm.xlu1 %1195, %v662_v2  }
  0x40   :  { %735 = vperm.xlu0 %1194, %v661_v1  }
  0x41   :  { %346 = vmatmul.mubr.f32.gmra.mrb[8].mxu0 %v92_v57 }
  0x42   :  { %848 = vmatprep.mubr.msk.f32.mxu0 %vm212_vm0, %v95_v58 }
  0x45   :  { %351 = vmatmul.mubr.f32.gmra.mrb[10].mxu0 %v94_v62 }
  0x46   :  { %849 = vmatprep.mubr.msk.f32.mxu0 %vm212_vm0, %v97_v63 }
  0x49   :  { %356 = vmatmul.mubr.f32.gmra.mrb[12].mxu0 %v96_v3 }
  0x4a   :  { %850 = vmatprep.mubr.msk.f32.mxu0 %vm212_vm0, %v99_v4 }
  0x4d   :  { %361 = vmatmul.mubr.f32.gmra.mrb[14].mxu0 %v98_v6 }
  0x4e   :  { %851 = vmatprep.mubr.msk.f32.mxu0 %vm212_vm0, %v101_v7 }
  0x51   :  { %366 = vmatmul.mubr.f32.gmra.mrb[16].mxu0 %v100_v9 }
  0x52   :  { %852 = vmatprep.mubr.msk.f32.mxu0 %vm212_vm0, %v103_v10 }
  0x55   :  { %371 = vmatmul.mubr.f32.gmra.mrb[18].mxu0 %v102_v12 }
  0x56   :  { %853 = vmatprep.mubr.msk.f32.mxu0 %vm212_vm0, %v105_v13 }
  0x59   :  { %376 = vmatmul.mubr.f32.gmra.mrb[20].mxu0 %v104_v15 }
  0x5a   :  { %854 = vmatprep.mubr.msk.f32.mxu0 %vm212_vm0, %v107_v16 }
  0x5d   :  { %381 = vmatmul.mubr.f32.gmra.mrb[22].mxu0 %v106_v18 }
  0x5e   :  { %855 = vmatprep.mubr.msk.f32.mxu0 %vm212_vm0, %v109_v19 }
  0x61   :  { %386 = vmatmul.mubr.f32.gmra.mrb[24].mxu0 %v108_v21 }
  0x62   :  { %856 = vmatprep.mubr.msk.f32.mxu0 %vm212_vm0, %v111_v22 }
  0x65   :  { %391 = vmatmul.mubr.f32.gmra.mrb[26].mxu0 %v110_v24 }
  0x66   :  { %857 = vmatprep.mubr.msk.f32.mxu0 %vm212_vm0, %v113_v25 }
  0x69   :  { %396 = vmatmul.mubr.f32.gmra.mrb[28].mxu0 %v112_v27 }
  0x6a   :  { %858 = vmatprep.mubr.msk.f32.mxu0 %vm212_vm0, %v115_v28 }
  0x6d   :  { %401 = vmatmul.mubr.f32.gmra.mrb[30].mxu0 %v114_v29 }
  0x82   :  { %v145_v41 = vpop.permute.xlu1 %144 }
  0x83   :  { %v135_v32 = vpop.permute.xlu0 %134 }
  0x86   :  { %v150_v49 = vpop.permute.xlu1 %149 }
  0x87   :  { %v140_v36 = vpop.permute.xlu0 %139 }
  0x8a   :  { %v160_v62 = vpop.permute.xlu1 %159 }
  0x8b   :  { %v155_v55 = vpop.permute.xlu0 %154 }
  0x8e   :  { %v170_v11 = vpop.permute.xlu1 %169 }
  0x8f   :  { %v165_v4 = vpop.permute.xlu0 %164 }
  0x92   :  { %v180_v24 = vpop.permute.xlu1 %179 }
  0x93   :  { %v175_v17 = vpop.permute.xlu0 %174 }
  0x97   :  { %v185_v31 = vpop.permute.xlu0 %184 }
 0x104   :  { %v327_v33 = vpop.f32.mrb[0].mxu0 }
 0x105   :  { %v328_v34 = vadd.f32 %v327_v33, %v135_v32  ;;  %v329_v35 = vpop.f32.mrb[1].mxu0 }
 0x107   :  { %v422_v38 = vmul.f32 0.1, %v328_v34  ;;  %vm406_vm1 = vcmp.gt.f32.partialorder %v328_v34, 0.0 }
 0x108   :  { %v332_v37 = vpop.f32.mrb[2].mxu0 }
 0x109   :  { %v333_v39 = vadd.f32 %v332_v37, %v140_v36  ;;  %v334_v40 = vpop.f32.mrb[3].mxu0  ;;  %v1446_v46 = vsel %vm406_vm1, %v328_v34, %v422_v38  ;;  %v190_v38 = vpop.permute.xlu1 %189 }
 0x10b   :  { %v423_v42 = vmul.f32 0.1, %v333_v39  ;;  %vm407_vm2 = vcmp.gt.f32.partialorder %v333_v39, 0.0 }
 0x10c   :  { %v337_v43 = vpop.f32.mrb[4].mxu0 }
 0x10d   :  { %v338_v44 = vadd.f32 %v337_v43, %v145_v41  ;;  %v339_v45 = vpop.f32.mrb[5].mxu0  ;;  %v1448_v47 = vsel %vm407_vm2, %v333_v39, %v423_v42 }
 0x10e   :  { %v1160_v48 = vpack.c.bf16 %v1448_v47, %v1446_v46 }
 0x10f   :  { %v424_v51 = vmul.f32 0.1, %v338_v44  ;;  %vm408_vm3 = vcmp.gt.f32.partialorder %v338_v44, 0.0 }
 0x110   :  { %v342_v50 = vpop.f32.mrb[6].mxu0  ;;  %1161 = vmatprep.subr.bf16.mxu1 %v1160_v48 }
 0x111   :  { %v343_v52 = vadd.f32 %v342_v50, %v150_v49  ;;  %v344_v53 = vpop.f32.mrb[7].mxu0  ;;  %1163 = vmatpush3.bf16.msra.mxu1 %v1160_v48  ;;  %v1452_v59 = vsel %vm408_vm3, %v338_v44, %v424_v51  ;;  %v195_v44 = vpop.permute.xlu0 %194 }
 0x112   :  { %v200_v53 = vpop.permute.xlu1 %199 }
 0x113   :  { %vm409_vm4 = vcmp.gt.f32.partialorder %v343_v52, 0.0  ;;  %v425_v54 = vmul.f32 0.1, %v343_v52 }
 0x114   :  { %v347_v56 = vpop.f32.mrb[8].mxu0 }
 0x115   :  { %v348_v57 = vadd.f32 %v347_v56, %v155_v55  ;;  %v349_v58 = vpop.f32.mrb[9].mxu0  ;;  %v1454_v60 = vsel %vm409_vm4, %v343_v52, %v425_v54 }
 0x116   :  { %v1164_v61 = vpack.c.bf16 %v1454_v60, %v1452_v59 }
 0x117   :  { %v426_v0 = vmul.f32 0.1, %v348_v57  ;;  %vm410_vm5 = vcmp.gt.f32.partialorder %v348_v57, 0.0 }
 0x118   :  { %v352_v63 = vpop.f32.mrb[10].mxu0  ;;  %1165 = vmatprep.subr.bf16.mxu1 %v1164_v61 }
 0x119   :  { %v353_v1 = vadd.f32 %v352_v63, %v160_v62  ;;  %v354_v2 = vpop.f32.mrb[11].mxu0  ;;  %1167 = vmatpush3.bf16.msra.mxu1 %v1164_v61  ;;  %v1458_v8 = vsel %vm410_vm5, %v348_v57, %v426_v0  ;;  %v205_v61 = vpop.permute.xlu0 %204 }
 0x11b   :  { %vm411_vm6 = vcmp.gt.f32.partialorder %v353_v1, 0.0  ;;  %v427_v3 = vmul.f32 0.1, %v353_v1 }
 0x11c   :  { %v357_v5 = vpop.f32.mrb[12].mxu0 }
 0x11d   :  { %v358_v6 = vadd.f32 %v357_v5, %v165_v4  ;;  %v359_v7 = vpop.f32.mrb[13].mxu0  ;;  %v1460_v9 = vsel %vm411_vm6, %v353_v1, %v427_v3  ;;  %v210_v4 = vpop.permute.xlu1 %209 }
 0x11e   :  { %v1168_v10 = vpack.c.bf16 %v1460_v9, %v1458_v8 }
 0x11f   :  { %v428_v13 = vmul.f32 0.1, %v358_v6  ;;  %vm412_vm7 = vcmp.gt.f32.partialorder %v358_v6, 0.0 }
 0x120   :  { %v362_v12 = vpop.f32.mrb[14].mxu0  ;;  %1169 = vmatprep.subr.bf16.mxu1 %v1168_v10 }
 0x121   :  { %v363_v14 = vadd.f32 %v362_v12, %v170_v11  ;;  %v364_v15 = vpop.f32.mrb[15].mxu0  ;;  %1171 = vmatpush3.bf16.msra.mxu1 %v1168_v10  ;;  %v1464_v21 = vsel %vm412_vm7, %v358_v6, %v428_v13 }
 0x122   :  { %v1022_v15 = vld [vmem:[%s1560_s3 + $0x8] sm:$0xff]  }
 0x123   :  { %vm413_vm8 = vcmp.gt.f32.partialorder %v363_v14, 0.0  ;;  %v429_v16 = vmul.f32 0.1, %v363_v14 }
 0x124   :  { %v367_v18 = vpop.f32.mrb[16].mxu0 }
 0x125   :  { %v368_v19 = vadd.f32 %v367_v18, %v175_v17  ;;  %v369_v20 = vpop.f32.mrb[17].mxu0  ;;  %v1466_v22 = vsel %vm413_vm8, %v363_v14, %v429_v16  ;;  %v942_v16 = vunpack.c.h.bf16 %v1443_v30  ;;  %v945_v17 = vunpack.c.l.bf16 %v1022_v15  ;;  %v1023_v18 = vld [vmem:[%s1560_s3 + $0x10] sm:$0xff]   ;;  %v1025_v30 = vld [vmem:[%s1560_s3 + $0x20] sm:$0xff]  }
 0x126   :  { %v1172_v23 = vpack.c.bf16 %v1466_v22, %v1464_v21  ;;  %v949_v20 = vunpack.c.l.bf16 %v1023_v18 }
 0x127   :  { %v430_v26 = vmul.f32 0.1, %v368_v19  ;;  %vm414_vm9 = vcmp.gt.f32.partialorder %v368_v19, 0.0 }
 0x128   :  { %v372_v25 = vpop.f32.mrb[18].mxu0  ;;  %1173 = vmatprep.subr.bf16.mxu1 %v1172_v23 }
 0x129   :  { %v373_v27 = vadd.f32 %v372_v25, %v180_v24  ;;  %v374_v28 = vpop.f32.mrb[19].mxu0  ;;  %1175 = vmatpush3.bf16.msra.mxu1 %v1172_v23  ;;  %v1470_v35 = vsel %vm414_vm9, %v368_v19, %v430_v26  ;;  %v946_v19 = vunpack.c.h.bf16 %v1022_v15  ;;  %v1024_v23 = vld [vmem:[%s1560_s3 + $0x18] sm:$0xff]   ;;  %v950_v24 = vunpack.c.h.bf16 %v1023_v18 }
 0x12a   :  { %v953_v25 = vunpack.c.l.bf16 %v1024_v23  ;;  %v954_v26 = vunpack.c.h.bf16 %v1024_v23  ;;  %v1026_v28 = vld [vmem:[%s1560_s3 + $0x28] sm:$0xff]  }
 0x12b   :  { %vm415_vm10 = vcmp.gt.f32.partialorder %v373_v27, 0.0  ;;  %v431_v29 = vmul.f32 0.1, %v373_v27 }
 0x12c   :  { %v377_v32 = vpop.f32.mrb[20].mxu0 }
 0x12d   :  { %v378_v33 = vadd.f32 %v377_v32, %v185_v31  ;;  %v379_v34 = vpop.f32.mrb[21].mxu0  ;;  %v1472_v36 = vsel %vm415_vm10, %v373_v27, %v431_v29  ;;  %v957_v27 = vunpack.c.l.bf16 %v1025_v30  ;;  %v958_v29 = vunpack.c.h.bf16 %v1025_v30  ;;  %v1027_v32 = vld [vmem:[%s1560_s3 + $0x30] sm:$0xff]  }
 0x12e   :  { %v1176_v37 = vpack.c.bf16 %v1472_v36, %v1470_v35  ;;  %v961_v31 = vunpack.c.l.bf16 %v1026_v28  ;;  %v965_v34 = vunpack.c.l.bf16 %v1027_v32 }
 0x12f   :  { %v432_v40 = vmul.f32 0.1, %v378_v33  ;;  %vm416_vm11 = vcmp.gt.f32.partialorder %v378_v33, 0.0 }
 0x130   :  { %v382_v39 = vpop.f32.mrb[22].mxu0  ;;  %1177 = vmatprep.subr.bf16.mxu1 %v1176_v37 }
 0x131   :  { %v383_v41 = vadd.f32 %v382_v39, %v190_v38  ;;  %v384_v42 = vpop.f32.mrb[23].mxu0  ;;  %1179 = vmatpush3.bf16.msra.mxu1 %v1176_v37  ;;  %v1476_v50 = vsel %vm416_vm11, %v378_v33, %v432_v40  ;;  %v962_v33 = vunpack.c.h.bf16 %v1026_v28  ;;  %v1028_v37 = vld [vmem:[%s1560_s3 + $0x38] sm:$0xff]   ;;  %v966_v38 = vunpack.c.h.bf16 %v1027_v32 }
 0x132   :  { %v969_v39 = vunpack.c.l.bf16 %v1028_v37  ;;  %v970_v40 = vunpack.c.h.bf16 %v1028_v37  ;;  %v666_v42 = vpop.permute.xlu0 %665 }
 0x133   :  { %vm417_vm12 = vcmp.gt.f32.partialorder %v383_v41, 0.0  ;;  %v433_v43 = vmul.f32 0.1, %v383_v41 }
 0x134   :  { %v387_v45 = vpop.f32.mrb[24].mxu0 }
 0x135   :  { %v388_v48 = vadd.f32 %v387_v45, %v195_v44  ;;  %v389_v49 = vpop.f32.mrb[25].mxu0  ;;  %v1478_v51 = vsel %vm417_vm12, %v383_v41, %v433_v43  ;;  %v671_v41 = vpop.permute.xlu1 %670 }
 0x136   :  { %v1180_v52 = vpack.c.bf16 %v1478_v51, %v1476_v50  ;;  %v676_v44 = vpop.permute.xlu0 %675 }
 0x137   :  { %v434_v55 = vmul.f32 0.1, %v388_v48  ;;  %vm418_vm13 = vcmp.gt.f32.partialorder %v388_v48, 0.0 }
 0x138   :  { %v392_v54 = vpop.f32.mrb[26].mxu0  ;;  %1181 = vmatprep.subr.bf16.mxu1 %v1180_v52 }
 0x139   :  { %v393_v56 = vadd.f32 %v392_v54, %v200_v53  ;;  %v394_v57 = vpop.f32.mrb[27].mxu0  ;;  %1183 = vmatpush3.bf16.msra.mxu1 %v1180_v52  ;;  %v1482_v1 = vsel %vm418_vm13, %v388_v48, %v434_v55  ;;  %v681_v43 = vpop.permute.xlu1 %680 }
 0x13a   :  { %v686_v49 = vpop.permute.xlu0 %685 }
 0x13b   :  { %vm419_vm14 = vcmp.gt.f32.partialorder %v393_v56, 0.0  ;;  %v435_v58 = vmul.f32 0.1, %v393_v56 }
 0x13c   :  { %v397_v62 = vpop.f32.mrb[28].mxu0 }
 0x13d   :  { %v398_v63 = vadd.f32 %v397_v62, %v205_v61  ;;  %v399_v0 = vpop.f32.mrb[29].mxu0  ;;  %v1484_v2 = vsel %vm419_vm14, %v393_v56, %v435_v58  ;;  %v691_v45 = vpop.permute.xlu1 %690 }
 0x13e   :  { %v1184_v3 = vpack.c.bf16 %v1484_v2, %v1482_v1 }
 0x13f   :  { %v436_v6 = vmul.f32 0.1, %v398_v63  ;;  %vm420_vm15 = vcmp.gt.f32.partialorder %v398_v63, 0.0 }
 0x140   :  { %v402_v5 = vpop.f32.mrb[30].mxu0  ;;  %1185 = vmatprep.subr.bf16.mxu1 %v1184_v3 }
 0x141   :  { %v403_v7 = vadd.f32 %v402_v5, %v210_v4  ;;  %v404_v10 = vpop.f32.mrb[31].mxu0  ;;  %1187 = vmatpush3.bf16.msra.mxu1 %v1184_v3  ;;  %v1488_v12 = vsel %vm420_vm15, %v398_v63, %v436_v6  ;;  %v701_v62 = vpop.permute.xlu1 %700 }
 0x142   :  { %v696_v3 = vpop.permute.xlu0 %695 }
 0x143   :  { %vm421_vm0 = vcmp.gt.f32.partialorder %v403_v7, 0.0  ;;  %v437_v11 = vmul.f32 0.1, %v403_v7 }
 0x145   :  { %v1490_v13 = vsel %vm421_vm0, %v403_v7, %v437_v11  ;;  %v711_v11 = vpop.permute.xlu1 %710 }
 0x146   :  { %v1188_v14 = vpack.c.bf16 %v1490_v13, %v1488_v12  ;;  %v706_v15 = vpop.permute.xlu0 %705 }
 0x148   :  { %1189 = vmatprep.subr.bf16.mxu1 %v1188_v14 }
 0x149   :  { %1191 = vmatpush3.bf16.msra.mxu1 %v1188_v14 }
 0x14c   :  { %1101 = vmatmul.mubr.f32.vlgmr.msra.gmra.mrb[0].mxu1 %v942_v16 }
 0x14d   :  { %1103 = vmatprep.mubr.f32.mxu1 %v945_v17 }
 0x150   :  { %1104 = vmatmul.mubr.f32.gmra.mrb[2].mxu1 %v946_v19 }
 0x151   :  { %1106 = vmatprep.mubr.f32.mxu1 %v949_v20 }
 0x154   :  { %1107 = vmatmul.mubr.f32.gmra.mrb[4].mxu1 %v950_v24 }
 0x155   :  { %1109 = vmatprep.mubr.f32.mxu1 %v953_v25  ;;  %v721_v25 = vpop.permute.xlu1 %720 }
 0x158   :  { %1110 = vmatmul.mubr.f32.gmra.mrb[6].mxu1 %v954_v26 }
 0x159   :  { %1112 = vmatprep.mubr.f32.mxu1 %v957_v27  ;;  %v716_v27 = vpop.permute.xlu0 %715 }
 0x15c   :  { %1113 = vmatmul.mubr.f32.gmra.mrb[8].mxu1 %v958_v29 }
 0x15d   :  { %1115 = vmatprep.mubr.f32.mxu1 %v961_v31 }
 0x160   :  { %1116 = vmatmul.mubr.f32.gmra.mrb[10].mxu1 %v962_v33 }
 0x161   :  { %1118 = vmatprep.mubr.f32.mxu1 %v965_v34  ;;  %v731_v34 = vpop.permute.xlu1 %730 }
 0x164   :  { %1119 = vmatmul.mubr.f32.gmra.mrb[12].mxu1 %v966_v38  ;;  %v726_v38 = vpop.permute.xlu0 %725 }
 0x165   :  { %1121 = vmatprep.mubr.f32.mxu1 %v969_v39 }
 0x168   :  { %1122 = vmatmul.mubr.f32.gmra.mrb[14].mxu1 %v970_v40 }
 0x21f   :  { %v1102_v48 = vpop.f32.mrb[0].mxu1 }
 0x220   :  { %v632_v52 = vadd.f32 %v1102_v48, %v1448_v47  ;;  %v552_v53 = vpop.f32.mrb[1].mxu1  ;;  %v741_v48 = vpop.permute.xlu1 %740 }
 0x221   :  { %v631_v54 = vadd.f32 %v552_v53, %v1446_v46  ;;  %v736_v53 = vpop.permute.xlu0 %735 }
 0x222   :  { %v744_v55 = vadd.f32 %v671_v41, %v632_v52 }
 0x223   :  { %v743_v56 = vadd.f32 %v666_v42, %v631_v54  ;;  %v1105_v57 = vpop.f32.mrb[2].mxu1 }
 0x224   :  { %v634_v58 = vadd.f32 %v1105_v57, %v1454_v60  ;;  %v562_v61 = vpop.f32.mrb[3].mxu1 }
 0x225   :  { %v974_v63 = vpack.c.bf16 %v744_v55, %v743_v56  ;;  %v633_v0 = vadd.f32 %v562_v61, %v1452_v59 }
 0x226   :  { %v746_v4 = vadd.f32 %v681_v43, %v634_v58 }
 0x227   :  { %975 = vst [vmem:[%s1561_s5] sm:$0xff] %v974_v63   ;;  %v745_v47 = vadd.f32 %v676_v44, %v633_v0  ;;  %v1108_v5 = vpop.f32.mrb[4].mxu1 }
 0x228   :  { %v636_v46 = vadd.f32 %v1108_v5, %v1460_v9  ;;  %v572_v6 = vpop.f32.mrb[5].mxu1 }
 0x229   :  { %v979_v7 = vpack.c.bf16 %v746_v4, %v745_v47  ;;  %v635_v10 = vadd.f32 %v572_v6, %v1458_v8 }
 0x22a   :  { %v748_v60 = vadd.f32 %v691_v45, %v636_v46 }
 0x22b   :  { %1029 = vst [vmem:[%s1561_s5 + $0x8] sm:$0xff] %v979_v7   ;;  %v747_v59 = vadd.f32 %v686_v49, %v635_v10  ;;  %v1111_v14 = vpop.f32.mrb[6].mxu1 }
 0x22c   :  { %v638_v16 = vadd.f32 %v1111_v14, %v1466_v22  ;;  %v582_v17 = vpop.f32.mrb[7].mxu1 }
 0x22d   :  { %v984_v18 = vpack.c.bf16 %v748_v60, %v747_v59  ;;  %v637_v19 = vadd.f32 %v582_v17, %v1464_v21 }
 0x22e   :  { %v750_v9 = vadd.f32 %v701_v62, %v638_v16 }
 0x22f   :  { %1030 = vst [vmem:[%s1561_s5 + $0x10] sm:$0xff] %v984_v18   ;;  %v749_v8 = vadd.f32 %v696_v3, %v637_v19  ;;  %v1114_v20 = vpop.f32.mrb[8].mxu1 }
 0x230   :  { %v640_v23 = vadd.f32 %v1114_v20, %v1472_v36  ;;  %v592_v24 = vpop.f32.mrb[9].mxu1 }
 0x231   :  { %v989_v30 = vpack.c.bf16 %v750_v9, %v749_v8  ;;  %v639_v26 = vadd.f32 %v592_v24, %v1470_v35 }
 0x232   :  { %v752_v22 = vadd.f32 %v711_v11, %v640_v23 }
 0x233   :  { %1031 = vst [vmem:[%s1561_s5 + $0x18] sm:$0xff] %v989_v30   ;;  %v751_v21 = vadd.f32 %v706_v15, %v639_v26  ;;  %v1117_v28 = vpop.f32.mrb[10].mxu1 }
 0x234   :  { %v642_v29 = vadd.f32 %v1117_v28, %v1478_v51  ;;  %v602_v31 = vpop.f32.mrb[11].mxu1 }
 0x235   :  { %v994_v32 = vpack.c.bf16 %v752_v22, %v751_v21  ;;  %v641_v33 = vadd.f32 %v602_v31, %v1476_v50 }
 0x236   :  { %v754_v36 = vadd.f32 %v721_v25, %v642_v29 }
 0x237   :  { %1032 = vst [vmem:[%s1561_s5 + $0x20] sm:$0xff] %v994_v32   ;;  %v753_v35 = vadd.f32 %v716_v27, %v641_v33  ;;  %v1120_v37 = vpop.f32.mrb[12].mxu1 }
 0x238   :  { %v644_v39 = vadd.f32 %v1120_v37, %v1484_v2  ;;  %v612_v40 = vpop.f32.mrb[13].mxu1 }
 0x239   :  { %v999_v41 = vpack.c.bf16 %v754_v36, %v753_v35  ;;  %v643_v42 = vadd.f32 %v612_v40, %v1482_v1 }
 0x23a   :  { %v756_v51 = vadd.f32 %v731_v34, %v644_v39 }
 0x23b   :  { %1033 = vst [vmem:[%s1561_s5 + $0x28] sm:$0xff] %v999_v41   ;;  %v755_v50 = vadd.f32 %v726_v38, %v643_v42  ;;  %v1123_v43 = vpop.f32.mrb[14].mxu1 }
 0x23c   :  { %v646_v44 = vadd.f32 %v1123_v43, %v1490_v13  ;;  %v622_v45 = vpop.f32.mrb[15].mxu1 }
 0x23d   :  { %v1004_v49 = vpack.c.bf16 %v756_v51, %v755_v50  ;;  %v645_v52 = vadd.f32 %v622_v45, %v1488_v12 }
 0x23e   :  { %v758_v2 = vadd.f32 %v741_v48, %v646_v44 }
 0x23f   :  { %1034 = vst [vmem:[%s1561_s5 + $0x30] sm:$0xff] %v1004_v49   ;;  %v757_v1 = vadd.f32 %v736_v53, %v645_v52 }
 0x241   :  { %v1009_v54 = vpack.c.bf16 %v758_v2, %v757_v1 }
 0x243   :  { %1035 = vst [vmem:[%s1561_s5 + $0x38] sm:$0xff] %v1009_v54  }

// kernel: forward.14
= control target key start
LH: loop header
LB: loop body
LE: loop exit
PB: predicated region body
PF: predicated region fallthrough
CT: control target
= control target key end

     0   :  { %v3263_v0 = vmov 0   ;;  %v3264_v3 = vmov 0.0   ;;  %s4909_s2 = inlined_call_operand.vmem [shape: f32[256,1], index: 2, kind: input, shape index: {}]   ;;  %s4910_s0 = inlined_call_operand.vmem [shape: bf16[128,512], index: 0, kind: input, shape index: {}]   ;;  %s4911_s1 = inlined_call_operand.vmem [shape: bf16[256,128], index: 1, kind: input, shape index: {}]   ;;  %s4912_s4 = inlined_call_operand.vmem [shape: f32[256,1], index: 4, kind: input, shape index: {}]   ;;  %s4913_s3 = inlined_call_operand.vmem [shape: bf16[256,256], index: 3, kind: input, shape index: {}]   ;;  %s4914_s5 = inlined_call_operand.vmem [shape: bf16[256,512], index: 5, kind: output, shape index: {}]  }
   0x1   :  { %3213 = vset.pattern.permute.xlu0 %v3263_v0  ;;  %v180_v1 = vld [vmem:[%s4909_s2] sm:$0xff]  ;;  %3214 = vset.pattern.permute.xlu1 %v3263_v0  ;;  %v3217_v4 = vld [vmem:[%s4910_s0 + $0xc] ss:$16 sps:$4 sm:$0xff]   ;;  %v182_v5 = vld [vmem:[%s4909_s2 + $0x10] sm:$0xff] }
   0x2   :  { %214 = vperm.xlu0 %3213, %v180_v1   ;;  %v3215_v2 = vld [vmem:[%s4910_s0 + $0x4] ss:$16 sps:$4 sm:$0xff]   ;;  %436 = vmatprep.mubr.f32.mxu0 %v3264_v3  ;;  %v3219_v6 = vld [vmem:[%s4910_s0] ss:$16 sps:$4 sm:$0xff]   ;;  %v3220_v7 = vld [vmem:[%s4910_s0 + $0x8] ss:$16 sps:$4 sm:$0xff]  }
   0x3   :  { %693 = vmatprep.mubr.f32.mxu1 %v3264_v3  ;;  %2988 = vmatprep.subr.bf16.mxu0 %v3215_v2  ;;  %v181_v8 = vld [vmem:[%s4909_s2 + $0x8] sm:$0xff]  ;;  %v3221_v9 = vld [vmem:[%s4910_s0 + $0x24] ss:$16 sps:$4 sm:$0xff]   ;;  %v183_v11 = vld [vmem:[%s4909_s2 + $0x18] sm:$0xff] }
   0x4   :  { %224 = vperm.xlu1 %3214, %v182_v5   ;;  %3020 = vmatprep.subr.bf16.mxu1 %v3217_v4  ;;  %v3223_v10 = vld [vmem:[%s4910_s0 + $0x2c] ss:$16 sps:$4 sm:$0xff]   ;;  %v3225_v12 = vld [vmem:[%s4910_s0 + $0x20] ss:$16 sps:$4 sm:$0xff]   ;;  %v3226_v13 = vld [vmem:[%s4910_s0 + $0x28] ss:$16 sps:$4 sm:$0xff]  }
   0x5   :  { %2990 = vmatpush1.bf16.msra.mxu0 %v3219_v6  ;;  %3022 = vmatpush1.bf16.msra.mxu1 %v3220_v7  ;;  %v184_v14 = vld [vmem:[%s4909_s2 + $0x20] sm:$0xff]  ;;  %v3229_v16 = vld [vmem:[%s4910_s0 + $0x4c] ss:$16 sps:$4 sm:$0xff]   ;;  %v3232_v19 = vld [vmem:[%s4910_s0 + $0x48] ss:$16 sps:$4 sm:$0xff]  }
   0x6   :  { %219 = vperm.xlu0 %3213, %v181_v8   ;;  %2992 = vmatprep.subr.bf16.mxu0 %v3221_v9  ;;  %v3227_v15 = vld [vmem:[%s4910_s0 + $0x44] ss:$16 sps:$4 sm:$0xff]   ;;  %v185_v17 = vld [vmem:[%s4909_s2 + $0x28] sm:$0xff]  ;;  %v3231_v18 = vld [vmem:[%s4910_s0 + $0x40] ss:$16 sps:$4 sm:$0xff]  }
   0x7   :  { %3024 = vmatprep.subr.bf16.mxu1 %v3223_v10  ;;  %v186_v20 = vld [vmem:[%s4909_s2 + $0x30] sm:$0xff]  ;;  %v3235_v22 = vld [vmem:[%s4910_s0 + $0x6c] ss:$16 sps:$4 sm:$0xff]   ;;  %v3238_v25 = vld [vmem:[%s4910_s0 + $0x68] ss:$16 sps:$4 sm:$0xff]  }
   0x8   :  { %229 = vperm.xlu1 %3214, %v183_v11   ;;  %v3233_v21 = vld [vmem:[%s4910_s0 + $0x64] ss:$16 sps:$4 sm:$0xff]   ;;  %v187_v23 = vld [vmem:[%s4909_s2 + $0x38] sm:$0xff]  ;;  %v3237_v24 = vld [vmem:[%s4910_s0 + $0x60] ss:$16 sps:$4 sm:$0xff]  }
   0x9   :  { %2994 = vmatpush1.bf16.msra.mxu0 %v3225_v12  ;;  %3026 = vmatpush1.bf16.msra.mxu1 %v3226_v13  ;;  %v188_v26 = vld [vmem:[%s4909_s2 + $0x40] sm:$0xff]  ;;  %v3241_v28 = vld [vmem:[%s4910_s0 + $0x8c] ss:$16 sps:$4 sm:$0xff]   ;;  %v3244_v31 = vld [vmem:[%s4910_s0 + $0x88] ss:$16 sps:$4 sm:$0xff]  }
   0xa   :  { %234 = vperm.xlu0 %3213, %v184_v14   ;;  %2996 = vmatprep.subr.bf16.mxu0 %v3227_v15  ;;  %v3239_v27 = vld [vmem:[%s4910_s0 + $0x84] ss:$16 sps:$4 sm:$0xff]   ;;  %v189_v29 = vld [vmem:[%s4909_s2 + $0x48] sm:$0xff]  ;;  %v3243_v30 = vld [vmem:[%s4910_s0 + $0x80] ss:$16 sps:$4 sm:$0xff]  }
   0xb   :  { %3028 = vmatprep.subr.bf16.mxu1 %v3229_v16  ;;  %v190_v32 = vld [vmem:[%s4909_s2 + $0x50] sm:$0xff]  ;;  %v3247_v34 = vld [vmem:[%s4910_s0 + $0xac] ss:$16 sps:$4 sm:$0xff]   ;;  %v3250_v37 = vld [vmem:[%s4910_s0 + $0xa8] ss:$16 sps:$4 sm:$0xff]  }
   0xc   :  { %239 = vperm.xlu1 %3214, %v185_v17   ;;  %v3245_v33 = vld [vmem:[%s4910_s0 + $0xa4] ss:$16 sps:$4 sm:$0xff]   ;;  %v191_v35 = vld [vmem:[%s4909_s2 + $0x58] sm:$0xff]  ;;  %v3249_v36 = vld [vmem:[%s4910_s0 + $0xa0] ss:$16 sps:$4 sm:$0xff]  }
   0xd   :  { %2998 = vmatpush1.bf16.msra.mxu0 %v3231_v18  ;;  %3030 = vmatpush1.bf16.msra.mxu1 %v3232_v19  ;;  %v192_v38 = vld [vmem:[%s4909_s2 + $0x60] sm:$0xff]  ;;  %v3253_v40 = vld [vmem:[%s4910_s0 + $0xcc] ss:$16 sps:$4 sm:$0xff]   ;;  %v3256_v43 = vld [vmem:[%s4910_s0 + $0xc8] ss:$16 sps:$4 sm:$0xff]  }
   0xe   :  { %244 = vperm.xlu0 %3213, %v186_v20   ;;  %3000 = vmatprep.subr.bf16.mxu0 %v3233_v21  ;;  %v3251_v39 = vld [vmem:[%s4910_s0 + $0xc4] ss:$16 sps:$4 sm:$0xff]   ;;  %v193_v41 = vld [vmem:[%s4909_s2 + $0x68] sm:$0xff]  ;;  %v3255_v42 = vld [vmem:[%s4910_s0 + $0xc0] ss:$16 sps:$4 sm:$0xff]  }
   0xf   :  { %3032 = vmatprep.subr.bf16.mxu1 %v3235_v22  ;;  %v194_v44 = vld [vmem:[%s4909_s2 + $0x70] sm:$0xff]  ;;  %v3259_v46 = vld [vmem:[%s4910_s0 + $0xec] ss:$16 sps:$4 sm:$0xff]   ;;  %v2909_v49 = vld [vmem:[%s4911_s1] sm:$0xff]  }
  0x10   :  { %249 = vperm.xlu1 %3214, %v187_v23   ;;  %v3257_v45 = vld [vmem:[%s4910_s0 + $0xe4] ss:$16 sps:$4 sm:$0xff]   ;;  %v195_v47 = vld [vmem:[%s4909_s2 + $0x78] sm:$0xff]  ;;  %v3261_v48 = vld [vmem:[%s4910_s0 + $0xe0] ss:$16 sps:$4 sm:$0xff]   ;;  %v2910_v52 = vunpack.c.l.bf16 %v2909_v49  ;;  %v2911_v55 = vunpack.c.h.bf16 %v2909_v49 }
  0x11   :  { %3002 = vmatpush1.bf16.msra.mxu0 %v3237_v24  ;;  %3034 = vmatpush1.bf16.msra.mxu1 %v3238_v25  ;;  %v3262_v50 = vld [vmem:[%s4910_s0 + $0xe8] ss:$16 sps:$4 sm:$0xff]   ;;  %v196_v51 = vld [vmem:[%s4909_s2 + $0x80] sm:$0xff]  ;;  %v198_v54 = vld [vmem:[%s4909_s2 + $0x90] sm:$0xff] }
  0x12   :  { %254 = vperm.xlu0 %3213, %v188_v26   ;;  %3004 = vmatprep.subr.bf16.mxu0 %v3239_v27  ;;  %v197_v53 = vld [vmem:[%s4909_s2 + $0x88] sm:$0xff]  ;;  %v199_v56 = vld [vmem:[%s4909_s2 + $0x98] sm:$0xff]  ;;  %v200_v58 = vld [vmem:[%s4909_s2 + $0xa0] sm:$0xff] }
  0x13   :  { %3036 = vmatprep.subr.bf16.mxu1 %v3241_v28  ;;  %v2972_v57 = vld [vmem:[%s4911_s1 + $0x8] sm:$0xff]   ;;  %v202_v61 = vld [vmem:[%s4909_s2 + $0xb0] sm:$0xff]  ;;  %v203_v63 = vld [vmem:[%s4909_s2 + $0xb8] sm:$0xff] }
  0x14   :  { %259 = vperm.xlu1 %3214, %v189_v29   ;;  %v2914_v59 = vunpack.c.l.bf16 %v2972_v57  ;;  %v201_v60 = vld [vmem:[%s4909_s2 + $0xa8] sm:$0xff]  ;;  %v2915_v62 = vunpack.c.h.bf16 %v2972_v57  ;;  %v2973_v0 = vld [vmem:[%s4911_s1 + $0x10] sm:$0xff]   ;;  %v204_v1 = vld [vmem:[%s4909_s2 + $0xc0] sm:$0xff] }
  0x15   :  { %3006 = vmatpush1.bf16.msra.mxu0 %v3243_v30  ;;  %3038 = vmatpush1.bf16.msra.mxu1 %v3244_v31  ;;  %v2918_v2 = vunpack.c.l.bf16 %v2973_v0  ;;  %v205_v4 = vld [vmem:[%s4909_s2 + $0xc8] sm:$0xff]  ;;  %v206_v5 = vld [vmem:[%s4909_s2 + $0xd0] sm:$0xff]  ;;  %v2919_v6 = vunpack.c.h.bf16 %v2973_v0  ;;  %v207_v7 = vld [vmem:[%s4909_s2 + $0xd8] sm:$0xff] }
  0x16   :  { %264 = vperm.xlu0 %3213, %v190_v32   ;;  %3008 = vmatprep.subr.bf16.mxu0 %v3245_v33  ;;  %v2974_v8 = vld [vmem:[%s4911_s1 + $0x18] sm:$0xff]   ;;  %v208_v9 = vld [vmem:[%s4909_s2 + $0xe0] sm:$0xff]  ;;  %v209_v11 = vld [vmem:[%s4909_s2 + $0xe8] sm:$0xff] }
  0x17   :  { %3040 = vmatprep.subr.bf16.mxu1 %v3247_v34  ;;  %v2922_v10 = vunpack.c.l.bf16 %v2974_v8  ;;  %v210_v12 = vld [vmem:[%s4909_s2 + $0xf0] sm:$0xff]  ;;  %v2923_v13 = vunpack.c.h.bf16 %v2974_v8  ;;  %v211_v14 = vld [vmem:[%s4909_s2 + $0xf8] sm:$0xff]  ;;  %v2975_v15 = vld [vmem:[%s4911_s1 + $0x20] sm:$0xff]  }
  0x18   :  { %269 = vperm.xlu1 %3214, %v191_v35   ;;  %v2008_v16 = vld [vmem:[%s4912_s4] sm:$0xff]  ;;  %v2926_v17 = vunpack.c.l.bf16 %v2975_v15  ;;  %v2009_v18 = vld [vmem:[%s4912_s4 + $0x8] sm:$0xff]  ;;  %v2010_v19 = vld [vmem:[%s4912_s4 + $0x10] sm:$0xff]  ;;  %v2927_v20 = vunpack.c.h.bf16 %v2975_v15 }
  0x19   :  { %3010 = vmatpush1.bf16.msra.mxu0 %v3249_v36  ;;  %3042 = vmatpush1.bf16.msra.mxu1 %v3250_v37  ;;  %v2011_v21 = vld [vmem:[%s4912_s4 + $0x18] sm:$0xff]  ;;  %v2976_v22 = vld [vmem:[%s4911_s1 + $0x28] sm:$0xff]   ;;  %v2012_v23 = vld [vmem:[%s4912_s4 + $0x20] sm:$0xff] }
  0x1a   :  { %274 = vperm.xlu0 %3213, %v192_v38   ;;  %3012 = vmatprep.subr.bf16.mxu0 %v3251_v39  ;;  %v2930_v24 = vunpack.c.l.bf16 %v2976_v22  ;;  %v2013_v25 = vld [vmem:[%s4912_s4 + $0x28] sm:$0xff]  ;;  %v2014_v26 = vld [vmem:[%s4912_s4 + $0x30] sm:$0xff]  ;;  %v2931_v27 = vunpack.c.h.bf16 %v2976_v22  ;;  %v2015_v28 = vld [vmem:[%s4912_s4 + $0x38] sm:$0xff] }
  0x1b   :  { %3044 = vmatprep.subr.bf16.mxu1 %v3253_v40  ;;  %v2977_v29 = vld [vmem:[%s4911_s1 + $0x30] sm:$0xff]   ;;  %v2016_v30 = vld [vmem:[%s4912_s4 + $0x40] sm:$0xff]  ;;  %v2017_v32 = vld [vmem:[%s4912_s4 + $0x48] sm:$0xff] }
  0x1c   :  { %279 = vperm.xlu1 %3214, %v193_v41   ;;  %v2934_v31 = vunpack.c.l.bf16 %v2977_v29  ;;  %v2018_v33 = vld [vmem:[%s4912_s4 + $0x50] sm:$0xff]  ;;  %v2935_v34 = vunpack.c.h.bf16 %v2977_v29  ;;  %v2019_v35 = vld [vmem:[%s4912_s4 + $0x58] sm:$0xff]  ;;  %v2020_v37 = vld [vmem:[%s4912_s4 + $0x60] sm:$0xff] }
  0x1d   :  { %3014 = vmatpush1.bf16.msra.mxu0 %v3255_v42  ;;  %3046 = vmatpush1.bf16.msra.mxu1 %v3256_v43  ;;  %v2978_v36 = vld [vmem:[%s4911_s1 + $0x38] sm:$0xff]   ;;  %v2021_v39 = vld [vmem:[%s4912_s4 + $0x68] sm:$0xff]  ;;  %v2022_v40 = vld [vmem:[%s4912_s4 + $0x70] sm:$0xff] }
  0x1e   :  { %284 = vperm.xlu0 %3213, %v194_v44   ;;  %3016 = vmatprep.subr.bf16.mxu0 %v3257_v45  ;;  %v2938_v38 = vunpack.c.l.bf16 %v2978_v36  ;;  %v2939_v41 = vunpack.c.h.bf16 %v2978_v36  ;;  %v2023_v42 = vld [vmem:[%s4912_s4 + $0x78] sm:$0xff]  ;;  %v2979_v43 = vld [vmem:[%s4911_s1 + $0x40] sm:$0xff]   ;;  %v2981_v57 = vld [vmem:[%s4911_s1 + $0x50] sm:$0xff]  }
  0x1f   :  { %3048 = vmatprep.subr.bf16.mxu1 %v3259_v46  ;;  %v2024_v44 = vld [vmem:[%s4912_s4 + $0x80] sm:$0xff]  ;;  %v2942_v45 = vunpack.c.l.bf16 %v2979_v43  ;;  %v2025_v46 = vld [vmem:[%s4912_s4 + $0x88] sm:$0xff]  ;;  %v2027_v49 = vld [vmem:[%s4912_s4 + $0x98] sm:$0xff] }
  0x20   :  { %289 = vperm.xlu1 %3214, %v195_v47   ;;  %v2026_v47 = vld [vmem:[%s4912_s4 + $0x90] sm:$0xff]  ;;  %v2982_v0 = vld [vmem:[%s4911_s1 + $0x58] sm:$0xff]   ;;  %v2983_v8 = vld [vmem:[%s4911_s1 + $0x60] sm:$0xff]  }
  0x21   :  { %3018 = vmatpush1.bf16.msra.mxu0 %v3261_v48  ;;  %3050 = vmatpush1.bf16.msra.mxu1 %v3262_v50  ;;  %v2943_v48 = vunpack.c.h.bf16 %v2979_v43  ;;  %v2980_v50 = vld [vmem:[%s4911_s1 + $0x48] sm:$0xff]  }
  0x22   :  { %294 = vperm.xlu0 %3213, %v196_v51   ;;  %v2028_v51 = vld [vmem:[%s4912_s4 + $0xa0] sm:$0xff] }
  0x24   :  { %437 = vmatmul.mubr.f32.vlgmr.msra.gmra.mrb[0].mxu0 %v2910_v52  ;;  %299 = vperm.xlu1 %3214, %v197_v53   ;;  %v2029_v53 = vld [vmem:[%s4912_s4 + $0xa8] sm:$0xff] }
  0x25   :  { %694 = vmatmul.mubr.f32.vlgmr.msra.gmra.mrb[0].mxu1 %v2910_v52  ;;  %442 = vmatprep.mubr.f32.mxu0 %v3264_v3  ;;  %v2946_v52 = vunpack.c.l.bf16 %v2980_v50 }
  0x26   :  { %304 = vperm.xlu0 %3213, %v198_v54   ;;  %699 = vmatprep.mubr.f32.mxu1 %v3264_v3  ;;  %v2030_v54 = vld [vmem:[%s4912_s4 + $0xb0] sm:$0xff] }
  0x28   :  { %443 = vmatmul.mubr.f32.gmra.mrb[2].mxu0 %v2911_v55  ;;  %309 = vperm.xlu1 %3214, %v199_v56   ;;  %v2031_v56 = vld [vmem:[%s4912_s4 + $0xb8] sm:$0xff] }
  0x29   :  { %700 = vmatmul.mubr.f32.gmra.mrb[2].mxu1 %v2911_v55  ;;  %448 = vmatprep.mubr.f32.mxu0 %v3264_v3  ;;  %v2947_v55 = vunpack.c.h.bf16 %v2980_v50 }
  0x2a   :  { %314 = vperm.xlu0 %3213, %v200_v58   ;;  %705 = vmatprep.mubr.f32.mxu1 %v3264_v3  ;;  %v2032_v58 = vld [vmem:[%s4912_s4 + $0xc0] sm:$0xff] }
  0x2c   :  { %449 = vmatmul.mubr.f32.gmra.mrb[4].mxu0 %v2914_v59  ;;  %319 = vperm.xlu1 %3214, %v201_v60   ;;  %v2033_v60 = vld [vmem:[%s4912_s4 + $0xc8] sm:$0xff] }
  0x2d   :  { %706 = vmatmul.mubr.f32.gmra.mrb[4].mxu1 %v2914_v59  ;;  %454 = vmatprep.mubr.f32.mxu0 %v3264_v3  ;;  %v2950_v59 = vunpack.c.l.bf16 %v2981_v57 }
  0x2e   :  { %324 = vperm.xlu0 %3213, %v202_v61   ;;  %711 = vmatprep.mubr.f32.mxu1 %v3264_v3  ;;  %v2034_v61 = vld [vmem:[%s4912_s4 + $0xd0] sm:$0xff] }
  0x30   :  { %455 = vmatmul.mubr.f32.gmra.mrb[6].mxu0 %v2915_v62  ;;  %329 = vperm.xlu1 %3214, %v203_v63   ;;  %v2035_v63 = vld [vmem:[%s4912_s4 + $0xd8] sm:$0xff] }
  0x31   :  { %712 = vmatmul.mubr.f32.gmra.mrb[6].mxu1 %v2915_v62  ;;  %460 = vmatprep.mubr.f32.mxu0 %v3264_v3  ;;  %v2951_v62 = vunpack.c.h.bf16 %v2981_v57 }
  0x32   :  { %334 = vperm.xlu0 %3213, %v204_v1   ;;  %717 = vmatprep.mubr.f32.mxu1 %v3264_v3  ;;  %v2036_v1 = vld [vmem:[%s4912_s4 + $0xe0] sm:$0xff] }
  0x34   :  { %461 = vmatmul.mubr.f32.gmra.mrb[8].mxu0 %v2918_v2  ;;  %339 = vperm.xlu1 %3214, %v205_v4   ;;  %v2037_v4 = vld [vmem:[%s4912_s4 + $0xe8] sm:$0xff] }
  0x35   :  { %718 = vmatmul.mubr.f32.gmra.mrb[8].mxu1 %v2918_v2  ;;  %466 = vmatprep.mubr.f32.mxu0 %v3264_v3  ;;  %v2954_v2 = vunpack.c.l.bf16 %v2982_v0 }
  0x36   :  { %344 = vperm.xlu0 %3213, %v206_v5   ;;  %723 = vmatprep.mubr.f32.mxu1 %v3264_v3  ;;  %v2038_v5 = vld [vmem:[%s4912_s4 + $0xf0] sm:$0xff] }
  0x38   :  { %467 = vmatmul.mubr.f32.gmra.mrb[10].mxu0 %v2919_v6  ;;  %349 = vperm.xlu1 %3214, %v207_v7   ;;  %v2039_v7 = vld [vmem:[%s4912_s4 + $0xf8] sm:$0xff] }
  0x39   :  { %724 = vmatmul.mubr.f32.gmra.mrb[10].mxu1 %v2919_v6  ;;  %472 = vmatprep.mubr.f32.mxu0 %v3264_v3  ;;  %v2955_v6 = vunpack.c.h.bf16 %v2982_v0 }
  0x3a   :  { %354 = vperm.xlu0 %3213, %v208_v9   ;;  %729 = vmatprep.mubr.f32.mxu1 %v3264_v3  ;;  %v2958_v9 = vunpack.c.l.bf16 %v2983_v8 }
  0x3c   :  { %473 = vmatmul.mubr.f32.gmra.mrb[12].mxu0 %v2922_v10  ;;  %359 = vperm.xlu1 %3214, %v209_v11   ;;  %v2984_v11 = vld [vmem:[%s4911_s1 + $0x68] sm:$0xff]  }
  0x3d   :  { %730 = vmatmul.mubr.f32.gmra.mrb[12].mxu1 %v2922_v10  ;;  %478 = vmatprep.mubr.f32.mxu0 %v3264_v3  ;;  %v2959_v10 = vunpack.c.h.bf16 %v2983_v8 }
  0x3e   :  { %364 = vperm.xlu0 %3213, %v210_v12   ;;  %735 = vmatprep.mubr.f32.mxu1 %v3264_v3  ;;  %v2962_v12 = vunpack.c.l.bf16 %v2984_v11 }
  0x40   :  { %479 = vmatmul.mubr.f32.gmra.mrb[14].mxu0 %v2923_v13  ;;  %369 = vperm.xlu1 %3214, %v211_v14   ;;  %v2985_v14 = vld [vmem:[%s4911_s1 + $0x70] sm:$0xff]  }
  0x41   :  { %736 = vmatmul.mubr.f32.gmra.mrb[14].mxu1 %v2923_v13  ;;  %484 = vmatprep.mubr.f32.mxu0 %v3264_v3  ;;  %v2963_v13 = vunpack.c.h.bf16 %v2984_v11  ;;  %v2966_v15 = vunpack.c.l.bf16 %v2985_v14 }
  0x42   :  { %2042 = vperm.xlu0 %3213, %v2008_v16   ;;  %741 = vmatprep.mubr.f32.mxu1 %v3264_v3  ;;  %v2967_v16 = vunpack.c.h.bf16 %v2985_v14 }
  0x44   :  { %485 = vmatmul.mubr.f32.gmra.mrb[16].mxu0 %v2926_v17  ;;  %2047 = vperm.xlu1 %3214, %v2009_v18  }
  0x45   :  { %742 = vmatmul.mubr.f32.gmra.mrb[16].mxu1 %v2926_v17  ;;  %490 = vmatprep.mubr.f32.mxu0 %v3264_v3  ;;  %v2986_v17 = vld [vmem:[%s4911_s1 + $0x78] sm:$0xff]  }
  0x46   :  { %2052 = vperm.xlu0 %3213, %v2010_v19   ;;  %747 = vmatprep.mubr.f32.mxu1 %v3264_v3  ;;  %v2970_v18 = vunpack.c.l.bf16 %v2986_v17  ;;  %v2971_v19 = vunpack.c.h.bf16 %v2986_v17 }
  0x48   :  { %491 = vmatmul.mubr.f32.gmra.mrb[18].mxu0 %v2927_v20  ;;  %2057 = vperm.xlu1 %3214, %v2011_v21  }
  0x49   :  { %748 = vmatmul.mubr.f32.gmra.mrb[18].mxu1 %v2927_v20  ;;  %496 = vmatprep.mubr.f32.mxu0 %v3264_v3 }
  0x4a   :  { %2062 = vperm.xlu0 %3213, %v2012_v23   ;;  %753 = vmatprep.mubr.f32.mxu1 %v3264_v3 }
  0x4c   :  { %497 = vmatmul.mubr.f32.gmra.mrb[20].mxu0 %v2930_v24  ;;  %2067 = vperm.xlu1 %3214, %v2013_v25  }
  0x4d   :  { %754 = vmatmul.mubr.f32.gmra.mrb[20].mxu1 %v2930_v24  ;;  %502 = vmatprep.mubr.f32.mxu0 %v3264_v3 }
  0x4e   :  { %2072 = vperm.xlu0 %3213, %v2014_v26   ;;  %759 = vmatprep.mubr.f32.mxu1 %v3264_v3 }
  0x50   :  { %503 = vmatmul.mubr.f32.gmra.mrb[22].mxu0 %v2931_v27  ;;  %2077 = vperm.xlu1 %3214, %v2015_v28  }
  0x51   :  { %760 = vmatmul.mubr.f32.gmra.mrb[22].mxu1 %v2931_v27  ;;  %508 = vmatprep.mubr.f32.mxu0 %v3264_v3 }
  0x52   :  { %2082 = vperm.xlu0 %3213, %v2016_v30   ;;  %765 = vmatprep.mubr.f32.mxu1 %v3264_v3 }
  0x54   :  { %509 = vmatmul.mubr.f32.gmra.mrb[24].mxu0 %v2934_v31  ;;  %2087 = vperm.xlu1 %3214, %v2017_v32  }
  0x55   :  { %766 = vmatmul.mubr.f32.gmra.mrb[24].mxu1 %v2934_v31  ;;  %514 = vmatprep.mubr.f32.mxu0 %v3264_v3 }
  0x56   :  { %2092 = vperm.xlu0 %3213, %v2018_v33   ;;  %771 = vmatprep.mubr.f32.mxu1 %v3264_v3 }
  0x58   :  { %515 = vmatmul.mubr.f32.gmra.mrb[26].mxu0 %v2935_v34  ;;  %2097 = vperm.xlu1 %3214, %v2019_v35  }
  0x59   :  { %772 = vmatmul.mubr.f32.gmra.mrb[26].mxu1 %v2935_v34  ;;  %520 = vmatprep.mubr.f32.mxu0 %v3264_v3 }
  0x5a   :  { %2102 = vperm.xlu0 %3213, %v2020_v37   ;;  %777 = vmatprep.mubr.f32.mxu1 %v3264_v3 }
  0x5c   :  { %521 = vmatmul.mubr.f32.gmra.mrb[28].mxu0 %v2938_v38  ;;  %2107 = vperm.xlu1 %3214, %v2021_v39  }
  0x5d   :  { %778 = vmatmul.mubr.f32.gmra.mrb[28].mxu1 %v2938_v38  ;;  %526 = vmatprep.mubr.f32.mxu0 %v3264_v3 }
  0x5e   :  { %2112 = vperm.xlu0 %3213, %v2022_v40   ;;  %783 = vmatprep.mubr.f32.mxu1 %v3264_v3 }
  0x60   :  { %527 = vmatmul.mubr.f32.gmra.mrb[30].mxu0 %v2939_v41  ;;  %2117 = vperm.xlu1 %3214, %v2023_v42  }
  0x61   :  { %784 = vmatmul.mubr.f32.gmra.mrb[30].mxu1 %v2939_v41  ;;  %532 = vmatprep.mubr.f32.mxu0 %v3264_v3 }
  0x62   :  { %2122 = vperm.xlu0 %3213, %v2024_v44   ;;  %789 = vmatprep.mubr.f32.mxu1 %v3264_v3 }
  0x64   :  { %533 = vmatmul.mubr.f32.gmra.mrb[32].mxu0 %v2942_v45  ;;  %2127 = vperm.xlu1 %3214, %v2025_v46  }
  0x65   :  { %790 = vmatmul.mubr.f32.gmra.mrb[32].mxu1 %v2942_v45  ;;  %538 = vmatprep.mubr.f32.mxu0 %v3264_v3 }
  0x66   :  { %2132 = vperm.xlu0 %3213, %v2026_v47   ;;  %795 = vmatprep.mubr.f32.mxu1 %v3264_v3 }
  0x68   :  { %539 = vmatmul.mubr.f32.gmra.mrb[34].mxu0 %v2943_v48  ;;  %2137 = vperm.xlu1 %3214, %v2027_v49  }
  0x69   :  { %796 = vmatmul.mubr.f32.gmra.mrb[34].mxu1 %v2943_v48  ;;  %544 = vmatprep.mubr.f32.mxu0 %v3264_v3 }
  0x6a   :  { %2142 = vperm.xlu0 %3213, %v2028_v51   ;;  %801 = vmatprep.mubr.f32.mxu1 %v3264_v3 }
  0x6c   :  { %545 = vmatmul.mubr.f32.gmra.mrb[36].mxu0 %v2946_v52  ;;  %2147 = vperm.xlu1 %3214, %v2029_v53  }
  0x6d   :  { %802 = vmatmul.mubr.f32.gmra.mrb[36].mxu1 %v2946_v52  ;;  %550 = vmatprep.mubr.f32.mxu0 %v3264_v3 }
  0x6e   :  { %2152 = vperm.xlu0 %3213, %v2030_v54   ;;  %807 = vmatprep.mubr.f32.mxu1 %v3264_v3 }
  0x70   :  { %551 = vmatmul.mubr.f32.gmra.mrb[38].mxu0 %v2947_v55  ;;  %2157 = vperm.xlu1 %3214, %v2031_v56  }
  0x71   :  { %808 = vmatmul.mubr.f32.gmra.mrb[38].mxu1 %v2947_v55  ;;  %556 = vmatprep.mubr.f32.mxu0 %v3264_v3 }
  0x72   :  { %2162 = vperm.xlu0 %3213, %v2032_v58   ;;  %813 = vmatprep.mubr.f32.mxu1 %v3264_v3 }
  0x74   :  { %557 = vmatmul.mubr.f32.gmra.mrb[40].mxu0 %v2950_v59  ;;  %2167 = vperm.xlu1 %3214, %v2033_v60  }
  0x75   :  { %814 = vmatmul.mubr.f32.gmra.mrb[40].mxu1 %v2950_v59  ;;  %562 = vmatprep.mubr.f32.mxu0 %v3264_v3 }
  0x76   :  { %2172 = vperm.xlu0 %3213, %v2034_v61   ;;  %819 = vmatprep.mubr.f32.mxu1 %v3264_v3 }
  0x78   :  { %563 = vmatmul.mubr.f32.gmra.mrb[42].mxu0 %v2951_v62  ;;  %2177 = vperm.xlu1 %3214, %v2035_v63  }
  0x79   :  { %820 = vmatmul.mubr.f32.gmra.mrb[42].mxu1 %v2951_v62  ;;  %568 = vmatprep.mubr.f32.mxu0 %v3264_v3 }
  0x7a   :  { %2182 = vperm.xlu0 %3213, %v2036_v1   ;;  %825 = vmatprep.mubr.f32.mxu1 %v3264_v3 }
  0x7c   :  { %569 = vmatmul.mubr.f32.gmra.mrb[44].mxu0 %v2954_v2  ;;  %2187 = vperm.xlu1 %3214, %v2037_v4  }
  0x7d   :  { %826 = vmatmul.mubr.f32.gmra.mrb[44].mxu1 %v2954_v2  ;;  %574 = vmatprep.mubr.f32.mxu0 %v3264_v3 }
  0x7e   :  { %2192 = vperm.xlu0 %3213, %v2038_v5   ;;  %831 = vmatprep.mubr.f32.mxu1 %v3264_v3 }
  0x80   :  { %575 = vmatmul.mubr.f32.gmra.mrb[46].mxu0 %v2955_v6  ;;  %2197 = vperm.xlu1 %3214, %v2039_v7  }
  0x81   :  { %832 = vmatmul.mubr.f32.gmra.mrb[46].mxu1 %v2955_v6  ;;  %580 = vmatprep.mubr.f32.mxu0 %v3264_v3  ;;  %v215_v20 = vpop.permute.xlu0 %214 }
  0x82   :  { %837 = vmatprep.mubr.f32.mxu1 %v3264_v3 }
  0x83   :  { %v225_v41 = vpop.permute.xlu1 %224 }
  0x84   :  { %581 = vmatmul.mubr.f32.gmra.mrb[48].mxu0 %v2958_v9 }
  0x85   :  { %838 = vmatmul.mubr.f32.gmra.mrb[48].mxu1 %v2958_v9  ;;  %586 = vmatprep.mubr.f32.mxu0 %v3264_v3  ;;  %v220_v29 = vpop.permute.xlu0 %219 }
  0x86   :  { %843 = vmatprep.mubr.f32.mxu1 %v3264_v3 }
  0x87   :  { %v230_v62 = vpop.permute.xlu1 %229 }
  0x88   :  { %587 = vmatmul.mubr.f32.gmra.mrb[50].mxu0 %v2959_v10 }
  0x89   :  { %844 = vmatmul.mubr.f32.gmra.mrb[50].mxu1 %v2959_v10  ;;  %592 = vmatprep.mubr.f32.mxu0 %v3264_v3  ;;  %v235_v63 = vpop.permute.xlu0 %234 }
  0x8a   :  { %849 = vmatprep.mubr.f32.mxu1 %v3264_v3 }
  0x8c   :  { %593 = vmatmul.mubr.f32.gmra.mrb[52].mxu0 %v2962_v12 }
  0x8d   :  { %850 = vmatmul.mubr.f32.gmra.mrb[52].mxu1 %v2962_v12  ;;  %598 = vmatprep.mubr.f32.mxu0 %v3264_v3 }
  0x8e   :  { %855 = vmatprep.mubr.f32.mxu1 %v3264_v3 }
  0x90   :  { %599 = vmatmul.mubr.f32.gmra.mrb[54].mxu0 %v2963_v13 }
  0x91   :  { %856 = vmatmul.mubr.f32.gmra.mrb[54].mxu1 %v2963_v13  ;;  %604 = vmatprep.mubr.f32.mxu0 %v3264_v3 }
  0x92   :  { %861 = vmatprep.mubr.f32.mxu1 %v3264_v3 }
  0x94   :  { %605 = vmatmul.mubr.f32.gmra.mrb[56].mxu0 %v2966_v15 }
  0x95   :  { %862 = vmatmul.mubr.f32.gmra.mrb[56].mxu1 %v2966_v15  ;;  %610 = vmatprep.mubr.f32.mxu0 %v3264_v3 }
  0x96   :  { %867 = vmatprep.mubr.f32.mxu1 %v3264_v3 }
  0x98   :  { %611 = vmatmul.mubr.f32.gmra.mrb[58].mxu0 %v2967_v16 }
  0x99   :  { %868 = vmatmul.mubr.f32.gmra.mrb[58].mxu1 %v2967_v16  ;;  %616 = vmatprep.mubr.f32.mxu0 %v3264_v3 }
  0x9a   :  { %873 = vmatprep.mubr.f32.mxu1 %v3264_v3 }
  0x9c   :  { %617 = vmatmul.mubr.f32.gmra.mrb[60].mxu0 %v2970_v18 }
  0x9d   :  { %874 = vmatmul.mubr.f32.gmra.mrb[60].mxu1 %v2970_v18  ;;  %622 = vmatprep.mubr.f32.mxu0 %v3264_v3 }
  0x9e   :  { %879 = vmatprep.mubr.f32.mxu1 %v3264_v3 }
  0xa0   :  { %623 = vmatmul.mubr.f32.gmra.mrb[62].mxu0 %v2971_v19 }
  0xa1   :  { %880 = vmatmul.mubr.f32.gmra.mrb[62].mxu1 %v2971_v19 }
  0xf7   :  { %v438_v21 = vpop.f32.mrb[0].mxu0 }
  0xf8   :  { %v695_v22 = vpop.f32.mrb[0].mxu1  ;;  %v440_v23 = vpop.f32.mrb[1].mxu0  ;;  %v439_v24 = vadd.f32 %v438_v21, %v215_v20 }
  0xf9   :  { %v696_v25 = vadd.f32 %v695_v22, %v215_v20  ;;  %v697_v26 = vpop.f32.mrb[1].mxu1  ;;  %v441_v27 = vadd.f32 %v440_v23, %v215_v20 }
  0xfa   :  { %v698_v28 = vadd.f32 %v697_v26, %v215_v20  ;;  %v1014_v32 = vmul.f32 0.1, %v439_v24  ;;  %vm886_vm2 = vcmp.gt.f32.partialorder %v439_v24, 0.0 }
  0xfb   :  { %v444_v30 = vpop.f32.mrb[2].mxu0  ;;  %v1016_v33 = vmul.f32 0.1, %v696_v25  ;;  %v1015_v37 = vmul.f32 0.1, %v441_v27  ;;  %vm888_vm4 = vcmp.gt.f32.partialorder %v696_v25, 0.0 }
  0xfc   :  { %v701_v31 = vpop.f32.mrb[2].mxu1  ;;  %v445_v34 = vadd.f32 %v444_v30, %v220_v29  ;;  %v446_v36 = vpop.f32.mrb[3].mxu0  ;;  %v1017_v38 = vmul.f32 0.1, %v698_v28  ;;  %vm887_vm5 = vcmp.gt.f32.partialorder %v441_v27, 0.0  ;;  %vm889_vm6 = vcmp.gt.f32.partialorder %v698_v28, 0.0 }
  0xfd   :  { %v702_v35 = vadd.f32 %v701_v31, %v220_v29  ;;  %v703_v3 = vpop.f32.mrb[3].mxu1  ;;  %v447_v39 = vadd.f32 %v446_v36, %v220_v29  ;;  %v3700_v54 = vsel %vm886_vm2, %v439_v24, %v1014_v32  ;;  %v3706_v58 = vsel %vm888_vm4, %v696_v25, %v1016_v33  ;;  %v240_v24 = vpop.permute.xlu1 %239 }
  0xfe   :  { %v704_v40 = vadd.f32 %v703_v3, %v220_v29  ;;  %vm890_vm0 = vcmp.gt.f32.partialorder %v445_v34, 0.0  ;;  %v1018_v42 = vmul.f32 0.1, %v445_v34  ;;  %v3709_v59 = vsel %vm887_vm5, %v441_v27, %v1015_v37 }
  0xff   :  { %vm892_vm1 = vcmp.gt.f32.partialorder %v702_v35, 0.0  ;;  %v1020_v43 = vmul.f32 0.1, %v702_v35  ;;  %vm891_vm3 = vcmp.gt.f32.partialorder %v447_v39, 0.0  ;;  %v1019_v44 = vmul.f32 0.1, %v447_v39 }
 0x100   :  { %v1021_v45 = vmul.f32 0.1, %v704_v40  ;;  %vm893_vm7 = vcmp.gt.f32.partialorder %v704_v40, 0.0  ;;  %v450_v46 = vpop.f32.mrb[4].mxu0  ;;  %v707_v47 = vpop.f32.mrb[4].mxu1  ;;  %v3695_v48 = vsel %vm890_vm0, %v445_v34, %v1018_v42  ;;  %v3712_v60 = vsel %vm889_vm6, %v698_v28, %v1017_v38 }
 0x101   :  { %v3697_v49 = vsel %vm892_vm1, %v702_v35, %v1020_v43  ;;  %v451_v50 = vadd.f32 %v450_v46, %v225_v41  ;;  %v708_v51 = vadd.f32 %v707_v47, %v225_v41  ;;  %v452_v52 = vpop.f32.mrb[5].mxu0  ;;  %v709_v53 = vpop.f32.mrb[5].mxu1  ;;  %v3703_v57 = vsel %vm891_vm3, %v447_v39, %v1019_v44 }
 0x102   :  { %v453_v55 = vadd.f32 %v452_v52, %v225_v41  ;;  %v3715_v61 = vsel %vm893_vm7, %v704_v40, %v1021_v45  ;;  %v3053_v0 = vpack.c.bf16 %v3695_v48, %v3700_v54  ;;  %v3117_v1 = vpack.c.bf16 %v3697_v49, %v3706_v58 }
 0x103   :  { %v456_v56 = vpop.f32.mrb[6].mxu0  ;;  %vm894_vm8 = vcmp.gt.f32.partialorder %v451_v50, 0.0  ;;  %v3721_v2 = vadd.f32 %v709_v53, %v225_v41  ;;  %v1022_v4 = vmul.f32 0.1, %v451_v50  ;;  %vm896_vm9 = vcmp.gt.f32.partialorder %v708_v51, 0.0 }
 0x104   :  { %v457_v5 = vadd.f32 %v456_v56, %v230_v62  ;;  %v713_v6 = vpop.f32.mrb[6].mxu1  ;;  %v458_v7 = vpop.f32.mrb[7].mxu0  ;;  %v3051_v8 = vpack.c.bf16 %v3703_v57, %v3709_v59  ;;  %v1024_v9 = vmul.f32 0.1, %v708_v51  ;;  %v1023_v10 = vmul.f32 0.1, %v453_v55 }
 0x105   :  { %v714_v11 = vadd.f32 %v713_v6, %v230_v62  ;;  %v715_v12 = vpop.f32.mrb[7].mxu1  ;;  %v3115_v13 = vpack.c.bf16 %v3715_v61, %v3712_v60  ;;  %vm895_vm10 = vcmp.gt.f32.partialorder %v453_v55, 0.0  ;;  %v459_v16 = vadd.f32 %v458_v7, %v230_v62 }
 0x106   :  { %vm898_vm11 = vcmp.gt.f32.partialorder %v457_v5, 0.0  ;;  %v1026_v15 = vmul.f32 0.1, %v457_v5  ;;  %3052 = vmatprep.subr.bf16.mxu0 %v3051_v8  ;;  %v716_v20 = vadd.f32 %v715_v12, %v230_v62  ;;  %vm897_vm13 = vcmp.gt.f32.partialorder %v3721_v2, 0.0  ;;  %v245_v62 = vpop.permute.xlu0 %244 }
 0x107   :  { %v462_v14 = vpop.f32.mrb[8].mxu0  ;;  %vm900_vm12 = vcmp.gt.f32.partialorder %v714_v11, 0.0  ;;  %v1028_v19 = vmul.f32 0.1, %v714_v11  ;;  %3116 = vmatprep.subr.bf16.mxu1 %v3115_v13  ;;  %3054 = vmatpush1.bf16.msra.mxu0 %v3053_v0  ;;  %v1025_v22 = vmul.f32 0.1, %v3721_v2  ;;  %v3730_v25 = vsel %vm894_vm8, %v451_v50, %v1022_v4  ;;  %v250_v4 = vpop.permute.xlu1 %249 }
 0x108   :  { %v719_v17 = vpop.f32.mrb[8].mxu1  ;;  %v464_v18 = vpop.f32.mrb[9].mxu0  ;;  %v463_v21 = vadd.f32 %v462_v14, %v235_v63  ;;  %3118 = vmatpush1.bf16.msra.mxu1 %v3117_v1  ;;  %v3733_v26 = vsel %vm896_vm9, %v708_v51, %v1024_v9  ;;  %v3736_v27 = vsel %vm898_vm11, %v457_v5, %v1026_v15  ;;  %v1027_v31 = vmul.f32 0.1, %v459_v16 }
 0x109   :  { %v721_v23 = vpop.f32.mrb[9].mxu1  ;;  %v720_v28 = vadd.f32 %v719_v17, %v235_v63  ;;  %v3739_v30 = vsel %vm900_vm12, %v714_v11, %v1028_v19  ;;  %v3742_v35 = vsel %vm895_vm10, %v453_v55, %v1023_v10  ;;  %vm899_vm14 = vcmp.gt.f32.partialorder %v459_v16, 0.0 }
 0x10a   :  { %v1029_v36 = vmul.f32 0.1, %v716_v20  ;;  %v1030_v3 = vmul.f32 0.1, %v463_v21  ;;  %v3057_v39 = vpack.c.bf16 %v3736_v27, %v3730_v25  ;;  %vm901_vm15 = vcmp.gt.f32.partialorder %v716_v20, 0.0 }
 0x10b   :  { %v468_v29 = vpop.f32.mrb[10].mxu0  ;;  %vm902_vm0 = vcmp.gt.f32.partialorder %v463_v21, 0.0  ;;  %v465_v40 = vadd.f32 %v464_v18, %v235_v63  ;;  %v3121_v41 = vpack.c.bf16 %v3739_v30, %v3733_v26  ;;  %v1032_v42 = vmul.f32 0.1, %v720_v28 }
 0x10c   :  { %v469_v32 = vadd.f32 %v468_v29, %v240_v24  ;;  %v725_v33 = vpop.f32.mrb[10].mxu1  ;;  %v470_v34 = vpop.f32.mrb[11].mxu0  ;;  %v3748_v45 = vadd.f32 %v721_v23, %v235_v63  ;;  %v3751_v47 = vsel %vm899_vm14, %v459_v16, %v1027_v31  ;;  %v3753_v52 = vsel %vm902_vm0, %v463_v21, %v1030_v3 }
 0x10d   :  { %v726_v37 = vadd.f32 %v725_v33, %v240_v24  ;;  %v727_v38 = vpop.f32.mrb[11].mxu1  ;;  %vm904_vm3 = vcmp.gt.f32.partialorder %v720_v28, 0.0  ;;  %v3055_v53 = vpack.c.bf16 %v3751_v47, %v3742_v35  ;;  %v3758_v55 = vsel %vm901_vm15, %v716_v20, %v1029_v36 }
 0x10e   :  { %vm906_vm1 = vcmp.gt.f32.partialorder %v469_v32, 0.0  ;;  %v1034_v43 = vmul.f32 0.1, %v469_v32  ;;  %vm903_vm4 = vcmp.gt.f32.partialorder %v465_v40, 0.0  ;;  %v471_v0 = vadd.f32 %v470_v34, %v240_v24 }
 0x10f   :  { %v474_v44 = vpop.f32.mrb[12].mxu0  ;;  %vm908_vm2 = vcmp.gt.f32.partialorder %v726_v37, 0.0  ;;  %v1036_v46 = vmul.f32 0.1, %v726_v37  ;;  %v3766_v1 = vsel %vm897_vm13, %v3721_v2, %v1025_v22  ;;  %v1031_v5 = vmul.f32 0.1, %v465_v40  ;;  %3056 = vmatprep.subr.bf16.mxu0 %v3055_v53 }
 0x110   :  { %v731_v50 = vpop.f32.mrb[12].mxu1  ;;  %v476_v51 = vpop.f32.mrb[13].mxu0  ;;  %v3761_v63 = vsel %vm906_vm1, %v469_v32, %v1034_v43  ;;  %v728_v7 = vadd.f32 %v727_v38, %v240_v24  ;;  %v3119_v8 = vpack.c.bf16 %v3758_v55, %v3766_v1  ;;  %v3774_v10 = vsel %vm904_vm3, %v720_v28, %v1032_v42  ;;  %3058 = vmatpush1.bf16.msra.mxu0 %v3057_v39 }
 0x111   :  { %v733_v56 = vpop.f32.mrb[13].mxu1  ;;  %4999 = vst [vmem:[#allocation2_spill] sm:$0xff] %v3761_v63  ;;  %v3769_v6 = vsel %vm908_vm2, %v726_v37, %v1036_v46  ;;  %vm905_vm5 = vcmp.gt.f32.partialorder %v3748_v45, 0.0  ;;  %v1033_v11 = vmul.f32 0.1, %v3748_v45  ;;  %v475_v2 = vadd.f32 %v474_v44, %v245_v62 }
 0x112   :  { %5000 = vst [vmem:[#allocation3_spill] sm:$0xff] %v3769_v6  ;;  %v3061_v14 = vpack.c.bf16 %v3761_v63, %v3753_v52  ;;  %3120 = vmatprep.subr.bf16.mxu1 %v3119_v8  ;;  %v732_v15 = vadd.f32 %v731_v50, %v245_v62  ;;  %v3125_v19 = vpack.c.bf16 %v3769_v6, %v3774_v10  ;;  %vm907_vm6 = vcmp.gt.f32.partialorder %v471_v0, 0.0 }
 0x113   :  { %v480_v9 = vpop.f32.mrb[14].mxu0  ;;  %v1035_v20 = vmul.f32 0.1, %v471_v0  ;;  %3122 = vmatpush1.bf16.msra.mxu1 %v3121_v41  ;;  %v3782_v21 = vadd.f32 %v476_v51, %v245_v62  ;;  %vm909_vm7 = vcmp.gt.f32.partialorder %v728_v7, 0.0  ;;  %v1037_v22 = vmul.f32 0.1, %v728_v7  ;;  %v255_v41 = vpop.permute.xlu0 %254 }
 0x114   :  { %v737_v12 = vpop.f32.mrb[14].mxu1  ;;  %v482_v13 = vpop.f32.mrb[15].mxu0  ;;  %v481_v16 = vadd.f32 %v480_v9, %v250_v4  ;;  %vm910_vm8 = vcmp.gt.f32.partialorder %v475_v2, 0.0  ;;  %v3784_v23 = vadd.f32 %v733_v56, %v245_v62  ;;  %v1038_v24 = vmul.f32 0.1, %v475_v2 }
 0x115   :  { %v738_v17 = vadd.f32 %v737_v12, %v250_v4  ;;  %v739_v18 = vpop.f32.mrb[15].mxu1  ;;  %v3786_v29 = vadd.f32 %v482_v13, %v250_v4  ;;  %v3789_v31 = vsel %vm903_vm4, %v465_v40, %v1031_v5  ;;  %v1040_v34 = vmul.f32 0.1, %v732_v15 }
 0x116   :  { %v1042_v28 = vmul.f32 0.1, %v481_v16  ;;  %vm914_vm9 = vcmp.gt.f32.partialorder %v481_v16, 0.0  ;;  %vm912_vm11 = vcmp.gt.f32.partialorder %v732_v15, 0.0  ;;  %vm911_vm12 = vcmp.gt.f32.partialorder %v3782_v21, 0.0 }
 0x117   :  { %v486_v32 = vpop.f32.mrb[16].mxu0  ;;  %vm916_vm10 = vcmp.gt.f32.partialorder %v738_v17, 0.0  ;;  %v1044_v36 = vmul.f32 0.1, %v738_v17  ;;  %v1039_v3 = vmul.f32 0.1, %v3782_v21  ;;  %v3794_v37 = vsel %vm907_vm6, %v471_v0, %v1035_v20  ;;  %v260_v0 = vpop.permute.xlu1 %259 }
 0x118   :  { %v743_v33 = vpop.f32.mrb[16].mxu1  ;;  %5001 = vst [vmem:[#allocation4_spill] sm:$0xff] %v3794_v37  ;;  %v488_v38 = vpop.f32.mrb[17].mxu0  ;;  %vm913_vm13 = vcmp.gt.f32.partialorder %v3784_v23, 0.0  ;;  %v3059_v40 = vpack.c.bf16 %v3794_v37, %v3789_v31  ;;  %v3802_v42 = vsel %vm905_vm5, %v3748_v45, %v1033_v11  ;;  %v3805_v43 = vsel %vm909_vm7, %v728_v7, %v1037_v22 }
 0x119   :  { %v745_v39 = vpop.f32.mrb[17].mxu1  ;;  %5002 = vst [vmem:[#allocation5_spill] sm:$0xff] %v3805_v43  ;;  %v3807_v46 = vsel %vm914_vm9, %v481_v16, %v1042_v28  ;;  %v3809_v50 = vsel %vm916_vm10, %v738_v17, %v1044_v36  ;;  %v740_v51 = vadd.f32 %v739_v18, %v250_v4  ;;  %v3123_v53 = vpack.c.bf16 %v3805_v43, %v3802_v42 }
 0x11a   :  { %5003 = vst [vmem:[#allocation6_spill] sm:$0xff] %v3807_v46  ;;  %5004 = vst [vmem:[#allocation7_spill] sm:$0xff] %v3809_v50  ;;  %v3814_v5 = vsel %vm910_vm8, %v475_v2, %v1038_v24  ;;  %v3817_v45 = vsel %vm912_vm11, %v732_v15, %v1040_v34  ;;  %v1041_v7 = vmul.f32 0.1, %v3784_v23  ;;  %3060 = vmatprep.subr.bf16.mxu0 %v3059_v40  ;;  %vm915_vm14 = vcmp.gt.f32.partialorder %v3786_v29, 0.0 }
 0x11b   :  { %v492_v44 = vpop.f32.mrb[18].mxu0  ;;  %5005 = vst [vmem:[#allocation8_spill] sm:$0xff] %v3814_v5  ;;  %5006 = vst [vmem:[#allocation9_spill] sm:$0xff] %v3817_v45  ;;  %v487_v8 = vadd.f32 %v486_v32, %v255_v41  ;;  %3124 = vmatprep.subr.bf16.mxu1 %v3123_v53  ;;  %3062 = vmatpush1.bf16.msra.mxu0 %v3061_v14  ;;  %v744_v4 = vadd.f32 %v743_v33, %v255_v41  ;;  %v1043_v15 = vmul.f32 0.1, %v3786_v29  ;;  %v265_v32 = vpop.permute.xlu0 %264 }
 0x11c   :  { %v749_v56 = vpop.f32.mrb[18].mxu1  ;;  %v494_v62 = vpop.f32.mrb[19].mxu0  ;;  %v493_v11 = vadd.f32 %v492_v44, %v260_v0  ;;  %v3065_v13 = vpack.c.bf16 %v3807_v46, %v3814_v5  ;;  %v3129_v2 = vpack.c.bf16 %v3809_v50, %v3817_v45  ;;  %3126 = vmatpush1.bf16.msra.mxu1 %v3125_v19  ;;  %v3826_v16 = vadd.f32 %v488_v38, %v255_v41 }
 0x11d   :  { %v751_v9 = vpop.f32.mrb[19].mxu1  ;;  %v750_v12 = vadd.f32 %v749_v56, %v260_v0  ;;  %vm917_vm15 = vcmp.gt.f32.partialorder %v740_v51, 0.0  ;;  %v1045_v17 = vmul.f32 0.1, %v740_v51  ;;  %v1046_v18 = vmul.f32 0.1, %v487_v8 }
 0x11e   :  { %v3828_v20 = vadd.f32 %v745_v39, %v255_v41  ;;  %vm918_vm0 = vcmp.gt.f32.partialorder %v487_v8, 0.0  ;;  %vm922_vm1 = vcmp.gt.f32.partialorder %v493_v11, 0.0  ;;  %v1050_v14 = vmul.f32 0.1, %v493_v11 }
 0x11f   :  { %v495_v22 = vadd.f32 %v494_v62, %v260_v0  ;;  %v498_v24 = vpop.f32.mrb[20].mxu0  ;;  %vm920_vm2 = vcmp.gt.f32.partialorder %v744_v4, 0.0  ;;  %v1048_v33 = vmul.f32 0.1, %v744_v4  ;;  %vm924_vm3 = vcmp.gt.f32.partialorder %v750_v12, 0.0 }
 0x120   :  { %v755_v28 = vpop.f32.mrb[20].mxu1  ;;  %v1052_v34 = vmul.f32 0.1, %v750_v12  ;;  %vm919_vm4 = vcmp.gt.f32.partialorder %v3826_v16, 0.0  ;;  %v1047_v19 = vmul.f32 0.1, %v3826_v16  ;;  %v3835_v36 = vsel %vm911_vm12, %v3782_v21, %v1039_v3 }
 0x121   :  { %5007 = vst [vmem:[#allocation10_spill] sm:$0xff] %v3835_v36  ;;  %v3840_v38 = vsel %vm915_vm14, %v3786_v29, %v1043_v15  ;;  %v500_v39 = vpop.f32.mrb[21].mxu0  ;;  %v757_v41 = vpop.f32.mrb[21].mxu1  ;;  %vm921_vm5 = vcmp.gt.f32.partialorder %v3828_v20, 0.0  ;;  %v1049_v40 = vmul.f32 0.1, %v3828_v20  ;;  %v3845_v44 = vsel %vm922_vm1, %v493_v11, %v1050_v14 }
 0x122   :  { %5008 = vst [vmem:[#allocation11_spill] sm:$0xff] %v3840_v38  ;;  %5009 = vst [vmem:[#allocation12_spill] sm:$0xff] %v3845_v44  ;;  %v3063_v53 = vpack.c.bf16 %v3840_v38, %v3835_v36  ;;  %v3849_v3 = vsel %vm924_vm3, %v750_v12, %v1052_v34  ;;  %v752_v62 = vadd.f32 %v751_v9, %v260_v0  ;;  %v270_v11 = vpop.permute.xlu1 %269  ;;  %vm923_vm6 = vcmp.gt.f32.partialorder %v495_v22, 0.0 }
 0x123   :  { %v504_v56 = vpop.f32.mrb[22].mxu0  ;;  %5010 = vst [vmem:[#allocation13_spill] sm:$0xff] %v3849_v3  ;;  %v3854_v29 = vsel %vm913_vm13, %v3784_v23, %v1041_v7  ;;  %v3857_v15 = vsel %vm917_vm15, %v740_v51, %v1045_v17  ;;  %v3860_v14 = vsel %vm918_vm0, %v487_v8, %v1046_v18  ;;  %v3863_v38 = vsel %vm920_vm2, %v744_v4, %v1048_v33 }
 0x124   :  { %v761_v21 = vpop.f32.mrb[22].mxu1  ;;  %5011 = vst [vmem:[#allocation14_spill] sm:$0xff] %v3854_v29  ;;  %5012 = vst [vmem:[#allocation15_spill] sm:$0xff] %v3857_v15  ;;  %v506_v50 = vpop.f32.mrb[23].mxu0  ;;  %3064 = vmatprep.subr.bf16.mxu0 %v3063_v53  ;;  %v3127_v0 = vpack.c.bf16 %v3857_v15, %v3854_v29  ;;  %v499_v9 = vadd.f32 %v498_v24, %v265_v32  ;;  %v756_v23 = vadd.f32 %v755_v28, %v265_v32 }
 0x125   :  { %v763_v46 = vpop.f32.mrb[23].mxu1  ;;  %5013 = vst [vmem:[#allocation16_spill] sm:$0xff] %v3860_v14  ;;  %5014 = vst [vmem:[#allocation17_spill] sm:$0xff] %v3863_v38  ;;  %3066 = vmatpush1.bf16.msra.mxu0 %v3065_v13  ;;  %v505_v7 = vadd.f32 %v504_v56, %v270_v11  ;;  %v762_v51 = vadd.f32 %v761_v21, %v270_v11  ;;  %v3069_v17 = vpack.c.bf16 %v3845_v44, %v3860_v14  ;;  %v275_v29 = vpop.permute.xlu0 %274 }
 0x126   :  { %v3133_v8 = vpack.c.bf16 %v3849_v3, %v3863_v38  ;;  %v1051_v18 = vmul.f32 0.1, %v495_v22  ;;  %3128 = vmatprep.subr.bf16.mxu1 %v3127_v0  ;;  %v3871_v4 = vadd.f32 %v500_v39, %v265_v32  ;;  %vm925_vm7 = vcmp.gt.f32.partialorder %v752_v62, 0.0 }
 0x127   :  { %v510_v12 = vpop.f32.mrb[24].mxu0  ;;  %v1053_v33 = vmul.f32 0.1, %v752_v62  ;;  %3130 = vmatpush1.bf16.msra.mxu1 %v3129_v2  ;;  %v1054_v24 = vmul.f32 0.1, %v499_v9  ;;  %v3873_v34 = vadd.f32 %v757_v41, %v265_v32  ;;  %vm926_vm8 = vcmp.gt.f32.partialorder %v499_v9, 0.0 }
 0x128   :  { %vm930_vm9 = vcmp.gt.f32.partialorder %v505_v7, 0.0  ;;  %v1058_v13 = vmul.f32 0.1, %v505_v7  ;;  %v3875_v28 = vadd.f32 %v506_v50, %v270_v11  ;;  %v767_v53 = vpop.f32.mrb[24].mxu1  ;;  %v512_v56 = vpop.f32.mrb[25].mxu0  ;;  %vm928_vm10 = vcmp.gt.f32.partialorder %v756_v23, 0.0 }
 0x129   :  { %v1056_v21 = vmul.f32 0.1, %v756_v23  ;;  %vm932_vm11 = vcmp.gt.f32.partialorder %v762_v51, 0.0  ;;  %v1060_v3 = vmul.f32 0.1, %v762_v51  ;;  %vm927_vm12 = vcmp.gt.f32.partialorder %v3871_v4, 0.0 }
 0x12a   :  { %v1055_v39 = vmul.f32 0.1, %v3871_v4  ;;  %v3882_v2 = vsel %vm919_vm4, %v3826_v16, %v1047_v19  ;;  %v3885_v32 = vsel %vm923_vm6, %v495_v22, %v1051_v18  ;;  %v769_v50 = vpop.f32.mrb[25].mxu1  ;;  %vm929_vm13 = vcmp.gt.f32.partialorder %v3873_v34, 0.0 }
 0x12b   :  { %5015 = vst [vmem:[#allocation18_spill] sm:$0xff] %v3882_v2  ;;  %5016 = vst [vmem:[#allocation19_spill] sm:$0xff] %v3885_v32  ;;  %v516_v41 = vpop.f32.mrb[26].mxu0  ;;  %v1057_v0 = vmul.f32 0.1, %v3873_v34  ;;  %v3890_v44 = vsel %vm930_vm9, %v505_v7, %v1058_v13  ;;  %v3067_v38 = vpack.c.bf16 %v3885_v32, %v3882_v2  ;;  %v3894_v16 = vsel %vm932_vm11, %v762_v51, %v1060_v3  ;;  %v280_v7 = vpop.permute.xlu1 %279 }
 0x12c   :  { %5017 = vst [vmem:[#allocation20_spill] sm:$0xff] %v3890_v44  ;;  %v773_v14 = vpop.f32.mrb[26].mxu1  ;;  %v518_v15 = vpop.f32.mrb[27].mxu0  ;;  %5018 = vst [vmem:[#allocation21_spill] sm:$0xff] %v3894_v16  ;;  %v764_v19 = vadd.f32 %v763_v46, %v270_v11  ;;  %v3899_v22 = vsel %vm921_vm5, %v3828_v20, %v1049_v40  ;;  %v3902_v18 = vsel %vm925_vm7, %v752_v62, %v1053_v33  ;;  %vm931_vm14 = vcmp.gt.f32.partialorder %v3875_v28, 0.0 }
 0x12d   :  { %5019 = vst [vmem:[#allocation22_spill] sm:$0xff] %v3899_v22  ;;  %5020 = vst [vmem:[#allocation23_spill] sm:$0xff] %v3902_v18  ;;  %v775_v45 = vpop.f32.mrb[27].mxu1  ;;  %v3905_v13 = vsel %vm926_vm8, %v499_v9, %v1054_v24  ;;  %v3908_v32 = vsel %vm928_vm10, %v756_v23, %v1056_v21  ;;  %3068 = vmatprep.subr.bf16.mxu0 %v3067_v38  ;;  %v3131_v46 = vpack.c.bf16 %v3902_v18, %v3899_v22 }
 0x12e   :  { %5021 = vst [vmem:[#allocation24_spill] sm:$0xff] %v3905_v13  ;;  %5022 = vst [vmem:[#allocation25_spill] sm:$0xff] %v3908_v32  ;;  %v511_v3 = vadd.f32 %v510_v12, %v275_v29  ;;  %3070 = vmatpush1.bf16.msra.mxu0 %v3069_v17  ;;  %v768_v20 = vadd.f32 %v767_v53, %v275_v29  ;;  %v517_v40 = vadd.f32 %v516_v41, %v280_v7 }
 0x12f   :  { %v522_v11 = vpop.f32.mrb[28].mxu0  ;;  %v774_v62 = vadd.f32 %v773_v14, %v280_v7  ;;  %v3073_v9 = vpack.c.bf16 %v3890_v44, %v3905_v13  ;;  %v3137_v23 = vpack.c.bf16 %v3894_v16, %v3908_v32  ;;  %v1059_v38 = vmul.f32 0.1, %v3875_v28  ;;  %3132 = vmatprep.subr.bf16.mxu1 %v3131_v46  ;;  %v285_v46 = vpop.permute.xlu0 %284 }
 0x130   :  { %v779_v51 = vpop.f32.mrb[28].mxu1  ;;  %v524_v33 = vpop.f32.mrb[29].mxu0  ;;  %v3918_v24 = vadd.f32 %v512_v56, %v275_v29  ;;  %vm933_vm15 = vcmp.gt.f32.partialorder %v764_v19, 0.0  ;;  %v1061_v12 = vmul.f32 0.1, %v764_v19  ;;  %3134 = vmatpush1.bf16.msra.mxu1 %v3133_v8  ;;  %v3920_v53 = vadd.f32 %v769_v50, %v275_v29 }
 0x131   :  { %v1062_v17 = vmul.f32 0.1, %v511_v3  ;;  %vm934_vm0 = vcmp.gt.f32.partialorder %v511_v3, 0.0  ;;  %vm938_vm1 = vcmp.gt.f32.partialorder %v517_v40, 0.0  ;;  %v1066_v14 = vmul.f32 0.1, %v517_v40 }
 0x132   :  { %v519_v21 = vadd.f32 %v518_v15, %v280_v7  ;;  %v781_v41 = vpop.f32.mrb[29].mxu1  ;;  %vm936_vm2 = vcmp.gt.f32.partialorder %v768_v20, 0.0  ;;  %v1064_v13 = vmul.f32 0.1, %v768_v20  ;;  %vm940_vm3 = vcmp.gt.f32.partialorder %v774_v62, 0.0 }
 0x133   :  { %v528_v44 = vpop.f32.mrb[30].mxu0  ;;  %v1068_v16 = vmul.f32 0.1, %v774_v62  ;;  %vm935_vm4 = vcmp.gt.f32.partialorder %v3918_v24, 0.0  ;;  %v1063_v56 = vmul.f32 0.1, %v3918_v24  ;;  %v3927_v8 = vsel %vm927_vm12, %v3871_v4, %v1055_v39  ;;  %v290_v39 = vpop.permute.xlu1 %289 }
 0x134   :  { %5023 = vst [vmem:[#allocation26_spill] sm:$0xff] %v3927_v8  ;;  %v3932_v29 = vsel %vm931_vm14, %v3875_v28, %v1059_v38  ;;  %v785_v15 = vpop.f32.mrb[30].mxu1  ;;  %v530_v50 = vpop.f32.mrb[31].mxu0  ;;  %vm937_vm5 = vcmp.gt.f32.partialorder %v3920_v53, 0.0  ;;  %v1065_v32 = vmul.f32 0.1, %v3920_v53  ;;  %v3937_v18 = vsel %vm938_vm1, %v517_v40, %v1066_v14 }
 0x135   :  { %5024 = vst [vmem:[#allocation27_spill] sm:$0xff] %v3932_v29  ;;  %5025 = vst [vmem:[#allocation28_spill] sm:$0xff] %v3937_v18  ;;  %v3071_v22 = vpack.c.bf16 %v3932_v29, %v3927_v8  ;;  %v787_v4 = vpop.f32.mrb[31].mxu1  ;;  %v3941_v2 = vsel %vm940_vm3, %v774_v62, %v1068_v16  ;;  %v776_v36 = vadd.f32 %v775_v45, %v280_v7  ;;  %vm939_vm6 = vcmp.gt.f32.partialorder %v519_v21, 0.0 }
 0x136   :  { %5026 = vst [vmem:[#allocation29_spill] sm:$0xff] %v3941_v2  ;;  %v3946_v28 = vsel %vm929_vm13, %v3873_v34, %v1057_v0  ;;  %v3949_v38 = vsel %vm933_vm15, %v764_v19, %v1061_v12  ;;  %v3952_v40 = vsel %vm934_vm0, %v511_v3, %v1062_v17  ;;  %v3955_v14 = vsel %vm936_vm2, %v768_v20, %v1064_v13 }
 0x137   :  { %5027 = vst [vmem:[#allocation30_spill] sm:$0xff] %v3946_v28  ;;  %5028 = vst [vmem:[#allocation31_spill] sm:$0xff] %v3949_v38  ;;  %v534_v5 = vpop.f32.mrb[32].mxu0  ;;  %3072 = vmatprep.subr.bf16.mxu0 %v3071_v22  ;;  %v3135_v16 = vpack.c.bf16 %v3949_v38, %v3946_v28  ;;  %v523_v45 = vadd.f32 %v522_v11, %v285_v46  ;;  %v780_v34 = vadd.f32 %v779_v51, %v285_v46  ;;  %v300_v6 = vpop.permute.xlu1 %299 }
 0x138   :  { %5029 = vst [vmem:[#allocation32_spill] sm:$0xff] %v3952_v40  ;;  %5030 = vst [vmem:[#allocation33_spill] sm:$0xff] %v3955_v14  ;;  %v791_v7 = vpop.f32.mrb[32].mxu1  ;;  %v536_v62 = vpop.f32.mrb[33].mxu0  ;;  %3074 = vmatpush1.bf16.msra.mxu0 %v3073_v9  ;;  %v529_v0 = vadd.f32 %v528_v44, %v290_v39  ;;  %v786_v19 = vadd.f32 %v785_v15, %v290_v39  ;;  %v3077_v3 = vpack.c.bf16 %v3937_v18, %v3952_v40 }
 0x139   :  { %v793_v12 = vpop.f32.mrb[33].mxu1  ;;  %v3141_v13 = vpack.c.bf16 %v3941_v2, %v3955_v14  ;;  %v1067_v20 = vmul.f32 0.1, %v519_v21  ;;  %3136 = vmatprep.subr.bf16.mxu1 %v3135_v16  ;;  %v3963_v22 = vadd.f32 %v524_v33, %v285_v46  ;;  %vm941_vm7 = vcmp.gt.f32.partialorder %v776_v36, 0.0  ;;  %v295_v16 = vpop.permute.xlu0 %294 }
 0x13a   :  { %v1069_v11 = vmul.f32 0.1, %v776_v36  ;;  %3138 = vmatpush1.bf16.msra.mxu1 %v3137_v23  ;;  %v1070_v17 = vmul.f32 0.1, %v523_v45  ;;  %v3965_v38 = vadd.f32 %v781_v41, %v285_v46  ;;  %vm942_vm8 = vcmp.gt.f32.partialorder %v523_v45, 0.0 }
 0x13b   :  { %vm946_vm9 = vcmp.gt.f32.partialorder %v529_v0, 0.0  ;;  %v1074_v44 = vmul.f32 0.1, %v529_v0  ;;  %v531_v51 = vadd.f32 %v530_v50, %v290_v39  ;;  %v540_v9 = vpop.f32.mrb[34].mxu0  ;;  %vm944_vm10 = vcmp.gt.f32.partialorder %v780_v34, 0.0 }
 0x13c   :  { %v797_v15 = vpop.f32.mrb[34].mxu1  ;;  %v1072_v18 = vmul.f32 0.1, %v780_v34  ;;  %vm948_vm11 = vcmp.gt.f32.partialorder %v786_v19, 0.0  ;;  %v1076_v2 = vmul.f32 0.1, %v786_v19  ;;  %v3972_v23 = vsel %vm935_vm4, %v3918_v24, %v1063_v56 }
 0x13d   :  { %vm943_vm12 = vcmp.gt.f32.partialorder %v3963_v22, 0.0  ;;  %v1071_v33 = vmul.f32 0.1, %v3963_v22  ;;  %5031 = vst [vmem:[#allocation34_spill] sm:$0xff] %v3972_v23  ;;  %v3975_v41 = vsel %vm939_vm6, %v519_v21, %v1067_v20  ;;  %v542_v46 = vpop.f32.mrb[35].mxu0  ;;  %v799_v50 = vpop.f32.mrb[35].mxu1  ;;  %v3980_v40 = vsel %vm946_vm9, %v529_v0, %v1074_v44 }
 0x13e   :  { %5032 = vst [vmem:[#allocation35_spill] sm:$0xff] %v3975_v41  ;;  %vm945_vm13 = vcmp.gt.f32.partialorder %v3965_v38, 0.0  ;;  %v1073_v14 = vmul.f32 0.1, %v3965_v38  ;;  %5033 = vst [vmem:[#allocation36_spill] sm:$0xff] %v3980_v40  ;;  %v3075_v29 = vpack.c.bf16 %v3975_v41, %v3972_v23  ;;  %v3984_v8 = vsel %vm948_vm11, %v786_v19, %v1076_v2 }
 0x13f   :  { %v546_v28 = vpop.f32.mrb[36].mxu0  ;;  %5034 = vst [vmem:[#allocation37_spill] sm:$0xff] %v3984_v8  ;;  %v788_v24 = vadd.f32 %v787_v4, %v290_v39  ;;  %v3989_v21 = vsel %vm937_vm5, %v3920_v53, %v1065_v32  ;;  %v3992_v56 = vsel %vm941_vm7, %v776_v36, %v1069_v11  ;;  %v3995_v0 = vsel %vm942_vm8, %v523_v45, %v1070_v17 }
 0x140   :  { %5035 = vst [vmem:[#allocation38_spill] sm:$0xff] %v3989_v21  ;;  %5036 = vst [vmem:[#allocation39_spill] sm:$0xff] %v3992_v56  ;;  %v803_v20 = vpop.f32.mrb[36].mxu1  ;;  %v548_v43 = vpop.f32.mrb[37].mxu0  ;;  %v3998_v44 = vsel %vm944_vm10, %v780_v34, %v1072_v18  ;;  %3076 = vmatprep.subr.bf16.mxu0 %v3075_v29  ;;  %v3139_v2 = vpack.c.bf16 %v3992_v56, %v3989_v21  ;;  %v535_v4 = vadd.f32 %v534_v5, %v295_v16 }
 0x141   :  { %5037 = vst [vmem:[#allocation40_spill] sm:$0xff] %v3995_v0  ;;  %5038 = vst [vmem:[#allocation41_spill] sm:$0xff] %v3998_v44  ;;  %v4002_v39 = vpop.f32.mrb[37].mxu1  ;;  %vm947_vm14 = vcmp.gt.f32.partialorder %v531_v51, 0.0  ;;  %3078 = vmatpush1.bf16.msra.mxu0 %v3077_v3  ;;  %v792_v36 = vadd.f32 %v791_v7, %v295_v16  ;;  %v541_v32 = vadd.f32 %v540_v9, %v300_v6  ;;  %v1075_v18 = vmul.f32 0.1, %v531_v51 }
 0x142   :  { %v798_v53 = vadd.f32 %v797_v15, %v300_v6  ;;  %v3081_v19 = vpack.c.bf16 %v3980_v40, %v3995_v0  ;;  %v3145_v45 = vpack.c.bf16 %v3984_v8, %v3998_v44  ;;  %3140 = vmatprep.subr.bf16.mxu1 %v3139_v2  ;;  %v4008_v29 = vadd.f32 %v536_v62, %v295_v16  ;;  %v305_v15 = vpop.permute.xlu0 %304 }
 0x143   :  { %vm949_vm15 = vcmp.gt.f32.partialorder %v788_v24, 0.0  ;;  %v1077_v34 = vmul.f32 0.1, %v788_v24  ;;  %3142 = vmatpush1.bf16.msra.mxu1 %v3141_v13  ;;  %v1078_v5 = vmul.f32 0.1, %v535_v4  ;;  %v4010_v11 = vadd.f32 %v793_v12, %v295_v16  ;;  %v552_v17 = vpop.f32.mrb[38].mxu0 }
 0x144   :  { %vm950_vm0 = vcmp.gt.f32.partialorder %v535_v4, 0.0  ;;  %vm954_vm1 = vcmp.gt.f32.partialorder %v541_v32, 0.0  ;;  %v1082_v7 = vmul.f32 0.1, %v541_v32  ;;  %v543_v3 = vadd.f32 %v542_v46, %v300_v6  ;;  %v809_v9 = vpop.f32.mrb[38].mxu1  ;;  %v554_v46 = vpop.f32.mrb[39].mxu0 }
 0x145   :  { %vm952_vm2 = vcmp.gt.f32.partialorder %v792_v36, 0.0  ;;  %v1080_v40 = vmul.f32 0.1, %v792_v36  ;;  %vm956_vm3 = vcmp.gt.f32.partialorder %v798_v53, 0.0  ;;  %v1084_v8 = vmul.f32 0.1, %v798_v53 }
 0x146   :  { %vm951_vm4 = vcmp.gt.f32.partialorder %v4008_v29, 0.0  ;;  %v1079_v62 = vmul.f32 0.1, %v4008_v29  ;;  %v4017_v12 = vsel %vm943_vm12, %v3963_v22, %v1071_v33  ;;  %v4020_v13 = vsel %vm947_vm14, %v531_v51, %v1075_v18  ;;  %v811_v16 = vpop.f32.mrb[39].mxu1 }
 0x147   :  { %5039 = vst [vmem:[#allocation42_spill] sm:$0xff] %v4017_v12  ;;  %5040 = vst [vmem:[#allocation43_spill] sm:$0xff] %v4020_v13  ;;  %vm953_vm5 = vcmp.gt.f32.partialorder %v4010_v11, 0.0  ;;  %v1081_v2 = vmul.f32 0.1, %v4010_v11  ;;  %v4025_v44 = vsel %vm954_vm1, %v541_v32, %v1082_v7  ;;  %v3079_v0 = vpack.c.bf16 %v4020_v13, %v4017_v12  ;;  %v558_v56 = vpop.f32.mrb[40].mxu0  ;;  %v310_v32 = vpop.permute.xlu1 %309 }
 0x148   :  { %5041 = vst [vmem:[#allocation44_spill] sm:$0xff] %v4025_v44  ;;  %v815_v41 = vpop.f32.mrb[40].mxu1  ;;  %v4029_v21 = vsel %vm956_vm3, %v798_v53, %v1084_v8  ;;  %v800_v22 = vadd.f32 %v799_v50, %v300_v6  ;;  %v4034_v51 = vsel %vm945_vm13, %v3965_v38, %v1073_v14  ;;  %v4037_v33 = vsel %vm949_vm15, %v788_v24, %v1077_v34  ;;  %v560_v18 = vpop.f32.mrb[41].mxu0 }
 0x149   :  { %5042 = vst [vmem:[#allocation45_spill] sm:$0xff] %v4029_v21  ;;  %5043 = vst [vmem:[#allocation46_spill] sm:$0xff] %v4034_v51  ;;  %v4039_v23 = vpop.f32.mrb[41].mxu1  ;;  %v4042_v7 = vsel %vm950_vm0, %v535_v4, %v1078_v5  ;;  %3080 = vmatprep.subr.bf16.mxu0 %v3079_v0  ;;  %v3143_v8 = vpack.c.bf16 %v4037_v33, %v4034_v51  ;;  %v547_v6 = vadd.f32 %v546_v28, %v305_v15 }
 0x14a   :  { %5044 = vst [vmem:[#allocation47_spill] sm:$0xff] %v4037_v33  ;;  %5045 = vst [vmem:[#allocation48_spill] sm:$0xff] %v4042_v7  ;;  %v804_v50 = vadd.f32 %v803_v20, %v305_v15  ;;  %v4047_v53 = vsel %vm952_vm2, %v792_v36, %v1080_v40  ;;  %3082 = vmatpush1.bf16.msra.mxu0 %v3081_v19  ;;  %v4049_v38 = vadd.f32 %v548_v43, %v305_v15 }
 0x14b   :  { %5046 = vst [vmem:[#allocation49_spill] sm:$0xff] %v4047_v53  ;;  %v553_v14 = vadd.f32 %v552_v17, %v310_v32  ;;  %v810_v24 = vadd.f32 %v809_v9, %v310_v32  ;;  %v564_v34 = vpop.f32.mrb[42].mxu0  ;;  %v3085_v13 = vpack.c.bf16 %v4025_v44, %v4042_v7  ;;  %v3149_v0 = vpack.c.bf16 %v4029_v21, %v4047_v53  ;;  %v320_v51 = vpop.permute.xlu1 %319 }
 0x14c   :  { %vm955_vm6 = vcmp.gt.f32.partialorder %v543_v3, 0.0  ;;  %v1083_v4 = vmul.f32 0.1, %v543_v3  ;;  %3144 = vmatprep.subr.bf16.mxu1 %v3143_v8  ;;  %vm957_vm7 = vcmp.gt.f32.partialorder %v800_v22, 0.0  ;;  %v1085_v28 = vmul.f32 0.1, %v800_v22 }
 0x14d   :  { %3146 = vmatpush1.bf16.msra.mxu1 %v3145_v45  ;;  %v1086_v40 = vmul.f32 0.1, %v547_v6  ;;  %v4056_v20 = vadd.f32 %v4002_v39, %v305_v15  ;;  %vm958_vm8 = vcmp.gt.f32.partialorder %v547_v6, 0.0  ;;  %vm960_vm9 = vcmp.gt.f32.partialorder %v804_v50, 0.0  ;;  %v821_v19 = vpop.f32.mrb[42].mxu1  ;;  %v566_v5 = vpop.f32.mrb[43].mxu0 }
 0x14e   :  { %v1090_v43 = vmul.f32 0.1, %v553_v14  ;;  %v4058_v36 = vadd.f32 %v554_v46, %v310_v32  ;;  %v1088_v17 = vmul.f32 0.1, %v804_v50  ;;  %vm959_vm10 = vcmp.gt.f32.partialorder %v4049_v38, 0.0  ;;  %v4070_v15 = vpop.f32.mrb[43].mxu1 }
 0x14f   :  { %vm962_vm11 = vcmp.gt.f32.partialorder %v553_v14, 0.0  ;;  %v1092_v9 = vmul.f32 0.1, %v810_v24  ;;  %v1087_v8 = vmul.f32 0.1, %v4049_v38  ;;  %vm964_vm12 = vcmp.gt.f32.partialorder %v810_v24, 0.0 }
 0x150   :  { %v4065_v39 = vsel %vm951_vm4, %v4008_v29, %v1079_v62  ;;  %v4068_v45 = vsel %vm955_vm6, %v543_v3, %v1083_v4  ;;  %v4072_v46 = vpop.f32.mrb[44].mxu0  ;;  %v4075_v21 = vsel %vm958_vm8, %v547_v6, %v1086_v40  ;;  %vm961_vm13 = vcmp.gt.f32.partialorder %v4056_v20, 0.0  ;;  %v4081_v7 = vpop.f32.mrb[44].mxu1 }
 0x151   :  { %5047 = vst [vmem:[#allocation50_spill] sm:$0xff] %v4065_v39  ;;  %5048 = vst [vmem:[#allocation51_spill] sm:$0xff] %v4068_v45  ;;  %v1089_v44 = vmul.f32 0.1, %v4056_v20  ;;  %v3083_v53 = vpack.c.bf16 %v4068_v45, %v4065_v39  ;;  %v4083_v29 = vpop.f32.mrb[45].mxu0  ;;  %v315_v3 = vpop.permute.xlu0 %314  ;;  %v4085_v62 = vsel %vm962_vm11, %v553_v14, %v1090_v43  ;;  %v812_v4 = vadd.f32 %v811_v16, %v310_v32 }
 0x152   :  { %5049 = vst [vmem:[#allocation52_spill] sm:$0xff] %v4075_v21  ;;  %5050 = vst [vmem:[#allocation53_spill] sm:$0xff] %v4085_v62  ;;  %v4090_v6 = vsel %vm953_vm5, %v4010_v11, %v1081_v2  ;;  %v4093_v40 = vsel %vm957_vm7, %v800_v22, %v1085_v28  ;;  %v4095_v33 = vpop.f32.mrb[45].mxu1  ;;  %v4098_v45 = vsel %vm964_vm12, %v810_v24, %v1092_v9  ;;  %vm963_vm14 = vcmp.gt.f32.partialorder %v4058_v36, 0.0 }
 0x153   :  { %5051 = vst [vmem:[#allocation54_spill] sm:$0xff] %v4090_v6  ;;  %5052 = vst [vmem:[#allocation55_spill] sm:$0xff] %v4093_v40  ;;  %3084 = vmatprep.subr.bf16.mxu0 %v3083_v53  ;;  %v3147_v14 = vpack.c.bf16 %v4093_v40, %v4090_v6  ;;  %v559_v43 = vadd.f32 %v558_v56, %v315_v3  ;;  %v816_v16 = vadd.f32 %v815_v41, %v315_v3  ;;  %v576_v32 = vpop.f32.mrb[46].mxu0  ;;  %v330_v6 = vpop.permute.xlu1 %329 }
 0x154   :  { %5053 = vst [vmem:[#allocation56_spill] sm:$0xff] %v4098_v45  ;;  %v4103_v39 = vsel %vm960_vm9, %v804_v50, %v1088_v17  ;;  %3086 = vmatpush1.bf16.msra.mxu0 %v3085_v13  ;;  %v4106_v11 = vadd.f32 %v560_v18, %v315_v3  ;;  %v565_v2 = vadd.f32 %v564_v34, %v320_v51  ;;  %v833_v22 = vpop.f32.mrb[46].mxu1  ;;  %v4108_v28 = vpop.f32.mrb[47].mxu0  ;;  %v1091_v24 = vmul.f32 0.1, %v4058_v36 }
 0x155   :  { %5054 = vst [vmem:[#allocation57_spill] sm:$0xff] %v4103_v39  ;;  %v3089_v53 = vpack.c.bf16 %v4085_v62, %v4075_v21  ;;  %3148 = vmatprep.subr.bf16.mxu1 %v3147_v14  ;;  %v4114_v41 = vadd.f32 %v4039_v23, %v315_v3  ;;  %v822_v56 = vadd.f32 %v821_v19, %v320_v51  ;;  %vm965_vm15 = vcmp.gt.f32.partialorder %v812_v4, 0.0  ;;  %v4120_v9 = vpop.f32.mrb[47].mxu1 }
 0x156   :  { %v3153_v50 = vpack.c.bf16 %v4098_v45, %v4103_v39  ;;  %v1093_v13 = vmul.f32 0.1, %v812_v4  ;;  %3150 = vmatpush1.bf16.msra.mxu1 %v3149_v0  ;;  %v1094_v18 = vmul.f32 0.1, %v559_v43  ;;  %vm966_vm0 = vcmp.gt.f32.partialorder %v559_v43, 0.0  ;;  %v325_v39 = vpop.permute.xlu0 %324 }
 0x157   :  { %vm968_vm1 = vcmp.gt.f32.partialorder %v816_v16, 0.0  ;;  %v1098_v34 = vmul.f32 0.1, %v565_v2  ;;  %v4118_v17 = vadd.f32 %v566_v5, %v320_v51  ;;  %v4122_v62 = vpop.f32.mrb[48].mxu0  ;;  %v1096_v14 = vmul.f32 0.1, %v816_v16 }
 0x158   :  { %vm967_vm2 = vcmp.gt.f32.partialorder %v4106_v11, 0.0  ;;  %v1095_v23 = vmul.f32 0.1, %v4106_v11  ;;  %vm970_vm3 = vcmp.gt.f32.partialorder %v565_v2, 0.0  ;;  %vm969_vm4 = vcmp.gt.f32.partialorder %v4114_v41, 0.0  ;;  %v4137_v3 = vpop.f32.mrb[48].mxu1 }
 0x159   :  { %v1100_v19 = vmul.f32 0.1, %v822_v56  ;;  %v4130_v0 = vsel %vm959_vm10, %v4049_v38, %v1087_v8  ;;  %v4135_v5 = vsel %vm963_vm14, %v4058_v36, %v1091_v24  ;;  %v4139_v45 = vpop.f32.mrb[49].mxu0  ;;  %v4142_v21 = vsel %vm966_vm0, %v559_v43, %v1094_v18  ;;  %v4147_v8 = vpop.f32.mrb[49].mxu1 }
 0x15a   :  { %5055 = vst [vmem:[#allocation58_spill] sm:$0xff] %v4130_v0  ;;  %5056 = vst [vmem:[#allocation59_spill] sm:$0xff] %v4135_v5  ;;  %v1097_v40 = vmul.f32 0.1, %v4114_v41  ;;  %vm972_vm5 = vcmp.gt.f32.partialorder %v822_v56, 0.0  ;;  %v3087_v38 = vpack.c.bf16 %v4135_v5, %v4130_v0  ;;  %v4149_v12 = vsel %vm970_vm3, %v565_v2, %v1098_v34 }
 0x15b   :  { %5057 = vst [vmem:[#allocation60_spill] sm:$0xff] %v4142_v21  ;;  %5058 = vst [vmem:[#allocation61_spill] sm:$0xff] %v4149_v12  ;;  %v824_v36 = vadd.f32 %v4070_v15, %v320_v51  ;;  %v4155_v24 = vsel %vm961_vm13, %v4056_v20, %v1089_v44  ;;  %v4158_v43 = vsel %vm965_vm15, %v812_v4, %v1093_v13  ;;  %v4160_v18 = vpop.f32.mrb[50].mxu0  ;;  %vm971_vm6 = vcmp.gt.f32.partialorder %v4118_v17, 0.0 }
 0x15c   :  { %5059 = vst [vmem:[#allocation62_spill] sm:$0xff] %v4155_v24  ;;  %5060 = vst [vmem:[#allocation63_spill] sm:$0xff] %v4158_v43  ;;  %v4163_v37 = vsel %vm968_vm1, %v816_v16, %v1096_v14  ;;  %3088 = vmatprep.subr.bf16.mxu0 %v3087_v38  ;;  %v3151_v2 = vpack.c.bf16 %v4158_v43, %v4155_v24  ;;  %v571_v34 = vadd.f32 %v4072_v46, %v325_v39  ;;  %v845_v15 = vpop.f32.mrb[50].mxu1  ;;  %v4169_v5 = vpop.f32.mrb[51].mxu0 }
 0x15d   :  { %5061 = vst [vmem:[#allocation64_spill] sm:$0xff] %v4163_v37  ;;  %v828_v51 = vadd.f32 %v4081_v7, %v325_v39  ;;  %v4172_v44 = vsel %vm972_vm5, %v822_v56, %v1100_v19  ;;  %3090 = vmatpush1.bf16.msra.mxu0 %v3089_v53  ;;  %v4176_v20 = vadd.f32 %v4083_v29, %v325_v39  ;;  %v4178_v16 = vpop.f32.mrb[51].mxu1  ;;  %v1099_v7 = vmul.f32 0.1, %v4118_v17 }
 0x15e   :  { %5062 = vst [vmem:[#allocation65_spill] sm:$0xff] %v4172_v44  ;;  %v577_v4 = vadd.f32 %v576_v32, %v330_v6  ;;  %v3093_v46 = vpack.c.bf16 %v4149_v12, %v4142_v21  ;;  %3152 = vmatprep.subr.bf16.mxu1 %v3151_v2  ;;  %v4184_v13 = vadd.f32 %v4095_v33, %v325_v39  ;;  %vm973_vm7 = vcmp.gt.f32.partialorder %v824_v36, 0.0  ;;  %v335_v21 = vpop.permute.xlu0 %334 }
 0x15f   :  { %v834_v56 = vadd.f32 %v833_v22, %v330_v6  ;;  %v1101_v14 = vmul.f32 0.1, %v824_v36  ;;  %3154 = vmatpush1.bf16.msra.mxu1 %v3153_v50  ;;  %vm974_vm8 = vcmp.gt.f32.partialorder %v571_v34, 0.0  ;;  %v1102_v53 = vmul.f32 0.1, %v571_v34  ;;  %v4191_v12 = vpop.f32.mrb[52].mxu0 }
 0x160   :  { %v3157_v29 = vpack.c.bf16 %v4172_v44, %v4163_v37  ;;  %v1104_v32 = vmul.f32 0.1, %v828_v51  ;;  %v1106_v19 = vmul.f32 0.1, %v577_v4  ;;  %v4189_v38 = vadd.f32 %v4108_v28, %v330_v6  ;;  %v4193_v2 = vpop.f32.mrb[52].mxu1  ;;  %v4211_v44 = vpop.f32.mrb[53].mxu0 }
 0x161   :  { %vm976_vm9 = vcmp.gt.f32.partialorder %v828_v51, 0.0  ;;  %vm975_vm10 = vcmp.gt.f32.partialorder %v4176_v20, 0.0  ;;  %v1103_v33 = vmul.f32 0.1, %v4176_v20  ;;  %vm978_vm11 = vcmp.gt.f32.partialorder %v577_v4, 0.0  ;;  %v4213_v37 = vpop.f32.mrb[53].mxu1 }
 0x162   :  { %vm977_vm12 = vcmp.gt.f32.partialorder %v4184_v13, 0.0  ;;  %v4199_v39 = vmul.f32 0.1, %v4184_v13  ;;  %v1108_v22 = vmul.f32 0.1, %v834_v56  ;;  %v4204_v28 = vsel %vm967_vm2, %v4106_v11, %v1095_v23 }
 0x163   :  { %5063 = vst [vmem:[#allocation66_spill] sm:$0xff] %v4204_v28  ;;  %v4209_v50 = vsel %vm971_vm6, %v4118_v17, %v1099_v7  ;;  %v4216_v43 = vsel %vm974_vm8, %v571_v34, %v1102_v53  ;;  %vm980_vm13 = vcmp.gt.f32.partialorder %v834_v56, 0.0  ;;  %v836_v24 = vadd.f32 %v4120_v9, %v330_v6  ;;  %v4221_v23 = vpop.f32.mrb[54].mxu0  ;;  %v340_v9 = vpop.permute.xlu1 %339 }
 0x164   :  { %5064 = vst [vmem:[#allocation67_spill] sm:$0xff] %v4209_v50  ;;  %5065 = vst [vmem:[#allocation68_spill] sm:$0xff] %v4216_v43  ;;  %v3091_v11 = vpack.c.bf16 %v4209_v50, %v4204_v28  ;;  %v4224_v0 = vsel %vm976_vm9, %v828_v51, %v1104_v32  ;;  %v4226_v17 = vsel %vm978_vm11, %v577_v4, %v1106_v19  ;;  %v4236_v53 = vpop.f32.mrb[54].mxu1  ;;  %v4238_v6 = vpop.f32.mrb[55].mxu0  ;;  %vm979_vm14 = vcmp.gt.f32.partialorder %v4189_v38, 0.0 }
 0x165   :  { %5066 = vst [vmem:[#allocation69_spill] sm:$0xff] %v4224_v0  ;;  %5067 = vst [vmem:[#allocation70_spill] sm:$0xff] %v4226_v17  ;;  %v4231_v7 = vsel %vm969_vm4, %v4114_v41, %v1097_v40  ;;  %v4234_v34 = vsel %vm973_vm7, %v824_v36, %v1101_v14  ;;  %v583_v4 = vadd.f32 %v4122_v62, %v335_v21  ;;  %v4245_v40 = vpop.f32.mrb[55].mxu1  ;;  %vm981_vm15 = vcmp.gt.f32.partialorder %v836_v24, 0.0 }
 0x166   :  { %5068 = vst [vmem:[#allocation71_spill] sm:$0xff] %v4231_v7  ;;  %5069 = vst [vmem:[#allocation72_spill] sm:$0xff] %v4234_v34  ;;  %3092 = vmatprep.subr.bf16.mxu0 %v3091_v11  ;;  %v3155_v51 = vpack.c.bf16 %v4234_v34, %v4231_v7  ;;  %v840_v32 = vadd.f32 %v4137_v3, %v335_v21  ;;  %v4248_v41 = vsel %vm980_vm13, %v834_v56, %v1108_v22 }
 0x167   :  { %5070 = vst [vmem:[#allocation73_spill] sm:$0xff] %v4248_v41  ;;  %3094 = vmatpush1.bf16.msra.mxu0 %v3093_v46  ;;  %v4251_v36 = vadd.f32 %v4139_v45, %v335_v21  ;;  %v589_v14 = vadd.f32 %v4160_v18, %v340_v9  ;;  %v846_v19 = vadd.f32 %v845_v15, %v340_v9  ;;  %v1107_v34 = vmul.f32 0.1, %v4189_v38  ;;  %v4263_v22 = vpop.f32.mrb[56].mxu0 }
 0x168   :  { %v3097_v11 = vpack.c.bf16 %v4226_v17, %v4216_v43  ;;  %3156 = vmatprep.subr.bf16.mxu1 %v3155_v51  ;;  %v4258_v62 = vadd.f32 %v4147_v8, %v335_v21  ;;  %v1109_v3 = vmul.f32 0.1, %v836_v24  ;;  %vm982_vm0 = vcmp.gt.f32.partialorder %v583_v4, 0.0  ;;  %v4265_v17 = vpop.f32.mrb[56].mxu1  ;;  %v345_v51 = vpop.permute.xlu0 %344 }
 0x169   :  { %3158 = vmatpush1.bf16.msra.mxu1 %v3157_v29  ;;  %v1110_v46 = vmul.f32 0.1, %v583_v4  ;;  %vm984_vm1 = vcmp.gt.f32.partialorder %v840_v32, 0.0  ;;  %v3161_v45 = vpack.c.bf16 %v4248_v41, %v4224_v0  ;;  %v1112_v18 = vmul.f32 0.1, %v840_v32  ;;  %v4280_v41 = vpop.f32.mrb[57].mxu0 }
 0x16a   :  { %v1114_v15 = vmul.f32 0.1, %v589_v14  ;;  %v591_v56 = vadd.f32 %v4169_v5, %v340_v9  ;;  %vm983_vm2 = vcmp.gt.f32.partialorder %v4251_v36, 0.0  ;;  %v1111_v21 = vmul.f32 0.1, %v4251_v36  ;;  %v4282_v0 = vpop.f32.mrb[57].mxu1 }
 0x16b   :  { %vm986_vm3 = vcmp.gt.f32.partialorder %v589_v14, 0.0  ;;  %v1116_v8 = vmul.f32 0.1, %v846_v19  ;;  %vm985_vm4 = vcmp.gt.f32.partialorder %v4258_v62, 0.0  ;;  %vm988_vm5 = vcmp.gt.f32.partialorder %v846_v19, 0.0 }
 0x16c   :  { %v4273_v29 = vsel %vm975_vm10, %v4176_v20, %v1103_v33  ;;  %v4278_v5 = vsel %vm979_vm14, %v4189_v38, %v1107_v34  ;;  %v4285_v43 = vsel %vm982_vm0, %v583_v4, %v1110_v46  ;;  %v1113_v50 = vmul.f32 0.1, %v4258_v62  ;;  %v4291_v33 = vpop.f32.mrb[58].mxu0  ;;  %v4293_v28 = vpop.f32.mrb[58].mxu1 }
 0x16d   :  { %5071 = vst [vmem:[#allocation74_spill] sm:$0xff] %v4273_v29  ;;  %5072 = vst [vmem:[#allocation75_spill] sm:$0xff] %v4278_v5  ;;  %v848_v7 = vadd.f32 %v4178_v16, %v340_v9  ;;  %v3095_v20 = vpack.c.bf16 %v4278_v5, %v4273_v29  ;;  %v4296_v38 = vsel %vm984_vm1, %v840_v32, %v1112_v18  ;;  %v4309_v9 = vpop.f32.mrb[59].mxu0  ;;  %v4311_v46 = vpop.f32.mrb[59].mxu1  ;;  %vm987_vm6 = vcmp.gt.f32.partialorder %v591_v56, 0.0 }
 0x16e   :  { %5073 = vst [vmem:[#allocation76_spill] sm:$0xff] %v4285_v43  ;;  %5074 = vst [vmem:[#allocation77_spill] sm:$0xff] %v4296_v38  ;;  %v4298_v34 = vsel %vm986_vm3, %v589_v14, %v1114_v15  ;;  %v4304_v4 = vsel %vm977_vm12, %v4184_v13, %v4199_v39  ;;  %v4307_v16 = vsel %vm981_vm15, %v836_v24, %v1109_v3  ;;  %v350_v5 = vpop.permute.xlu1 %349  ;;  %v1115_v15 = vmul.f32 0.1, %v591_v56 }
 0x16f   :  { %5075 = vst [vmem:[#allocation78_spill] sm:$0xff] %v4298_v34  ;;  %5076 = vst [vmem:[#allocation79_spill] sm:$0xff] %v4304_v4  ;;  %v4314_v29 = vsel %vm988_vm5, %v846_v19, %v1116_v8  ;;  %3096 = vmatprep.subr.bf16.mxu0 %v3095_v20  ;;  %v3159_v32 = vpack.c.bf16 %v4307_v16, %v4304_v4  ;;  %v595_v14 = vadd.f32 %v4191_v12, %v345_v51  ;;  %v4325_v18 = vpop.f32.mrb[60].mxu0 }
 0x170   :  { %5077 = vst [vmem:[#allocation80_spill] sm:$0xff] %v4307_v16  ;;  %5078 = vst [vmem:[#allocation81_spill] sm:$0xff] %v4314_v29  ;;  %v852_v13 = vadd.f32 %v4193_v2, %v345_v51  ;;  %3098 = vmatpush1.bf16.msra.mxu0 %v3097_v11  ;;  %v4321_v24 = vadd.f32 %v4211_v44, %v345_v51  ;;  %v601_v39 = vadd.f32 %v4221_v23, %v350_v5  ;;  %v4335_v20 = vpop.f32.mrb[60].mxu1 }
 0x171   :  { %v858_v3 = vadd.f32 %v4236_v53, %v350_v5  ;;  %v3101_v19 = vpack.c.bf16 %v4298_v34, %v4285_v43  ;;  %vm989_vm7 = vcmp.gt.f32.partialorder %v848_v7, 0.0  ;;  %3160 = vmatprep.subr.bf16.mxu1 %v3159_v32  ;;  %v4330_v12 = vadd.f32 %v4213_v37, %v345_v51  ;;  %v4337_v34 = vpop.f32.mrb[61].mxu0  ;;  %v4350_v32 = vpop.f32.mrb[61].mxu1 }
 0x172   :  { %v3165_v2 = vpack.c.bf16 %v4314_v29, %v4296_v38  ;;  %v1117_v44 = vmul.f32 0.1, %v848_v7  ;;  %3162 = vmatpush1.bf16.msra.mxu1 %v3161_v45  ;;  %v1118_v11 = vmul.f32 0.1, %v595_v14  ;;  %v1120_v23 = vmul.f32 0.1, %v852_v13 }
 0x173   :  { %vm990_vm8 = vcmp.gt.f32.partialorder %v595_v14, 0.0  ;;  %vm992_vm9 = vcmp.gt.f32.partialorder %v852_v13, 0.0  ;;  %v1122_v53 = vmul.f32 0.1, %v601_v39  ;;  %v603_v8 = vadd.f32 %v4238_v6, %v350_v5  ;;  %v4352_v29 = vpop.f32.mrb[62].mxu0 }
 0x174   :  { %vm991_vm10 = vcmp.gt.f32.partialorder %v4321_v24, 0.0  ;;  %v1119_v37 = vmul.f32 0.1, %v4321_v24  ;;  %vm994_vm11 = vcmp.gt.f32.partialorder %v601_v39, 0.0  ;;  %v1124_v51 = vmul.f32 0.1, %v858_v3 }
 0x175   :  { %vm993_vm12 = vcmp.gt.f32.partialorder %v4330_v12, 0.0  ;;  %vm996_vm13 = vcmp.gt.f32.partialorder %v858_v3, 0.0  ;;  %v4345_v45 = vsel %vm983_vm2, %v4251_v36, %v1111_v21  ;;  %v4348_v6 = vsel %vm987_vm6, %v591_v56, %v1115_v15  ;;  %v4363_v36 = vpop.f32.mrb[62].mxu1  ;;  %v626_v21 = vpop.f32.mrb[63].mxu0 }
 0x176   :  { %5079 = vst [vmem:[#allocation82_spill] sm:$0xff] %v4348_v6  ;;  %v4355_v38 = vsel %vm990_vm8, %v595_v14, %v1118_v11  ;;  %v4358_v43 = vsel %vm992_vm9, %v852_v13, %v1120_v23  ;;  %v1121_v16 = vmul.f32 0.1, %v4330_v12  ;;  %v3099_v4 = vpack.c.bf16 %v4348_v6, %v4345_v45  ;;  %v355_v56 = vpop.permute.xlu0 %354  ;;  %v4376_v11 = vpop.f32.mrb[63].mxu1 }
 0x177   :  { %v4365_v15 = vsel %vm994_vm11, %v601_v39, %v1122_v53  ;;  %v860_v63 = vadd.f32 %v4245_v40, %v350_v5  ;;  %v4371_v14 = vsel %vm985_vm4, %v4258_v62, %v1113_v50  ;;  %v4374_v13 = vsel %vm989_vm7, %v848_v7, %v1117_v44  ;;  %v360_v23 = vpop.permute.xlu1 %359 }
 0x178   :  { %5080 = vst [vmem:[#allocation83_spill] sm:$0xff] %v4365_v15  ;;  %v4379_v6 = vsel %vm996_vm13, %v858_v3, %v1124_v51  ;;  %3100 = vmatprep.subr.bf16.mxu0 %v3099_v4  ;;  %v3163_v39 = vpack.c.bf16 %v4374_v13, %v4371_v14  ;;  %v607_v40 = vadd.f32 %v4263_v22, %v355_v56  ;;  %vm995_vm14 = vcmp.gt.f32.partialorder %v603_v8, 0.0 }
 0x179   :  { %5081 = vst [vmem:[#allocation84_spill] sm:$0xff] %v4379_v6  ;;  %v864_v5 = vadd.f32 %v4265_v17, %v355_v56  ;;  %3102 = vmatpush1.bf16.msra.mxu0 %v3101_v19  ;;  %v4386_v50 = vadd.f32 %v4280_v41, %v355_v56  ;;  %v4389_v7 = vadd.f32 %v4282_v0, %v355_v56  ;;  %v1123_v3 = vmul.f32 0.1, %v603_v8 }
 0x17a   :  { %v613_v62 = vadd.f32 %v4291_v33, %v360_v23  ;;  %v3105_v4 = vpack.c.bf16 %v4365_v15, %v4355_v38  ;;  %3164 = vmatprep.subr.bf16.mxu1 %v3163_v39  ;;  %v1126_v44 = vmul.f32 0.1, %v607_v40  ;;  %v870_v22 = vadd.f32 %v4293_v28, %v360_v23 }
 0x17b   :  { %v3169_v17 = vpack.c.bf16 %v4379_v6, %v4358_v43  ;;  %vm997_vm15 = vcmp.gt.f32.partialorder %v860_v63, 0.0  ;;  %3166 = vmatpush1.bf16.msra.mxu1 %v3165_v2  ;;  %vm998_vm0 = vcmp.gt.f32.partialorder %v607_v40, 0.0  ;;  %v1128_v41 = vmul.f32 0.1, %v864_v5 }
 0x17c   :  { %v1125_v19 = vmul.f32 0.1, %v860_v63  ;;  %vm1000_vm1 = vcmp.gt.f32.partialorder %v864_v5, 0.0  ;;  %v1130_v0 = vmul.f32 0.1, %v613_v62  ;;  %v615_v33 = vadd.f32 %v4309_v9, %v360_v23 }
 0x17d   :  { %vm999_vm2 = vcmp.gt.f32.partialorder %v4386_v50, 0.0  ;;  %v1127_v53 = vmul.f32 0.1, %v4386_v50  ;;  %v1129_v51 = vmul.f32 0.1, %v4389_v7  ;;  %vm1002_vm3 = vcmp.gt.f32.partialorder %v613_v62, 0.0 }
 0x17e   :  { %v4401_v28 = vsel %vm998_vm0, %v607_v40, %v1126_v44  ;;  %vm1001_vm4 = vcmp.gt.f32.partialorder %v4389_v7, 0.0  ;;  %v1132_v56 = vmul.f32 0.1, %v870_v22  ;;  %v4407_v2 = vsel %vm991_vm10, %v4321_v24, %v1119_v37  ;;  %v365_v44 = vpop.permute.xlu0 %364  ;;  %v370_v37 = vpop.permute.xlu1 %369 }
 0x17f   :  { %v4410_v39 = vsel %vm995_vm14, %v603_v8, %v1123_v3  ;;  %v4412_v9 = vsel %vm1000_vm1, %v864_v5, %v1128_v41  ;;  %vm1004_vm5 = vcmp.gt.f32.partialorder %v870_v22, 0.0  ;;  %v872_v6 = vadd.f32 %v4311_v46, %v360_v23 }
 0x180   :  { %v3103_v40 = vpack.c.bf16 %v4410_v39, %v4407_v2  ;;  %v4417_v15 = vsel %vm1002_vm3, %v613_v62, %v1130_v0  ;;  %vm1003_vm6 = vcmp.gt.f32.partialorder %v615_v33, 0.0  ;;  %v4422_v24 = vsel %vm993_vm12, %v4330_v12, %v1121_v16 }
 0x181   :  { %v4425_v8 = vsel %vm997_vm15, %v860_v63, %v1125_v19  ;;  %v619_v23 = vadd.f32 %v4325_v18, %v365_v44  ;;  %v876_v5 = vadd.f32 %v4335_v20, %v365_v44  ;;  %v621_v62 = vadd.f32 %v4337_v34, %v365_v44 }
 0x182   :  { %3104 = vmatprep.subr.bf16.mxu0 %v3103_v40  ;;  %v3167_v46 = vpack.c.bf16 %v4425_v8, %v4422_v24  ;;  %v4432_v3 = vsel %vm1004_vm5, %v870_v22, %v1132_v56  ;;  %v878_v16 = vadd.f32 %v4350_v32, %v365_v44  ;;  %v625_v12 = vadd.f32 %v4352_v29, %v370_v37 }
 0x183   :  { %5082 = vst [vmem:[#allocation85_spill] sm:$0xff] %v4432_v3  ;;  %3106 = vmatpush1.bf16.msra.mxu0 %v3105_v4  ;;  %v627_v63 = vadd.f32 %v626_v21, %v370_v37  ;;  %v3109_v41 = vpack.c.bf16 %v4417_v15, %v4401_v28  ;;  %v1131_v19 = vmul.f32 0.1, %v615_v33  ;;  %vm1005_vm7 = vcmp.gt.f32.partialorder %v872_v6, 0.0 }
 0x184   :  { %v1133_v0 = vmul.f32 0.1, %v872_v6  ;;  %3168 = vmatprep.subr.bf16.mxu1 %v3167_v46  ;;  %vm1006_vm8 = vcmp.gt.f32.partialorder %v619_v23, 0.0  ;;  %v1134_v18 = vmul.f32 0.1, %v619_v23  ;;  %vm1008_vm9 = vcmp.gt.f32.partialorder %v876_v5, 0.0 }
 0x185   :  { %3170 = vmatpush1.bf16.msra.mxu1 %v3169_v17  ;;  %v882_v34 = vadd.f32 %v4363_v36, %v370_v37  ;;  %v3173_v20 = vpack.c.bf16 %v4432_v3, %v4412_v9  ;;  %v1136_v32 = vmul.f32 0.1, %v876_v5  ;;  %v1135_v4 = vmul.f32 0.1, %v621_v62  ;;  %v1270_v46 = vld [vmem:[%s4913_s3] sm:$0xff] }
 0x186   :  { %v1137_v29 = vmul.f32 0.1, %v878_v16  ;;  %vm1007_vm10 = vcmp.gt.f32.partialorder %v621_v62, 0.0  ;;  %vm1010_vm11 = vcmp.gt.f32.partialorder %v625_v12, 0.0  ;;  %v1138_v21 = vmul.f32 0.1, %v625_v12 }
 0x187   :  { %v1139_v22 = vmul.f32 0.1, %v627_v63  ;;  %vm1011_vm12 = vcmp.gt.f32.partialorder %v627_v63, 0.0  ;;  %v884_v56 = vadd.f32 %v4376_v11, %v370_v37  ;;  %v4445_v17 = vsel %vm999_vm2, %v4386_v50, %v1127_v53 }
 0x188   :  { %v4448_v36 = vsel %vm1003_vm6, %v615_v33, %v1131_v19  ;;  %vm1009_vm13 = vcmp.gt.f32.partialorder %v878_v16, 0.0  ;;  %vm1012_vm14 = vcmp.gt.f32.partialorder %v882_v34, 0.0  ;;  %v1140_v40 = vmul.f32 0.1, %v882_v34 }
 0x189   :  { %v3107_v44 = vpack.c.bf16 %v4448_v36, %v4445_v17  ;;  %vm1013_vm15 = vcmp.gt.f32.partialorder %v884_v56, 0.0  ;;  %v1141_v11 = vmul.f32 0.1, %v884_v56  ;;  %v4458_v50 = vsel %vm1001_vm4, %v4389_v7, %v1129_v51 }
 0x18a   :  { %v4461_v33 = vsel %vm1005_vm7, %v872_v6, %v1133_v0  ;;  %v4464_v53 = vsel %vm1010_vm11, %v625_v12, %v1138_v21  ;;  %v4469_v19 = vsel %vm1007_vm10, %v621_v62, %v1135_v4  ;;  %v4472_v3 = vsel %vm1011_vm12, %v627_v63, %v1139_v22  ;;  %v1271_v63 = vld [vmem:[%s4913_s3 + $0x8] sm:$0xff]  ;;  %v1272_v4 = vld [vmem:[%s4913_s3 + $0x10] sm:$0xff] }
 0x18b   :  { %3108 = vmatprep.subr.bf16.mxu0 %v3107_v44  ;;  %v3171_v37 = vpack.c.bf16 %v4461_v33, %v4458_v50  ;;  %v3111_v7 = vpack.c.bf16 %v4472_v3, %v4469_v19  ;;  %v4477_v6 = vsel %vm1009_vm13, %v878_v16, %v1137_v29  ;;  %v4479_v51 = vsel %vm1013_vm15, %v884_v56, %v1141_v11  ;;  %v1274_v56 = vld [vmem:[%s4913_s3 + $0x20] sm:$0xff] }
 0x18c   :  { %3110 = vmatpush1.bf16.msra.mxu0 %v3109_v41  ;;  %v1303_v12 = vunpack.c.h.bf16 %v1270_v46  ;;  %v4482_v0 = vsel %vm1006_vm8, %v619_v23, %v1134_v18  ;;  %v4485_v21 = vsel %vm1012_vm14, %v882_v34, %v1140_v40  ;;  %v3175_v62 = vpack.c.bf16 %v4479_v51, %v4477_v6 }
 0x18d   :  { %3172 = vmatprep.subr.bf16.mxu1 %v3171_v37  ;;  %v3113_v16 = vpack.c.bf16 %v4464_v53, %v4482_v0  ;;  %3112 = vmatprep.subr.bf16.mxu0 %v3111_v7  ;;  %v4495_v41 = vsel %vm1008_vm9, %v876_v5, %v1136_v32  ;;  %v1302_v23 = vunpack.c.l.bf16 %v1270_v46  ;;  %v1305_v34 = vunpack.c.h.bf16 %v1271_v63  ;;  %v1273_v5 = vld [vmem:[%s4913_s3 + $0x18] sm:$0xff]  ;;  %v1275_v46 = vld [vmem:[%s4913_s3 + $0x28] sm:$0xff]  ;;  %v1276_v7 = vld [vmem:[%s4913_s3 + $0x30] sm:$0xff] }
 0x18e   :  { %3174 = vmatpush1.bf16.msra.mxu1 %v3173_v20  ;;  %1430 = vmatprep.mubr.f32.mxu0 %v1303_v12  ;;  %v3177_v18 = vpack.c.bf16 %v4485_v21, %v4495_v41  ;;  %v1304_v20 = vunpack.c.l.bf16 %v1271_v63  ;;  %v1307_v29 = vunpack.c.h.bf16 %v1272_v4  ;;  %v1306_v32 = vunpack.c.l.bf16 %v1272_v4  ;;  %v1277_v63 = vld [vmem:[%s4913_s3 + $0x38] sm:$0xff] }
 0x18f   :  { %3176 = vmatprep.subr.bf16.mxu1 %v3175_v62  ;;  %1687 = vmatprep.mubr.f32.mxu1 %v1303_v12  ;;  %v1309_v22 = vunpack.c.h.bf16 %v1273_v5  ;;  %v1308_v40 = vunpack.c.l.bf16 %v1273_v5  ;;  %v1311_v44 = vunpack.c.h.bf16 %v1274_v56  ;;  %v1310_v11 = vunpack.c.l.bf16 %v1274_v56 }
 0x190   :  { %3114 = vmatpush1.bf16.msra.mxu0 %v3113_v16  ;;  %v1313_v37 = vunpack.c.h.bf16 %v1275_v46  ;;  %v1312_v12 = vunpack.c.l.bf16 %v1275_v46  ;;  %v1315_v62 = vunpack.c.h.bf16 %v1276_v7  ;;  %v1314_v16 = vunpack.c.l.bf16 %v1276_v7 }
 0x192   :  { %3178 = vmatpush1.bf16.msra.mxu1 %v3177_v18  ;;  %v1278_v18 = vld [vmem:[%s4913_s3 + $0x40] sm:$0xff] }
 0x193   :  { %1431 = vmatmul.mubr.f32.vlgmr.msra.gmra.mrb[64].mxu0 %v1302_v23  ;;  %v1319_v4 = vunpack.c.h.bf16 %v1278_v18 }
 0x194   :  { %1436 = vmatprep.mubr.f32.mxu0 %v1305_v34 }
 0x195   :  { %1688 = vmatmul.mubr.f32.vlgmr.msra.gmra.mrb[64].mxu1 %v1302_v23  ;;  %v1317_v23 = vunpack.c.h.bf16 %v1277_v63 }
 0x196   :  { %1693 = vmatprep.mubr.f32.mxu1 %v1305_v34  ;;  %v1316_v34 = vunpack.c.l.bf16 %v1277_v63 }
 0x197   :  { %1437 = vmatmul.mubr.f32.gmra.mrb[66].mxu0 %v1304_v20 }
 0x198   :  { %1442 = vmatprep.mubr.f32.mxu0 %v1307_v29 }
 0x199   :  { %1694 = vmatmul.mubr.f32.gmra.mrb[66].mxu1 %v1304_v20  ;;  %v1279_v20 = vld [vmem:[%s4913_s3 + $0x48] sm:$0xff] }
 0x19a   :  { %1699 = vmatprep.mubr.f32.mxu1 %v1307_v29  ;;  %v1318_v29 = vunpack.c.l.bf16 %v1278_v18  ;;  %v1321_v5 = vunpack.c.h.bf16 %v1279_v20 }
 0x19b   :  { %1443 = vmatmul.mubr.f32.gmra.mrb[68].mxu0 %v1306_v32 }
 0x19c   :  { %1448 = vmatprep.mubr.f32.mxu0 %v1309_v22 }
 0x19d   :  { %1700 = vmatmul.mubr.f32.gmra.mrb[68].mxu1 %v1306_v32  ;;  %v1280_v32 = vld [vmem:[%s4913_s3 + $0x50] sm:$0xff] }
 0x19e   :  { %1705 = vmatprep.mubr.f32.mxu1 %v1309_v22  ;;  %v1320_v22 = vunpack.c.l.bf16 %v1279_v20  ;;  %v1323_v56 = vunpack.c.h.bf16 %v1280_v32 }
 0x19f   :  { %1449 = vmatmul.mubr.f32.gmra.mrb[70].mxu0 %v1308_v40 }
 0x1a0   :  { %1454 = vmatprep.mubr.f32.mxu0 %v1311_v44 }
 0x1a1   :  { %1706 = vmatmul.mubr.f32.gmra.mrb[70].mxu1 %v1308_v40  ;;  %v1281_v40 = vld [vmem:[%s4913_s3 + $0x58] sm:$0xff] }
 0x1a2   :  { %1711 = vmatprep.mubr.f32.mxu1 %v1311_v44  ;;  %v1322_v44 = vunpack.c.l.bf16 %v1280_v32  ;;  %v1325_v46 = vunpack.c.h.bf16 %v1281_v40 }
 0x1a3   :  { %1455 = vmatmul.mubr.f32.gmra.mrb[72].mxu0 %v1310_v11 }
 0x1a4   :  { %1460 = vmatprep.mubr.f32.mxu0 %v1313_v37 }
 0x1a5   :  { %1712 = vmatmul.mubr.f32.gmra.mrb[72].mxu1 %v1310_v11  ;;  %v1282_v11 = vld [vmem:[%s4913_s3 + $0x60] sm:$0xff] }
 0x1a6   :  { %1717 = vmatprep.mubr.f32.mxu1 %v1313_v37  ;;  %v1324_v37 = vunpack.c.l.bf16 %v1281_v40  ;;  %v1327_v7 = vunpack.c.h.bf16 %v1282_v11 }
 0x1a7   :  { %1461 = vmatmul.mubr.f32.gmra.mrb[74].mxu0 %v1312_v12 }
 0x1a8   :  { %1466 = vmatprep.mubr.f32.mxu0 %v1315_v62 }
 0x1a9   :  { %1718 = vmatmul.mubr.f32.gmra.mrb[74].mxu1 %v1312_v12  ;;  %v1283_v12 = vld [vmem:[%s4913_s3 + $0x68] sm:$0xff] }
 0x1aa   :  { %1723 = vmatprep.mubr.f32.mxu1 %v1315_v62  ;;  %v1326_v62 = vunpack.c.l.bf16 %v1282_v11  ;;  %v1329_v63 = vunpack.c.h.bf16 %v1283_v12 }
 0x1ab   :  { %1467 = vmatmul.mubr.f32.gmra.mrb[76].mxu0 %v1314_v16 }
 0x1ac   :  { %1472 = vmatprep.mubr.f32.mxu0 %v1317_v23 }
 0x1ad   :  { %1724 = vmatmul.mubr.f32.gmra.mrb[76].mxu1 %v1314_v16  ;;  %v1284_v16 = vld [vmem:[%s4913_s3 + $0x70] sm:$0xff] }
 0x1ae   :  { %1729 = vmatprep.mubr.f32.mxu1 %v1317_v23  ;;  %v1328_v23 = vunpack.c.l.bf16 %v1283_v12  ;;  %v1331_v18 = vunpack.c.h.bf16 %v1284_v16 }
 0x1af   :  { %1473 = vmatmul.mubr.f32.gmra.mrb[78].mxu0 %v1316_v34 }
 0x1b0   :  { %1478 = vmatprep.mubr.f32.mxu0 %v1319_v4 }
 0x1b1   :  { %1730 = vmatmul.mubr.f32.gmra.mrb[78].mxu1 %v1316_v34  ;;  %v1285_v34 = vld [vmem:[%s4913_s3 + $0x78] sm:$0xff] }
 0x1b2   :  { %1735 = vmatprep.mubr.f32.mxu1 %v1319_v4  ;;  %v1330_v4 = vunpack.c.l.bf16 %v1284_v16  ;;  %v1333_v20 = vunpack.c.h.bf16 %v1285_v34 }
 0x1b3   :  { %1479 = vmatmul.mubr.f32.gmra.mrb[80].mxu0 %v1318_v29 }
 0x1b4   :  { %1484 = vmatprep.mubr.f32.mxu0 %v1321_v5 }
 0x1b5   :  { %1736 = vmatmul.mubr.f32.gmra.mrb[80].mxu1 %v1318_v29  ;;  %v1286_v29 = vld [vmem:[%s4913_s3 + $0x80] sm:$0xff] }
 0x1b6   :  { %1741 = vmatprep.mubr.f32.mxu1 %v1321_v5  ;;  %v1332_v5 = vunpack.c.l.bf16 %v1285_v34  ;;  %v1335_v32 = vunpack.c.h.bf16 %v1286_v29 }
 0x1b7   :  { %1485 = vmatmul.mubr.f32.gmra.mrb[82].mxu0 %v1320_v22 }
 0x1b8   :  { %1490 = vmatprep.mubr.f32.mxu0 %v1323_v56 }
 0x1b9   :  { %1742 = vmatmul.mubr.f32.gmra.mrb[82].mxu1 %v1320_v22  ;;  %v1287_v22 = vld [vmem:[%s4913_s3 + $0x88] sm:$0xff] }
 0x1ba   :  { %1747 = vmatprep.mubr.f32.mxu1 %v1323_v56  ;;  %v1334_v56 = vunpack.c.l.bf16 %v1286_v29  ;;  %v1337_v40 = vunpack.c.h.bf16 %v1287_v22 }
 0x1bb   :  { %1491 = vmatmul.mubr.f32.gmra.mrb[84].mxu0 %v1322_v44 }
 0x1bc   :  { %1496 = vmatprep.mubr.f32.mxu0 %v1325_v46 }
 0x1bd   :  { %1748 = vmatmul.mubr.f32.gmra.mrb[84].mxu1 %v1322_v44  ;;  %v1288_v44 = vld [vmem:[%s4913_s3 + $0x90] sm:$0xff] }
 0x1be   :  { %1753 = vmatprep.mubr.f32.mxu1 %v1325_v46  ;;  %v1336_v46 = vunpack.c.l.bf16 %v1287_v22  ;;  %v1339_v11 = vunpack.c.h.bf16 %v1288_v44 }
 0x1bf   :  { %1497 = vmatmul.mubr.f32.gmra.mrb[86].mxu0 %v1324_v37 }
 0x1c0   :  { %1502 = vmatprep.mubr.f32.mxu0 %v1327_v7 }
 0x1c1   :  { %1754 = vmatmul.mubr.f32.gmra.mrb[86].mxu1 %v1324_v37  ;;  %v1289_v37 = vld [vmem:[%s4913_s3 + $0x98] sm:$0xff] }
 0x1c2   :  { %1759 = vmatprep.mubr.f32.mxu1 %v1327_v7  ;;  %v1338_v7 = vunpack.c.l.bf16 %v1288_v44  ;;  %v1341_v12 = vunpack.c.h.bf16 %v1289_v37 }
 0x1c3   :  { %1503 = vmatmul.mubr.f32.gmra.mrb[88].mxu0 %v1326_v62 }
 0x1c4   :  { %1508 = vmatprep.mubr.f32.mxu0 %v1329_v63 }
 0x1c5   :  { %1760 = vmatmul.mubr.f32.gmra.mrb[88].mxu1 %v1326_v62  ;;  %v1290_v62 = vld [vmem:[%s4913_s3 + $0xa0] sm:$0xff] }
 0x1c6   :  { %1765 = vmatprep.mubr.f32.mxu1 %v1329_v63  ;;  %v1340_v63 = vunpack.c.l.bf16 %v1289_v37  ;;  %v1343_v16 = vunpack.c.h.bf16 %v1290_v62 }
 0x1c7   :  { %1509 = vmatmul.mubr.f32.gmra.mrb[90].mxu0 %v1328_v23 }
 0x1c8   :  { %1514 = vmatprep.mubr.f32.mxu0 %v1331_v18 }
 0x1c9   :  { %1766 = vmatmul.mubr.f32.gmra.mrb[90].mxu1 %v1328_v23  ;;  %v1291_v23 = vld [vmem:[%s4913_s3 + $0xa8] sm:$0xff] }
 0x1ca   :  { %1771 = vmatprep.mubr.f32.mxu1 %v1331_v18  ;;  %v1342_v18 = vunpack.c.l.bf16 %v1290_v62  ;;  %v1345_v34 = vunpack.c.h.bf16 %v1291_v23 }
 0x1cb   :  { %1515 = vmatmul.mubr.f32.gmra.mrb[92].mxu0 %v1330_v4 }
 0x1cc   :  { %1520 = vmatprep.mubr.f32.mxu0 %v1333_v20 }
 0x1cd   :  { %1772 = vmatmul.mubr.f32.gmra.mrb[92].mxu1 %v1330_v4  ;;  %v1292_v4 = vld [vmem:[%s4913_s3 + $0xb0] sm:$0xff] }
 0x1ce   :  { %1777 = vmatprep.mubr.f32.mxu1 %v1333_v20  ;;  %v1344_v20 = vunpack.c.l.bf16 %v1291_v23  ;;  %v1347_v29 = vunpack.c.h.bf16 %v1292_v4 }
 0x1cf   :  { %1521 = vmatmul.mubr.f32.gmra.mrb[94].mxu0 %v1332_v5 }
 0x1d0   :  { %1526 = vmatprep.mubr.f32.mxu0 %v1335_v32 }
 0x1d1   :  { %1778 = vmatmul.mubr.f32.gmra.mrb[94].mxu1 %v1332_v5  ;;  %v1293_v5 = vld [vmem:[%s4913_s3 + $0xb8] sm:$0xff] }
 0x1d2   :  { %1783 = vmatprep.mubr.f32.mxu1 %v1335_v32  ;;  %v1346_v32 = vunpack.c.l.bf16 %v1292_v4  ;;  %v1349_v22 = vunpack.c.h.bf16 %v1293_v5 }
 0x1d3   :  { %1527 = vmatmul.mubr.f32.gmra.mrb[96].mxu0 %v1334_v56 }
 0x1d4   :  { %1532 = vmatprep.mubr.f32.mxu0 %v1337_v40 }
 0x1d5   :  { %1784 = vmatmul.mubr.f32.gmra.mrb[96].mxu1 %v1334_v56  ;;  %v1294_v56 = vld [vmem:[%s4913_s3 + $0xc0] sm:$0xff] }
 0x1d6   :  { %1789 = vmatprep.mubr.f32.mxu1 %v1337_v40  ;;  %v1348_v40 = vunpack.c.l.bf16 %v1293_v5  ;;  %v1351_v44 = vunpack.c.h.bf16 %v1294_v56 }
 0x1d7   :  { %1533 = vmatmul.mubr.f32.gmra.mrb[98].mxu0 %v1336_v46 }
 0x1d8   :  { %1538 = vmatprep.mubr.f32.mxu0 %v1339_v11 }
 0x1d9   :  { %1790 = vmatmul.mubr.f32.gmra.mrb[98].mxu1 %v1336_v46  ;;  %v1295_v46 = vld [vmem:[%s4913_s3 + $0xc8] sm:$0xff] }
 0x1da   :  { %1795 = vmatprep.mubr.f32.mxu1 %v1339_v11  ;;  %v1350_v11 = vunpack.c.l.bf16 %v1294_v56  ;;  %v1353_v37 = vunpack.c.h.bf16 %v1295_v46 }
 0x1db   :  { %1539 = vmatmul.mubr.f32.gmra.mrb[100].mxu0 %v1338_v7 }
 0x1dc   :  { %1544 = vmatprep.mubr.f32.mxu0 %v1341_v12 }
 0x1dd   :  { %1796 = vmatmul.mubr.f32.gmra.mrb[100].mxu1 %v1338_v7  ;;  %v1296_v7 = vld [vmem:[%s4913_s3 + $0xd0] sm:$0xff] }
 0x1de   :  { %1801 = vmatprep.mubr.f32.mxu1 %v1341_v12  ;;  %v1352_v12 = vunpack.c.l.bf16 %v1295_v46  ;;  %v1355_v62 = vunpack.c.h.bf16 %v1296_v7 }
 0x1df   :  { %1545 = vmatmul.mubr.f32.gmra.mrb[102].mxu0 %v1340_v63 }
 0x1e0   :  { %1550 = vmatprep.mubr.f32.mxu0 %v1343_v16 }
 0x1e1   :  { %1802 = vmatmul.mubr.f32.gmra.mrb[102].mxu1 %v1340_v63  ;;  %v1297_v63 = vld [vmem:[%s4913_s3 + $0xd8] sm:$0xff] }
 0x1e2   :  { %1807 = vmatprep.mubr.f32.mxu1 %v1343_v16  ;;  %v1354_v16 = vunpack.c.l.bf16 %v1296_v7  ;;  %v1357_v23 = vunpack.c.h.bf16 %v1297_v63 }
 0x1e3   :  { %1551 = vmatmul.mubr.f32.gmra.mrb[104].mxu0 %v1342_v18 }
 0x1e4   :  { %1556 = vmatprep.mubr.f32.mxu0 %v1345_v34 }
 0x1e5   :  { %1808 = vmatmul.mubr.f32.gmra.mrb[104].mxu1 %v1342_v18  ;;  %v1298_v18 = vld [vmem:[%s4913_s3 + $0xe0] sm:$0xff] }
 0x1e6   :  { %1813 = vmatprep.mubr.f32.mxu1 %v1345_v34  ;;  %v1356_v34 = vunpack.c.l.bf16 %v1297_v63  ;;  %v1359_v4 = vunpack.c.h.bf16 %v1298_v18 }
 0x1e7   :  { %1557 = vmatmul.mubr.f32.gmra.mrb[106].mxu0 %v1344_v20 }
 0x1e8   :  { %1562 = vmatprep.mubr.f32.mxu0 %v1347_v29 }
 0x1e9   :  { %1814 = vmatmul.mubr.f32.gmra.mrb[106].mxu1 %v1344_v20  ;;  %v1299_v20 = vld [vmem:[%s4913_s3 + $0xe8] sm:$0xff] }
 0x1ea   :  { %1819 = vmatprep.mubr.f32.mxu1 %v1347_v29  ;;  %v1358_v29 = vunpack.c.l.bf16 %v1298_v18  ;;  %v1361_v5 = vunpack.c.h.bf16 %v1299_v20 }
 0x1eb   :  { %1563 = vmatmul.mubr.f32.gmra.mrb[108].mxu0 %v1346_v32 }
 0x1ec   :  { %1568 = vmatprep.mubr.f32.mxu0 %v1349_v22 }
 0x1ed   :  { %1820 = vmatmul.mubr.f32.gmra.mrb[108].mxu1 %v1346_v32  ;;  %v1300_v32 = vld [vmem:[%s4913_s3 + $0xf0] sm:$0xff] }
 0x1ee   :  { %1825 = vmatprep.mubr.f32.mxu1 %v1349_v22  ;;  %v1360_v22 = vunpack.c.l.bf16 %v1299_v20  ;;  %v1363_v56 = vunpack.c.h.bf16 %v1300_v32 }
 0x1ef   :  { %1569 = vmatmul.mubr.f32.gmra.mrb[110].mxu0 %v1348_v40 }
 0x1f0   :  { %1574 = vmatprep.mubr.f32.mxu0 %v1351_v44 }
 0x1f1   :  { %1826 = vmatmul.mubr.f32.gmra.mrb[110].mxu1 %v1348_v40  ;;  %v1301_v40 = vld [vmem:[%s4913_s3 + $0xf8] sm:$0xff] }
 0x1f2   :  { %1831 = vmatprep.mubr.f32.mxu1 %v1351_v44  ;;  %v1362_v44 = vunpack.c.l.bf16 %v1300_v32  ;;  %v1365_v46 = vunpack.c.h.bf16 %v1301_v40 }
 0x1f3   :  { %1575 = vmatmul.mubr.f32.gmra.mrb[112].mxu0 %v1350_v11 }
 0x1f4   :  { %1580 = vmatprep.mubr.f32.mxu0 %v1353_v37 }
 0x1f5   :  { %1832 = vmatmul.mubr.f32.gmra.mrb[112].mxu1 %v1350_v11  ;;  %v1364_v11 = vunpack.c.l.bf16 %v1301_v40 }
 0x1f6   :  { %1837 = vmatprep.mubr.f32.mxu1 %v1353_v37 }
 0x1f7   :  { %1581 = vmatmul.mubr.f32.gmra.mrb[114].mxu0 %v1352_v12 }
 0x1f8   :  { %1586 = vmatprep.mubr.f32.mxu0 %v1355_v62 }
 0x1f9   :  { %1838 = vmatmul.mubr.f32.gmra.mrb[114].mxu1 %v1352_v12 }
 0x1fa   :  { %1843 = vmatprep.mubr.f32.mxu1 %v1355_v62  ;;  %v2043_v62 = vpop.permute.xlu0 %2042 }
 0x1fb   :  { %1587 = vmatmul.mubr.f32.gmra.mrb[116].mxu0 %v1354_v16 }
 0x1fc   :  { %1592 = vmatprep.mubr.f32.mxu0 %v1357_v23 }
 0x1fd   :  { %1844 = vmatmul.mubr.f32.gmra.mrb[116].mxu1 %v1354_v16 }
 0x1fe   :  { %1849 = vmatprep.mubr.f32.mxu1 %v1357_v23 }
 0x1ff   :  { %1593 = vmatmul.mubr.f32.gmra.mrb[118].mxu0 %v1356_v34 }
 0x200   :  { %1598 = vmatprep.mubr.f32.mxu0 %v1359_v4 }
 0x201   :  { %1850 = vmatmul.mubr.f32.gmra.mrb[118].mxu1 %v1356_v34 }
 0x202   :  { %1855 = vmatprep.mubr.f32.mxu1 %v1359_v4 }
 0x203   :  { %1599 = vmatmul.mubr.f32.gmra.mrb[120].mxu0 %v1358_v29 }
 0x204   :  { %1604 = vmatprep.mubr.f32.mxu0 %v1361_v5 }
 0x205   :  { %1856 = vmatmul.mubr.f32.gmra.mrb[120].mxu1 %v1358_v29 }
 0x206   :  { %1861 = vmatprep.mubr.f32.mxu1 %v1361_v5 }
 0x207   :  { %1605 = vmatmul.mubr.f32.gmra.mrb[122].mxu0 %v1360_v22 }
 0x208   :  { %1610 = vmatprep.mubr.f32.mxu0 %v1363_v56 }
 0x209   :  { %1862 = vmatmul.mubr.f32.gmra.mrb[122].mxu1 %v1360_v22 }
 0x20a   :  { %1867 = vmatprep.mubr.f32.mxu1 %v1363_v56  ;;  %v2048_v56 = vpop.permute.xlu1 %2047 }
 0x20b   :  { %1611 = vmatmul.mubr.f32.gmra.mrb[124].mxu0 %v1362_v44 }
 0x20c   :  { %1616 = vmatprep.mubr.f32.mxu0 %v1365_v46 }
 0x20d   :  { %1868 = vmatmul.mubr.f32.gmra.mrb[124].mxu1 %v1362_v44 }
 0x20e   :  { %1873 = vmatprep.mubr.f32.mxu1 %v1365_v46 }
 0x20f   :  { %1617 = vmatmul.mubr.f32.gmra.mrb[126].mxu0 %v1364_v11 }
 0x211   :  { %1874 = vmatmul.mubr.f32.gmra.mrb[126].mxu1 %v1364_v11 }
 0x266   :  { %v1432_v37 = vpop.f32.mrb[64].mxu0 }
 0x267   :  { %v1880_v7 = vadd.f32 %v1432_v37, %v3700_v54  ;;  %v1434_v12 = vpop.f32.mrb[65].mxu0 }
 0x268   :  { %v1689_v63 = vpop.f32.mrb[64].mxu1  ;;  %v1881_v16 = vadd.f32 %v1434_v12, %v3709_v59 }
 0x269   :  { %v2200_v23 = vadd.f32 %v2043_v62, %v1880_v7  ;;  %v1882_v18 = vadd.f32 %v1689_v63, %v3706_v58  ;;  %v1691_v34 = vpop.f32.mrb[65].mxu1 }
 0x26a   :  { %v2201_v4 = vadd.f32 %v2043_v62, %v1881_v16  ;;  %v1883_v20 = vadd.f32 %v1691_v34, %v3712_v60  ;;  %v1438_v29 = vpop.f32.mrb[66].mxu0  ;;  %v2053_v16 = vpop.permute.xlu0 %2052 }
 0x26b   :  { %v2202_v5 = vadd.f32 %v2043_v62, %v1882_v18  ;;  %v1884_v32 = vadd.f32 %v1438_v29, %v3695_v48  ;;  %v1440_v22 = vpop.f32.mrb[67].mxu0 }
 0x26c   :  { %v2844_v40 = vpack.c.bf16 %v2201_v4, %v2200_v23  ;;  %v2203_v54 = vadd.f32 %v2043_v62, %v1883_v20  ;;  %v1695_v44 = vpop.f32.mrb[66].mxu1  ;;  %v1885_v46 = vadd.f32 %v1440_v22, %v3703_v57 }
 0x26d   :  { %v2204_v11 = vadd.f32 %v2048_v56, %v1884_v32  ;;  %v1886_v59 = vadd.f32 %v1695_v44, %v3697_v49  ;;  %v1697_v37 = vpop.f32.mrb[67].mxu1 }
 0x26e   :  { %2712 = vst [vmem:[%s4914_s5] sm:$0xff] %v2844_v40  ;;  %v2845_v58 = vpack.c.bf16 %v2203_v54, %v2202_v5  ;;  %v2205_v60 = vadd.f32 %v2048_v56, %v1885_v46  ;;  %v1887_v7 = vadd.f32 %v1697_v37, %v3715_v61  ;;  %v1444_v48 = vpop.f32.mrb[68].mxu0  ;;  %v2058_v40 = vpop.permute.xlu1 %2057 }
 0x26f   :  { %v2206_v12 = vadd.f32 %v2048_v56, %v1886_v59  ;;  %v1888_v63 = vadd.f32 %v1444_v48, %v3730_v25  ;;  %v1446_v62 = vpop.f32.mrb[69].mxu0 }
 0x270   :  { %2713 = vst [vmem:[%s4914_s5 + $0x8] sm:$0xff] %v2845_v58  ;;  %v2846_v49 = vpack.c.bf16 %v2205_v60, %v2204_v11  ;;  %v2207_v57 = vadd.f32 %v2048_v56, %v1887_v7  ;;  %v1701_v23 = vpop.f32.mrb[68].mxu1  ;;  %v1889_v18 = vadd.f32 %v1446_v62, %v3742_v35 }
 0x271   :  { %v2208_v34 = vadd.f32 %v2053_v16, %v1888_v63  ;;  %v1890_v4 = vadd.f32 %v1701_v23, %v3733_v26  ;;  %v1703_v20 = vpop.f32.mrb[69].mxu1 }
 0x272   :  { %2714 = vst [vmem:[%s4914_s5 + $0x10] sm:$0xff] %v2846_v49  ;;  %v2847_v61 = vpack.c.bf16 %v2207_v57, %v2206_v12  ;;  %v2209_v25 = vadd.f32 %v2053_v16, %v1889_v18  ;;  %v1891_v29 = vadd.f32 %v1703_v20, %v3766_v1  ;;  %v1450_v5 = vpop.f32.mrb[70].mxu0  ;;  %v2063_v12 = vpop.permute.xlu0 %2062 }
 0x273   :  { %v2210_v32 = vadd.f32 %v2053_v16, %v1890_v4  ;;  %v1892_v22 = vadd.f32 %v1450_v5, %v3736_v27  ;;  %v1452_v56 = vpop.f32.mrb[71].mxu0  ;;  %v5083_v4 = vld [vmem:[#allocation2_spill] sm:$0xff]  ;;  %v5084_v5 = vld [vmem:[#allocation4_spill] sm:$0xff] }
 0x274   :  { %2715 = vst [vmem:[%s4914_s5 + $0x18] sm:$0xff] %v2847_v61  ;;  %v2848_v26 = vpack.c.bf16 %v2209_v25, %v2208_v34  ;;  %v2211_v35 = vadd.f32 %v2053_v16, %v1891_v29  ;;  %v1707_v54 = vpop.f32.mrb[70].mxu1  ;;  %v1893_v44 = vadd.f32 %v1452_v56, %v3751_v47  ;;  %v2068_v25 = vpop.permute.xlu1 %2067  ;;  %v5085_v56 = vld [vmem:[#allocation3_spill] sm:$0xff] }
 0x275   :  { %v2212_v46 = vadd.f32 %v2058_v40, %v1892_v22  ;;  %v1894_v11 = vadd.f32 %v1707_v54, %v3739_v30  ;;  %v1709_v59 = vpop.f32.mrb[71].mxu1  ;;  %v5086_v54 = vld [vmem:[#allocation5_spill] sm:$0xff] }
 0x276   :  { %2716 = vst [vmem:[%s4914_s5 + $0x20] sm:$0xff] %v2848_v26  ;;  %v2849_v27 = vpack.c.bf16 %v2211_v35, %v2210_v32  ;;  %v2213_v1 = vadd.f32 %v2058_v40, %v1893_v44  ;;  %v1895_v37 = vadd.f32 %v1709_v59, %v3758_v55  ;;  %v1456_v58 = vpop.f32.mrb[72].mxu0  ;;  %v5087_v59 = vld [vmem:[#allocation8_spill] sm:$0xff] }
 0x277   :  { %v2214_v60 = vadd.f32 %v2058_v40, %v1894_v11  ;;  %v1896_v7 = vadd.f32 %v1456_v58, %v3753_v52  ;;  %v1458_v48 = vpop.f32.mrb[73].mxu0 }
 0x278   :  { %2717 = vst [vmem:[%s4914_s5 + $0x28] sm:$0xff] %v2849_v27  ;;  %v2850_v30 = vpack.c.bf16 %v2213_v1, %v2212_v46  ;;  %v2215_v47 = vadd.f32 %v2058_v40, %v1895_v37  ;;  %v1713_v63 = vpop.f32.mrb[72].mxu1  ;;  %v1897_v62 = vadd.f32 %v1458_v48, %v3789_v31  ;;  %v2073_v37 = vpop.permute.xlu0 %2072  ;;  %v5088_v48 = vld [vmem:[#allocation10_spill] sm:$0xff] }
 0x279   :  { %v2216_v16 = vadd.f32 %v2063_v12, %v1896_v7  ;;  %v1898_v49 = vadd.f32 %v1713_v63, %v3774_v10  ;;  %v1715_v57 = vpop.f32.mrb[73].mxu1 }
 0x27a   :  { %2718 = vst [vmem:[%s4914_s5 + $0x30] sm:$0xff] %v2850_v30  ;;  %v2851_v52 = vpack.c.bf16 %v2215_v47, %v2214_v60  ;;  %v2217_v55 = vadd.f32 %v2063_v12, %v1897_v62  ;;  %v1899_v23 = vadd.f32 %v1715_v57, %v3802_v42  ;;  %v1462_v18 = vpop.f32.mrb[74].mxu0  ;;  %v5089_v47 = vld [vmem:[#allocation9_spill] sm:$0xff]  ;;  %v5090_v57 = vld [vmem:[#allocation14_spill] sm:$0xff] }
 0x27b   :  { %v2218_v34 = vadd.f32 %v2063_v12, %v1898_v49  ;;  %v1900_v20 = vadd.f32 %v1462_v18, %v5083_v4  ;;  %v1464_v61 = vpop.f32.mrb[75].mxu0  ;;  %v5091_v18 = vld [vmem:[#allocation6_spill] sm:$0xff] }
 0x27c   :  { %2719 = vst [vmem:[%s4914_s5 + $0x38] sm:$0xff] %v2851_v52  ;;  %v2852_v10 = vpack.c.bf16 %v2217_v55, %v2216_v16  ;;  %v2219_v31 = vadd.f32 %v2063_v12, %v1899_v23  ;;  %v1719_v29 = vpop.f32.mrb[74].mxu1  ;;  %v1901_v32 = vadd.f32 %v1464_v61, %v5084_v5 }
 0x27d   :  { %v2220_v22 = vadd.f32 %v2068_v25, %v1900_v20  ;;  %v1902_v40 = vadd.f32 %v1719_v29, %v5085_v56  ;;  %v1721_v26 = vpop.f32.mrb[75].mxu1  ;;  %v2078_v20 = vpop.permute.xlu1 %2077 }
 0x27e   :  { %2720 = vst [vmem:[%s4914_s5 + $0x40] sm:$0xff] %v2852_v10  ;;  %v2853_v42 = vpack.c.bf16 %v2219_v31, %v2218_v34  ;;  %v2221_v35 = vadd.f32 %v2068_v25, %v1901_v32  ;;  %v1903_v44 = vadd.f32 %v1721_v26, %v5086_v54  ;;  %v1468_v46 = vpop.f32.mrb[76].mxu0  ;;  %v5092_v31 = vld [vmem:[#allocation11_spill] sm:$0xff] }
 0x27f   :  { %v2222_v11 = vadd.f32 %v2068_v25, %v1902_v40  ;;  %v1904_v27 = vadd.f32 %v1468_v46, %v5087_v59  ;;  %v1470_v1 = vpop.f32.mrb[77].mxu0  ;;  %v5093_v32 = vld [vmem:[#allocation7_spill] sm:$0xff]  ;;  %v5095_v46 = vld [vmem:[#allocation16_spill] sm:$0xff] }
 0x280   :  { %2721 = vst [vmem:[%s4914_s5 + $0x48] sm:$0xff] %v2853_v42  ;;  %v2854_v58 = vpack.c.bf16 %v2221_v35, %v2220_v22  ;;  %v2223_v60 = vadd.f32 %v2068_v25, %v1903_v44  ;;  %v1725_v7 = vpop.f32.mrb[76].mxu1  ;;  %v1905_v12 = vadd.f32 %v1470_v1, %v5088_v48  ;;  %v5094_v42 = vld [vmem:[#allocation15_spill] sm:$0xff] }
 0x281   :  { %v2224_v30 = vadd.f32 %v2073_v37, %v1904_v27  ;;  %v1906_v63 = vadd.f32 %v1725_v7, %v5089_v47  ;;  %v1727_v62 = vpop.f32.mrb[77].mxu1  ;;  %v2083_v27 = vpop.permute.xlu0 %2082 }
 0x282   :  { %2722 = vst [vmem:[%s4914_s5 + $0x50] sm:$0xff] %v2854_v58  ;;  %v2855_v16 = vpack.c.bf16 %v2223_v60, %v2222_v11  ;;  %v2225_v49 = vadd.f32 %v2073_v37, %v1905_v12  ;;  %v1907_v52 = vadd.f32 %v1727_v62, %v5090_v57  ;;  %v1474_v55 = vpop.f32.mrb[78].mxu0  ;;  %v5096_v60 = vld [vmem:[#allocation18_spill] sm:$0xff]  ;;  %v5097_v12 = vld [vmem:[#allocation17_spill] sm:$0xff] }
 0x283   :  { %v2226_v23 = vadd.f32 %v2073_v37, %v1906_v63  ;;  %v1908_v34 = vadd.f32 %v1474_v55, %v5091_v18  ;;  %v1476_v4 = vpop.f32.mrb[79].mxu0  ;;  %v5099_v55 = vld [vmem:[#allocation12_spill] sm:$0xff] }
 0x284   :  { %2723 = vst [vmem:[%s4914_s5 + $0x58] sm:$0xff] %v2855_v16  ;;  %v2856_v61 = vpack.c.bf16 %v2225_v49, %v2224_v30  ;;  %v2227_v25 = vadd.f32 %v2073_v37, %v1907_v52  ;;  %v1731_v10 = vpop.f32.mrb[78].mxu1  ;;  %v1909_v29 = vadd.f32 %v1476_v4, %v5092_v31  ;;  %v5098_v16 = vld [vmem:[#allocation22_spill] sm:$0xff] }
 0x285   :  { %v2228_v5 = vadd.f32 %v2078_v20, %v1908_v34  ;;  %v1910_v22 = vadd.f32 %v1731_v10, %v5093_v32  ;;  %v1733_v56 = vpop.f32.mrb[79].mxu1  ;;  %v2088_v34 = vpop.permute.xlu1 %2087 }
 0x286   :  { %2724 = vst [vmem:[%s4914_s5 + $0x60] sm:$0xff] %v2856_v61  ;;  %v2857_v40 = vpack.c.bf16 %v2227_v25, %v2226_v23  ;;  %v2229_v26 = vadd.f32 %v2078_v20, %v1909_v29  ;;  %v1911_v35 = vadd.f32 %v1733_v56, %v5094_v42  ;;  %v1480_v54 = vpop.f32.mrb[80].mxu0  ;;  %v5100_v25 = vld [vmem:[#allocation19_spill] sm:$0xff]  ;;  %v5101_v29 = vld [vmem:[#allocation13_spill] sm:$0xff] }
 0x287   :  { %v2230_v44 = vadd.f32 %v2078_v20, %v1910_v22  ;;  %v1912_v11 = vadd.f32 %v1480_v54, %v5095_v46  ;;  %v1482_v59 = vpop.f32.mrb[81].mxu0  ;;  %v5103_v54 = vld [vmem:[#allocation24_spill] sm:$0xff] }
 0x288   :  { %2725 = vst [vmem:[%s4914_s5 + $0x68] sm:$0xff] %v2857_v40  ;;  %v2858_v1 = vpack.c.bf16 %v2229_v26, %v2228_v5  ;;  %v2231_v37 = vadd.f32 %v2078_v20, %v1911_v35  ;;  %v1737_v58 = vpop.f32.mrb[80].mxu1  ;;  %v1913_v7 = vadd.f32 %v1482_v59, %v5096_v60  ;;  %v5102_v40 = vld [vmem:[#allocation23_spill] sm:$0xff] }
 0x289   :  { %v2232_v48 = vadd.f32 %v2083_v27, %v1912_v11  ;;  %v1914_v30 = vadd.f32 %v1737_v58, %v5097_v12  ;;  %v1739_v47 = vpop.f32.mrb[81].mxu1  ;;  %v2093_v11 = vpop.permute.xlu0 %2092 }
 0x28a   :  { %2726 = vst [vmem:[%s4914_s5 + $0x70] sm:$0xff] %v2858_v1  ;;  %v2859_v63 = vpack.c.bf16 %v2231_v37, %v2230_v44  ;;  %v2233_v62 = vadd.f32 %v2083_v27, %v1913_v7  ;;  %v1915_v49 = vadd.f32 %v1739_v47, %v5098_v16  ;;  %v1486_v57 = vpop.f32.mrb[82].mxu0  ;;  %v5104_v37 = vld [vmem:[#allocation26_spill] sm:$0xff]  ;;  %v5105_v7 = vld [vmem:[#allocation25_spill] sm:$0xff] }
 0x28b   :  { %v2234_v52 = vadd.f32 %v2083_v27, %v1914_v30  ;;  %v1916_v23 = vadd.f32 %v1486_v57, %v5099_v55  ;;  %v1488_v18 = vpop.f32.mrb[83].mxu0  ;;  %v5107_v57 = vld [vmem:[#allocation20_spill] sm:$0xff] }
 0x28c   :  { %2727 = vst [vmem:[%s4914_s5 + $0x78] sm:$0xff] %v2859_v63  ;;  %v2860_v4 = vpack.c.bf16 %v2233_v62, %v2232_v48  ;;  %v2235_v20 = vadd.f32 %v2083_v27, %v1915_v49  ;;  %v1743_v61 = vpop.f32.mrb[82].mxu1  ;;  %v1917_v10 = vadd.f32 %v1488_v18, %v5100_v25  ;;  %v5106_v63 = vld [vmem:[#allocation30_spill] sm:$0xff] }
 0x28d   :  { %v2236_v31 = vadd.f32 %v2088_v34, %v1916_v23  ;;  %v1918_v5 = vadd.f32 %v1743_v61, %v5101_v29  ;;  %v1745_v32 = vpop.f32.mrb[83].mxu1  ;;  %v2098_v23 = vpop.permute.xlu1 %2097 }
 0x28e   :  { %2728 = vst [vmem:[%s4914_s5 + $0x80] sm:$0xff] %v2860_v4  ;;  %v2861_v22 = vpack.c.bf16 %v2235_v20, %v2234_v52  ;;  %v2237_v56 = vadd.f32 %v2088_v34, %v1917_v10  ;;  %v1919_v26 = vadd.f32 %v1745_v32, %v5102_v40  ;;  %v1492_v42 = vpop.f32.mrb[84].mxu0  ;;  %v5108_v20 = vld [vmem:[#allocation27_spill] sm:$0xff]  ;;  %v5109_v10 = vld [vmem:[#allocation21_spill] sm:$0xff] }
 0x28f   :  { %v2238_v35 = vadd.f32 %v2088_v34, %v1918_v5  ;;  %v1920_v44 = vadd.f32 %v1492_v42, %v5103_v54  ;;  %v1494_v46 = vpop.f32.mrb[85].mxu0  ;;  %v5111_v42 = vld [vmem:[#allocation32_spill] sm:$0xff] }
 0x290   :  { %2729 = vst [vmem:[%s4914_s5 + $0x88] sm:$0xff] %v2861_v22  ;;  %v2862_v59 = vpack.c.bf16 %v2237_v56, %v2236_v31  ;;  %v2239_v27 = vadd.f32 %v2088_v34, %v1919_v26  ;;  %v1749_v1 = vpop.f32.mrb[84].mxu1  ;;  %v1921_v58 = vadd.f32 %v1494_v46, %v5104_v37  ;;  %v5110_v22 = vld [vmem:[#allocation31_spill] sm:$0xff] }
 0x291   :  { %v2240_v60 = vadd.f32 %v2093_v11, %v1920_v44  ;;  %v1922_v48 = vadd.f32 %v1749_v1, %v5105_v7  ;;  %v1751_v12 = vpop.f32.mrb[85].mxu1  ;;  %v2103_v44 = vpop.permute.xlu0 %2102 }
 0x292   :  { %2730 = vst [vmem:[%s4914_s5 + $0x90] sm:$0xff] %v2862_v59  ;;  %v2863_v30 = vpack.c.bf16 %v2239_v27, %v2238_v35  ;;  %v2241_v47 = vadd.f32 %v2093_v11, %v1921_v58  ;;  %v1923_v62 = vadd.f32 %v1751_v12, %v5106_v63  ;;  %v1498_v16 = vpop.f32.mrb[86].mxu0  ;;  %v5112_v27 = vld [vmem:[#allocation34_spill] sm:$0xff]  ;;  %v5113_v58 = vld [vmem:[#allocation33_spill] sm:$0xff] }
 0x293   :  { %v2242_v49 = vadd.f32 %v2093_v11, %v1922_v48  ;;  %v1924_v52 = vadd.f32 %v1498_v16, %v5107_v57  ;;  %v1500_v55 = vpop.f32.mrb[87].mxu0  ;;  %v5115_v16 = vld [vmem:[#allocation28_spill] sm:$0xff] }
 0x294   :  { %2731 = vst [vmem:[%s4914_s5 + $0x98] sm:$0xff] %v2863_v30  ;;  %v2864_v18 = vpack.c.bf16 %v2241_v47, %v2240_v60  ;;  %v2243_v34 = vadd.f32 %v2093_v11, %v1923_v62  ;;  %v1755_v4 = vpop.f32.mrb[86].mxu1  ;;  %v1925_v61 = vadd.f32 %v1500_v55, %v5108_v20  ;;  %v5114_v30 = vld [vmem:[#allocation38_spill] sm:$0xff] }
 0x295   :  { %v2244_v25 = vadd.f32 %v2098_v23, %v1924_v52  ;;  %v1926_v31 = vadd.f32 %v1755_v4, %v5109_v10  ;;  %v1757_v29 = vpop.f32.mrb[87].mxu1  ;;  %v2108_v52 = vpop.permute.xlu1 %2107 }
 0x296   :  { %2732 = vst [vmem:[%s4914_s5 + $0xa0] sm:$0xff] %v2864_v18  ;;  %v2865_v5 = vpack.c.bf16 %v2243_v34, %v2242_v49  ;;  %v2245_v32 = vadd.f32 %v2098_v23, %v1925_v61  ;;  %v1927_v56 = vadd.f32 %v1757_v29, %v5110_v22  ;;  %v1504_v40 = vpop.f32.mrb[88].mxu0  ;;  %v5116_v34 = vld [vmem:[#allocation35_spill] sm:$0xff]  ;;  %v5117_v61 = vld [vmem:[#allocation29_spill] sm:$0xff] }
 0x297   :  { %v2246_v26 = vadd.f32 %v2098_v23, %v1926_v31  ;;  %v1928_v35 = vadd.f32 %v1504_v40, %v5111_v42  ;;  %v1506_v54 = vpop.f32.mrb[89].mxu0  ;;  %v5119_v40 = vld [vmem:[#allocation40_spill] sm:$0xff] }
 0x298   :  { %2733 = vst [vmem:[%s4914_s5 + $0xa8] sm:$0xff] %v2865_v5  ;;  %v2866_v46 = vpack.c.bf16 %v2245_v32, %v2244_v25  ;;  %v2247_v11 = vadd.f32 %v2098_v23, %v1927_v56  ;;  %v1761_v59 = vpop.f32.mrb[88].mxu1  ;;  %v1929_v1 = vadd.f32 %v1506_v54, %v5112_v27  ;;  %v5118_v5 = vld [vmem:[#allocation39_spill] sm:$0xff] }
 0x299   :  { %v2248_v37 = vadd.f32 %v2103_v44, %v1928_v35  ;;  %v1930_v60 = vadd.f32 %v1761_v59, %v5113_v58  ;;  %v1763_v7 = vpop.f32.mrb[89].mxu1  ;;  %v2113_v35 = vpop.permute.xlu0 %2112 }
 0x29a   :  { %2734 = vst [vmem:[%s4914_s5 + $0xb0] sm:$0xff] %v2866_v46  ;;  %v2867_v48 = vpack.c.bf16 %v2247_v11, %v2246_v26  ;;  %v2249_v12 = vadd.f32 %v2103_v44, %v1929_v1  ;;  %v1931_v47 = vadd.f32 %v1763_v7, %v5114_v30  ;;  %v1510_v63 = vpop.f32.mrb[90].mxu0  ;;  %v5120_v11 = vld [vmem:[#allocation42_spill] sm:$0xff]  ;;  %v5121_v1 = vld [vmem:[#allocation41_spill] sm:$0xff] }
 0x29b   :  { %v2250_v62 = vadd.f32 %v2103_v44, %v1930_v60  ;;  %v1932_v49 = vadd.f32 %v1510_v63, %v5115_v16  ;;  %v1512_v57 = vpop.f32.mrb[91].mxu0  ;;  %v5123_v63 = vld [vmem:[#allocation36_spill] sm:$0xff] }
 0x29c   :  { %2735 = vst [vmem:[%s4914_s5 + $0xb8] sm:$0xff] %v2867_v48  ;;  %v2868_v55 = vpack.c.bf16 %v2249_v12, %v2248_v37  ;;  %v2251_v23 = vadd.f32 %v2103_v44, %v1931_v47  ;;  %v1767_v18 = vpop.f32.mrb[90].mxu1  ;;  %v1933_v4 = vadd.f32 %v1512_v57, %v5116_v34  ;;  %v5122_v48 = vld [vmem:[#allocation46_spill] sm:$0xff] }
 0x29d   :  { %v2252_v20 = vadd.f32 %v2108_v52, %v1932_v49  ;;  %v1934_v25 = vadd.f32 %v1767_v18, %v5117_v61  ;;  %v1769_v10 = vpop.f32.mrb[91].mxu1  ;;  %v2118_v49 = vpop.permute.xlu1 %2117 }
 0x29e   :  { %2736 = vst [vmem:[%s4914_s5 + $0xc0] sm:$0xff] %v2868_v55  ;;  %v2869_v31 = vpack.c.bf16 %v2251_v23, %v2250_v62  ;;  %v2253_v29 = vadd.f32 %v2108_v52, %v1933_v4  ;;  %v1935_v32 = vadd.f32 %v1769_v10, %v5118_v5  ;;  %v1516_v22 = vpop.f32.mrb[92].mxu0  ;;  %v5124_v23 = vld [vmem:[#allocation43_spill] sm:$0xff]  ;;  %v5125_v4 = vld [vmem:[#allocation37_spill] sm:$0xff] }
 0x29f   :  { %v2254_v56 = vadd.f32 %v2108_v52, %v1934_v25  ;;  %v1936_v26 = vadd.f32 %v1516_v22, %v5119_v40  ;;  %v1518_v42 = vpop.f32.mrb[93].mxu0  ;;  %v5127_v22 = vld [vmem:[#allocation48_spill] sm:$0xff] }
 0x2a0   :  { %2737 = vst [vmem:[%s4914_s5 + $0xc8] sm:$0xff] %v2869_v31  ;;  %v2870_v54 = vpack.c.bf16 %v2253_v29, %v2252_v20  ;;  %v2255_v44 = vadd.f32 %v2108_v52, %v1935_v32  ;;  %v1773_v46 = vpop.f32.mrb[92].mxu1  ;;  %v1937_v59 = vadd.f32 %v1518_v42, %v5120_v11  ;;  %v5126_v31 = vld [vmem:[#allocation47_spill] sm:$0xff] }
 0x2a1   :  { %v2256_v27 = vadd.f32 %v2113_v35, %v1936_v26  ;;  %v1938_v37 = vadd.f32 %v1773_v46, %v5121_v1  ;;  %v1775_v58 = vpop.f32.mrb[93].mxu1  ;;  %v2123_v26 = vpop.permute.xlu0 %2122 }
 0x2a2   :  { %2738 = vst [vmem:[%s4914_s5 + $0xd0] sm:$0xff] %v2870_v54  ;;  %v2871_v60 = vpack.c.bf16 %v2255_v44, %v2254_v56  ;;  %v2257_v7 = vadd.f32 %v2113_v35, %v1937_v59  ;;  %v1939_v12 = vadd.f32 %v1775_v58, %v5122_v48  ;;  %v1522_v30 = vpop.f32.mrb[94].mxu0  ;;  %v5128_v44 = vld [vmem:[#allocation50_spill] sm:$0xff]  ;;  %v5129_v59 = vld [vmem:[#allocation49_spill] sm:$0xff] }
 0x2a3   :  { %v2258_v47 = vadd.f32 %v2113_v35, %v1938_v37  ;;  %v1940_v62 = vadd.f32 %v1522_v30, %v5123_v63  ;;  %v1524_v16 = vpop.f32.mrb[95].mxu0  ;;  %v5131_v30 = vld [vmem:[#allocation44_spill] sm:$0xff] }
 0x2a4   :  { %2739 = vst [vmem:[%s4914_s5 + $0xd8] sm:$0xff] %v2871_v60  ;;  %v2872_v57 = vpack.c.bf16 %v2257_v7, %v2256_v27  ;;  %v2259_v52 = vadd.f32 %v2113_v35, %v1939_v12  ;;  %v1779_v55 = vpop.f32.mrb[94].mxu1  ;;  %v1941_v18 = vadd.f32 %v1524_v16, %v5124_v23  ;;  %v5130_v60 = vld [vmem:[#allocation54_spill] sm:$0xff] }
 0x2a5   :  { %v2260_v34 = vadd.f32 %v2118_v49, %v1940_v62  ;;  %v1942_v20 = vadd.f32 %v1779_v55, %v5125_v4  ;;  %v1781_v61 = vpop.f32.mrb[95].mxu1  ;;  %v2128_v62 = vpop.permute.xlu1 %2127 }
 0x2a6   :  { %2740 = vst [vmem:[%s4914_s5 + $0xe0] sm:$0xff] %v2872_v57  ;;  %v2873_v25 = vpack.c.bf16 %v2259_v52, %v2258_v47  ;;  %v2261_v10 = vadd.f32 %v2118_v49, %v1941_v18  ;;  %v1943_v29 = vadd.f32 %v1781_v61, %v5126_v31  ;;  %v1528_v5 = vpop.f32.mrb[96].mxu0  ;;  %v5132_v52 = vld [vmem:[#allocation51_spill] sm:$0xff]  ;;  %v5133_v18 = vld [vmem:[#allocation45_spill] sm:$0xff] }
 0x2a7   :  { %v2262_v32 = vadd.f32 %v2118_v49, %v1942_v20  ;;  %v1944_v56 = vadd.f32 %v1528_v5, %v5127_v22  ;;  %v1530_v40 = vpop.f32.mrb[97].mxu0  ;;  %v5135_v5 = vld [vmem:[#allocation52_spill] sm:$0xff] }
 0x2a8   :  { %2741 = vst [vmem:[%s4914_s5 + $0xe8] sm:$0xff] %v2873_v25  ;;  %v2874_v42 = vpack.c.bf16 %v2261_v10, %v2260_v34  ;;  %v2263_v35 = vadd.f32 %v2118_v49, %v1943_v29  ;;  %v1785_v54 = vpop.f32.mrb[96].mxu1  ;;  %v1945_v46 = vadd.f32 %v1530_v40, %v5128_v44  ;;  %v5134_v25 = vld [vmem:[#allocation55_spill] sm:$0xff] }
 0x2a9   :  { %v2264_v11 = vadd.f32 %v2123_v26, %v1944_v56  ;;  %v1946_v27 = vadd.f32 %v1785_v54, %v5129_v59  ;;  %v1787_v1 = vpop.f32.mrb[97].mxu1  ;;  %v2133_v56 = vpop.permute.xlu0 %2132 }
 0x2aa   :  { %2742 = vst [vmem:[%s4914_s5 + $0xf0] sm:$0xff] %v2874_v42  ;;  %v2875_v37 = vpack.c.bf16 %v2263_v35, %v2262_v32  ;;  %v2265_v58 = vadd.f32 %v2123_v26, %v1945_v46  ;;  %v1947_v7 = vadd.f32 %v1787_v1, %v5130_v60  ;;  %v1534_v48 = vpop.f32.mrb[98].mxu0  ;;  %v5136_v35 = vld [vmem:[#allocation58_spill] sm:$0xff]  ;;  %v5137_v46 = vld [vmem:[#allocation57_spill] sm:$0xff] }
 0x2ab   :  { %v2266_v12 = vadd.f32 %v2123_v26, %v1946_v27  ;;  %v1948_v47 = vadd.f32 %v1534_v48, %v5131_v30  ;;  %v1536_v63 = vpop.f32.mrb[99].mxu0  ;;  %v5139_v48 = vld [vmem:[#allocation53_spill] sm:$0xff] }
 0x2ac   :  { %2743 = vst [vmem:[%s4914_s5 + $0xf8] sm:$0xff] %v2875_v37  ;;  %v2876_v16 = vpack.c.bf16 %v2265_v58, %v2264_v11  ;;  %v2267_v49 = vadd.f32 %v2123_v26, %v1947_v7  ;;  %v1791_v57 = vpop.f32.mrb[98].mxu1  ;;  %v1949_v55 = vadd.f32 %v1536_v63, %v5132_v52  ;;  %v5138_v37 = vld [vmem:[#allocation62_spill] sm:$0xff] }
 0x2ad   :  { %v2268_v23 = vadd.f32 %v2128_v62, %v1948_v47  ;;  %v1950_v34 = vadd.f32 %v1791_v57, %v5133_v18  ;;  %v1793_v4 = vpop.f32.mrb[99].mxu1  ;;  %v2138_v47 = vpop.permute.xlu1 %2137 }
 0x2ae   :  { %2744 = vst [vmem:[%s4914_s5 + $0x100] sm:$0xff] %v2876_v16  ;;  %v2877_v20 = vpack.c.bf16 %v2267_v49, %v2266_v12  ;;  %v2269_v61 = vadd.f32 %v2128_v62, %v1949_v55  ;;  %v1951_v10 = vadd.f32 %v1793_v4, %v5134_v25  ;;  %v1540_v31 = vpop.f32.mrb[100].mxu0  ;;  %v5140_v49 = vld [vmem:[#allocation59_spill] sm:$0xff]  ;;  %v5141_v55 = vld [vmem:[#allocation56_spill] sm:$0xff] }
 0x2af   :  { %v2270_v29 = vadd.f32 %v2128_v62, %v1950_v34  ;;  %v1952_v32 = vadd.f32 %v1540_v31, %v5135_v5  ;;  %v1542_v22 = vpop.f32.mrb[101].mxu0  ;;  %v5143_v31 = vld [vmem:[#allocation60_spill] sm:$0xff] }
 0x2b0   :  { %2745 = vst [vmem:[%s4914_s5 + $0x108] sm:$0xff] %v2877_v20  ;;  %v2878_v40 = vpack.c.bf16 %v2269_v61, %v2268_v23  ;;  %v2271_v26 = vadd.f32 %v2128_v62, %v1951_v10  ;;  %v1797_v42 = vpop.f32.mrb[100].mxu1  ;;  %v1953_v54 = vadd.f32 %v1542_v22, %v5136_v35  ;;  %v5142_v20 = vld [vmem:[#allocation63_spill] sm:$0xff] }
 0x2b1   :  { %v2272_v44 = vadd.f32 %v2133_v56, %v1952_v32  ;;  %v1954_v11 = vadd.f32 %v1797_v42, %v5137_v46  ;;  %v1799_v59 = vpop.f32.mrb[101].mxu1  ;;  %v2143_v32 = vpop.permute.xlu0 %2142 }
 0x2b2   :  { %2746 = vst [vmem:[%s4914_s5 + $0x110] sm:$0xff] %v2878_v40  ;;  %v2879_v27 = vpack.c.bf16 %v2271_v26, %v2270_v29  ;;  %v2273_v1 = vadd.f32 %v2133_v56, %v1953_v54  ;;  %v1955_v58 = vadd.f32 %v1799_v59, %v5138_v37  ;;  %v1546_v60 = vpop.f32.mrb[102].mxu0  ;;  %v5144_v26 = vld [vmem:[#allocation66_spill] sm:$0xff]  ;;  %v5145_v54 = vld [vmem:[#allocation64_spill] sm:$0xff] }
 0x2b3   :  { %v2274_v7 = vadd.f32 %v2133_v56, %v1954_v11  ;;  %v1956_v12 = vadd.f32 %v1546_v60, %v5139_v48  ;;  %v1548_v30 = vpop.f32.mrb[103].mxu0  ;;  %v5147_v60 = vld [vmem:[#allocation61_spill] sm:$0xff] }
 0x2b4   :  { %2747 = vst [vmem:[%s4914_s5 + $0x118] sm:$0xff] %v2879_v27  ;;  %v2880_v63 = vpack.c.bf16 %v2273_v1, %v2272_v44  ;;  %v2275_v62 = vadd.f32 %v2133_v56, %v1955_v58  ;;  %v1803_v16 = vpop.f32.mrb[102].mxu1  ;;  %v1957_v57 = vadd.f32 %v1548_v30, %v5140_v49  ;;  %v5146_v27 = vld [vmem:[#allocation71_spill] sm:$0xff] }
 0x2b5   :  { %v2276_v52 = vadd.f32 %v2138_v47, %v1956_v12  ;;  %v1958_v23 = vadd.f32 %v1803_v16, %v5141_v55  ;;  %v1805_v18 = vpop.f32.mrb[103].mxu1  ;;  %v2148_v12 = vpop.permute.xlu1 %2147 }
 0x2b6   :  { %2748 = vst [vmem:[%s4914_s5 + $0x120] sm:$0xff] %v2880_v63  ;;  %v2881_v34 = vpack.c.bf16 %v2275_v62, %v2274_v7  ;;  %v2277_v4 = vadd.f32 %v2138_v47, %v1957_v57  ;;  %v1959_v61 = vadd.f32 %v1805_v18, %v5142_v20  ;;  %v1552_v25 = vpop.f32.mrb[104].mxu0  ;;  %v5148_v62 = vld [vmem:[#allocation67_spill] sm:$0xff]  ;;  %v5149_v57 = vld [vmem:[#allocation65_spill] sm:$0xff] }
 0x2b7   :  { %v2278_v10 = vadd.f32 %v2138_v47, %v1958_v23  ;;  %v1960_v29 = vadd.f32 %v1552_v25, %v5143_v31  ;;  %v1554_v5 = vpop.f32.mrb[105].mxu0  ;;  %v5151_v25 = vld [vmem:[#allocation68_spill] sm:$0xff] }
 0x2b8   :  { %2749 = vst [vmem:[%s4914_s5 + $0x128] sm:$0xff] %v2881_v34  ;;  %v2882_v22 = vpack.c.bf16 %v2277_v4, %v2276_v52  ;;  %v2279_v56 = vadd.f32 %v2138_v47, %v1959_v61  ;;  %v1809_v40 = vpop.f32.mrb[104].mxu1  ;;  %v1961_v42 = vadd.f32 %v1554_v5, %v5144_v26  ;;  %v5150_v34 = vld [vmem:[#allocation72_spill] sm:$0xff] }
 0x2b9   :  { %v2280_v35 = vadd.f32 %v2143_v32, %v1960_v29  ;;  %v1962_v44 = vadd.f32 %v1809_v40, %v5145_v54  ;;  %v1811_v46 = vpop.f32.mrb[105].mxu1  ;;  %v2153_v29 = vpop.permute.xlu0 %2152 }
 0x2ba   :  { %2750 = vst [vmem:[%s4914_s5 + $0x130] sm:$0xff] %v2882_v22  ;;  %v2883_v11 = vpack.c.bf16 %v2279_v56, %v2278_v10  ;;  %v2281_v59 = vadd.f32 %v2143_v32, %v1961_v42  ;;  %v1963_v1 = vadd.f32 %v1811_v46, %v5146_v27  ;;  %v1558_v37 = vpop.f32.mrb[106].mxu0  ;;  %v5152_v56 = vld [vmem:[#allocation74_spill] sm:$0xff]  ;;  %v5153_v42 = vld [vmem:[#allocation69_spill] sm:$0xff] }
 0x2bb   :  { %v2282_v58 = vadd.f32 %v2143_v32, %v1962_v44  ;;  %v1964_v7 = vadd.f32 %v1558_v37, %v5147_v60  ;;  %v1560_v48 = vpop.f32.mrb[107].mxu0  ;;  %v5155_v37 = vld [vmem:[#allocation70_spill] sm:$0xff] }
 0x2bc   :  { %2751 = vst [vmem:[%s4914_s5 + $0x138] sm:$0xff] %v2883_v11  ;;  %v2884_v30 = vpack.c.bf16 %v2281_v59, %v2280_v35  ;;  %v2283_v47 = vadd.f32 %v2143_v32, %v1963_v1  ;;  %v1815_v63 = vpop.f32.mrb[106].mxu1  ;;  %v1965_v16 = vadd.f32 %v1560_v48, %v5148_v62  ;;  %v5154_v11 = vld [vmem:[#allocation79_spill] sm:$0xff] }
 0x2bd   :  { %v2284_v49 = vadd.f32 %v2148_v12, %v1964_v7  ;;  %v1966_v52 = vadd.f32 %v1815_v63, %v5149_v57  ;;  %v1817_v55 = vpop.f32.mrb[107].mxu1  ;;  %v2158_v7 = vpop.permute.xlu1 %2157 }
 0x2be   :  { %2752 = vst [vmem:[%s4914_s5 + $0x140] sm:$0xff] %v2884_v30  ;;  %v2885_v23 = vpack.c.bf16 %v2283_v47, %v2282_v58  ;;  %v2285_v18 = vadd.f32 %v2148_v12, %v1965_v16  ;;  %v1967_v4 = vadd.f32 %v1817_v55, %v5150_v34  ;;  %v1564_v20 = vpop.f32.mrb[108].mxu0  ;;  %v5156_v47 = vld [vmem:[#allocation75_spill] sm:$0xff]  ;;  %v5157_v16 = vld [vmem:[#allocation73_spill] sm:$0xff] }
 0x2bf   :  { %v2286_v61 = vadd.f32 %v2148_v12, %v1966_v52  ;;  %v1968_v10 = vadd.f32 %v1564_v20, %v5151_v25  ;;  %v1566_v31 = vpop.f32.mrb[109].mxu0  ;;  %v5159_v20 = vld [vmem:[#allocation76_spill] sm:$0xff] }
 0x2c0   :  { %2753 = vst [vmem:[%s4914_s5 + $0x148] sm:$0xff] %v2885_v23  ;;  %v2886_v5 = vpack.c.bf16 %v2285_v18, %v2284_v49  ;;  %v2287_v32 = vadd.f32 %v2148_v12, %v1967_v4  ;;  %v1821_v22 = vpop.f32.mrb[108].mxu1  ;;  %v1969_v40 = vadd.f32 %v1566_v31, %v5152_v56  ;;  %v5158_v23 = vld [vmem:[#allocation80_spill] sm:$0xff]  ;;  %v5160_v56 = vld [vmem:[#allocation77_spill] sm:$0xff] }
 0x2c1   :  { %v2288_v26 = vadd.f32 %v2153_v29, %v1968_v10  ;;  %v1970_v35 = vadd.f32 %v1821_v22, %v5153_v42  ;;  %v1823_v54 = vpop.f32.mrb[109].mxu1  ;;  %v2163_v10 = vpop.permute.xlu0 %2162 }
 0x2c2   :  { %2754 = vst [vmem:[%s4914_s5 + $0x150] sm:$0xff] %v2886_v5  ;;  %v2887_v44 = vpack.c.bf16 %v2287_v32, %v2286_v61  ;;  %v2289_v46 = vadd.f32 %v2153_v29, %v1969_v40  ;;  %v1971_v59 = vadd.f32 %v1823_v54, %v5154_v11  ;;  %v1570_v27 = vpop.f32.mrb[110].mxu0  ;;  %v5161_v11 = vld [vmem:[#allocation78_spill] sm:$0xff] }
 0x2c3   :  { %v2290_v1 = vadd.f32 %v2153_v29, %v1970_v35  ;;  %v1972_v58 = vadd.f32 %v1570_v27, %v5155_v37  ;;  %v1572_v60 = vpop.f32.mrb[111].mxu0 }
 0x2c4   :  { %2755 = vst [vmem:[%s4914_s5 + $0x158] sm:$0xff] %v2887_v44  ;;  %v2888_v48 = vpack.c.bf16 %v2289_v46, %v2288_v26  ;;  %v2291_v12 = vadd.f32 %v2153_v29, %v1971_v59  ;;  %v1827_v30 = vpop.f32.mrb[110].mxu1  ;;  %v1973_v63 = vadd.f32 %v1572_v60, %v5156_v47  ;;  %v5162_v60 = vld [vmem:[#allocation82_spill] sm:$0xff] }
 0x2c5   :  { %v2292_v62 = vadd.f32 %v2158_v7, %v1972_v58  ;;  %v1974_v49 = vadd.f32 %v1827_v30, %v5157_v16  ;;  %v1829_v57 = vpop.f32.mrb[111].mxu1 }
 0x2c6   :  { %2756 = vst [vmem:[%s4914_s5 + $0x160] sm:$0xff] %v2888_v48  ;;  %v2889_v52 = vpack.c.bf16 %v2291_v12, %v2290_v1  ;;  %v2293_v55 = vadd.f32 %v2158_v7, %v1973_v63  ;;  %v1975_v18 = vadd.f32 %v1829_v57, %v5158_v23  ;;  %v1576_v34 = vpop.f32.mrb[112].mxu0  ;;  %v2168_v1 = vpop.permute.xlu1 %2167  ;;  %v5163_v12 = vld [vmem:[#allocation81_spill] sm:$0xff] }
 0x2c7   :  { %v2294_v4 = vadd.f32 %v2158_v7, %v1974_v49  ;;  %v1976_v61 = vadd.f32 %v1576_v34, %v5159_v20  ;;  %v1578_v25 = vpop.f32.mrb[113].mxu0 }
 0x2c8   :  { %2757 = vst [vmem:[%s4914_s5 + $0x168] sm:$0xff] %v2889_v52  ;;  %v2890_v31 = vpack.c.bf16 %v2293_v55, %v2292_v62  ;;  %v2295_v29 = vadd.f32 %v2158_v7, %v1975_v18  ;;  %v1833_v5 = vpop.f32.mrb[112].mxu1  ;;  %v1977_v32 = vadd.f32 %v1578_v25, %v4345_v45  ;;  %v2173_v55 = vpop.permute.xlu0 %2172 }
 0x2c9   :  { %v2296_v22 = vadd.f32 %v2163_v10, %v1976_v61  ;;  %v1978_v40 = vadd.f32 %v1833_v5, %v5160_v56  ;;  %v1835_v26 = vpop.f32.mrb[113].mxu1  ;;  %v5164_v5 = vld [vmem:[#allocation83_spill] sm:$0xff] }
 0x2ca   :  { %2758 = vst [vmem:[%s4914_s5 + $0x170] sm:$0xff] %v2890_v31  ;;  %v2891_v42 = vpack.c.bf16 %v2295_v29, %v2294_v4  ;;  %v2297_v35 = vadd.f32 %v2163_v10, %v1977_v32  ;;  %v1979_v54 = vadd.f32 %v1835_v26, %v4371_v14  ;;  %v1582_v44 = vpop.f32.mrb[114].mxu0  ;;  %v2178_v56 = vpop.permute.xlu1 %2177 }
 0x2cb   :  { %v2298_v46 = vadd.f32 %v2163_v10, %v1978_v40  ;;  %v1980_v59 = vadd.f32 %v1582_v44, %v5161_v11  ;;  %v1584_v27 = vpop.f32.mrb[115].mxu0 }
 0x2cc   :  { %2759 = vst [vmem:[%s4914_s5 + $0x178] sm:$0xff] %v2891_v42  ;;  %v2892_v45 = vpack.c.bf16 %v2297_v35, %v2296_v22  ;;  %v2299_v37 = vadd.f32 %v2163_v10, %v1979_v54  ;;  %v1839_v58 = vpop.f32.mrb[114].mxu1  ;;  %v1981_v7 = vadd.f32 %v1584_v27, %v5162_v60  ;;  %v5165_v35 = vld [vmem:[#allocation84_spill] sm:$0xff] }
 0x2cd   :  { %v2300_v48 = vadd.f32 %v2168_v1, %v1980_v59  ;;  %v1982_v30 = vadd.f32 %v1839_v58, %v5163_v12  ;;  %v1841_v47 = vpop.f32.mrb[115].mxu1 }
 0x2ce   :  { %2760 = vst [vmem:[%s4914_s5 + $0x180] sm:$0xff] %v2892_v45  ;;  %v2893_v14 = vpack.c.bf16 %v2299_v37, %v2298_v46  ;;  %v2301_v63 = vadd.f32 %v2168_v1, %v1981_v7  ;;  %v1983_v62 = vadd.f32 %v1841_v47, %v4374_v13  ;;  %v1588_v16 = vpop.f32.mrb[116].mxu0  ;;  %v2183_v37 = vpop.permute.xlu0 %2182 }
 0x2cf   :  { %v2302_v49 = vadd.f32 %v2168_v1, %v1982_v30  ;;  %v1984_v57 = vadd.f32 %v1588_v16, %v4355_v38  ;;  %v1590_v52 = vpop.f32.mrb[117].mxu0 }
 0x2d0   :  { %2761 = vst [vmem:[%s4914_s5 + $0x188] sm:$0xff] %v2893_v14  ;;  %v2894_v23 = vpack.c.bf16 %v2301_v63, %v2300_v48  ;;  %v2303_v18 = vadd.f32 %v2168_v1, %v1983_v62  ;;  %v1845_v34 = vpop.f32.mrb[116].mxu1  ;;  %v1985_v4 = vadd.f32 %v1590_v52, %v4407_v2 }
 0x2d1   :  { %v2304_v20 = vadd.f32 %v2173_v55, %v1984_v57  ;;  %v1986_v61 = vadd.f32 %v1845_v34, %v4358_v43  ;;  %v1847_v25 = vpop.f32.mrb[117].mxu1 }
 0x2d2   :  { %2762 = vst [vmem:[%s4914_s5 + $0x190] sm:$0xff] %v2894_v23  ;;  %v2895_v38 = vpack.c.bf16 %v2303_v18, %v2302_v49  ;;  %v2305_v13 = vadd.f32 %v2173_v55, %v1985_v4  ;;  %v1987_v10 = vadd.f32 %v1847_v25, %v4422_v24  ;;  %v1594_v31 = vpop.f32.mrb[118].mxu0  ;;  %v2188_v49 = vpop.permute.xlu1 %2187  ;;  %v5166_v23 = vld [vmem:[#allocation85_spill] sm:$0xff] }
 0x2d3   :  { %v2306_v29 = vadd.f32 %v2173_v55, %v1986_v61  ;;  %v1988_v32 = vadd.f32 %v1594_v31, %v5164_v5  ;;  %v1596_v22 = vpop.f32.mrb[119].mxu0 }
 0x2d4   :  { %2763 = vst [vmem:[%s4914_s5 + $0x198] sm:$0xff] %v2895_v38  ;;  %v2896_v43 = vpack.c.bf16 %v2305_v13, %v2304_v20  ;;  %v2307_v2 = vadd.f32 %v2173_v55, %v1987_v10  ;;  %v1851_v40 = vpop.f32.mrb[118].mxu1  ;;  %v1989_v26 = vadd.f32 %v1596_v22, %v4410_v39  ;;  %v2193_v13 = vpop.permute.xlu0 %2192 }
 0x2d5   :  { %v2308_v42 = vadd.f32 %v2178_v56, %v1988_v32  ;;  %v1990_v54 = vadd.f32 %v1851_v40, %v5165_v35  ;;  %v1853_v44 = vpop.f32.mrb[119].mxu1 }
 0x2d6   :  { %2764 = vst [vmem:[%s4914_s5 + $0x1a0] sm:$0xff] %v2896_v43  ;;  %v2897_v24 = vpack.c.bf16 %v2307_v2, %v2306_v29  ;;  %v2309_v46 = vadd.f32 %v2178_v56, %v1989_v26  ;;  %v1991_v11 = vadd.f32 %v1853_v44, %v4425_v8  ;;  %v1600_v59 = vpop.f32.mrb[120].mxu0 }
 0x2d7   :  { %v2310_v27 = vadd.f32 %v2178_v56, %v1990_v54  ;;  %v1992_v1 = vadd.f32 %v1600_v59, %v4401_v28  ;;  %v1602_v45 = vpop.f32.mrb[121].mxu0 }
 0x2d8   :  { %2765 = vst [vmem:[%s4914_s5 + $0x1a8] sm:$0xff] %v2897_v24  ;;  %v2898_v39 = vpack.c.bf16 %v2309_v46, %v2308_v42  ;;  %v2311_v58 = vadd.f32 %v2178_v56, %v1991_v11  ;;  %v1857_v60 = vpop.f32.mrb[120].mxu1  ;;  %v1993_v7 = vadd.f32 %v1602_v45, %v4445_v17  ;;  %v2198_v42 = vpop.permute.xlu1 %2197 }
 0x2d9   :  { %v2312_v48 = vadd.f32 %v2183_v37, %v1992_v1  ;;  %v1994_v12 = vadd.f32 %v1857_v60, %v4412_v9  ;;  %v1859_v30 = vpop.f32.mrb[121].mxu1 }
 0x2da   :  { %2766 = vst [vmem:[%s4914_s5 + $0x1b0] sm:$0xff] %v2898_v39  ;;  %v2899_v28 = vpack.c.bf16 %v2311_v58, %v2310_v27  ;;  %v2313_v8 = vadd.f32 %v2183_v37, %v1993_v7  ;;  %v1995_v47 = vadd.f32 %v1859_v30, %v4458_v50  ;;  %v1606_v14 = vpop.f32.mrb[122].mxu0 }
 0x2db   :  { %v2314_v63 = vadd.f32 %v2183_v37, %v1994_v12  ;;  %v1996_v62 = vadd.f32 %v1606_v14, %v4417_v15  ;;  %v1608_v16 = vpop.f32.mrb[123].mxu0 }
 0x2dc   :  { %2767 = vst [vmem:[%s4914_s5 + $0x1b8] sm:$0xff] %v2899_v28  ;;  %v2900_v9 = vpack.c.bf16 %v2313_v8, %v2312_v48  ;;  %v2315_v17 = vadd.f32 %v2183_v37, %v1995_v47  ;;  %v1863_v57 = vpop.f32.mrb[122].mxu1  ;;  %v1997_v52 = vadd.f32 %v1608_v16, %v4448_v36 }
 0x2dd   :  { %v2316_v55 = vadd.f32 %v2188_v49, %v1996_v62  ;;  %v1998_v18 = vadd.f32 %v1863_v57, %v5166_v23  ;;  %v1865_v34 = vpop.f32.mrb[123].mxu1 }
 0x2de   :  { %2768 = vst [vmem:[%s4914_s5 + $0x1c0] sm:$0xff] %v2900_v9  ;;  %v2901_v15 = vpack.c.bf16 %v2315_v17, %v2314_v63  ;;  %v2317_v50 = vadd.f32 %v2188_v49, %v1997_v52  ;;  %v1999_v4 = vadd.f32 %v1865_v34, %v4461_v33  ;;  %v1612_v20 = vpop.f32.mrb[124].mxu0 }
 0x2df   :  { %v2318_v61 = vadd.f32 %v2188_v49, %v1998_v18  ;;  %v2000_v25 = vadd.f32 %v1612_v20, %v4482_v0  ;;  %v1614_v38 = vpop.f32.mrb[125].mxu0 }
 0x2e0   :  { %2769 = vst [vmem:[%s4914_s5 + $0x1c8] sm:$0xff] %v2901_v15  ;;  %v2902_v36 = vpack.c.bf16 %v2317_v50, %v2316_v55  ;;  %v2319_v10 = vadd.f32 %v2188_v49, %v1999_v4  ;;  %v1869_v31 = vpop.f32.mrb[124].mxu1  ;;  %v2001_v29 = vadd.f32 %v1614_v38, %v4469_v19 }
 0x2e1   :  { %v2320_v5 = vadd.f32 %v2193_v13, %v2000_v25  ;;  %v2002_v32 = vadd.f32 %v1869_v31, %v4495_v41  ;;  %v1871_v22 = vpop.f32.mrb[125].mxu1 }
 0x2e2   :  { %2770 = vst [vmem:[%s4914_s5 + $0x1d0] sm:$0xff] %v2902_v36  ;;  %v2903_v33 = vpack.c.bf16 %v2319_v10, %v2318_v61  ;;  %v2321_v0 = vadd.f32 %v2193_v13, %v2001_v29  ;;  %v2003_v56 = vadd.f32 %v1871_v22, %v4477_v6  ;;  %v1618_v43 = vpop.f32.mrb[126].mxu0 }
 0x2e3   :  { %v2322_v2 = vadd.f32 %v2193_v13, %v2002_v32  ;;  %v2004_v40 = vadd.f32 %v1618_v43, %v4464_v53  ;;  %v1620_v26 = vpop.f32.mrb[127].mxu0 }
 0x2e4   :  { %2771 = vst [vmem:[%s4914_s5 + $0x1d8] sm:$0xff] %v2903_v33  ;;  %v2904_v19 = vpack.c.bf16 %v2321_v0, %v2320_v5  ;;  %v2323_v41 = vadd.f32 %v2193_v13, %v2003_v56  ;;  %v1875_v35 = vpop.f32.mrb[126].mxu1  ;;  %v2005_v54 = vadd.f32 %v1620_v26, %v4472_v3 }
 0x2e5   :  { %v2324_v44 = vadd.f32 %v2198_v42, %v2004_v40  ;;  %v2006_v24 = vadd.f32 %v1875_v35, %v4485_v21  ;;  %v1877_v46 = vpop.f32.mrb[127].mxu1 }
 0x2e6   :  { %2772 = vst [vmem:[%s4914_s5 + $0x1e0] sm:$0xff] %v2904_v19  ;;  %v2905_v53 = vpack.c.bf16 %v2323_v41, %v2322_v2  ;;  %v2325_v6 = vadd.f32 %v2198_v42, %v2005_v54  ;;  %v2007_v11 = vadd.f32 %v1877_v46, %v4479_v51 }
 0x2e7   :  { %v2326_v59 = vadd.f32 %v2198_v42, %v2006_v24 }
 0x2e8   :  { %2773 = vst [vmem:[%s4914_s5 + $0x1e8] sm:$0xff] %v2905_v53  ;;  %v2906_v27 = vpack.c.bf16 %v2325_v6, %v2324_v44  ;;  %v2327_v1 = vadd.f32 %v2198_v42, %v2007_v11 }
 0x2ea   :  { %2774 = vst [vmem:[%s4914_s5 + $0x1f0] sm:$0xff] %v2906_v27  ;;  %v2907_v3 = vpack.c.bf16 %v2327_v1, %v2326_v59 }
 0x2ec   :  { %2775 = vst [vmem:[%s4914_s5 + $0x1f8] sm:$0xff] %v2907_v3 }

// kernel: forward.15
= control target key start
LH: loop header
LB: loop body
LE: loop exit
PB: predicated region body
PF: predicated region fallthrough
CT: control target
= control target key end

     0   :  { %s2924_s12 = smov 0   ;;  %s2926_s13 = smov 0   ;;  %s3572_s0 = inlined_call_operand.vmem [shape: bf16[576,2048], index: 0, kind: input, shape index: {}]   ;;  %s3573_s1 = inlined_call_operand.vmem [shape: bf16[64,576], index: 1, kind: input, shape index: {}]   ;;  %s3574_s2 = inlined_call_operand.vmem [shape: f32[64,1], index: 2, kind: input, shape index: {}]   ;;  %s3575_s3 = inlined_call_operand.vmem [shape: bf16[64,2048], index: 3, kind: output, shape index: {}]  }
   0x1   :  { %s2928_s14 = smov 0  }
   0x2 LB: > { %s2041_s15 = sadd.s32 4294967295, %s2900_s14   ;;  %s2941_s16 = sadd.s32 1, %s2900_s14   ;;  %s2900_s14 = sphi %s2928_s14, %s3579_s14   ;;  %s2896_s13 = sphi %s2926_s13, %s3578_s13   ;;  %s2892_s12 = sphi %s2924_s12, %s3577_s12  }
   0x3   : > { %s17_s17 = ssub.s32 %s2900_s14, %s2941_s16  ;;  %s20_s18 = sadd.s32 1, %s2896_s13 }
   0x4   : > { %p18_p0 = scmp.eq.s32.totalorder %s17_s17, 0  ;;  %p27_p1 = scmp.ne.s32.totalorder %s2896_s13, %s2892_s12 }
   0x5   : > { %p28_p2 = scmp.eq.s32.totalorder %s2900_s14, 0  ;;  %p99_p3 = scmp.eq.s32.totalorder %s2041_s15, 3 }
   0x6   : > { %s2952_s19 = scalar_select %p18_p0, %s2896_s13, %s20_s18  }
   0x7   : > { %p29_p4 = por %p28_p2, %p27_p1  ;;  %p2954_p5 = por %p99_p3, %p27_p1 }
   0x8   : > { %p2044_p6 = scmp.ge.s32.totalorder %s2900_s14, 4 }
   0xa   : > { %127 = sbr.rel (%p2044_p6) target bundleno = 93 (0x5d), region = 24 }
  0x11   : > { %130 = sbr.rel (!%p29_p4) target bundleno = 93 (0x5d), region = 28  ;;  %s132_s21 = sand.u32 (%p29_p4), 1, %s2896_s13  }
  0x12   : > { %s2086_s22 = sshll.u32 (%p29_p4), %s2900_s14, 4  ;;  %s2632_s23 = smul.u32 (%p29_p4), 1152, %s132_s21 }
  0x13   : > { %s2964_s26 = scalar_lea.vmem (%p29_p4), %s3572_s0, %s2086_s22 }
  0x14   : > { %v150_v0 = vld [vmem:[%s2964_s26] sm:$0xff] (%p29_p4)  ;;  %v152_v1 = vld [vmem:[%s2964_s26 + $0x8] sm:$0xff] (%p29_p4)  ;;  %s2972_s27 = scalar_lea.vmem (%p29_p4), [#allocation2], %s2632_s23 }
  0x15   : > { %v154_v2 = vld [vmem:[%s2964_s26 + $0x40] sm:$0xff] (%p29_p4)  ;;  %v156_v3 = vld [vmem:[%s2964_s26 + $0x48] sm:$0xff] (%p29_p4)  ;;  %151 = vst [vmem:[%s2972_s27] sm:$0xff] (%p29_p4), %v150_v0  ;;  %153 = vst [vmem:[%s2972_s27 + $0x8] sm:$0xff] (%p29_p4), %v152_v1 }
  0x16   : > { %v158_v4 = vld [vmem:[%s2964_s26 + $0x80] sm:$0xff] (%p29_p4)  ;;  %v160_v5 = vld [vmem:[%s2964_s26 + $0x88] sm:$0xff] (%p29_p4)  ;;  %155 = vst [vmem:[%s2972_s27 + $0x10] sm:$0xff] (%p29_p4), %v154_v2  ;;  %157 = vst [vmem:[%s2972_s27 + $0x18] sm:$0xff] (%p29_p4), %v156_v3 }
  0x17   : > { %159 = vst [vmem:[%s2972_s27 + $0x20] sm:$0xff] (%p29_p4), %v158_v4  ;;  %161 = vst [vmem:[%s2972_s27 + $0x28] sm:$0xff] (%p29_p4), %v160_v5  ;;  %v162_v6 = vld [vmem:[%s2964_s26 + $0xc0] sm:$0xff] (%p29_p4)  ;;  %v164_v7 = vld [vmem:[%s2964_s26 + $0xc8] sm:$0xff] (%p29_p4) }
  0x18   : > { %v166_v8 = vld [vmem:[%s2964_s26 + $0x100] sm:$0xff]  ;;  %163 = vst [vmem:[%s2972_s27 + $0x30] sm:$0xff] %v162_v6  ;;  %165 = vst [vmem:[%s2972_s27 + $0x38] sm:$0xff] %v164_v7  ;;  %v168_v9 = vld [vmem:[%s2964_s26 + $0x108] sm:$0xff] }
  0x19   : > { %167 = vst [vmem:[%s2972_s27 + $0x40] sm:$0xff] %v166_v8  ;;  %v170_v10 = vld [vmem:[%s2964_s26 + $0x140] sm:$0xff]  ;;  %v172_v11 = vld [vmem:[%s2964_s26 + $0x148] sm:$0xff]  ;;  %169 = vst [vmem:[%s2972_s27 + $0x48] sm:$0xff] %v168_v9 }
  0x1a   : > { %171 = vst [vmem:[%s2972_s27 + $0x50] sm:$0xff] %v170_v10  ;;  %173 = vst [vmem:[%s2972_s27 + $0x58] sm:$0xff] %v172_v11  ;;  %v174_v12 = vld [vmem:[%s2964_s26 + $0x180] sm:$0xff]  ;;  %v176_v13 = vld [vmem:[%s2964_s26 + $0x188] sm:$0xff] }
  0x1b   : > { %v178_v14 = vld [vmem:[%s2964_s26 + $0x1c0] sm:$0xff]  ;;  %175 = vst [vmem:[%s2972_s27 + $0x60] sm:$0xff] %v174_v12  ;;  %177 = vst [vmem:[%s2972_s27 + $0x68] sm:$0xff] %v176_v13  ;;  %v180_v15 = vld [vmem:[%s2964_s26 + $0x1c8] sm:$0xff] }
  0x1c   : > { %179 = vst [vmem:[%s2972_s27 + $0x70] sm:$0xff] %v178_v14  ;;  %v182_v16 = vld [vmem:[%s2964_s26 + $0x200] sm:$0xff]  ;;  %v184_v17 = vld [vmem:[%s2964_s26 + $0x208] sm:$0xff]  ;;  %181 = vst [vmem:[%s2972_s27 + $0x78] sm:$0xff] %v180_v15 }
  0x1d   : > { %183 = vst [vmem:[%s2972_s27 + $0x80] sm:$0xff] %v182_v16  ;;  %185 = vst [vmem:[%s2972_s27 + $0x88] sm:$0xff] %v184_v17  ;;  %v186_v18 = vld [vmem:[%s2964_s26 + $0x240] sm:$0xff]  ;;  %v188_v19 = vld [vmem:[%s2964_s26 + $0x248] sm:$0xff] }
  0x1e   : > { %v190_v20 = vld [vmem:[%s2964_s26 + $0x280] sm:$0xff]  ;;  %187 = vst [vmem:[%s2972_s27 + $0x90] sm:$0xff] %v186_v18  ;;  %189 = vst [vmem:[%s2972_s27 + $0x98] sm:$0xff] %v188_v19  ;;  %v192_v21 = vld [vmem:[%s2964_s26 + $0x288] sm:$0xff] }
  0x1f   : > { %191 = vst [vmem:[%s2972_s27 + $0xa0] sm:$0xff] %v190_v20  ;;  %v194_v22 = vld [vmem:[%s2964_s26 + $0x2c0] sm:$0xff]  ;;  %v196_v23 = vld [vmem:[%s2964_s26 + $0x2c8] sm:$0xff]  ;;  %193 = vst [vmem:[%s2972_s27 + $0xa8] sm:$0xff] %v192_v21 }
  0x20   : > { %195 = vst [vmem:[%s2972_s27 + $0xb0] sm:$0xff] %v194_v22  ;;  %197 = vst [vmem:[%s2972_s27 + $0xb8] sm:$0xff] %v196_v23  ;;  %v198_v24 = vld [vmem:[%s2964_s26 + $0x300] sm:$0xff]  ;;  %v200_v25 = vld [vmem:[%s2964_s26 + $0x308] sm:$0xff] }
  0x21   : > { %v202_v26 = vld [vmem:[%s2964_s26 + $0x340] sm:$0xff]  ;;  %199 = vst [vmem:[%s2972_s27 + $0xc0] sm:$0xff] %v198_v24  ;;  %201 = vst [vmem:[%s2972_s27 + $0xc8] sm:$0xff] %v200_v25  ;;  %v204_v27 = vld [vmem:[%s2964_s26 + $0x348] sm:$0xff] }
  0x22   : > { %203 = vst [vmem:[%s2972_s27 + $0xd0] sm:$0xff] %v202_v26  ;;  %v206_v28 = vld [vmem:[%s2964_s26 + $0x380] sm:$0xff]  ;;  %v208_v29 = vld [vmem:[%s2964_s26 + $0x388] sm:$0xff]  ;;  %205 = vst [vmem:[%s2972_s27 + $0xd8] sm:$0xff] %v204_v27 }
  0x23   : > { %207 = vst [vmem:[%s2972_s27 + $0xe0] sm:$0xff] %v206_v28  ;;  %209 = vst [vmem:[%s2972_s27 + $0xe8] sm:$0xff] %v208_v29  ;;  %v210_v30 = vld [vmem:[%s2964_s26 + $0x3c0] sm:$0xff]  ;;  %v212_v31 = vld [vmem:[%s2964_s26 + $0x3c8] sm:$0xff] }
  0x24   : > { %v214_v32 = vld [vmem:[%s2964_s26 + $0x400] sm:$0xff]  ;;  %211 = vst [vmem:[%s2972_s27 + $0xf0] sm:$0xff] %v210_v30  ;;  %213 = vst [vmem:[%s2972_s27 + $0xf8] sm:$0xff] %v212_v31  ;;  %v216_v33 = vld [vmem:[%s2964_s26 + $0x408] sm:$0xff] }
  0x25   : > { %215 = vst [vmem:[%s2972_s27 + $0x100] sm:$0xff] %v214_v32  ;;  %v218_v34 = vld [vmem:[%s2964_s26 + $0x440] sm:$0xff]  ;;  %v220_v35 = vld [vmem:[%s2964_s26 + $0x448] sm:$0xff]  ;;  %217 = vst [vmem:[%s2972_s27 + $0x108] sm:$0xff] %v216_v33 }
  0x26   : > { %219 = vst [vmem:[%s2972_s27 + $0x110] sm:$0xff] %v218_v34  ;;  %221 = vst [vmem:[%s2972_s27 + $0x118] sm:$0xff] %v220_v35  ;;  %v222_v36 = vld [vmem:[%s2964_s26 + $0x480] sm:$0xff]  ;;  %v224_v37 = vld [vmem:[%s2964_s26 + $0x488] sm:$0xff] }
  0x27   : > { %v226_v38 = vld [vmem:[%s2964_s26 + $0x4c0] sm:$0xff]  ;;  %223 = vst [vmem:[%s2972_s27 + $0x120] sm:$0xff] %v222_v36  ;;  %225 = vst [vmem:[%s2972_s27 + $0x128] sm:$0xff] %v224_v37  ;;  %v228_v39 = vld [vmem:[%s2964_s26 + $0x4c8] sm:$0xff] }
  0x28   : > { %227 = vst [vmem:[%s2972_s27 + $0x130] sm:$0xff] %v226_v38  ;;  %v230_v40 = vld [vmem:[%s2964_s26 + $0x500] sm:$0xff]  ;;  %v232_v41 = vld [vmem:[%s2964_s26 + $0x508] sm:$0xff]  ;;  %229 = vst [vmem:[%s2972_s27 + $0x138] sm:$0xff] %v228_v39 }
  0x29   : > { %231 = vst [vmem:[%s2972_s27 + $0x140] sm:$0xff] %v230_v40  ;;  %233 = vst [vmem:[%s2972_s27 + $0x148] sm:$0xff] %v232_v41  ;;  %v234_v42 = vld [vmem:[%s2964_s26 + $0x540] sm:$0xff]  ;;  %v236_v43 = vld [vmem:[%s2964_s26 + $0x548] sm:$0xff] }
  0x2a   : > { %v238_v44 = vld [vmem:[%s2964_s26 + $0x580] sm:$0xff]  ;;  %235 = vst [vmem:[%s2972_s27 + $0x150] sm:$0xff] %v234_v42  ;;  %237 = vst [vmem:[%s2972_s27 + $0x158] sm:$0xff] %v236_v43  ;;  %v240_v45 = vld [vmem:[%s2964_s26 + $0x588] sm:$0xff] }
  0x2b   : > { %239 = vst [vmem:[%s2972_s27 + $0x160] sm:$0xff] %v238_v44  ;;  %v242_v46 = vld [vmem:[%s2964_s26 + $0x5c0] sm:$0xff]  ;;  %v244_v47 = vld [vmem:[%s2964_s26 + $0x5c8] sm:$0xff]  ;;  %241 = vst [vmem:[%s2972_s27 + $0x168] sm:$0xff] %v240_v45 }
  0x2c   : > { %243 = vst [vmem:[%s2972_s27 + $0x170] sm:$0xff] %v242_v46  ;;  %245 = vst [vmem:[%s2972_s27 + $0x178] sm:$0xff] %v244_v47  ;;  %v246_v48 = vld [vmem:[%s2964_s26 + $0x600] sm:$0xff]  ;;  %v248_v49 = vld [vmem:[%s2964_s26 + $0x608] sm:$0xff] }
  0x2d   : > { %v250_v50 = vld [vmem:[%s2964_s26 + $0x640] sm:$0xff]  ;;  %247 = vst [vmem:[%s2972_s27 + $0x180] sm:$0xff] %v246_v48  ;;  %249 = vst [vmem:[%s2972_s27 + $0x188] sm:$0xff] %v248_v49  ;;  %v252_v51 = vld [vmem:[%s2964_s26 + $0x648] sm:$0xff] }
  0x2e   : > { %251 = vst [vmem:[%s2972_s27 + $0x190] sm:$0xff] %v250_v50  ;;  %v254_v52 = vld [vmem:[%s2964_s26 + $0x680] sm:$0xff]  ;;  %v256_v53 = vld [vmem:[%s2964_s26 + $0x688] sm:$0xff]  ;;  %253 = vst [vmem:[%s2972_s27 + $0x198] sm:$0xff] %v252_v51 }
  0x2f   : > { %255 = vst [vmem:[%s2972_s27 + $0x1a0] sm:$0xff] %v254_v52  ;;  %257 = vst [vmem:[%s2972_s27 + $0x1a8] sm:$0xff] %v256_v53  ;;  %v258_v54 = vld [vmem:[%s2964_s26 + $0x6c0] sm:$0xff]  ;;  %v260_v55 = vld [vmem:[%s2964_s26 + $0x6c8] sm:$0xff] }
  0x30   : > { %v262_v56 = vld [vmem:[%s2964_s26 + $0x700] sm:$0xff]  ;;  %259 = vst [vmem:[%s2972_s27 + $0x1b0] sm:$0xff] %v258_v54  ;;  %261 = vst [vmem:[%s2972_s27 + $0x1b8] sm:$0xff] %v260_v55  ;;  %v264_v57 = vld [vmem:[%s2964_s26 + $0x708] sm:$0xff] }
  0x31   : > { %263 = vst [vmem:[%s2972_s27 + $0x1c0] sm:$0xff] %v262_v56  ;;  %v266_v58 = vld [vmem:[%s2964_s26 + $0x740] sm:$0xff]  ;;  %v268_v59 = vld [vmem:[%s2964_s26 + $0x748] sm:$0xff]  ;;  %265 = vst [vmem:[%s2972_s27 + $0x1c8] sm:$0xff] %v264_v57 }
  0x32   : > { %267 = vst [vmem:[%s2972_s27 + $0x1d0] sm:$0xff] %v266_v58  ;;  %269 = vst [vmem:[%s2972_s27 + $0x1d8] sm:$0xff] %v268_v59  ;;  %v270_v60 = vld [vmem:[%s2964_s26 + $0x780] sm:$0xff]  ;;  %v272_v61 = vld [vmem:[%s2964_s26 + $0x788] sm:$0xff] }
  0x33   : > { %v274_v62 = vld [vmem:[%s2964_s26 + $0x7c0] sm:$0xff]  ;;  %271 = vst [vmem:[%s2972_s27 + $0x1e0] sm:$0xff] %v270_v60  ;;  %273 = vst [vmem:[%s2972_s27 + $0x1e8] sm:$0xff] %v272_v61  ;;  %v276_v63 = vld [vmem:[%s2964_s26 + $0x7c8] sm:$0xff] }
  0x34   : > { %275 = vst [vmem:[%s2972_s27 + $0x1f0] sm:$0xff] %v274_v62  ;;  %v278_v0 = vld [vmem:[%s2964_s26 + $0x800] sm:$0xff]  ;;  %v280_v1 = vld [vmem:[%s2964_s26 + $0x808] sm:$0xff]  ;;  %277 = vst [vmem:[%s2972_s27 + $0x1f8] sm:$0xff] %v276_v63 }
  0x35   : > { %279 = vst [vmem:[%s2972_s27 + $0x200] sm:$0xff] %v278_v0  ;;  %281 = vst [vmem:[%s2972_s27 + $0x208] sm:$0xff] %v280_v1  ;;  %v282_v2 = vld [vmem:[%s2964_s26 + $0x840] sm:$0xff]  ;;  %v284_v3 = vld [vmem:[%s2964_s26 + $0x848] sm:$0xff] }
  0x36   : > { %v286_v4 = vld [vmem:[%s2964_s26 + $0x880] sm:$0xff]  ;;  %283 = vst [vmem:[%s2972_s27 + $0x210] sm:$0xff] %v282_v2  ;;  %285 = vst [vmem:[%s2972_s27 + $0x218] sm:$0xff] %v284_v3  ;;  %v288_v5 = vld [vmem:[%s2964_s26 + $0x888] sm:$0xff] }
  0x37   : > { %287 = vst [vmem:[%s2972_s27 + $0x220] sm:$0xff] %v286_v4  ;;  %v290_v6 = vld [vmem:[%s2964_s26 + $0x8c0] sm:$0xff]  ;;  %v292_v7 = vld [vmem:[%s2964_s26 + $0x8c8] sm:$0xff]  ;;  %289 = vst [vmem:[%s2972_s27 + $0x228] sm:$0xff] %v288_v5 }
  0x38   : > { %291 = vst [vmem:[%s2972_s27 + $0x230] sm:$0xff] %v290_v6  ;;  %293 = vst [vmem:[%s2972_s27 + $0x238] sm:$0xff] %v292_v7  ;;  %v294_v8 = vld [vmem:[%s2964_s26 + $0x900] sm:$0xff]  ;;  %v296_v9 = vld [vmem:[%s2964_s26 + $0x908] sm:$0xff] }
  0x39   : > { %v298_v10 = vld [vmem:[%s2964_s26 + $0x940] sm:$0xff]  ;;  %295 = vst [vmem:[%s2972_s27 + $0x240] sm:$0xff] %v294_v8  ;;  %297 = vst [vmem:[%s2972_s27 + $0x248] sm:$0xff] %v296_v9  ;;  %v300_v11 = vld [vmem:[%s2964_s26 + $0x948] sm:$0xff] }
  0x3a   : > { %299 = vst [vmem:[%s2972_s27 + $0x250] sm:$0xff] %v298_v10  ;;  %v302_v12 = vld [vmem:[%s2964_s26 + $0x980] sm:$0xff]  ;;  %v304_v13 = vld [vmem:[%s2964_s26 + $0x988] sm:$0xff]  ;;  %301 = vst [vmem:[%s2972_s27 + $0x258] sm:$0xff] %v300_v11 }
  0x3b   : > { %303 = vst [vmem:[%s2972_s27 + $0x260] sm:$0xff] %v302_v12  ;;  %305 = vst [vmem:[%s2972_s27 + $0x268] sm:$0xff] %v304_v13  ;;  %v306_v14 = vld [vmem:[%s2964_s26 + $0x9c0] sm:$0xff]  ;;  %v308_v15 = vld [vmem:[%s2964_s26 + $0x9c8] sm:$0xff] }
  0x3c   : > { %v310_v16 = vld [vmem:[%s2964_s26 + $0xa00] sm:$0xff]  ;;  %307 = vst [vmem:[%s2972_s27 + $0x270] sm:$0xff] %v306_v14  ;;  %309 = vst [vmem:[%s2972_s27 + $0x278] sm:$0xff] %v308_v15  ;;  %v312_v17 = vld [vmem:[%s2964_s26 + $0xa08] sm:$0xff] }
  0x3d   : > { %311 = vst [vmem:[%s2972_s27 + $0x280] sm:$0xff] %v310_v16  ;;  %v314_v18 = vld [vmem:[%s2964_s26 + $0xa40] sm:$0xff]  ;;  %v316_v19 = vld [vmem:[%s2964_s26 + $0xa48] sm:$0xff]  ;;  %313 = vst [vmem:[%s2972_s27 + $0x288] sm:$0xff] %v312_v17 }
  0x3e   : > { %315 = vst [vmem:[%s2972_s27 + $0x290] sm:$0xff] %v314_v18  ;;  %317 = vst [vmem:[%s2972_s27 + $0x298] sm:$0xff] %v316_v19  ;;  %v318_v20 = vld [vmem:[%s2964_s26 + $0xa80] sm:$0xff]  ;;  %v320_v21 = vld [vmem:[%s2964_s26 + $0xa88] sm:$0xff] }
  0x3f   : > { %v322_v22 = vld [vmem:[%s2964_s26 + $0xac0] sm:$0xff]  ;;  %319 = vst [vmem:[%s2972_s27 + $0x2a0] sm:$0xff] %v318_v20  ;;  %321 = vst [vmem:[%s2972_s27 + $0x2a8] sm:$0xff] %v320_v21  ;;  %v324_v23 = vld [vmem:[%s2964_s26 + $0xac8] sm:$0xff] }
  0x40   : > { %323 = vst [vmem:[%s2972_s27 + $0x2b0] sm:$0xff] %v322_v22  ;;  %v326_v24 = vld [vmem:[%s2964_s26 + $0xb00] sm:$0xff]  ;;  %v328_v25 = vld [vmem:[%s2964_s26 + $0xb08] sm:$0xff]  ;;  %325 = vst [vmem:[%s2972_s27 + $0x2b8] sm:$0xff] %v324_v23 }
  0x41   : > { %327 = vst [vmem:[%s2972_s27 + $0x2c0] sm:$0xff] %v326_v24  ;;  %329 = vst [vmem:[%s2972_s27 + $0x2c8] sm:$0xff] %v328_v25  ;;  %v330_v26 = vld [vmem:[%s2964_s26 + $0xb40] sm:$0xff]  ;;  %v332_v27 = vld [vmem:[%s2964_s26 + $0xb48] sm:$0xff] }
  0x42   : > { %v334_v28 = vld [vmem:[%s2964_s26 + $0xb80] sm:$0xff]  ;;  %331 = vst [vmem:[%s2972_s27 + $0x2d0] sm:$0xff] %v330_v26  ;;  %333 = vst [vmem:[%s2972_s27 + $0x2d8] sm:$0xff] %v332_v27  ;;  %v336_v29 = vld [vmem:[%s2964_s26 + $0xb88] sm:$0xff] }
  0x43   : > { %335 = vst [vmem:[%s2972_s27 + $0x2e0] sm:$0xff] %v334_v28  ;;  %v338_v30 = vld [vmem:[%s2964_s26 + $0xbc0] sm:$0xff]  ;;  %v340_v31 = vld [vmem:[%s2964_s26 + $0xbc8] sm:$0xff]  ;;  %337 = vst [vmem:[%s2972_s27 + $0x2e8] sm:$0xff] %v336_v29 }
  0x44   : > { %339 = vst [vmem:[%s2972_s27 + $0x2f0] sm:$0xff] %v338_v30  ;;  %341 = vst [vmem:[%s2972_s27 + $0x2f8] sm:$0xff] %v340_v31  ;;  %v342_v32 = vld [vmem:[%s2964_s26 + $0xc00] sm:$0xff]  ;;  %v344_v33 = vld [vmem:[%s2964_s26 + $0xc08] sm:$0xff] }
  0x45   : > { %v346_v34 = vld [vmem:[%s2964_s26 + $0xc40] sm:$0xff]  ;;  %343 = vst [vmem:[%s2972_s27 + $0x300] sm:$0xff] %v342_v32  ;;  %345 = vst [vmem:[%s2972_s27 + $0x308] sm:$0xff] %v344_v33  ;;  %v348_v35 = vld [vmem:[%s2964_s26 + $0xc48] sm:$0xff] }
  0x46   : > { %347 = vst [vmem:[%s2972_s27 + $0x310] sm:$0xff] %v346_v34  ;;  %v350_v36 = vld [vmem:[%s2964_s26 + $0xc80] sm:$0xff]  ;;  %v352_v37 = vld [vmem:[%s2964_s26 + $0xc88] sm:$0xff]  ;;  %349 = vst [vmem:[%s2972_s27 + $0x318] sm:$0xff] %v348_v35 }
  0x47   : > { %351 = vst [vmem:[%s2972_s27 + $0x320] sm:$0xff] %v350_v36  ;;  %353 = vst [vmem:[%s2972_s27 + $0x328] sm:$0xff] %v352_v37  ;;  %v354_v38 = vld [vmem:[%s2964_s26 + $0xcc0] sm:$0xff]  ;;  %v356_v39 = vld [vmem:[%s2964_s26 + $0xcc8] sm:$0xff] }
  0x48   : > { %v358_v40 = vld [vmem:[%s2964_s26 + $0xd00] sm:$0xff]  ;;  %355 = vst [vmem:[%s2972_s27 + $0x330] sm:$0xff] %v354_v38  ;;  %357 = vst [vmem:[%s2972_s27 + $0x338] sm:$0xff] %v356_v39  ;;  %v360_v41 = vld [vmem:[%s2964_s26 + $0xd08] sm:$0xff] }
  0x49   : > { %359 = vst [vmem:[%s2972_s27 + $0x340] sm:$0xff] %v358_v40  ;;  %v362_v42 = vld [vmem:[%s2964_s26 + $0xd40] sm:$0xff]  ;;  %v364_v43 = vld [vmem:[%s2964_s26 + $0xd48] sm:$0xff]  ;;  %361 = vst [vmem:[%s2972_s27 + $0x348] sm:$0xff] %v360_v41 }
  0x4a   : > { %363 = vst [vmem:[%s2972_s27 + $0x350] sm:$0xff] %v362_v42  ;;  %365 = vst [vmem:[%s2972_s27 + $0x358] sm:$0xff] %v364_v43  ;;  %v366_v44 = vld [vmem:[%s2964_s26 + $0xd80] sm:$0xff]  ;;  %v368_v45 = vld [vmem:[%s2964_s26 + $0xd88] sm:$0xff] }
  0x4b   : > { %v370_v46 = vld [vmem:[%s2964_s26 + $0xdc0] sm:$0xff]  ;;  %367 = vst [vmem:[%s2972_s27 + $0x360] sm:$0xff] %v366_v44  ;;  %369 = vst [vmem:[%s2972_s27 + $0x368] sm:$0xff] %v368_v45  ;;  %v372_v47 = vld [vmem:[%s2964_s26 + $0xdc8] sm:$0xff] }
  0x4c   : > { %371 = vst [vmem:[%s2972_s27 + $0x370] sm:$0xff] %v370_v46  ;;  %v374_v48 = vld [vmem:[%s2964_s26 + $0xe00] sm:$0xff]  ;;  %v376_v49 = vld [vmem:[%s2964_s26 + $0xe08] sm:$0xff]  ;;  %373 = vst [vmem:[%s2972_s27 + $0x378] sm:$0xff] %v372_v47 }
  0x4d   : > { %375 = vst [vmem:[%s2972_s27 + $0x380] sm:$0xff] %v374_v48  ;;  %377 = vst [vmem:[%s2972_s27 + $0x388] sm:$0xff] %v376_v49  ;;  %v378_v50 = vld [vmem:[%s2964_s26 + $0xe40] sm:$0xff]  ;;  %v380_v51 = vld [vmem:[%s2964_s26 + $0xe48] sm:$0xff] }
  0x4e   : > { %v382_v52 = vld [vmem:[%s2964_s26 + $0xe80] sm:$0xff]  ;;  %379 = vst [vmem:[%s2972_s27 + $0x390] sm:$0xff] %v378_v50  ;;  %381 = vst [vmem:[%s2972_s27 + $0x398] sm:$0xff] %v380_v51  ;;  %v384_v53 = vld [vmem:[%s2964_s26 + $0xe88] sm:$0xff] }
  0x4f   : > { %383 = vst [vmem:[%s2972_s27 + $0x3a0] sm:$0xff] %v382_v52  ;;  %v386_v54 = vld [vmem:[%s2964_s26 + $0xec0] sm:$0xff]  ;;  %v388_v55 = vld [vmem:[%s2964_s26 + $0xec8] sm:$0xff]  ;;  %385 = vst [vmem:[%s2972_s27 + $0x3a8] sm:$0xff] %v384_v53 }
  0x50   : > { %387 = vst [vmem:[%s2972_s27 + $0x3b0] sm:$0xff] %v386_v54  ;;  %389 = vst [vmem:[%s2972_s27 + $0x3b8] sm:$0xff] %v388_v55  ;;  %v390_v56 = vld [vmem:[%s2964_s26 + $0xf00] sm:$0xff]  ;;  %v392_v57 = vld [vmem:[%s2964_s26 + $0xf08] sm:$0xff] }
  0x51   : > { %v394_v58 = vld [vmem:[%s2964_s26 + $0xf40] sm:$0xff]  ;;  %391 = vst [vmem:[%s2972_s27 + $0x3c0] sm:$0xff] %v390_v56  ;;  %393 = vst [vmem:[%s2972_s27 + $0x3c8] sm:$0xff] %v392_v57  ;;  %v396_v59 = vld [vmem:[%s2964_s26 + $0xf48] sm:$0xff] }
  0x52   : > { %395 = vst [vmem:[%s2972_s27 + $0x3d0] sm:$0xff] %v394_v58  ;;  %v398_v60 = vld [vmem:[%s2964_s26 + $0xf80] sm:$0xff]  ;;  %v400_v61 = vld [vmem:[%s2964_s26 + $0xf88] sm:$0xff]  ;;  %397 = vst [vmem:[%s2972_s27 + $0x3d8] sm:$0xff] %v396_v59 }
  0x53   : > { %399 = vst [vmem:[%s2972_s27 + $0x3e0] sm:$0xff] %v398_v60  ;;  %401 = vst [vmem:[%s2972_s27 + $0x3e8] sm:$0xff] %v400_v61  ;;  %v402_v62 = vld [vmem:[%s2964_s26 + $0xfc0] sm:$0xff]  ;;  %v404_v63 = vld [vmem:[%s2964_s26 + $0xfc8] sm:$0xff] }
  0x54   : > { %v406_v0 = vld [vmem:[%s2964_s26 + $0x1000] sm:$0xff]  ;;  %403 = vst [vmem:[%s2972_s27 + $0x3f0] sm:$0xff] %v402_v62  ;;  %405 = vst [vmem:[%s2972_s27 + $0x3f8] sm:$0xff] %v404_v63  ;;  %v408_v1 = vld [vmem:[%s2964_s26 + $0x1008] sm:$0xff] }
  0x55   : > { %407 = vst [vmem:[%s2972_s27 + $0x400] sm:$0xff] %v406_v0  ;;  %v410_v2 = vld [vmem:[%s2964_s26 + $0x1040] sm:$0xff]  ;;  %v412_v3 = vld [vmem:[%s2964_s26 + $0x1048] sm:$0xff]  ;;  %409 = vst [vmem:[%s2972_s27 + $0x408] sm:$0xff] %v408_v1 }
  0x56   : > { %411 = vst [vmem:[%s2972_s27 + $0x410] sm:$0xff] %v410_v2  ;;  %413 = vst [vmem:[%s2972_s27 + $0x418] sm:$0xff] %v412_v3  ;;  %v414_v4 = vld [vmem:[%s2964_s26 + $0x1080] sm:$0xff]  ;;  %v416_v5 = vld [vmem:[%s2964_s26 + $0x1088] sm:$0xff] }
  0x57   : > { %v418_v6 = vld [vmem:[%s2964_s26 + $0x10c0] sm:$0xff]  ;;  %415 = vst [vmem:[%s2972_s27 + $0x420] sm:$0xff] %v414_v4  ;;  %417 = vst [vmem:[%s2972_s27 + $0x428] sm:$0xff] %v416_v5  ;;  %v420_v7 = vld [vmem:[%s2964_s26 + $0x10c8] sm:$0xff] }
  0x58   : > { %419 = vst [vmem:[%s2972_s27 + $0x430] sm:$0xff] %v418_v6  ;;  %v422_v8 = vld [vmem:[%s2964_s26 + $0x1100] sm:$0xff]  ;;  %v424_v9 = vld [vmem:[%s2964_s26 + $0x1108] sm:$0xff]  ;;  %421 = vst [vmem:[%s2972_s27 + $0x438] sm:$0xff] %v420_v7 }
  0x59   : > { %423 = vst [vmem:[%s2972_s27 + $0x440] sm:$0xff] %v422_v8  ;;  %425 = vst [vmem:[%s2972_s27 + $0x448] sm:$0xff] %v424_v9  ;;  %v426_v10 = vld [vmem:[%s2964_s26 + $0x1140] sm:$0xff]  ;;  %v428_v11 = vld [vmem:[%s2964_s26 + $0x1148] sm:$0xff] }
  0x5a   : > { %v430_v12 = vld [vmem:[%s2964_s26 + $0x1180] sm:$0xff]  ;;  %427 = vst [vmem:[%s2972_s27 + $0x450] sm:$0xff] %v426_v10  ;;  %429 = vst [vmem:[%s2972_s27 + $0x458] sm:$0xff] %v428_v11  ;;  %v432_v13 = vld [vmem:[%s2964_s26 + $0x1188] sm:$0xff] }
  0x5b   : > { %431 = vst [vmem:[%s2972_s27 + $0x460] sm:$0xff] %v430_v12  ;;  %v434_v14 = vld [vmem:[%s2964_s26 + $0x11c0] sm:$0xff]  ;;  %v436_v15 = vld [vmem:[%s2964_s26 + $0x11c8] sm:$0xff]  ;;  %433 = vst [vmem:[%s2972_s27 + $0x468] sm:$0xff] %v432_v13 }
  0x5c   : > { %435 = vst [vmem:[%s2972_s27 + $0x470] sm:$0xff] %v434_v14  ;;  %437 = vst [vmem:[%s2972_s27 + $0x478] sm:$0xff] %v436_v15 }
  0x5d PF: > { %p2047_p7 = scmp.ge.s32.totalorder %s2900_s14, 1  ;;  %p442_p8 = scmp.lt.s32.totalorder %s2900_s14, 5 }
  0x5f   : > { %p443_p9 = pnand %p2047_p7, %p442_p8 }
  0x60   : > { %s449_s28 = sand.u32 (!%p443_p9), 1, %s2892_s12   ;;  %v3262_v16 = vld [vmem:[%s3573_s1] sm:$0xff] (!%p443_p9)  ;;  %vm1017_vm0 = vcmask (!%p443_p9), 523264  }
  0x61   : > { %446 = sbr.rel (%p443_p9) target bundleno = 524 (0x20c), region = 51  ;;  %v930_v17 = vunpack.c.h.bf16 (!%p443_p9), %v3262_v16 }
  0x62   : > { %s2633_s4 = smul.u32 (!%p443_p9), 1152, %s449_s28 }
  0x63   : > { %1106 = vmatprep.mubr.f32.mxu0 (!%p443_p9), %v930_v17  ;;  %1445 = vmatprep.mubr.f32.mxu1 (!%p443_p9), %v930_v17 }
  0x64   : > { %s3267_s5 = scalar_lea.vmem (!%p443_p9), [#allocation2], %s2633_s4  ;;  %s3517_s4 = sshll.u32 (!%p443_p9), %s449_s28, 7 }
  0x65   : > { %v2662_v18 = vld [vmem:[%s3267_s5 + $0x4] ss:$16 sps:$4 sm:$0xff] (!%p443_p9)   ;;  %v2664_v19 = vld [vmem:[%s3267_s5 + $0xc] ss:$16 sps:$4 sm:$0xff] (!%p443_p9)   ;;  %v2666_v20 = vld [vmem:[%s3267_s5] ss:$16 sps:$4 sm:$0xff] (!%p443_p9)  }
  0x66   : > { %2105 = vmatprep.subr.bf16.mxu0 (!%p443_p9), %v2662_v18  ;;  %v2667_v21 = vld [vmem:[%s3267_s5 + $0x8] ss:$16 sps:$4 sm:$0xff] (!%p443_p9)   ;;  %2249 = vmatprep.subr.bf16.mxu1 (!%p443_p9), %v2664_v19  ;;  %v2668_v22 = vld [vmem:[%s3267_s5 + $0x24] ss:$16 sps:$4 sm:$0xff] (!%p443_p9)   ;;  %v2670_v23 = vld [vmem:[%s3267_s5 + $0x2c] ss:$16 sps:$4 sm:$0xff] (!%p443_p9)  }
  0x67   : > { %2107 = vmatpush1.bf16.msra.mxu0 (!%p443_p9), %v2666_v20  ;;  %2251 = vmatpush1.bf16.msra.mxu1 (!%p443_p9), %v2667_v21  ;;  %v2672_v24 = vld [vmem:[%s3267_s5 + $0x20] ss:$16 sps:$4 sm:$0xff] (!%p443_p9)   ;;  %v2673_v25 = vld [vmem:[%s3267_s5 + $0x28] ss:$16 sps:$4 sm:$0xff] (!%p443_p9)   ;;  %v2674_v26 = vld [vmem:[%s3267_s5 + $0x44] ss:$16 sps:$4 sm:$0xff] (!%p443_p9)  }
  0x68   : > { %2109 = vmatprep.subr.bf16.mxu0 %v2668_v22  ;;  %2253 = vmatprep.subr.bf16.mxu1 %v2670_v23  ;;  %v2676_v27 = vld [vmem:[%s3267_s5 + $0x4c] ss:$16 sps:$4 sm:$0xff]   ;;  %v2678_v28 = vld [vmem:[%s3267_s5 + $0x40] ss:$16 sps:$4 sm:$0xff]   ;;  %v2679_v29 = vld [vmem:[%s3267_s5 + $0x48] ss:$16 sps:$4 sm:$0xff]   ;;  %v929_v22 = vunpack.c.l.bf16 %v3262_v16 }
  0x69   : > { %v2680_v30 = vld [vmem:[%s3267_s5 + $0x64] ss:$16 sps:$4 sm:$0xff]   ;;  %v2682_v31 = vld [vmem:[%s3267_s5 + $0x6c] ss:$16 sps:$4 sm:$0xff]   ;;  %v2684_v32 = vld [vmem:[%s3267_s5 + $0x60] ss:$16 sps:$4 sm:$0xff]  }
  0x6a   : > { %v2685_v33 = vld [vmem:[%s3267_s5 + $0x68] ss:$16 sps:$4 sm:$0xff]   ;;  %v2686_v34 = vld [vmem:[%s3267_s5 + $0x84] ss:$16 sps:$4 sm:$0xff]   ;;  %v2688_v35 = vld [vmem:[%s3267_s5 + $0x8c] ss:$16 sps:$4 sm:$0xff]  }
  0x6b   : > { %2111 = vmatpush1.bf16.msra.mxu0 %v2672_v24  ;;  %2255 = vmatpush1.bf16.msra.mxu1 %v2673_v25  ;;  %v2690_v36 = vld [vmem:[%s3267_s5 + $0x80] ss:$16 sps:$4 sm:$0xff]   ;;  %v2691_v37 = vld [vmem:[%s3267_s5 + $0x88] ss:$16 sps:$4 sm:$0xff]   ;;  %v2692_v38 = vld [vmem:[%s3267_s5 + $0xa4] ss:$16 sps:$4 sm:$0xff]  }
  0x6c   : > { %2113 = vmatprep.subr.bf16.mxu0 %v2674_v26  ;;  %2257 = vmatprep.subr.bf16.mxu1 %v2676_v27  ;;  %v2694_v39 = vld [vmem:[%s3267_s5 + $0xac] ss:$16 sps:$4 sm:$0xff]   ;;  %v2696_v40 = vld [vmem:[%s3267_s5 + $0xa0] ss:$16 sps:$4 sm:$0xff]   ;;  %v2697_v41 = vld [vmem:[%s3267_s5 + $0xa8] ss:$16 sps:$4 sm:$0xff]  }
  0x6d   : > { %v2698_v42 = vld [vmem:[%s3267_s5 + $0xc4] ss:$16 sps:$4 sm:$0xff]   ;;  %v2700_v43 = vld [vmem:[%s3267_s5 + $0xcc] ss:$16 sps:$4 sm:$0xff]   ;;  %v2702_v44 = vld [vmem:[%s3267_s5 + $0xc0] ss:$16 sps:$4 sm:$0xff]  }
  0x6e   : > { %v2703_v45 = vld [vmem:[%s3267_s5 + $0xc8] ss:$16 sps:$4 sm:$0xff]   ;;  %v2704_v46 = vld [vmem:[%s3267_s5 + $0xe4] ss:$16 sps:$4 sm:$0xff]   ;;  %v2706_v47 = vld [vmem:[%s3267_s5 + $0xec] ss:$16 sps:$4 sm:$0xff]  }
  0x6f   : > { %2115 = vmatpush1.bf16.msra.mxu0 %v2678_v28  ;;  %2259 = vmatpush1.bf16.msra.mxu1 %v2679_v29  ;;  %v2708_v48 = vld [vmem:[%s3267_s5 + $0xe0] ss:$16 sps:$4 sm:$0xff]   ;;  %v2709_v49 = vld [vmem:[%s3267_s5 + $0xe8] ss:$16 sps:$4 sm:$0xff]   ;;  %v2710_v50 = vld [vmem:[%s3267_s5 + $0x104] ss:$16 sps:$4 sm:$0xff]  }
  0x70   : > { %2117 = vmatprep.subr.bf16.mxu0 %v2680_v30  ;;  %2261 = vmatprep.subr.bf16.mxu1 %v2682_v31  ;;  %v2712_v51 = vld [vmem:[%s3267_s5 + $0x10c] ss:$16 sps:$4 sm:$0xff]   ;;  %v2714_v52 = vld [vmem:[%s3267_s5 + $0x100] ss:$16 sps:$4 sm:$0xff]   ;;  %v2715_v53 = vld [vmem:[%s3267_s5 + $0x108] ss:$16 sps:$4 sm:$0xff]  }
  0x71   : > { %v2716_v54 = vld [vmem:[%s3267_s5 + $0x124] ss:$16 sps:$4 sm:$0xff]   ;;  %v2718_v55 = vld [vmem:[%s3267_s5 + $0x12c] ss:$16 sps:$4 sm:$0xff]   ;;  %v2720_v56 = vld [vmem:[%s3267_s5 + $0x120] ss:$16 sps:$4 sm:$0xff]  }
  0x72   : > { %v2721_v57 = vld [vmem:[%s3267_s5 + $0x128] ss:$16 sps:$4 sm:$0xff]   ;;  %v2722_v58 = vld [vmem:[%s3267_s5 + $0x144] ss:$16 sps:$4 sm:$0xff]   ;;  %v2724_v59 = vld [vmem:[%s3267_s5 + $0x14c] ss:$16 sps:$4 sm:$0xff]  }
  0x73   : > { %2119 = vmatpush1.bf16.msra.mxu0 %v2684_v32  ;;  %2263 = vmatpush1.bf16.msra.mxu1 %v2685_v33  ;;  %v2726_v60 = vld [vmem:[%s3267_s5 + $0x140] ss:$16 sps:$4 sm:$0xff]   ;;  %v2727_v61 = vld [vmem:[%s3267_s5 + $0x148] ss:$16 sps:$4 sm:$0xff]   ;;  %v2728_v62 = vld [vmem:[%s3267_s5 + $0x164] ss:$16 sps:$4 sm:$0xff]  }
  0x74   : > { %2121 = vmatprep.subr.bf16.mxu0 %v2686_v34  ;;  %2265 = vmatprep.subr.bf16.mxu1 %v2688_v35  ;;  %v2730_v63 = vld [vmem:[%s3267_s5 + $0x16c] ss:$16 sps:$4 sm:$0xff]   ;;  %v2732_v0 = vld [vmem:[%s3267_s5 + $0x160] ss:$16 sps:$4 sm:$0xff]   ;;  %v2733_v1 = vld [vmem:[%s3267_s5 + $0x168] ss:$16 sps:$4 sm:$0xff]  }
  0x75   : > { %v2734_v2 = vld [vmem:[%s3267_s5 + $0x184] ss:$16 sps:$4 sm:$0xff]   ;;  %v2736_v3 = vld [vmem:[%s3267_s5 + $0x18c] ss:$16 sps:$4 sm:$0xff]   ;;  %v2738_v4 = vld [vmem:[%s3267_s5 + $0x180] ss:$16 sps:$4 sm:$0xff]  }
  0x76   : > { %v2739_v5 = vld [vmem:[%s3267_s5 + $0x188] ss:$16 sps:$4 sm:$0xff]   ;;  %v2740_v6 = vld [vmem:[%s3267_s5 + $0x1a4] ss:$16 sps:$4 sm:$0xff]   ;;  %v2742_v7 = vld [vmem:[%s3267_s5 + $0x1ac] ss:$16 sps:$4 sm:$0xff]  }
  0x77   : > { %2123 = vmatpush1.bf16.msra.mxu0 %v2690_v36  ;;  %2267 = vmatpush1.bf16.msra.mxu1 %v2691_v37  ;;  %v2744_v8 = vld [vmem:[%s3267_s5 + $0x1a0] ss:$16 sps:$4 sm:$0xff]   ;;  %v2745_v9 = vld [vmem:[%s3267_s5 + $0x1a8] ss:$16 sps:$4 sm:$0xff]   ;;  %v2746_v10 = vld [vmem:[%s3267_s5 + $0x1c4] ss:$16 sps:$4 sm:$0xff]  }
  0x78   : > { %2125 = vmatprep.subr.bf16.mxu0 %v2692_v38  ;;  %2269 = vmatprep.subr.bf16.mxu1 %v2694_v39  ;;  %v2748_v11 = vld [vmem:[%s3267_s5 + $0x1cc] ss:$16 sps:$4 sm:$0xff]   ;;  %v2750_v12 = vld [vmem:[%s3267_s5 + $0x1c0] ss:$16 sps:$4 sm:$0xff]   ;;  %v2751_v13 = vld [vmem:[%s3267_s5 + $0x1c8] ss:$16 sps:$4 sm:$0xff]  }
  0x79   : > { %v2752_v14 = vld [vmem:[%s3267_s5 + $0x1e4] ss:$16 sps:$4 sm:$0xff]   ;;  %v2754_v15 = vld [vmem:[%s3267_s5 + $0x1ec] ss:$16 sps:$4 sm:$0xff]   ;;  %v2756_v17 = vld [vmem:[%s3267_s5 + $0x1e0] ss:$16 sps:$4 sm:$0xff]  }
  0x7a   : > { %v2757_v18 = vld [vmem:[%s3267_s5 + $0x1e8] ss:$16 sps:$4 sm:$0xff]   ;;  %v2758_v19 = vld [vmem:[%s3267_s5 + $0x204] ss:$16 sps:$4 sm:$0xff]   ;;  %v2761_v20 = vld [vmem:[%s3267_s5 + $0x20c] ss:$16 sps:$4 sm:$0xff]  }
  0x7b   : > { %2127 = vmatpush1.bf16.msra.mxu0 %v2696_v40  ;;  %2271 = vmatpush1.bf16.msra.mxu1 %v2697_v41  ;;  %v908_v21 = vld [vmem:[%s3573_s1 + $0x14] sm:$0xff]  ;;  %v2760_v23 = vld [vmem:[%s3267_s5 + $0x200] ss:$16 sps:$4 sm:$0xff]   ;;  %v2767_v26 = vld [vmem:[%s3267_s5 + $0x22c] ss:$16 sps:$4 sm:$0xff]   ;;  %v2902_v29 = vmov 0  }
  0x7c   : > { %2129 = vmatprep.subr.bf16.mxu0 %v2698_v42  ;;  %2273 = vmatprep.subr.bf16.mxu1 %v2700_v43  ;;  %v2763_v24 = vld [vmem:[%s3267_s5 + $0x208] ss:$16 sps:$4 sm:$0xff]   ;;  %v2764_v25 = vld [vmem:[%s3267_s5 + $0x224] ss:$16 sps:$4 sm:$0xff]   ;;  %v935_v27 = vunpack.c.h.bf16 %v908_v21  ;;  %v2766_v16 = vld [vmem:[%s3267_s5 + $0x220] ss:$16 sps:$4 sm:$0xff]   ;;  %v934_v31 = vunpack.c.l.bf16 %v908_v21 }
  0x7d   : > { %v911_v28 = vld [vmem:[%s3573_s1 + $0x28] sm:$0xff]  ;;  %2660 = vset.pattern.permute.xlu0 %v2902_v29  ;;  %2661 = vset.pattern.permute.xlu1 %v2902_v29  ;;  %v2770_v32 = vld [vmem:[%s3267_s5 + $0x244] ss:$16 sps:$4 sm:$0xff]   ;;  %v914_v35 = vld [vmem:[%s3573_s1 + $0x3c] sm:$0xff]  ;;  %s3520_s12 = scalar_lea.vmem [#allocation3], %s3517_s4  ;;  %s2103_s28 = sshll.u32 (%p2954_p5), %s2041_s15, 4 }
  0x7e   : > { %v2769_v30 = vld [vmem:[%s3267_s5 + $0x228] ss:$16 sps:$4 sm:$0xff]   ;;  %v2773_v33 = vld [vmem:[%s3267_s5 + $0x24c] ss:$16 sps:$4 sm:$0xff]   ;;  %v940_v34 = vunpack.c.h.bf16 %v911_v28  ;;  %v2772_v36 = vld [vmem:[%s3267_s5 + $0x240] ss:$16 sps:$4 sm:$0xff]   ;;  %v939_v38 = vunpack.c.l.bf16 %v911_v28  ;;  %v945_v41 = vunpack.c.h.bf16 %v914_v35  ;;  %s1937_s20 = scalar_lea.vmem (%p2954_p5), %s3575_s3, %s2103_s28 }
  0x7f   : > { %2131 = vmatpush1.bf16.msra.mxu0 %v2702_v44  ;;  %2275 = vmatpush1.bf16.msra.mxu1 %v2703_v45  ;;  %v2775_v37 = vld [vmem:[%s3267_s5 + $0x248] ss:$16 sps:$4 sm:$0xff]   ;;  %v2776_v39 = vld [vmem:[%s3267_s5 + $0x264] ss:$16 sps:$4 sm:$0xff]   ;;  %v2779_v40 = vld [vmem:[%s3267_s5 + $0x26c] ss:$16 sps:$4 sm:$0xff]   ;;  %v944_v45 = vunpack.c.l.bf16 %v914_v35 }
  0x80   : > { %2133 = vmatprep.subr.bf16.mxu0 %v2704_v46  ;;  %2277 = vmatprep.subr.bf16.mxu1 %v2706_v47  ;;  %v917_v42 = vld [vmem:[%s3573_s1 + $0x50] sm:$0xff]  ;;  %v2781_v44 = vld [vmem:[%s3267_s5 + $0x268] ss:$16 sps:$4 sm:$0xff]   ;;  %v2785_v47 = vld [vmem:[%s3267_s5 + $0x28c] ss:$16 sps:$4 sm:$0xff]  }
  0x81   : > { %v2778_v43 = vld [vmem:[%s3267_s5 + $0x260] ss:$16 sps:$4 sm:$0xff]   ;;  %v2782_v46 = vld [vmem:[%s3267_s5 + $0x284] ss:$16 sps:$4 sm:$0xff]   ;;  %v2827_v29 = vld [vmem:[%s3267_s5 + $0x36c] ss:$16 sps:$4 sm:$0xff]  }
  0x82   : > { %v971_v21 = vld [vmem:[%s3574_s2 + $0x10] sm:$0xff]  ;;  %v976_v35 = vld [vmem:[%s3574_s2 + $0x38] sm:$0xff] }
  0x83   : > { %2135 = vmatpush1.bf16.msra.mxu0 %v2708_v48  ;;  %2279 = vmatpush1.bf16.msra.mxu1 %v2709_v49  ;;  %v950_v48 = vunpack.c.h.bf16 %v917_v42  ;;  %v920_v49 = vld [vmem:[%s3573_s1 + $0x64] sm:$0xff] }
  0x84   : > { %2137 = vmatprep.subr.bf16.mxu0 %v2710_v50  ;;  %2281 = vmatprep.subr.bf16.mxu1 %v2712_v51  ;;  %v2784_v50 = vld [vmem:[%s3267_s5 + $0x280] ss:$16 sps:$4 sm:$0xff]   ;;  %v2787_v51 = vld [vmem:[%s3267_s5 + $0x288] ss:$16 sps:$4 sm:$0xff]   ;;  %v2824_v28 = vld [vmem:[%s3267_s5 + $0x364] ss:$16 sps:$4 sm:$0xff]  }
  0x85   : > { %989 = vperm.xlu1 %2661, %v971_v21  }
  0x87   : > { %2139 = vmatpush1.bf16.msra.mxu0 %v2714_v52  ;;  %2283 = vmatpush1.bf16.msra.mxu1 %v2715_v53  ;;  %v949_v52 = vunpack.c.l.bf16 %v917_v42  ;;  %v2788_v53 = vld [vmem:[%s3267_s5 + $0x2a4] ss:$16 sps:$4 sm:$0xff]   ;;  %v2841_v42 = vld [vmem:[%s3267_s5 + $0x3a8] ss:$16 sps:$4 sm:$0xff]  }
  0x88   : > { %2141 = vmatprep.subr.bf16.mxu0 %v2716_v54  ;;  %2285 = vmatprep.subr.bf16.mxu1 %v2718_v55  ;;  %v2791_v54 = vld [vmem:[%s3267_s5 + $0x2ac] ss:$16 sps:$4 sm:$0xff]   ;;  %v955_v55 = vunpack.c.h.bf16 %v920_v49 }
  0x8b   : > { %2143 = vmatpush1.bf16.msra.mxu0 %v2720_v56  ;;  %2287 = vmatpush1.bf16.msra.mxu1 %v2721_v57  ;;  %v923_v56 = vld [vmem:[%s3573_s1 + $0x78] sm:$0xff]  ;;  %v2790_v57 = vld [vmem:[%s3267_s5 + $0x2a0] ss:$16 sps:$4 sm:$0xff]  }
  0x8c   : > { %2145 = vmatprep.subr.bf16.mxu0 %v2722_v58  ;;  %2289 = vmatprep.subr.bf16.mxu1 %v2724_v59  ;;  %v2793_v58 = vld [vmem:[%s3267_s5 + $0x2a8] ss:$16 sps:$4 sm:$0xff]   ;;  %v954_v59 = vunpack.c.l.bf16 %v920_v49  ;;  %v2850_v49 = vld [vmem:[%s3267_s5 + $0x3e0] ss:$16 sps:$4 sm:$0xff]  }
  0x8f   : > { %2147 = vmatpush1.bf16.msra.mxu0 %v2726_v60  ;;  %2291 = vmatpush1.bf16.msra.mxu1 %v2727_v61  ;;  %v2794_v60 = vld [vmem:[%s3267_s5 + $0x2c4] ss:$16 sps:$4 sm:$0xff]   ;;  %v2797_v61 = vld [vmem:[%s3267_s5 + $0x2cc] ss:$16 sps:$4 sm:$0xff]  }
  0x90   : > { %2149 = vmatprep.subr.bf16.mxu0 %v2728_v62  ;;  %2293 = vmatprep.subr.bf16.mxu1 %v2730_v63  ;;  %v960_v62 = vunpack.c.h.bf16 %v923_v56  ;;  %v959_v63 = vunpack.c.l.bf16 %v923_v56  ;;  %v2859_v56 = vld [vmem:[%s3267_s5 + $0x408] ss:$16 sps:$4 sm:$0xff]  }
  0x93   : > { %2151 = vmatpush1.bf16.msra.mxu0 %v2732_v0  ;;  %2295 = vmatpush1.bf16.msra.mxu1 %v2733_v1  ;;  %v926_v0 = vld [vmem:[%s3573_s1 + $0x8c] sm:$0xff] }
  0x94   : > { %2153 = vmatprep.subr.bf16.mxu0 %v2734_v2  ;;  %2297 = vmatprep.subr.bf16.mxu1 %v2736_v3  ;;  %v2796_v1 = vld [vmem:[%s3267_s5 + $0x2c0] ss:$16 sps:$4 sm:$0xff]   ;;  %v2799_v2 = vld [vmem:[%s3267_s5 + $0x2c8] ss:$16 sps:$4 sm:$0xff]   ;;  %v2800_v3 = vld [vmem:[%s3267_s5 + $0x2e4] ss:$16 sps:$4 sm:$0xff]  }
  0x97   : > { %2155 = vmatpush1.bf16.msra.mxu0 %v2738_v4  ;;  %2299 = vmatpush1.bf16.msra.mxu1 %v2739_v5  ;;  %v2803_v4 = vld [vmem:[%s3267_s5 + $0x2ec] ss:$16 sps:$4 sm:$0xff]   ;;  %v965_v5 = vunpack.c.h.bf16 %v926_v0 }
  0x98   : > { %2157 = vmatprep.subr.bf16.mxu0 %v2740_v6  ;;  %2301 = vmatprep.subr.bf16.mxu1 %v2742_v7  ;;  %v2802_v6 = vld [vmem:[%s3267_s5 + $0x2e0] ss:$16 sps:$4 sm:$0xff]   ;;  %v2805_v7 = vld [vmem:[%s3267_s5 + $0x2e8] ss:$16 sps:$4 sm:$0xff]  }
  0x9b   : > { %2159 = vmatpush1.bf16.msra.mxu0 %v2744_v8  ;;  %2303 = vmatpush1.bf16.msra.mxu1 %v2745_v9  ;;  %v964_v8 = vunpack.c.l.bf16 %v926_v0  ;;  %v3390_v9 = vld [vmem:[%s3573_s1 + $0x8] sm:$0xff] }
  0x9c   : > { %2161 = vmatprep.subr.bf16.mxu0 %v2746_v10  ;;  %2305 = vmatprep.subr.bf16.mxu1 %v2748_v11  ;;  %v2806_v10 = vld [vmem:[%s3267_s5 + $0x304] ss:$16 sps:$4 sm:$0xff]   ;;  %v2809_v11 = vld [vmem:[%s3267_s5 + $0x30c] ss:$16 sps:$4 sm:$0xff]   ;;  %v2865_v0 = vld [vmem:[%s3267_s5 + $0x428] ss:$16 sps:$4 sm:$0xff]  }
  0x9f   : > { %2163 = vmatpush1.bf16.msra.mxu0 %v2750_v12  ;;  %2307 = vmatpush1.bf16.msra.mxu1 %v2751_v13  ;;  %v932_v12 = vunpack.c.h.bf16 %v3390_v9  ;;  %v2808_v13 = vld [vmem:[%s3267_s5 + $0x300] ss:$16 sps:$4 sm:$0xff]  }
  0xa0   : > { %2165 = vmatprep.subr.bf16.mxu0 %v2752_v14  ;;  %2309 = vmatprep.subr.bf16.mxu1 %v2754_v15  ;;  %v2811_v14 = vld [vmem:[%s3267_s5 + $0x308] ss:$16 sps:$4 sm:$0xff]   ;;  %v2812_v15 = vld [vmem:[%s3267_s5 + $0x324] ss:$16 sps:$4 sm:$0xff]  }
  0xa3   : > { %2167 = vmatpush1.bf16.msra.mxu0 %v2756_v17  ;;  %2311 = vmatpush1.bf16.msra.mxu1 %v2757_v18  ;;  %v2815_v17 = vld [vmem:[%s3267_s5 + $0x32c] ss:$16 sps:$4 sm:$0xff]   ;;  %v969_v18 = vld [vmem:[%s3574_s2] sm:$0xff] }
  0xa4   : > { %2169 = vmatprep.subr.bf16.mxu0 %v2758_v19  ;;  %2313 = vmatprep.subr.bf16.mxu1 %v2761_v20  ;;  %v2814_v19 = vld [vmem:[%s3267_s5 + $0x320] ss:$16 sps:$4 sm:$0xff]   ;;  %v2817_v20 = vld [vmem:[%s3267_s5 + $0x328] ss:$16 sps:$4 sm:$0xff]  }
  0xa5   : > { %979 = vperm.xlu0 %2660, %v969_v18  }
  0xa6   : > { %1107 = vmatmul.mubr.f32.vlgmr.msra.gmra.mrb[0].mxu0 %v929_v22  ;;  %1446 = vmatmul.mubr.f32.vlgmr.msra.gmra.mrb[0].mxu1 %v929_v22  ;;  %v2818_v22 = vld [vmem:[%s3267_s5 + $0x344] ss:$16 sps:$4 sm:$0xff]  }
  0xa7   : > { %2171 = vmatpush1.bf16.msra.mxu0 %v2760_v23  ;;  %2315 = vmatpush1.bf16.msra.mxu1 %v2763_v24  ;;  %v2821_v23 = vld [vmem:[%s3267_s5 + $0x34c] ss:$16 sps:$4 sm:$0xff]  }
  0xa8   : > { %2173 = vmatprep.subr.bf16.mxu0 %v2764_v25  ;;  %2317 = vmatprep.subr.bf16.mxu1 %v2767_v26  ;;  %v970_v24 = vld [vmem:[%s3574_s2 + $0x8] sm:$0xff]  ;;  %v972_v25 = vld [vmem:[%s3574_s2 + $0x18] sm:$0xff]  ;;  %v2820_v26 = vld [vmem:[%s3267_s5 + $0x340] ss:$16 sps:$4 sm:$0xff]  }
  0xa9   : > { %1112 = vmatprep.mubr.f32.mxu0 %v935_v27  ;;  %1451 = vmatprep.mubr.f32.mxu1 %v935_v27  ;;  %v2823_v27 = vld [vmem:[%s3267_s5 + $0x348] ss:$16 sps:$4 sm:$0xff]  }
  0xaa   : > { %1113 = vmatmul.mubr.f32.gmra.mrb[2].mxu0 %v934_v31  ;;  %1452 = vmatmul.mubr.f32.gmra.mrb[2].mxu1 %v934_v31  ;;  %v2826_v31 = vld [vmem:[%s3267_s5 + $0x360] ss:$16 sps:$4 sm:$0xff]  }
  0xab   : > { %2175 = vmatpush1.bf16.msra.mxu0 %v2766_v16  ;;  %2319 = vmatpush1.bf16.msra.mxu1 %v2769_v30  ;;  %v974_v16 = vld [vmem:[%s3574_s2 + $0x28] sm:$0xff]  ;;  %v973_v30 = vld [vmem:[%s3574_s2 + $0x20] sm:$0xff] }
  0xac   : > { %2177 = vmatprep.subr.bf16.mxu0 %v2770_v32  ;;  %2321 = vmatprep.subr.bf16.mxu1 %v2773_v33  ;;  %v2829_v32 = vld [vmem:[%s3267_s5 + $0x368] ss:$16 sps:$4 sm:$0xff]   ;;  %v2830_v33 = vld [vmem:[%s3267_s5 + $0x384] ss:$16 sps:$4 sm:$0xff]  }
  0xad   : > { %1118 = vmatprep.mubr.f32.mxu0 %v940_v34  ;;  %1457 = vmatprep.mubr.f32.mxu1 %v940_v34  ;;  %v2833_v34 = vld [vmem:[%s3267_s5 + $0x38c] ss:$16 sps:$4 sm:$0xff]  }
  0xae   : > { %1119 = vmatmul.mubr.f32.gmra.mrb[4].mxu0 %v939_v38  ;;  %1458 = vmatmul.mubr.f32.gmra.mrb[4].mxu1 %v939_v38  ;;  %v2835_v38 = vld [vmem:[%s3267_s5 + $0x388] ss:$16 sps:$4 sm:$0xff]  }
  0xaf   : > { %2179 = vmatpush1.bf16.msra.mxu0 %v2772_v36  ;;  %2323 = vmatpush1.bf16.msra.mxu1 %v2775_v37  ;;  %v975_v36 = vld [vmem:[%s3574_s2 + $0x30] sm:$0xff] }
  0xb0   : > { %2181 = vmatprep.subr.bf16.mxu0 %v2776_v39  ;;  %2325 = vmatprep.subr.bf16.mxu1 %v2779_v40  ;;  %v2832_v37 = vld [vmem:[%s3267_s5 + $0x380] ss:$16 sps:$4 sm:$0xff]   ;;  %v2836_v39 = vld [vmem:[%s3267_s5 + $0x3a4] ss:$16 sps:$4 sm:$0xff]   ;;  %v2839_v40 = vld [vmem:[%s3267_s5 + $0x3ac] ss:$16 sps:$4 sm:$0xff]  }
  0xb1   : > { %1124 = vmatprep.mubr.f32.mxu0 %v945_v41  ;;  %1463 = vmatprep.mubr.f32.mxu1 %v945_v41  ;;  %v2838_v41 = vld [vmem:[%s3267_s5 + $0x3a0] ss:$16 sps:$4 sm:$0xff]  }
  0xb2   : > { %1125 = vmatmul.mubr.f32.gmra.mrb[6].mxu0 %v944_v45  ;;  %1464 = vmatmul.mubr.f32.gmra.mrb[6].mxu1 %v944_v45  ;;  %v2844_v45 = vld [vmem:[%s3267_s5 + $0x3c0] ss:$16 sps:$4 sm:$0xff]  }
  0xb3   : > { %2183 = vmatpush1.bf16.msra.mxu0 %v2778_v43  ;;  %2327 = vmatpush1.bf16.msra.mxu1 %v2781_v44  ;;  %v2842_v43 = vld [vmem:[%s3267_s5 + $0x3c4] ss:$16 sps:$4 sm:$0xff]   ;;  %v2845_v44 = vld [vmem:[%s3267_s5 + $0x3cc] ss:$16 sps:$4 sm:$0xff]  }
  0xb4   : > { %2185 = vmatprep.subr.bf16.mxu0 %v2782_v46  ;;  %2329 = vmatprep.subr.bf16.mxu1 %v2785_v47  ;;  %v2847_v46 = vld [vmem:[%s3267_s5 + $0x3c8] ss:$16 sps:$4 sm:$0xff]   ;;  %v2848_v47 = vld [vmem:[%s3267_s5 + $0x3e4] ss:$16 sps:$4 sm:$0xff]  }
  0xb5   : > { %1130 = vmatprep.mubr.f32.mxu0 %v950_v48  ;;  %1469 = vmatprep.mubr.f32.mxu1 %v950_v48  ;;  %v2851_v48 = vld [vmem:[%s3267_s5 + $0x3ec] ss:$16 sps:$4 sm:$0xff]  }
  0xb6   : > { %1131 = vmatmul.mubr.f32.gmra.mrb[8].mxu0 %v949_v52  ;;  %1470 = vmatmul.mubr.f32.gmra.mrb[8].mxu1 %v949_v52  ;;  %v2857_v52 = vld [vmem:[%s3267_s5 + $0x40c] ss:$16 sps:$4 sm:$0xff]  }
  0xb7   : > { %2187 = vmatpush1.bf16.msra.mxu0 %v2784_v50  ;;  %2331 = vmatpush1.bf16.msra.mxu1 %v2787_v51  ;;  %v2853_v50 = vld [vmem:[%s3267_s5 + $0x3e8] ss:$16 sps:$4 sm:$0xff]   ;;  %v2854_v51 = vld [vmem:[%s3267_s5 + $0x404] ss:$16 sps:$4 sm:$0xff]  }
  0xb8   : > { %2189 = vmatprep.subr.bf16.mxu0 %v2788_v53  ;;  %2333 = vmatprep.subr.bf16.mxu1 %v2791_v54  ;;  %v909_v53 = vld [vmem:[%s3573_s1 + $0x1c] sm:$0xff]  ;;  %v931_v54 = vunpack.c.l.bf16 %v3390_v9  ;;  %v2872_v9 = vld [vmem:[%s3267_s5 + $0x464] ss:$16 sps:$4 sm:$0xff]  }
  0xb9   : > { %1136 = vmatprep.mubr.f32.mxu0 %v955_v55  ;;  %1475 = vmatprep.mubr.f32.mxu1 %v955_v55  ;;  %v2856_v55 = vld [vmem:[%s3267_s5 + $0x400] ss:$16 sps:$4 sm:$0xff]  }
  0xba   : > { %1137 = vmatmul.mubr.f32.gmra.mrb[10].mxu0 %v954_v59  ;;  %1476 = vmatmul.mubr.f32.gmra.mrb[10].mxu1 %v954_v59  ;;  %v2860_v59 = vld [vmem:[%s3267_s5 + $0x424] ss:$16 sps:$4 sm:$0xff]  }
  0xbb   : > { %2191 = vmatpush1.bf16.msra.mxu0 %v2790_v57  ;;  %2335 = vmatpush1.bf16.msra.mxu1 %v2793_v58  ;;  %v937_v57 = vunpack.c.h.bf16 %v909_v53  ;;  %v912_v58 = vld [vmem:[%s3573_s1 + $0x30] sm:$0xff] }
  0xbc   : > { %2193 = vmatprep.subr.bf16.mxu0 %v2794_v60  ;;  %2337 = vmatprep.subr.bf16.mxu1 %v2797_v61  ;;  %v2863_v60 = vld [vmem:[%s3267_s5 + $0x42c] ss:$16 sps:$4 sm:$0xff]   ;;  %v936_v61 = vunpack.c.l.bf16 %v909_v53 }
  0xbd   : > { %1142 = vmatprep.mubr.f32.mxu0 %v960_v62  ;;  %1481 = vmatprep.mubr.f32.mxu1 %v960_v62  ;;  %v942_v62 = vunpack.c.h.bf16 %v912_v58 }
  0xbe   : > { %1143 = vmatmul.mubr.f32.gmra.mrb[12].mxu0 %v959_v63  ;;  %1482 = vmatmul.mubr.f32.gmra.mrb[12].mxu1 %v959_v63  ;;  %v2862_v63 = vld [vmem:[%s3267_s5 + $0x420] ss:$16 sps:$4 sm:$0xff]  }
  0xbf   : > { %2195 = vmatpush1.bf16.msra.mxu0 %v2796_v1  ;;  %2339 = vmatpush1.bf16.msra.mxu1 %v2799_v2  ;;  %v915_v1 = vld [vmem:[%s3573_s1 + $0x44] sm:$0xff] }
  0xc0   : > { %2197 = vmatprep.subr.bf16.mxu0 %v2800_v3  ;;  %2341 = vmatprep.subr.bf16.mxu1 %v2803_v4  ;;  %v2866_v2 = vld [vmem:[%s3267_s5 + $0x444] ss:$16 sps:$4 sm:$0xff]   ;;  %v2869_v3 = vld [vmem:[%s3267_s5 + $0x44c] ss:$16 sps:$4 sm:$0xff]   ;;  %v941_v4 = vunpack.c.l.bf16 %v912_v58 }
  0xc1   : > { %1148 = vmatprep.mubr.f32.mxu0 %v965_v5  ;;  %1487 = vmatprep.mubr.f32.mxu1 %v965_v5  ;;  %v947_v5 = vunpack.c.h.bf16 %v915_v1 }
  0xc2   : > { %1149 = vmatmul.mubr.f32.gmra.mrb[14].mxu0 %v964_v8  ;;  %1488 = vmatmul.mubr.f32.gmra.mrb[14].mxu1 %v964_v8  ;;  %v2871_v8 = vld [vmem:[%s3267_s5 + $0x448] ss:$16 sps:$4 sm:$0xff]  }
  0xc3   : > { %2199 = vmatpush1.bf16.msra.mxu0 %v2802_v6  ;;  %2343 = vmatpush1.bf16.msra.mxu1 %v2805_v7  ;;  %v918_v6 = vld [vmem:[%s3573_s1 + $0x58] sm:$0xff]  ;;  %v2868_v7 = vld [vmem:[%s3267_s5 + $0x440] ss:$16 sps:$4 sm:$0xff]  }
  0xc4   : > { %2201 = vmatprep.subr.bf16.mxu0 %v2806_v10  ;;  %2345 = vmatprep.subr.bf16.mxu1 %v2809_v11  ;;  %v2875_v10 = vld [vmem:[%s3267_s5 + $0x46c] ss:$16 sps:$4 sm:$0xff]   ;;  %v946_v11 = vunpack.c.l.bf16 %v915_v1 }
  0xc5   : > { %1219 = vmatprep.mubr.f32.mxu0 %v932_v12  ;;  %1558 = vmatprep.mubr.f32.mxu1 %v932_v12  ;;  %v952_v12 = vunpack.c.h.bf16 %v918_v6 }
  0xc6   : > { %984 = vperm.xlu0 %2660, %v970_v24   ;;  %994 = vperm.xlu1 %2661, %v972_v25  }
  0xc7   : > { %2203 = vmatpush1.bf16.msra.mxu0 %v2808_v13  ;;  %2347 = vmatpush1.bf16.msra.mxu1 %v2811_v14  ;;  %v921_v13 = vld [vmem:[%s3573_s1 + $0x6c] sm:$0xff] }
  0xc8   : > { %2205 = vmatprep.subr.bf16.mxu0 %v2812_v15  ;;  %2349 = vmatprep.subr.bf16.mxu1 %v2815_v17  ;;  %v2874_v14 = vld [vmem:[%s3267_s5 + $0x460] ss:$16 sps:$4 sm:$0xff]   ;;  %v2877_v15 = vld [vmem:[%s3267_s5 + $0x468] ss:$16 sps:$4 sm:$0xff]   ;;  %v951_v17 = vunpack.c.l.bf16 %v918_v6  ;;  %v957_v18 = vunpack.c.h.bf16 %v921_v13 }
  0xca   : > { %1004 = vperm.xlu1 %2661, %v974_v16   ;;  %999 = vperm.xlu0 %2660, %v973_v30   ;;  %v913_v16 = vld [vmem:[%s3573_s1 + $0x38] ss:$20 sps:$4 sm:$0xff]  }
  0xcb   : > { %2207 = vmatpush1.bf16.msra.mxu0 %v2814_v19  ;;  %2351 = vmatpush1.bf16.msra.mxu1 %v2817_v20  ;;  %v924_v19 = vld [vmem:[%s3573_s1 + $0x80] sm:$0xff]  ;;  %v956_v20 = vunpack.c.l.bf16 %v921_v13  ;;  %v943_v30 = vunpack.c.l.bf16 %v913_v16 }
  0xcc   : > { %2209 = vmatprep.subr.bf16.mxu0 %v2818_v22  ;;  %2353 = vmatprep.subr.bf16.mxu1 %v2821_v23  ;;  %v962_v21 = vunpack.c.h.bf16 %v924_v19  ;;  %v927_v22 = vld [vmem:[%s3573_s1 + $0x94] sm:$0xff]  ;;  %v961_v23 = vunpack.c.l.bf16 %v924_v19 }
  0xcd   : > { %v967_v24 = vunpack.c.h.bf16 %v927_v22  ;;  %v966_v25 = vunpack.c.l.bf16 %v927_v22 }
  0xce   : > { %1014 = vperm.xlu1 %2661, %v976_v35   ;;  %1009 = vperm.xlu0 %2660, %v975_v36   ;;  %v925_v35 = vld [vmem:[%s3573_s1 + $0x88] ss:$20 sps:$4 sm:$0xff]  }
  0xcf   : > { %2211 = vmatpush1.bf16.msra.mxu0 %v2820_v26  ;;  %2355 = vmatpush1.bf16.msra.mxu1 %v2823_v27  ;;  %v907_v26 = vld [vmem:[%s3573_s1 + $0x10] ss:$20 sps:$4 sm:$0xff]   ;;  %v963_v36 = vunpack.c.l.bf16 %v925_v35 }
  0xd0   : > { %2213 = vmatprep.subr.bf16.mxu0 %v2824_v28  ;;  %2357 = vmatprep.subr.bf16.mxu1 %v2827_v29  ;;  %v933_v27 = vunpack.c.l.bf16 %v907_v26  ;;  %v2903_v28 = vmov 0.0   ;;  %v938_v29 = vunpack.c.h.bf16 %v907_v26 }
  0xd3   : > { %2215 = vmatpush1.bf16.msra.mxu0 %v2826_v31  ;;  %2359 = vmatpush1.bf16.msra.mxu1 %v2829_v32  ;;  %v948_v31 = vunpack.c.h.bf16 %v913_v16  ;;  %v919_v32 = vld [vmem:[%s3573_s1 + $0x60] ss:$20 sps:$4 sm:$0xff]  }
  0xd4   : > { %2217 = vmatprep.subr.bf16.mxu0 %v2830_v33  ;;  %2361 = vmatprep.subr.bf16.mxu1 %v2833_v34  ;;  %v953_v33 = vunpack.c.l.bf16 %v919_v32  ;;  %v958_v34 = vunpack.c.h.bf16 %v919_v32 }
  0xd7   : > { %2219 = vmatpush1.bf16.msra.mxu0 %v2832_v37  ;;  %2363 = vmatpush1.bf16.msra.mxu1 %v2835_v38  ;;  %v968_v37 = vunpack.c.h.bf16 %v925_v35 }
  0xd8   : > { %2221 = vmatprep.subr.bf16.mxu0 %v2836_v39  ;;  %2365 = vmatprep.subr.bf16.mxu1 %v2839_v40 }
  0xdb   : > { %2223 = vmatpush1.bf16.msra.mxu0 %v2838_v41  ;;  %2367 = vmatpush1.bf16.msra.mxu1 %v2841_v42 }
  0xdc   : > { %2225 = vmatprep.subr.bf16.mxu0 %v2842_v43  ;;  %2369 = vmatprep.subr.bf16.mxu1 %v2845_v44 }
  0xdf   : > { %2227 = vmatpush1.bf16.msra.mxu0 %v2844_v45  ;;  %2371 = vmatpush1.bf16.msra.mxu1 %v2847_v46 }
  0xe0   : > { %2229 = vmatprep.subr.bf16.mxu0 %v2848_v47  ;;  %2373 = vmatprep.subr.bf16.mxu1 %v2851_v48 }
  0xe3   : > { %2231 = vmatpush1.bf16.msra.mxu0 %v2850_v49  ;;  %2375 = vmatpush1.bf16.msra.mxu1 %v2853_v50 }
  0xe4   : > { %2233 = vmatprep.subr.bf16.mxu0 %v2854_v51  ;;  %2377 = vmatprep.subr.bf16.mxu1 %v2857_v52 }
  0xe6   : > { %1220 = vmatmul.mubr.f32.vlgmr.msra.gmra.mrb[0].mxu0 %v931_v54  ;;  %1559 = vmatmul.mubr.f32.vlgmr.msra.gmra.mrb[0].mxu1 %v931_v54 }
  0xe7   : > { %2235 = vmatpush1.bf16.msra.mxu0 %v2856_v55  ;;  %2379 = vmatpush1.bf16.msra.mxu1 %v2859_v56 }
  0xe8   : > { %1225 = vmatprep.mubr.f32.mxu0 %v937_v57  ;;  %1564 = vmatprep.mubr.f32.mxu1 %v937_v57 }
  0xe9   : > { %2237 = vmatprep.subr.bf16.mxu0 %v2860_v59  ;;  %2381 = vmatprep.subr.bf16.mxu1 %v2863_v60 }
  0xea   : > { %1226 = vmatmul.mubr.f32.gmra.mrb[2].mxu0 %v936_v61  ;;  %1565 = vmatmul.mubr.f32.gmra.mrb[2].mxu1 %v936_v61 }
  0xeb   : > { %1231 = vmatprep.mubr.f32.mxu0 %v942_v62  ;;  %1570 = vmatprep.mubr.f32.mxu1 %v942_v62 }
  0xec   : > { %2239 = vmatpush1.bf16.msra.mxu0 %v2862_v63  ;;  %2383 = vmatpush1.bf16.msra.mxu1 %v2865_v0 }
  0xed   : > { %2241 = vmatprep.subr.bf16.mxu0 %v2866_v2  ;;  %2385 = vmatprep.subr.bf16.mxu1 %v2869_v3 }
  0xee   : > { %1232 = vmatmul.mubr.f32.gmra.mrb[4].mxu0 %v941_v4  ;;  %1571 = vmatmul.mubr.f32.gmra.mrb[4].mxu1 %v941_v4 }
  0xef   : > { %1237 = vmatprep.mubr.f32.mxu0 %v947_v5  ;;  %1576 = vmatprep.mubr.f32.mxu1 %v947_v5 }
  0xf0   : > { %2243 = vmatpush1.bf16.msra.mxu0 %v2868_v7  ;;  %2387 = vmatpush1.bf16.msra.mxu1 %v2871_v8 }
  0xf1   : > { %2245 = vmatprep.subr.bf16.mxu0 %v2872_v9  ;;  %2389 = vmatprep.subr.bf16.mxu1 %v2875_v10 }
  0xf2   : > { %1238 = vmatmul.mubr.f32.gmra.mrb[6].mxu0 %v946_v11  ;;  %1577 = vmatmul.mubr.f32.gmra.mrb[6].mxu1 %v946_v11 }
  0xf3   : > { %1243 = vmatprep.mubr.f32.mxu0 %v952_v12  ;;  %1582 = vmatprep.mubr.f32.mxu1 %v952_v12 }
  0xf4   : > { %2247 = vmatpush1.bf16.msra.mxu0 %v2874_v14  ;;  %2391 = vmatpush1.bf16.msra.mxu1 %v2877_v15 }
  0xf6   : > { %1244 = vmatmul.mubr.f32.gmra.mrb[8].mxu0 %v951_v17  ;;  %1583 = vmatmul.mubr.f32.gmra.mrb[8].mxu1 %v951_v17 }
  0xf7   : > { %1249 = vmatprep.mubr.f32.mxu0 %v957_v18  ;;  %1588 = vmatprep.mubr.f32.mxu1 %v957_v18 }
  0xfa   : > { %1250 = vmatmul.mubr.f32.gmra.mrb[10].mxu0 %v956_v20  ;;  %1589 = vmatmul.mubr.f32.gmra.mrb[10].mxu1 %v956_v20 }
  0xfb   : > { %1255 = vmatprep.mubr.f32.mxu0 %v962_v21  ;;  %1594 = vmatprep.mubr.f32.mxu1 %v962_v21 }
  0xfe   : > { %1256 = vmatmul.mubr.f32.gmra.mrb[12].mxu0 %v961_v23  ;;  %1595 = vmatmul.mubr.f32.gmra.mrb[12].mxu1 %v961_v23 }
  0xff   : > { %1261 = vmatprep.mubr.f32.mxu0 %v967_v24  ;;  %1600 = vmatprep.mubr.f32.mxu1 %v967_v24 }
 0x102   : > { %1262 = vmatmul.mubr.f32.gmra.mrb[14].mxu0 %v966_v25  ;;  %1601 = vmatmul.mubr.f32.gmra.mrb[14].mxu1 %v966_v25 }
 0x103   : > { %1332 = vmatprep.mubr.f32.mxu0 %v2903_v28  ;;  %1671 = vmatprep.mubr.f32.mxu1 %v2903_v28 }
 0x104   : > { %v990_v2 = vpop.permute.xlu1 %989 }
 0x106   : > { %2049 = vmatmul.mubr.msk.f32.vlgmr.msra.gmra.mrb[0].mxu0 %vm1017_vm0, %v933_v27  ;;  %2057 = vmatmul.mubr.msk.f32.vlgmr.msra.gmra.mrb[0].mxu1 %vm1017_vm0, %v933_v27 }
 0x107   : > { %1338 = vmatprep.mubr.f32.mxu0 %v2903_v28  ;;  %1677 = vmatprep.mubr.f32.mxu1 %v2903_v28 }
 0x10a   : > { %2050 = vmatmul.mubr.msk.f32.gmra.mrb[2].mxu0 %vm1017_vm0, %v938_v29  ;;  %2058 = vmatmul.mubr.msk.f32.gmra.mrb[2].mxu1 %vm1017_vm0, %v938_v29 }
 0x10b   : > { %1344 = vmatprep.mubr.f32.mxu0 %v2903_v28  ;;  %1683 = vmatprep.mubr.f32.mxu1 %v2903_v28 }
 0x10e   : > { %2051 = vmatmul.mubr.msk.f32.gmra.mrb[4].mxu0 %vm1017_vm0, %v943_v30  ;;  %2059 = vmatmul.mubr.msk.f32.gmra.mrb[4].mxu1 %vm1017_vm0, %v943_v30 }
 0x10f   : > { %1350 = vmatprep.mubr.f32.mxu0 %v2903_v28  ;;  %1689 = vmatprep.mubr.f32.mxu1 %v2903_v28 }
 0x112   : > { %2052 = vmatmul.mubr.msk.f32.gmra.mrb[6].mxu0 %vm1017_vm0, %v948_v31  ;;  %2060 = vmatmul.mubr.msk.f32.gmra.mrb[6].mxu1 %vm1017_vm0, %v948_v31 }
 0x113   : > { %1356 = vmatprep.mubr.f32.mxu0 %v2903_v28  ;;  %1695 = vmatprep.mubr.f32.mxu1 %v2903_v28 }
 0x116   : > { %2053 = vmatmul.mubr.msk.f32.gmra.mrb[8].mxu0 %vm1017_vm0, %v953_v33  ;;  %2061 = vmatmul.mubr.msk.f32.gmra.mrb[8].mxu1 %vm1017_vm0, %v953_v33 }
 0x117   : > { %1362 = vmatprep.mubr.f32.mxu0 %v2903_v28  ;;  %1701 = vmatprep.mubr.f32.mxu1 %v2903_v28 }
 0x11a   : > { %2054 = vmatmul.mubr.msk.f32.gmra.mrb[10].mxu0 %vm1017_vm0, %v958_v34  ;;  %2062 = vmatmul.mubr.msk.f32.gmra.mrb[10].mxu1 %vm1017_vm0, %v958_v34 }
 0x11b   : > { %1368 = vmatprep.mubr.f32.mxu0 %v2903_v28  ;;  %1707 = vmatprep.mubr.f32.mxu1 %v2903_v28 }
 0x11e   : > { %2055 = vmatmul.mubr.msk.f32.gmra.mrb[12].mxu0 %vm1017_vm0, %v963_v36  ;;  %2063 = vmatmul.mubr.msk.f32.gmra.mrb[12].mxu1 %vm1017_vm0, %v963_v36 }
 0x11f   : > { %1374 = vmatprep.mubr.f32.mxu0 %v2903_v28  ;;  %1713 = vmatprep.mubr.f32.mxu1 %v2903_v28 }
 0x122   : > { %2056 = vmatmul.mubr.msk.f32.gmra.mrb[14].mxu0 %vm1017_vm0, %v968_v37  ;;  %2064 = vmatmul.mubr.msk.f32.gmra.mrb[14].mxu1 %vm1017_vm0, %v968_v37 }
 0x124   : > { %v980_v38 = vpop.permute.xlu0 %979 }
 0x145   : > { %v985_v49 = vpop.permute.xlu0 %984  ;;  %v995_v26 = vpop.permute.xlu1 %994 }
 0x1d9   : > { %v1334_v39 = vpop.f32.mrb[0].mxu0  ;;  %v1673_v40 = vpop.f32.mrb[0].mxu1 }
 0x1da   : > { %v2392_v41 = vadd.f32 %v1334_v39, %v980_v38  ;;  %v2408_v42 = vadd.f32 %v1673_v40, %v980_v38  ;;  %v1336_v43 = vpop.f32.mrb[1].mxu0  ;;  %v1675_v44 = vpop.f32.mrb[1].mxu1 }
 0x1db   : > { %v2393_v45 = vadd.f32 %v1336_v43, %v980_v38  ;;  %v2409_v46 = vadd.f32 %v1675_v44, %v980_v38 }
 0x1dc   : > { %vm1720_vm1 = vcmp.gt.f32.partialorder %v2392_v41, 0.0  ;;  %v1752_v47 = vmul.f32 0.1, %v2392_v41  ;;  %vm1722_vm2 = vcmp.gt.f32.partialorder %v2408_v42, 0.0  ;;  %v1754_v48 = vmul.f32 0.1, %v2408_v42 }
 0x1dd   : > { %vm1721_vm3 = vcmp.gt.f32.partialorder %v2393_v45, 0.0  ;;  %v1753_v50 = vmul.f32 0.1, %v2393_v45  ;;  %vm1723_vm4 = vcmp.gt.f32.partialorder %v2409_v46, 0.0  ;;  %v1755_v51 = vmul.f32 0.1, %v2409_v46 }
 0x1de   : > { %v1784_v52 = vsel %vm1720_vm1, %v2392_v41, %v1752_v47  ;;  %v1786_v53 = vsel %vm1722_vm2, %v2408_v42, %v1754_v48  ;;  %v1340_v54 = vpop.f32.mrb[2].mxu0  ;;  %v1679_v55 = vpop.f32.mrb[2].mxu1 }
 0x1df   : > { %v1785_v56 = vsel %vm1721_vm3, %v2393_v45, %v1753_v50  ;;  %v1787_v57 = vsel %vm1723_vm4, %v2409_v46, %v1755_v51  ;;  %v2394_v58 = vadd.f32 %v1340_v54, %v985_v49  ;;  %v2410_v59 = vadd.f32 %v1679_v55, %v985_v49  ;;  %v1342_v60 = vpop.f32.mrb[3].mxu0  ;;  %v1681_v61 = vpop.f32.mrb[3].mxu1 }
 0x1e0   : > { %v2087_v62 = vpack.c.bf16 %v1785_v56, %v1784_v52  ;;  %v2088_v63 = vpack.c.bf16 %v1787_v57, %v1786_v53  ;;  %v2395_v0 = vadd.f32 %v1342_v60, %v985_v49  ;;  %v2411_v1 = vadd.f32 %v1681_v61, %v985_v49  ;;  %v1000_v47 = vpop.permute.xlu0 %999  ;;  %v1005_v50 = vpop.permute.xlu1 %1004 }
 0x1e1   : > { %vm1724_vm5 = vcmp.gt.f32.partialorder %v2394_v58, 0.0  ;;  %v1756_v3 = vmul.f32 0.1, %v2394_v58  ;;  %vm1726_vm6 = vcmp.gt.f32.partialorder %v2410_v59, 0.0  ;;  %v1758_v4 = vmul.f32 0.1, %v2410_v59 }
 0x1e2   : > { %1912 = vst [vmem:[%s3520_s12] sm:$0xff] %v2087_v62  ;;  %1913 = vst [vmem:[%s3520_s12 + $0x8] sm:$0xff] %v2088_v63  ;;  %vm1725_vm7 = vcmp.gt.f32.partialorder %v2395_v0, 0.0  ;;  %v1757_v5 = vmul.f32 0.1, %v2395_v0  ;;  %vm1727_vm8 = vcmp.gt.f32.partialorder %v2411_v1, 0.0  ;;  %v1346_v9 = vpop.f32.mrb[4].mxu0 }
 0x1e3   : > { %v1759_v6 = vmul.f32 0.1, %v2411_v1  ;;  %v1788_v7 = vsel %vm1724_vm5, %v2394_v58, %v1756_v3  ;;  %v1790_v8 = vsel %vm1726_vm6, %v2410_v59, %v1758_v4  ;;  %v1685_v10 = vpop.f32.mrb[4].mxu1  ;;  %v2396_v13 = vadd.f32 %v1346_v9, %v990_v2  ;;  %v1348_v15 = vpop.f32.mrb[5].mxu0 }
 0x1e4   : > { %v1789_v11 = vsel %vm1725_vm7, %v2395_v0, %v1757_v5  ;;  %v2412_v14 = vadd.f32 %v1685_v10, %v990_v2  ;;  %v1687_v17 = vpop.f32.mrb[5].mxu1  ;;  %v2397_v20 = vadd.f32 %v1348_v15, %v990_v2 }
 0x1e5   : > { %v1791_v12 = vsel %vm1727_vm8, %v2411_v1, %v1759_v6  ;;  %v2089_v18 = vpack.c.bf16 %v1789_v11, %v1788_v7  ;;  %v2413_v21 = vadd.f32 %v1687_v17, %v990_v2  ;;  %v1352_v22 = vpop.f32.mrb[6].mxu0  ;;  %v1691_v23 = vpop.f32.mrb[6].mxu1  ;;  %vm1728_vm9 = vcmp.gt.f32.partialorder %v2396_v13, 0.0 }
 0x1e6   : > { %v2090_v19 = vpack.c.bf16 %v1791_v12, %v1790_v8  ;;  %v1760_v24 = vmul.f32 0.1, %v2396_v13  ;;  %vm1730_vm10 = vcmp.gt.f32.partialorder %v2412_v14, 0.0  ;;  %v1762_v25 = vmul.f32 0.1, %v2412_v14  ;;  %v1354_v32 = vpop.f32.mrb[7].mxu0 }
 0x1e7   : > { %1914 = vst [vmem:[%s3520_s12 + $0x10] sm:$0xff] %v2089_v18  ;;  %vm1729_vm11 = vcmp.gt.f32.partialorder %v2397_v20, 0.0  ;;  %v1761_v27 = vmul.f32 0.1, %v2397_v20  ;;  %vm1731_vm12 = vcmp.gt.f32.partialorder %v2413_v21, 0.0  ;;  %v2398_v30 = vadd.f32 %v1352_v22, %v995_v26  ;;  %v1693_v33 = vpop.f32.mrb[7].mxu1 }
 0x1e8   : > { %1915 = vst [vmem:[%s3520_s12 + $0x18] sm:$0xff] %v2090_v19  ;;  %v1763_v28 = vmul.f32 0.1, %v2413_v21  ;;  %v1792_v29 = vsel %vm1728_vm9, %v2396_v13, %v1760_v24  ;;  %v1794_v16 = vsel %vm1730_vm10, %v2412_v14, %v1762_v25  ;;  %v2414_v31 = vadd.f32 %v1691_v23, %v995_v26 }
 0x1e9   : > { %v1793_v34 = vsel %vm1729_vm11, %v2397_v20, %v1761_v27  ;;  %v2399_v36 = vadd.f32 %v1354_v32, %v995_v26  ;;  %v2415_v37 = vadd.f32 %v1693_v33, %v995_v26  ;;  %v1358_v38 = vpop.f32.mrb[8].mxu0  ;;  %v1697_v39 = vpop.f32.mrb[8].mxu1  ;;  %vm1732_vm13 = vcmp.gt.f32.partialorder %v2398_v30, 0.0 }
 0x1ea   : > { %v1795_v35 = vsel %vm1731_vm12, %v2413_v21, %v1763_v28  ;;  %v2091_v40 = vpack.c.bf16 %v1793_v34, %v1792_v29  ;;  %v1764_v42 = vmul.f32 0.1, %v2398_v30  ;;  %v1360_v43 = vpop.f32.mrb[9].mxu0  ;;  %v1699_v44 = vpop.f32.mrb[9].mxu1  ;;  %vm1734_vm14 = vcmp.gt.f32.partialorder %v2414_v31, 0.0 }
 0x1eb   : > { %v2092_v41 = vpack.c.bf16 %v1795_v35, %v1794_v16  ;;  %v1766_v45 = vmul.f32 0.1, %v2414_v31  ;;  %vm1733_vm15 = vcmp.gt.f32.partialorder %v2399_v36, 0.0  ;;  %v1765_v46 = vmul.f32 0.1, %v2399_v36  ;;  %v1015_v20 = vpop.permute.xlu1 %1014  ;;  %v1010_v21 = vpop.permute.xlu0 %1009 }
 0x1ec   : > { %1916 = vst [vmem:[%s3520_s12 + $0x20] sm:$0xff] %v2091_v40  ;;  %v1796_v48 = vsel %vm1732_vm13, %v2398_v30, %v1764_v42  ;;  %vm1735_vm0 = vcmp.gt.f32.partialorder %v2415_v37, 0.0  ;;  %v1767_v49 = vmul.f32 0.1, %v2415_v37  ;;  %v2400_v51 = vadd.f32 %v1358_v38, %v1000_v47 }
 0x1ed   : > { %1917 = vst [vmem:[%s3520_s12 + $0x28] sm:$0xff] %v2092_v41  ;;  %v1798_v52 = vsel %vm1734_vm14, %v2414_v31, %v1766_v45  ;;  %v1797_v53 = vsel %vm1733_vm15, %v2399_v36, %v1765_v46  ;;  %v2416_v54 = vadd.f32 %v1697_v39, %v1000_v47  ;;  %v2401_v55 = vadd.f32 %v1360_v43, %v1000_v47  ;;  %v1364_v56 = vpop.f32.mrb[10].mxu0  ;;  %v1703_v57 = vpop.f32.mrb[10].mxu1 }
 0x1ee   : > { %v2093_v58 = vpack.c.bf16 %v1797_v53, %v1796_v48  ;;  %v1799_v59 = vsel %vm1735_vm0, %v2415_v37, %v1767_v49  ;;  %vm1736_vm1 = vcmp.gt.f32.partialorder %v2400_v51, 0.0  ;;  %v1768_v60 = vmul.f32 0.1, %v2400_v51  ;;  %v1366_v61 = vpop.f32.mrb[11].mxu0  ;;  %v1705_v62 = vpop.f32.mrb[11].mxu1 }
 0x1ef   : > { %v2094_v63 = vpack.c.bf16 %v1799_v59, %v1798_v52  ;;  %vm1738_vm2 = vcmp.gt.f32.partialorder %v2416_v54, 0.0  ;;  %v1770_v0 = vmul.f32 0.1, %v2416_v54  ;;  %vm1737_vm3 = vcmp.gt.f32.partialorder %v2401_v55, 0.0 }
 0x1f0   : > { %1918 = vst [vmem:[%s3520_s12 + $0x30] sm:$0xff] %v2093_v58  ;;  %v1800_v1 = vsel %vm1736_vm1, %v2400_v51, %v1768_v60  ;;  %v1769_v2 = vmul.f32 0.1, %v2401_v55  ;;  %v2417_v3 = vadd.f32 %v1699_v44, %v1000_v47  ;;  %v2402_v4 = vadd.f32 %v1364_v56, %v1005_v50 }
 0x1f1   : > { %1919 = vst [vmem:[%s3520_s12 + $0x38] sm:$0xff] %v2094_v63  ;;  %v1802_v5 = vsel %vm1738_vm2, %v2416_v54, %v1770_v0  ;;  %v2418_v6 = vadd.f32 %v1703_v57, %v1005_v50  ;;  %v2403_v7 = vadd.f32 %v1366_v61, %v1005_v50  ;;  %v2419_v8 = vadd.f32 %v1705_v62, %v1005_v50  ;;  %v1370_v9 = vpop.f32.mrb[12].mxu0  ;;  %v1709_v10 = vpop.f32.mrb[12].mxu1  ;;  %v1950_v62 = vld [vmem:[%s3520_s12] sm:$0xff] (%p2954_p5)  ;;  %v1952_v63 = vld [vmem:[%s3520_s12 + $0x8] sm:$0xff] (%p2954_p5)  ;;  %v1954_v0 = vld [vmem:[%s3520_s12 + $0x10] sm:$0xff] (%p2954_p5) }
 0x1f2   : > { %v1801_v11 = vsel %vm1737_vm3, %v2401_v55, %v1769_v2  ;;  %vm1739_vm4 = vcmp.gt.f32.partialorder %v2417_v3, 0.0  ;;  %v1771_v12 = vmul.f32 0.1, %v2417_v3  ;;  %vm1740_vm5 = vcmp.gt.f32.partialorder %v2402_v4, 0.0  ;;  %v1372_v13 = vpop.f32.mrb[13].mxu0  ;;  %v1711_v14 = vpop.f32.mrb[13].mxu1  ;;  %1951 = vst [vmem:[%s1937_s20] sm:$0xff] (%p2954_p5), %v1950_v62 }
 0x1f3   : > { %v2095_v15 = vpack.c.bf16 %v1801_v11, %v1800_v1  ;;  %v1772_v17 = vmul.f32 0.1, %v2402_v4  ;;  %vm1742_vm6 = vcmp.gt.f32.partialorder %v2418_v6, 0.0  ;;  %v1774_v18 = vmul.f32 0.1, %v2418_v6  ;;  %v1956_v1 = vld [vmem:[%s3520_s12 + $0x18] sm:$0xff] (%p2954_p5) }
 0x1f4   : > { %v1803_v19 = vsel %vm1739_vm4, %v2417_v3, %v1771_v12  ;;  %vm1741_vm7 = vcmp.gt.f32.partialorder %v2403_v7, 0.0  ;;  %v1773_v22 = vmul.f32 0.1, %v2403_v7  ;;  %vm1743_vm8 = vcmp.gt.f32.partialorder %v2419_v8, 0.0  ;;  %v1958_v2 = vld [vmem:[%s3520_s12 + $0x20] sm:$0xff] (%p2954_p5)  ;;  %v1960_v3 = vld [vmem:[%s3520_s12 + $0x28] sm:$0xff] (%p2954_p5) }
 0x1f5   : > { %1920 = vst [vmem:[%s3520_s12 + $0x40] sm:$0xff] %v2095_v15  ;;  %v2096_v23 = vpack.c.bf16 %v1803_v19, %v1802_v5  ;;  %v1804_v24 = vsel %vm1740_vm5, %v2402_v4, %v1772_v17  ;;  %v1806_v25 = vsel %vm1742_vm6, %v2418_v6, %v1774_v18  ;;  %v1775_v26 = vmul.f32 0.1, %v2419_v8  ;;  %v1376_v27 = vpop.f32.mrb[14].mxu0  ;;  %v1715_v28 = vpop.f32.mrb[14].mxu1  ;;  %1953 = vst [vmem:[%s1937_s20 + $0x8] sm:$0xff] (%p2954_p5), %v1952_v63 }
 0x1f6   : > { %v1805_v29 = vsel %vm1741_vm7, %v2403_v7, %v1773_v22  ;;  %v2404_v16 = vadd.f32 %v1370_v9, %v1010_v21  ;;  %v2420_v30 = vadd.f32 %v1709_v10, %v1010_v21  ;;  %v2405_v31 = vadd.f32 %v1372_v13, %v1010_v21  ;;  %v1378_v32 = vpop.f32.mrb[15].mxu0  ;;  %v1717_v33 = vpop.f32.mrb[15].mxu1  ;;  %1955 = vst [vmem:[%s1937_s20 + $0x40] sm:$0xff] (%p2954_p5), %v1954_v0 }
 0x1f7   : > { %1921 = vst [vmem:[%s3520_s12 + $0x48] sm:$0xff] %v2096_v23  ;;  %v2097_v34 = vpack.c.bf16 %v1805_v29, %v1804_v24  ;;  %v1807_v35 = vsel %vm1743_vm8, %v2419_v8, %v1775_v26  ;;  %v2421_v36 = vadd.f32 %v1711_v14, %v1010_v21  ;;  %v2406_v37 = vadd.f32 %v1376_v27, %v1015_v20  ;;  %v1962_v4 = vld [vmem:[%s3520_s12 + $0x30] sm:$0xff] (%p2954_p5) }
 0x1f8   : > { %v2098_v38 = vpack.c.bf16 %v1807_v35, %v1806_v25  ;;  %vm1744_vm9 = vcmp.gt.f32.partialorder %v2404_v16, 0.0  ;;  %v1776_v39 = vmul.f32 0.1, %v2404_v16  ;;  %vm1746_vm10 = vcmp.gt.f32.partialorder %v2420_v30, 0.0  ;;  %1957 = vst [vmem:[%s1937_s20 + $0x48] sm:$0xff] (%p2954_p5), %v1956_v1  ;;  %1959 = vst [vmem:[%s1937_s20 + $0x80] sm:$0xff] (%p2954_p5), %v1958_v2 }
 0x1f9   : > { %1922 = vst [vmem:[%s3520_s12 + $0x50] sm:$0xff] %v2097_v34  ;;  %v1778_v40 = vmul.f32 0.1, %v2420_v30  ;;  %vm1745_vm11 = vcmp.gt.f32.partialorder %v2405_v31, 0.0  ;;  %v1777_v41 = vmul.f32 0.1, %v2405_v31  ;;  %v2422_v47 = vadd.f32 %v1715_v28, %v1015_v20 }
 0x1fa   : > { %vm1747_vm12 = vcmp.gt.f32.partialorder %v2421_v36, 0.0  ;;  %1923 = vst [vmem:[%s3520_s12 + $0x58] sm:$0xff] %v2098_v38  ;;  %v1808_v42 = vsel %vm1744_vm9, %v2404_v16, %v1776_v39  ;;  %v1779_v43 = vmul.f32 0.1, %v2421_v36  ;;  %vm1748_vm13 = vcmp.gt.f32.partialorder %v2406_v37, 0.0  ;;  %1961 = vst [vmem:[%s1937_s20 + $0x88] sm:$0xff] (%p2954_p5), %v1960_v3 }
 0x1fb   : > { %v1780_v44 = vmul.f32 0.1, %v2406_v37  ;;  %v1810_v45 = vsel %vm1746_vm10, %v2420_v30, %v1778_v40  ;;  %v1809_v46 = vsel %vm1745_vm11, %v2405_v31, %v1777_v41  ;;  %v2407_v48 = vadd.f32 %v1378_v32, %v1015_v20  ;;  %v1964_v5 = vld [vmem:[%s3520_s12 + $0x38] sm:$0xff] (%p2954_p5)  ;;  %1963 = vst [vmem:[%s1937_s20 + $0xc0] sm:$0xff] (%p2954_p5), %v1962_v4 }
 0x1fc   : > { %v2099_v49 = vpack.c.bf16 %v1809_v46, %v1808_v42  ;;  %v1811_v50 = vsel %vm1747_vm12, %v2421_v36, %v1779_v43  ;;  %v2423_v51 = vadd.f32 %v1717_v33, %v1015_v20  ;;  %vm1750_vm14 = vcmp.gt.f32.partialorder %v2422_v47, 0.0  ;;  %v1966_v6 = vld [vmem:[%s3520_s12 + $0x40] sm:$0xff] (%p2954_p5)  ;;  %1965 = vst [vmem:[%s1937_s20 + $0xc8] sm:$0xff] (%p2954_p5), %v1964_v5 }
 0x1fd   : > { %v2100_v52 = vpack.c.bf16 %v1811_v50, %v1810_v45  ;;  %v1782_v53 = vmul.f32 0.1, %v2422_v47  ;;  %vm1749_vm15 = vcmp.gt.f32.partialorder %v2407_v48, 0.0  ;;  %v1812_v54 = vsel %vm1748_vm13, %v2406_v37, %v1780_v44  ;;  %1934 = sbr.rel (!%p2954_p5) target bundleno = 524 (0x20c), region = 59  ;;  %1967 = vst [vmem:[%s1937_s20 + $0x100] sm:$0xff] (%p2954_p5), %v1966_v6 }
 0x1fe   : > { %1924 = vst [vmem:[%s3520_s12 + $0x60] sm:$0xff] %v2099_v49  ;;  %v1781_v55 = vmul.f32 0.1, %v2407_v48  ;;  %vm1751_vm0 = vcmp.gt.f32.partialorder %v2423_v51, 0.0  ;;  %v1783_v56 = vmul.f32 0.1, %v2423_v51 }
 0x1ff   : > { %1925 = vst [vmem:[%s3520_s12 + $0x68] sm:$0xff] %v2100_v52  ;;  %v1814_v57 = vsel %vm1750_vm14, %v2422_v47, %v1782_v53  ;;  %v1968_v7 = vld [vmem:[%s3520_s12 + $0x48] sm:$0xff] (%p2954_p5) }
 0x200   : > { %v1813_v58 = vsel %vm1749_vm15, %v2407_v48, %v1781_v55  ;;  %v1815_v59 = vsel %vm1751_vm0, %v2423_v51, %v1783_v56  ;;  %v1970_v8 = vld [vmem:[%s3520_s12 + $0x50] sm:$0xff] (%p2954_p5)  ;;  %1969 = vst [vmem:[%s1937_s20 + $0x108] sm:$0xff] (%p2954_p5), %v1968_v7 }
 0x201   : > { %v2101_v60 = vpack.c.bf16 %v1813_v58, %v1812_v54  ;;  %v2102_v61 = vpack.c.bf16 %v1815_v59, %v1814_v57  ;;  %v1972_v9 = vld [vmem:[%s3520_s12 + $0x58] sm:$0xff] (%p2954_p5)  ;;  %1971 = vst [vmem:[%s1937_s20 + $0x140] sm:$0xff] (%p2954_p5), %v1970_v8 }
 0x202   : > { %1973 = vst [vmem:[%s1937_s20 + $0x148] sm:$0xff] (%p2954_p5), %v1972_v9 }
 0x203   : > { %1926 = vst [vmem:[%s3520_s12 + $0x70] sm:$0xff] %v2101_v60  ;;  %1927 = vst [vmem:[%s3520_s12 + $0x78] sm:$0xff] %v2102_v61 }
 0x205   : > { %v1974_v10 = vld [vmem:[%s3520_s12 + $0x60] sm:$0xff] }
 0x206   : > { %v1976_v11 = vld [vmem:[%s3520_s12 + $0x68] sm:$0xff]  ;;  %1975 = vst [vmem:[%s1937_s20 + $0x180] sm:$0xff] %v1974_v10 }
 0x207   : > { %1977 = vst [vmem:[%s1937_s20 + $0x188] sm:$0xff] %v1976_v11 }
 0x20a   : > { %v1978_v12 = vld [vmem:[%s3520_s12 + $0x70] sm:$0xff]  ;;  %v1980_v13 = vld [vmem:[%s3520_s12 + $0x78] sm:$0xff] }
 0x20b   : > { %1979 = vst [vmem:[%s1937_s20 + $0x1c0] sm:$0xff] %v1978_v12  ;;  %1981 = vst [vmem:[%s1937_s20 + $0x1c8] sm:$0xff] %v1980_v13 }
 0x20c PF: > { %p10_p10 = scmp.ge.s32.totalorder %s2941_s16, 6   ;;  %s3577_s12 = smov %s2896_s13 }
 0x20d   : > { %s3578_s13 = smov %s2952_s19  ;;  %s3579_s14 = smov %s2941_s16 }
 0x20e   :  { %12 = sbr.rel (!%p10_p10) target bundleno = 2 (0x2), region = 113 }

// kernel: forward.17
= control target key start
LH: loop header
LB: loop body
LE: loop exit
PB: predicated region body
PF: predicated region fallthrough
CT: control target
= control target key end

     0   :  { %s2219_s12 = smov 0   ;;  %s2221_s13 = smov 0   ;;  %s2734_s0 = inlined_call_operand.vmem [shape: bf16[576,2048], index: 0, kind: input, shape index: {}]   ;;  %s2735_s1 = inlined_call_operand.vmem [shape: bf16[3,576], index: 1, kind: input, shape index: {}]   ;;  %s2736_s2 = inlined_call_operand.vmem [shape: f32[3,1], index: 2, kind: input, shape index: {}]   ;;  %s2737_s3 = inlined_call_operand.vmem [shape: f32[3,2048], index: 3, kind: output, shape index: {}]  }
   0x1   :  { %s2223_s14 = smov 0  }
   0x2 LB: > { %s1454_s15 = sadd.s32 4294967295, %s2195_s14   ;;  %s2236_s16 = sadd.s32 1, %s2195_s14   ;;  %s2195_s14 = sphi %s2223_s14, %s2740_s14   ;;  %s2191_s13 = sphi %s2221_s13, %s2739_s13   ;;  %s2187_s12 = sphi %s2219_s12, %s2738_s12  }
   0x3   : > { %s17_s17 = ssub.s32 %s2195_s14, %s2236_s16  ;;  %s20_s18 = sadd.s32 1, %s2191_s13 }
   0x4   : > { %p18_p0 = scmp.eq.s32.totalorder %s17_s17, 0  ;;  %p27_p1 = scmp.ne.s32.totalorder %s2191_s13, %s2187_s12 }
   0x5   : > { %p28_p2 = scmp.eq.s32.totalorder %s2195_s14, 0  ;;  %p1457_p4 = scmp.ge.s32.totalorder %s2195_s14, 4 }
   0x6   : > { %s2245_s19 = scalar_select %p18_p0, %s2191_s13, %s20_s18  }
   0x7   : > { %p29_p3 = por %p28_p2, %p27_p1  ;;  %127 = sbr.rel (%p1457_p4) target bundleno = 90 (0x5a), region = 24 }
   0xe   : > { %130 = sbr.rel (!%p29_p3) target bundleno = 90 (0x5a), region = 28  ;;  %s132_s20 = sand.u32 (%p29_p3), 1, %s2191_s13  }
   0xf   : > { %s1467_s21 = sshll.u32 (%p29_p3), %s2195_s14, 4  ;;  %s1912_s22 = smul.u32 (%p29_p3), 1152, %s132_s20 }
  0x10   : > { %s2253_s25 = scalar_lea.vmem (%p29_p3), %s2734_s0, %s1467_s21 }
  0x11   : > { %v150_v0 = vld [vmem:[%s2253_s25] sm:$0xff] (%p29_p3)  ;;  %v152_v1 = vld [vmem:[%s2253_s25 + $0x8] sm:$0xff] (%p29_p3)  ;;  %s2261_s26 = scalar_lea.vmem (%p29_p3), [#allocation2], %s1912_s22 }
  0x12   : > { %v154_v2 = vld [vmem:[%s2253_s25 + $0x40] sm:$0xff] (%p29_p3)  ;;  %v156_v3 = vld [vmem:[%s2253_s25 + $0x48] sm:$0xff] (%p29_p3)  ;;  %151 = vst [vmem:[%s2261_s26] sm:$0xff] (%p29_p3), %v150_v0  ;;  %153 = vst [vmem:[%s2261_s26 + $0x8] sm:$0xff] (%p29_p3), %v152_v1 }
  0x13   : > { %v158_v4 = vld [vmem:[%s2253_s25 + $0x80] sm:$0xff] (%p29_p3)  ;;  %v160_v5 = vld [vmem:[%s2253_s25 + $0x88] sm:$0xff] (%p29_p3)  ;;  %155 = vst [vmem:[%s2261_s26 + $0x10] sm:$0xff] (%p29_p3), %v154_v2  ;;  %157 = vst [vmem:[%s2261_s26 + $0x18] sm:$0xff] (%p29_p3), %v156_v3 }
  0x14   : > { %159 = vst [vmem:[%s2261_s26 + $0x20] sm:$0xff] (%p29_p3), %v158_v4  ;;  %161 = vst [vmem:[%s2261_s26 + $0x28] sm:$0xff] (%p29_p3), %v160_v5  ;;  %v162_v6 = vld [vmem:[%s2253_s25 + $0xc0] sm:$0xff] (%p29_p3)  ;;  %v164_v7 = vld [vmem:[%s2253_s25 + $0xc8] sm:$0xff] (%p29_p3) }
  0x15   : > { %v166_v8 = vld [vmem:[%s2253_s25 + $0x100] sm:$0xff]  ;;  %163 = vst [vmem:[%s2261_s26 + $0x30] sm:$0xff] %v162_v6  ;;  %165 = vst [vmem:[%s2261_s26 + $0x38] sm:$0xff] %v164_v7  ;;  %v168_v9 = vld [vmem:[%s2253_s25 + $0x108] sm:$0xff] }
  0x16   : > { %167 = vst [vmem:[%s2261_s26 + $0x40] sm:$0xff] %v166_v8  ;;  %v170_v10 = vld [vmem:[%s2253_s25 + $0x140] sm:$0xff]  ;;  %v172_v11 = vld [vmem:[%s2253_s25 + $0x148] sm:$0xff]  ;;  %169 = vst [vmem:[%s2261_s26 + $0x48] sm:$0xff] %v168_v9 }
  0x17   : > { %171 = vst [vmem:[%s2261_s26 + $0x50] sm:$0xff] %v170_v10  ;;  %173 = vst [vmem:[%s2261_s26 + $0x58] sm:$0xff] %v172_v11  ;;  %v174_v12 = vld [vmem:[%s2253_s25 + $0x180] sm:$0xff]  ;;  %v176_v13 = vld [vmem:[%s2253_s25 + $0x188] sm:$0xff] }
  0x18   : > { %v178_v14 = vld [vmem:[%s2253_s25 + $0x1c0] sm:$0xff]  ;;  %175 = vst [vmem:[%s2261_s26 + $0x60] sm:$0xff] %v174_v12  ;;  %177 = vst [vmem:[%s2261_s26 + $0x68] sm:$0xff] %v176_v13  ;;  %v180_v15 = vld [vmem:[%s2253_s25 + $0x1c8] sm:$0xff] }
  0x19   : > { %179 = vst [vmem:[%s2261_s26 + $0x70] sm:$0xff] %v178_v14  ;;  %v182_v16 = vld [vmem:[%s2253_s25 + $0x200] sm:$0xff]  ;;  %v184_v17 = vld [vmem:[%s2253_s25 + $0x208] sm:$0xff]  ;;  %181 = vst [vmem:[%s2261_s26 + $0x78] sm:$0xff] %v180_v15 }
  0x1a   : > { %183 = vst [vmem:[%s2261_s26 + $0x80] sm:$0xff] %v182_v16  ;;  %185 = vst [vmem:[%s2261_s26 + $0x88] sm:$0xff] %v184_v17  ;;  %v186_v18 = vld [vmem:[%s2253_s25 + $0x240] sm:$0xff]  ;;  %v188_v19 = vld [vmem:[%s2253_s25 + $0x248] sm:$0xff] }
  0x1b   : > { %v190_v20 = vld [vmem:[%s2253_s25 + $0x280] sm:$0xff]  ;;  %187 = vst [vmem:[%s2261_s26 + $0x90] sm:$0xff] %v186_v18  ;;  %189 = vst [vmem:[%s2261_s26 + $0x98] sm:$0xff] %v188_v19  ;;  %v192_v21 = vld [vmem:[%s2253_s25 + $0x288] sm:$0xff] }
  0x1c   : > { %191 = vst [vmem:[%s2261_s26 + $0xa0] sm:$0xff] %v190_v20  ;;  %v194_v22 = vld [vmem:[%s2253_s25 + $0x2c0] sm:$0xff]  ;;  %v196_v23 = vld [vmem:[%s2253_s25 + $0x2c8] sm:$0xff]  ;;  %193 = vst [vmem:[%s2261_s26 + $0xa8] sm:$0xff] %v192_v21 }
  0x1d   : > { %195 = vst [vmem:[%s2261_s26 + $0xb0] sm:$0xff] %v194_v22  ;;  %197 = vst [vmem:[%s2261_s26 + $0xb8] sm:$0xff] %v196_v23  ;;  %v198_v24 = vld [vmem:[%s2253_s25 + $0x300] sm:$0xff]  ;;  %v200_v25 = vld [vmem:[%s2253_s25 + $0x308] sm:$0xff] }
  0x1e   : > { %v202_v26 = vld [vmem:[%s2253_s25 + $0x340] sm:$0xff]  ;;  %199 = vst [vmem:[%s2261_s26 + $0xc0] sm:$0xff] %v198_v24  ;;  %201 = vst [vmem:[%s2261_s26 + $0xc8] sm:$0xff] %v200_v25  ;;  %v204_v27 = vld [vmem:[%s2253_s25 + $0x348] sm:$0xff] }
  0x1f   : > { %203 = vst [vmem:[%s2261_s26 + $0xd0] sm:$0xff] %v202_v26  ;;  %v206_v28 = vld [vmem:[%s2253_s25 + $0x380] sm:$0xff]  ;;  %v208_v29 = vld [vmem:[%s2253_s25 + $0x388] sm:$0xff]  ;;  %205 = vst [vmem:[%s2261_s26 + $0xd8] sm:$0xff] %v204_v27 }
  0x20   : > { %207 = vst [vmem:[%s2261_s26 + $0xe0] sm:$0xff] %v206_v28  ;;  %209 = vst [vmem:[%s2261_s26 + $0xe8] sm:$0xff] %v208_v29  ;;  %v210_v30 = vld [vmem:[%s2253_s25 + $0x3c0] sm:$0xff]  ;;  %v212_v31 = vld [vmem:[%s2253_s25 + $0x3c8] sm:$0xff] }
  0x21   : > { %v214_v32 = vld [vmem:[%s2253_s25 + $0x400] sm:$0xff]  ;;  %211 = vst [vmem:[%s2261_s26 + $0xf0] sm:$0xff] %v210_v30  ;;  %213 = vst [vmem:[%s2261_s26 + $0xf8] sm:$0xff] %v212_v31  ;;  %v216_v33 = vld [vmem:[%s2253_s25 + $0x408] sm:$0xff] }
  0x22   : > { %215 = vst [vmem:[%s2261_s26 + $0x100] sm:$0xff] %v214_v32  ;;  %v218_v34 = vld [vmem:[%s2253_s25 + $0x440] sm:$0xff]  ;;  %v220_v35 = vld [vmem:[%s2253_s25 + $0x448] sm:$0xff]  ;;  %217 = vst [vmem:[%s2261_s26 + $0x108] sm:$0xff] %v216_v33 }
  0x23   : > { %219 = vst [vmem:[%s2261_s26 + $0x110] sm:$0xff] %v218_v34  ;;  %221 = vst [vmem:[%s2261_s26 + $0x118] sm:$0xff] %v220_v35  ;;  %v222_v36 = vld [vmem:[%s2253_s25 + $0x480] sm:$0xff]  ;;  %v224_v37 = vld [vmem:[%s2253_s25 + $0x488] sm:$0xff] }
  0x24   : > { %v226_v38 = vld [vmem:[%s2253_s25 + $0x4c0] sm:$0xff]  ;;  %223 = vst [vmem:[%s2261_s26 + $0x120] sm:$0xff] %v222_v36  ;;  %225 = vst [vmem:[%s2261_s26 + $0x128] sm:$0xff] %v224_v37  ;;  %v228_v39 = vld [vmem:[%s2253_s25 + $0x4c8] sm:$0xff] }
  0x25   : > { %227 = vst [vmem:[%s2261_s26 + $0x130] sm:$0xff] %v226_v38  ;;  %v230_v40 = vld [vmem:[%s2253_s25 + $0x500] sm:$0xff]  ;;  %v232_v41 = vld [vmem:[%s2253_s25 + $0x508] sm:$0xff]  ;;  %229 = vst [vmem:[%s2261_s26 + $0x138] sm:$0xff] %v228_v39 }
  0x26   : > { %231 = vst [vmem:[%s2261_s26 + $0x140] sm:$0xff] %v230_v40  ;;  %233 = vst [vmem:[%s2261_s26 + $0x148] sm:$0xff] %v232_v41  ;;  %v234_v42 = vld [vmem:[%s2253_s25 + $0x540] sm:$0xff]  ;;  %v236_v43 = vld [vmem:[%s2253_s25 + $0x548] sm:$0xff] }
  0x27   : > { %v238_v44 = vld [vmem:[%s2253_s25 + $0x580] sm:$0xff]  ;;  %235 = vst [vmem:[%s2261_s26 + $0x150] sm:$0xff] %v234_v42  ;;  %237 = vst [vmem:[%s2261_s26 + $0x158] sm:$0xff] %v236_v43  ;;  %v240_v45 = vld [vmem:[%s2253_s25 + $0x588] sm:$0xff] }
  0x28   : > { %239 = vst [vmem:[%s2261_s26 + $0x160] sm:$0xff] %v238_v44  ;;  %v242_v46 = vld [vmem:[%s2253_s25 + $0x5c0] sm:$0xff]  ;;  %v244_v47 = vld [vmem:[%s2253_s25 + $0x5c8] sm:$0xff]  ;;  %241 = vst [vmem:[%s2261_s26 + $0x168] sm:$0xff] %v240_v45 }
  0x29   : > { %243 = vst [vmem:[%s2261_s26 + $0x170] sm:$0xff] %v242_v46  ;;  %245 = vst [vmem:[%s2261_s26 + $0x178] sm:$0xff] %v244_v47  ;;  %v246_v48 = vld [vmem:[%s2253_s25 + $0x600] sm:$0xff]  ;;  %v248_v49 = vld [vmem:[%s2253_s25 + $0x608] sm:$0xff] }
  0x2a   : > { %v250_v50 = vld [vmem:[%s2253_s25 + $0x640] sm:$0xff]  ;;  %247 = vst [vmem:[%s2261_s26 + $0x180] sm:$0xff] %v246_v48  ;;  %249 = vst [vmem:[%s2261_s26 + $0x188] sm:$0xff] %v248_v49  ;;  %v252_v51 = vld [vmem:[%s2253_s25 + $0x648] sm:$0xff] }
  0x2b   : > { %251 = vst [vmem:[%s2261_s26 + $0x190] sm:$0xff] %v250_v50  ;;  %v254_v52 = vld [vmem:[%s2253_s25 + $0x680] sm:$0xff]  ;;  %v256_v53 = vld [vmem:[%s2253_s25 + $0x688] sm:$0xff]  ;;  %253 = vst [vmem:[%s2261_s26 + $0x198] sm:$0xff] %v252_v51 }
  0x2c   : > { %255 = vst [vmem:[%s2261_s26 + $0x1a0] sm:$0xff] %v254_v52  ;;  %257 = vst [vmem:[%s2261_s26 + $0x1a8] sm:$0xff] %v256_v53  ;;  %v258_v54 = vld [vmem:[%s2253_s25 + $0x6c0] sm:$0xff]  ;;  %v260_v55 = vld [vmem:[%s2253_s25 + $0x6c8] sm:$0xff] }
  0x2d   : > { %v262_v56 = vld [vmem:[%s2253_s25 + $0x700] sm:$0xff]  ;;  %259 = vst [vmem:[%s2261_s26 + $0x1b0] sm:$0xff] %v258_v54  ;;  %261 = vst [vmem:[%s2261_s26 + $0x1b8] sm:$0xff] %v260_v55  ;;  %v264_v57 = vld [vmem:[%s2253_s25 + $0x708] sm:$0xff] }
  0x2e   : > { %263 = vst [vmem:[%s2261_s26 + $0x1c0] sm:$0xff] %v262_v56  ;;  %v266_v58 = vld [vmem:[%s2253_s25 + $0x740] sm:$0xff]  ;;  %v268_v59 = vld [vmem:[%s2253_s25 + $0x748] sm:$0xff]  ;;  %265 = vst [vmem:[%s2261_s26 + $0x1c8] sm:$0xff] %v264_v57 }
  0x2f   : > { %267 = vst [vmem:[%s2261_s26 + $0x1d0] sm:$0xff] %v266_v58  ;;  %269 = vst [vmem:[%s2261_s26 + $0x1d8] sm:$0xff] %v268_v59  ;;  %v270_v60 = vld [vmem:[%s2253_s25 + $0x780] sm:$0xff]  ;;  %v272_v61 = vld [vmem:[%s2253_s25 + $0x788] sm:$0xff] }
  0x30   : > { %v274_v62 = vld [vmem:[%s2253_s25 + $0x7c0] sm:$0xff]  ;;  %271 = vst [vmem:[%s2261_s26 + $0x1e0] sm:$0xff] %v270_v60  ;;  %273 = vst [vmem:[%s2261_s26 + $0x1e8] sm:$0xff] %v272_v61  ;;  %v276_v63 = vld [vmem:[%s2253_s25 + $0x7c8] sm:$0xff] }
  0x31   : > { %275 = vst [vmem:[%s2261_s26 + $0x1f0] sm:$0xff] %v274_v62  ;;  %v278_v0 = vld [vmem:[%s2253_s25 + $0x800] sm:$0xff]  ;;  %v280_v1 = vld [vmem:[%s2253_s25 + $0x808] sm:$0xff]  ;;  %277 = vst [vmem:[%s2261_s26 + $0x1f8] sm:$0xff] %v276_v63 }
  0x32   : > { %279 = vst [vmem:[%s2261_s26 + $0x200] sm:$0xff] %v278_v0  ;;  %281 = vst [vmem:[%s2261_s26 + $0x208] sm:$0xff] %v280_v1  ;;  %v282_v2 = vld [vmem:[%s2253_s25 + $0x840] sm:$0xff]  ;;  %v284_v3 = vld [vmem:[%s2253_s25 + $0x848] sm:$0xff] }
  0x33   : > { %v286_v4 = vld [vmem:[%s2253_s25 + $0x880] sm:$0xff]  ;;  %283 = vst [vmem:[%s2261_s26 + $0x210] sm:$0xff] %v282_v2  ;;  %285 = vst [vmem:[%s2261_s26 + $0x218] sm:$0xff] %v284_v3  ;;  %v288_v5 = vld [vmem:[%s2253_s25 + $0x888] sm:$0xff] }
  0x34   : > { %287 = vst [vmem:[%s2261_s26 + $0x220] sm:$0xff] %v286_v4  ;;  %v290_v6 = vld [vmem:[%s2253_s25 + $0x8c0] sm:$0xff]  ;;  %v292_v7 = vld [vmem:[%s2253_s25 + $0x8c8] sm:$0xff]  ;;  %289 = vst [vmem:[%s2261_s26 + $0x228] sm:$0xff] %v288_v5 }
  0x35   : > { %291 = vst [vmem:[%s2261_s26 + $0x230] sm:$0xff] %v290_v6  ;;  %293 = vst [vmem:[%s2261_s26 + $0x238] sm:$0xff] %v292_v7  ;;  %v294_v8 = vld [vmem:[%s2253_s25 + $0x900] sm:$0xff]  ;;  %v296_v9 = vld [vmem:[%s2253_s25 + $0x908] sm:$0xff] }
  0x36   : > { %v298_v10 = vld [vmem:[%s2253_s25 + $0x940] sm:$0xff]  ;;  %295 = vst [vmem:[%s2261_s26 + $0x240] sm:$0xff] %v294_v8  ;;  %297 = vst [vmem:[%s2261_s26 + $0x248] sm:$0xff] %v296_v9  ;;  %v300_v11 = vld [vmem:[%s2253_s25 + $0x948] sm:$0xff] }
  0x37   : > { %299 = vst [vmem:[%s2261_s26 + $0x250] sm:$0xff] %v298_v10  ;;  %v302_v12 = vld [vmem:[%s2253_s25 + $0x980] sm:$0xff]  ;;  %v304_v13 = vld [vmem:[%s2253_s25 + $0x988] sm:$0xff]  ;;  %301 = vst [vmem:[%s2261_s26 + $0x258] sm:$0xff] %v300_v11 }
  0x38   : > { %303 = vst [vmem:[%s2261_s26 + $0x260] sm:$0xff] %v302_v12  ;;  %305 = vst [vmem:[%s2261_s26 + $0x268] sm:$0xff] %v304_v13  ;;  %v306_v14 = vld [vmem:[%s2253_s25 + $0x9c0] sm:$0xff]  ;;  %v308_v15 = vld [vmem:[%s2253_s25 + $0x9c8] sm:$0xff] }
  0x39   : > { %v310_v16 = vld [vmem:[%s2253_s25 + $0xa00] sm:$0xff]  ;;  %307 = vst [vmem:[%s2261_s26 + $0x270] sm:$0xff] %v306_v14  ;;  %309 = vst [vmem:[%s2261_s26 + $0x278] sm:$0xff] %v308_v15  ;;  %v312_v17 = vld [vmem:[%s2253_s25 + $0xa08] sm:$0xff] }
  0x3a   : > { %311 = vst [vmem:[%s2261_s26 + $0x280] sm:$0xff] %v310_v16  ;;  %v314_v18 = vld [vmem:[%s2253_s25 + $0xa40] sm:$0xff]  ;;  %v316_v19 = vld [vmem:[%s2253_s25 + $0xa48] sm:$0xff]  ;;  %313 = vst [vmem:[%s2261_s26 + $0x288] sm:$0xff] %v312_v17 }
  0x3b   : > { %315 = vst [vmem:[%s2261_s26 + $0x290] sm:$0xff] %v314_v18  ;;  %317 = vst [vmem:[%s2261_s26 + $0x298] sm:$0xff] %v316_v19  ;;  %v318_v20 = vld [vmem:[%s2253_s25 + $0xa80] sm:$0xff]  ;;  %v320_v21 = vld [vmem:[%s2253_s25 + $0xa88] sm:$0xff] }
  0x3c   : > { %v322_v22 = vld [vmem:[%s2253_s25 + $0xac0] sm:$0xff]  ;;  %319 = vst [vmem:[%s2261_s26 + $0x2a0] sm:$0xff] %v318_v20  ;;  %321 = vst [vmem:[%s2261_s26 + $0x2a8] sm:$0xff] %v320_v21  ;;  %v324_v23 = vld [vmem:[%s2253_s25 + $0xac8] sm:$0xff] }
  0x3d   : > { %323 = vst [vmem:[%s2261_s26 + $0x2b0] sm:$0xff] %v322_v22  ;;  %v326_v24 = vld [vmem:[%s2253_s25 + $0xb00] sm:$0xff]  ;;  %v328_v25 = vld [vmem:[%s2253_s25 + $0xb08] sm:$0xff]  ;;  %325 = vst [vmem:[%s2261_s26 + $0x2b8] sm:$0xff] %v324_v23 }
  0x3e   : > { %327 = vst [vmem:[%s2261_s26 + $0x2c0] sm:$0xff] %v326_v24  ;;  %329 = vst [vmem:[%s2261_s26 + $0x2c8] sm:$0xff] %v328_v25  ;;  %v330_v26 = vld [vmem:[%s2253_s25 + $0xb40] sm:$0xff]  ;;  %v332_v27 = vld [vmem:[%s2253_s25 + $0xb48] sm:$0xff] }
  0x3f   : > { %v334_v28 = vld [vmem:[%s2253_s25 + $0xb80] sm:$0xff]  ;;  %331 = vst [vmem:[%s2261_s26 + $0x2d0] sm:$0xff] %v330_v26  ;;  %333 = vst [vmem:[%s2261_s26 + $0x2d8] sm:$0xff] %v332_v27  ;;  %v336_v29 = vld [vmem:[%s2253_s25 + $0xb88] sm:$0xff] }
  0x40   : > { %335 = vst [vmem:[%s2261_s26 + $0x2e0] sm:$0xff] %v334_v28  ;;  %v338_v30 = vld [vmem:[%s2253_s25 + $0xbc0] sm:$0xff]  ;;  %v340_v31 = vld [vmem:[%s2253_s25 + $0xbc8] sm:$0xff]  ;;  %337 = vst [vmem:[%s2261_s26 + $0x2e8] sm:$0xff] %v336_v29 }
  0x41   : > { %339 = vst [vmem:[%s2261_s26 + $0x2f0] sm:$0xff] %v338_v30  ;;  %341 = vst [vmem:[%s2261_s26 + $0x2f8] sm:$0xff] %v340_v31  ;;  %v342_v32 = vld [vmem:[%s2253_s25 + $0xc00] sm:$0xff]  ;;  %v344_v33 = vld [vmem:[%s2253_s25 + $0xc08] sm:$0xff] }
  0x42   : > { %v346_v34 = vld [vmem:[%s2253_s25 + $0xc40] sm:$0xff]  ;;  %343 = vst [vmem:[%s2261_s26 + $0x300] sm:$0xff] %v342_v32  ;;  %345 = vst [vmem:[%s2261_s26 + $0x308] sm:$0xff] %v344_v33  ;;  %v348_v35 = vld [vmem:[%s2253_s25 + $0xc48] sm:$0xff] }
  0x43   : > { %347 = vst [vmem:[%s2261_s26 + $0x310] sm:$0xff] %v346_v34  ;;  %v350_v36 = vld [vmem:[%s2253_s25 + $0xc80] sm:$0xff]  ;;  %v352_v37 = vld [vmem:[%s2253_s25 + $0xc88] sm:$0xff]  ;;  %349 = vst [vmem:[%s2261_s26 + $0x318] sm:$0xff] %v348_v35 }
  0x44   : > { %351 = vst [vmem:[%s2261_s26 + $0x320] sm:$0xff] %v350_v36  ;;  %353 = vst [vmem:[%s2261_s26 + $0x328] sm:$0xff] %v352_v37  ;;  %v354_v38 = vld [vmem:[%s2253_s25 + $0xcc0] sm:$0xff]  ;;  %v356_v39 = vld [vmem:[%s2253_s25 + $0xcc8] sm:$0xff] }
  0x45   : > { %v358_v40 = vld [vmem:[%s2253_s25 + $0xd00] sm:$0xff]  ;;  %355 = vst [vmem:[%s2261_s26 + $0x330] sm:$0xff] %v354_v38  ;;  %357 = vst [vmem:[%s2261_s26 + $0x338] sm:$0xff] %v356_v39  ;;  %v360_v41 = vld [vmem:[%s2253_s25 + $0xd08] sm:$0xff] }
  0x46   : > { %359 = vst [vmem:[%s2261_s26 + $0x340] sm:$0xff] %v358_v40  ;;  %v362_v42 = vld [vmem:[%s2253_s25 + $0xd40] sm:$0xff]  ;;  %v364_v43 = vld [vmem:[%s2253_s25 + $0xd48] sm:$0xff]  ;;  %361 = vst [vmem:[%s2261_s26 + $0x348] sm:$0xff] %v360_v41 }
  0x47   : > { %363 = vst [vmem:[%s2261_s26 + $0x350] sm:$0xff] %v362_v42  ;;  %365 = vst [vmem:[%s2261_s26 + $0x358] sm:$0xff] %v364_v43  ;;  %v366_v44 = vld [vmem:[%s2253_s25 + $0xd80] sm:$0xff]  ;;  %v368_v45 = vld [vmem:[%s2253_s25 + $0xd88] sm:$0xff] }
  0x48   : > { %v370_v46 = vld [vmem:[%s2253_s25 + $0xdc0] sm:$0xff]  ;;  %367 = vst [vmem:[%s2261_s26 + $0x360] sm:$0xff] %v366_v44  ;;  %369 = vst [vmem:[%s2261_s26 + $0x368] sm:$0xff] %v368_v45  ;;  %v372_v47 = vld [vmem:[%s2253_s25 + $0xdc8] sm:$0xff] }
  0x49   : > { %371 = vst [vmem:[%s2261_s26 + $0x370] sm:$0xff] %v370_v46  ;;  %v374_v48 = vld [vmem:[%s2253_s25 + $0xe00] sm:$0xff]  ;;  %v376_v49 = vld [vmem:[%s2253_s25 + $0xe08] sm:$0xff]  ;;  %373 = vst [vmem:[%s2261_s26 + $0x378] sm:$0xff] %v372_v47 }
  0x4a   : > { %375 = vst [vmem:[%s2261_s26 + $0x380] sm:$0xff] %v374_v48  ;;  %377 = vst [vmem:[%s2261_s26 + $0x388] sm:$0xff] %v376_v49  ;;  %v378_v50 = vld [vmem:[%s2253_s25 + $0xe40] sm:$0xff]  ;;  %v380_v51 = vld [vmem:[%s2253_s25 + $0xe48] sm:$0xff] }
  0x4b   : > { %v382_v52 = vld [vmem:[%s2253_s25 + $0xe80] sm:$0xff]  ;;  %379 = vst [vmem:[%s2261_s26 + $0x390] sm:$0xff] %v378_v50  ;;  %381 = vst [vmem:[%s2261_s26 + $0x398] sm:$0xff] %v380_v51  ;;  %v384_v53 = vld [vmem:[%s2253_s25 + $0xe88] sm:$0xff] }
  0x4c   : > { %383 = vst [vmem:[%s2261_s26 + $0x3a0] sm:$0xff] %v382_v52  ;;  %v386_v54 = vld [vmem:[%s2253_s25 + $0xec0] sm:$0xff]  ;;  %v388_v55 = vld [vmem:[%s2253_s25 + $0xec8] sm:$0xff]  ;;  %385 = vst [vmem:[%s2261_s26 + $0x3a8] sm:$0xff] %v384_v53 }
  0x4d   : > { %387 = vst [vmem:[%s2261_s26 + $0x3b0] sm:$0xff] %v386_v54  ;;  %389 = vst [vmem:[%s2261_s26 + $0x3b8] sm:$0xff] %v388_v55  ;;  %v390_v56 = vld [vmem:[%s2253_s25 + $0xf00] sm:$0xff]  ;;  %v392_v57 = vld [vmem:[%s2253_s25 + $0xf08] sm:$0xff] }
  0x4e   : > { %v394_v58 = vld [vmem:[%s2253_s25 + $0xf40] sm:$0xff]  ;;  %391 = vst [vmem:[%s2261_s26 + $0x3c0] sm:$0xff] %v390_v56  ;;  %393 = vst [vmem:[%s2261_s26 + $0x3c8] sm:$0xff] %v392_v57  ;;  %v396_v59 = vld [vmem:[%s2253_s25 + $0xf48] sm:$0xff] }
  0x4f   : > { %395 = vst [vmem:[%s2261_s26 + $0x3d0] sm:$0xff] %v394_v58  ;;  %v398_v60 = vld [vmem:[%s2253_s25 + $0xf80] sm:$0xff]  ;;  %v400_v61 = vld [vmem:[%s2253_s25 + $0xf88] sm:$0xff]  ;;  %397 = vst [vmem:[%s2261_s26 + $0x3d8] sm:$0xff] %v396_v59 }
  0x50   : > { %399 = vst [vmem:[%s2261_s26 + $0x3e0] sm:$0xff] %v398_v60  ;;  %401 = vst [vmem:[%s2261_s26 + $0x3e8] sm:$0xff] %v400_v61  ;;  %v402_v62 = vld [vmem:[%s2253_s25 + $0xfc0] sm:$0xff]  ;;  %v404_v63 = vld [vmem:[%s2253_s25 + $0xfc8] sm:$0xff] }
  0x51   : > { %v406_v0 = vld [vmem:[%s2253_s25 + $0x1000] sm:$0xff]  ;;  %403 = vst [vmem:[%s2261_s26 + $0x3f0] sm:$0xff] %v402_v62  ;;  %405 = vst [vmem:[%s2261_s26 + $0x3f8] sm:$0xff] %v404_v63  ;;  %v408_v1 = vld [vmem:[%s2253_s25 + $0x1008] sm:$0xff] }
  0x52   : > { %407 = vst [vmem:[%s2261_s26 + $0x400] sm:$0xff] %v406_v0  ;;  %v410_v2 = vld [vmem:[%s2253_s25 + $0x1040] sm:$0xff]  ;;  %v412_v3 = vld [vmem:[%s2253_s25 + $0x1048] sm:$0xff]  ;;  %409 = vst [vmem:[%s2261_s26 + $0x408] sm:$0xff] %v408_v1 }
  0x53   : > { %411 = vst [vmem:[%s2261_s26 + $0x410] sm:$0xff] %v410_v2  ;;  %413 = vst [vmem:[%s2261_s26 + $0x418] sm:$0xff] %v412_v3  ;;  %v414_v4 = vld [vmem:[%s2253_s25 + $0x1080] sm:$0xff]  ;;  %v416_v5 = vld [vmem:[%s2253_s25 + $0x1088] sm:$0xff] }
  0x54   : > { %v418_v6 = vld [vmem:[%s2253_s25 + $0x10c0] sm:$0xff]  ;;  %415 = vst [vmem:[%s2261_s26 + $0x420] sm:$0xff] %v414_v4  ;;  %417 = vst [vmem:[%s2261_s26 + $0x428] sm:$0xff] %v416_v5  ;;  %v420_v7 = vld [vmem:[%s2253_s25 + $0x10c8] sm:$0xff] }
  0x55   : > { %419 = vst [vmem:[%s2261_s26 + $0x430] sm:$0xff] %v418_v6  ;;  %v422_v8 = vld [vmem:[%s2253_s25 + $0x1100] sm:$0xff]  ;;  %v424_v9 = vld [vmem:[%s2253_s25 + $0x1108] sm:$0xff]  ;;  %421 = vst [vmem:[%s2261_s26 + $0x438] sm:$0xff] %v420_v7 }
  0x56   : > { %423 = vst [vmem:[%s2261_s26 + $0x440] sm:$0xff] %v422_v8  ;;  %425 = vst [vmem:[%s2261_s26 + $0x448] sm:$0xff] %v424_v9  ;;  %v426_v10 = vld [vmem:[%s2253_s25 + $0x1140] sm:$0xff]  ;;  %v428_v11 = vld [vmem:[%s2253_s25 + $0x1148] sm:$0xff] }
  0x57   : > { %v430_v12 = vld [vmem:[%s2253_s25 + $0x1180] sm:$0xff]  ;;  %427 = vst [vmem:[%s2261_s26 + $0x450] sm:$0xff] %v426_v10  ;;  %429 = vst [vmem:[%s2261_s26 + $0x458] sm:$0xff] %v428_v11  ;;  %v432_v13 = vld [vmem:[%s2253_s25 + $0x1188] sm:$0xff] }
  0x58   : > { %431 = vst [vmem:[%s2261_s26 + $0x460] sm:$0xff] %v430_v12  ;;  %v434_v14 = vld [vmem:[%s2253_s25 + $0x11c0] sm:$0xff]  ;;  %v436_v15 = vld [vmem:[%s2253_s25 + $0x11c8] sm:$0xff]  ;;  %433 = vst [vmem:[%s2261_s26 + $0x468] sm:$0xff] %v432_v13 }
  0x59   : > { %435 = vst [vmem:[%s2261_s26 + $0x470] sm:$0xff] %v434_v14  ;;  %437 = vst [vmem:[%s2261_s26 + $0x478] sm:$0xff] %v436_v15 }
  0x5a PF: > { %p1460_p5 = scmp.ge.s32.totalorder %s2195_s14, 1  ;;  %p442_p6 = scmp.lt.s32.totalorder %s2195_s14, 5 }
  0x5c   : > { %p443_p7 = pnand %p1460_p5, %p442_p6 }
  0x5d   : > { %s449_s27 = sand.u32 (!%p443_p7), 1, %s2187_s12   ;;  %v2551_v16 = vld [vmem:[%s2735_s1] sm:$0xff] (!%p443_p7)  ;;  %v2197_v45 = vmov (!%p443_p7), 0   ;;  %vm929_vm0 = vcmask (!%p443_p7), 523264   ;;  %s1461_s9 = sshll.u32 (!%p443_p7), %s1454_s15, 2 }
  0x5e   : > { %446 = sbr.rel (%p443_p7) target bundleno = 491 (0x1eb), region = 51  ;;  %v2554_v17 = vunpack.c.l.bf16 (!%p443_p7), %v2551_v16  ;;  %1940 = vset.pattern.permute.xlu0 (!%p443_p7), %v2197_v45  ;;  %p474_p8 = scmp.lt.s32.totalorder (!%p443_p7), %s1461_s9, 15 }
  0x5f   : > { %s1913_s30 = smul.u32 (!%p443_p7), 1152, %s449_s27 }
  0x60   : > { %v925_v18 = vcombine.high (!%p443_p7), %v2554_v17, %v2554_v17 }
  0x61   : > { %s2558_s4 = scalar_lea.vmem (!%p443_p7), [#allocation2], %s1913_s30 }
  0x62   : > { %v1941_v19 = vld [vmem:[%s2558_s4 + $0x4] ss:$16 sps:$4 sm:$0xff] (!%p443_p7)   ;;  %v1943_v20 = vld [vmem:[%s2558_s4 + $0xc] ss:$16 sps:$4 sm:$0xff] (!%p443_p7)   ;;  %996 = vmatprep.mubr.f32.mxu0 (!%p443_p7), %v925_v18  ;;  %1209 = vmatprep.mubr.f32.mxu1 (!%p443_p7), %v925_v18  ;;  %v1945_v21 = vld [vmem:[%s2558_s4] ss:$16 sps:$4 sm:$0xff] (!%p443_p7)  }
  0x63   : > { %1469 = vmatprep.subr.bf16.mxu0 (!%p443_p7), %v1941_v19  ;;  %v1946_v22 = vld [vmem:[%s2558_s4 + $0x8] ss:$16 sps:$4 sm:$0xff] (!%p443_p7)   ;;  %1613 = vmatprep.subr.bf16.mxu1 (!%p443_p7), %v1943_v20  ;;  %v1947_v23 = vld [vmem:[%s2558_s4 + $0x24] ss:$16 sps:$4 sm:$0xff] (!%p443_p7)   ;;  %v1949_v24 = vld [vmem:[%s2558_s4 + $0x2c] ss:$16 sps:$4 sm:$0xff] (!%p443_p7)  }
  0x64   : > { %1471 = vmatpush1.bf16.msra.mxu0 (!%p443_p7), %v1945_v21  ;;  %1615 = vmatpush1.bf16.msra.mxu1 (!%p443_p7), %v1946_v22  ;;  %v1951_v25 = vld [vmem:[%s2558_s4 + $0x20] ss:$16 sps:$4 sm:$0xff] (!%p443_p7)   ;;  %v1952_v26 = vld [vmem:[%s2558_s4 + $0x28] ss:$16 sps:$4 sm:$0xff] (!%p443_p7)   ;;  %v1953_v27 = vld [vmem:[%s2558_s4 + $0x44] ss:$16 sps:$4 sm:$0xff] (!%p443_p7)  }
  0x65   : > { %1473 = vmatprep.subr.bf16.mxu0 %v1947_v23  ;;  %1617 = vmatprep.subr.bf16.mxu1 %v1949_v24  ;;  %v1955_v28 = vld [vmem:[%s2558_s4 + $0x4c] ss:$16 sps:$4 sm:$0xff]   ;;  %v1957_v29 = vld [vmem:[%s2558_s4 + $0x40] ss:$16 sps:$4 sm:$0xff]   ;;  %v1958_v30 = vld [vmem:[%s2558_s4 + $0x48] ss:$16 sps:$4 sm:$0xff]   ;;  %v2627_v24 = vunpack.c.h.bf16 %v2551_v16 }
  0x66   : > { %v1959_v31 = vld [vmem:[%s2558_s4 + $0x64] ss:$16 sps:$4 sm:$0xff]   ;;  %v1961_v32 = vld [vmem:[%s2558_s4 + $0x6c] ss:$16 sps:$4 sm:$0xff]   ;;  %v1963_v33 = vld [vmem:[%s2558_s4 + $0x60] ss:$16 sps:$4 sm:$0xff]  }
  0x67   : > { %v1964_v34 = vld [vmem:[%s2558_s4 + $0x68] ss:$16 sps:$4 sm:$0xff]   ;;  %v1965_v35 = vld [vmem:[%s2558_s4 + $0x84] ss:$16 sps:$4 sm:$0xff]   ;;  %v1967_v36 = vld [vmem:[%s2558_s4 + $0x8c] ss:$16 sps:$4 sm:$0xff]  }
  0x68   : > { %1475 = vmatpush1.bf16.msra.mxu0 %v1951_v25  ;;  %1619 = vmatpush1.bf16.msra.mxu1 %v1952_v26  ;;  %v1969_v37 = vld [vmem:[%s2558_s4 + $0x80] ss:$16 sps:$4 sm:$0xff]   ;;  %v1970_v38 = vld [vmem:[%s2558_s4 + $0x88] ss:$16 sps:$4 sm:$0xff]   ;;  %v1971_v39 = vld [vmem:[%s2558_s4 + $0xa4] ss:$16 sps:$4 sm:$0xff]  }
  0x69   : > { %1477 = vmatprep.subr.bf16.mxu0 %v1953_v27  ;;  %1621 = vmatprep.subr.bf16.mxu1 %v1955_v28  ;;  %v1973_v40 = vld [vmem:[%s2558_s4 + $0xac] ss:$16 sps:$4 sm:$0xff]   ;;  %v1975_v41 = vld [vmem:[%s2558_s4 + $0xa0] ss:$16 sps:$4 sm:$0xff]   ;;  %v1976_v42 = vld [vmem:[%s2558_s4 + $0xa8] ss:$16 sps:$4 sm:$0xff]  }
  0x6a   : > { %v1977_v43 = vld [vmem:[%s2558_s4 + $0xc4] ss:$16 sps:$4 sm:$0xff]   ;;  %v1979_v44 = vld [vmem:[%s2558_s4 + $0xcc] ss:$16 sps:$4 sm:$0xff]   ;;  %v1981_v46 = vld [vmem:[%s2558_s4 + $0xc0] ss:$16 sps:$4 sm:$0xff]  }
  0x6b   : > { %v1982_v47 = vld [vmem:[%s2558_s4 + $0xc8] ss:$16 sps:$4 sm:$0xff]   ;;  %v1983_v48 = vld [vmem:[%s2558_s4 + $0xe4] ss:$16 sps:$4 sm:$0xff]   ;;  %v1985_v49 = vld [vmem:[%s2558_s4 + $0xec] ss:$16 sps:$4 sm:$0xff]  }
  0x6c   : > { %1479 = vmatpush1.bf16.msra.mxu0 %v1957_v29  ;;  %1623 = vmatpush1.bf16.msra.mxu1 %v1958_v30  ;;  %v1987_v50 = vld [vmem:[%s2558_s4 + $0xe0] ss:$16 sps:$4 sm:$0xff]   ;;  %v1988_v51 = vld [vmem:[%s2558_s4 + $0xe8] ss:$16 sps:$4 sm:$0xff]   ;;  %v1989_v52 = vld [vmem:[%s2558_s4 + $0x104] ss:$16 sps:$4 sm:$0xff]   ;;  %v926_v29 = vcombine.high %v2627_v24, %v2627_v24 }
  0x6d   : > { %1481 = vmatprep.subr.bf16.mxu0 %v1959_v31  ;;  %1625 = vmatprep.subr.bf16.mxu1 %v1961_v32  ;;  %v1991_v53 = vld [vmem:[%s2558_s4 + $0x10c] ss:$16 sps:$4 sm:$0xff]   ;;  %v1993_v54 = vld [vmem:[%s2558_s4 + $0x100] ss:$16 sps:$4 sm:$0xff]   ;;  %v1994_v55 = vld [vmem:[%s2558_s4 + $0x108] ss:$16 sps:$4 sm:$0xff]  }
  0x6e   : > { %v1995_v56 = vld [vmem:[%s2558_s4 + $0x124] ss:$16 sps:$4 sm:$0xff]   ;;  %v1997_v57 = vld [vmem:[%s2558_s4 + $0x12c] ss:$16 sps:$4 sm:$0xff]   ;;  %v1999_v58 = vld [vmem:[%s2558_s4 + $0x120] ss:$16 sps:$4 sm:$0xff]  }
  0x6f   : > { %v2000_v59 = vld [vmem:[%s2558_s4 + $0x128] ss:$16 sps:$4 sm:$0xff]   ;;  %v2001_v60 = vld [vmem:[%s2558_s4 + $0x144] ss:$16 sps:$4 sm:$0xff]   ;;  %v2003_v61 = vld [vmem:[%s2558_s4 + $0x14c] ss:$16 sps:$4 sm:$0xff]  }
  0x70   : > { %1483 = vmatpush1.bf16.msra.mxu0 %v1963_v33  ;;  %1627 = vmatpush1.bf16.msra.mxu1 %v1964_v34  ;;  %v2005_v62 = vld [vmem:[%s2558_s4 + $0x140] ss:$16 sps:$4 sm:$0xff]   ;;  %v2006_v63 = vld [vmem:[%s2558_s4 + $0x148] ss:$16 sps:$4 sm:$0xff]   ;;  %v2007_v0 = vld [vmem:[%s2558_s4 + $0x164] ss:$16 sps:$4 sm:$0xff]  }
  0x71   : > { %1485 = vmatprep.subr.bf16.mxu0 %v1965_v35  ;;  %1629 = vmatprep.subr.bf16.mxu1 %v1967_v36  ;;  %v2009_v1 = vld [vmem:[%s2558_s4 + $0x16c] ss:$16 sps:$4 sm:$0xff]   ;;  %v2011_v2 = vld [vmem:[%s2558_s4 + $0x160] ss:$16 sps:$4 sm:$0xff]   ;;  %v2012_v3 = vld [vmem:[%s2558_s4 + $0x168] ss:$16 sps:$4 sm:$0xff]  }
  0x72   : > { %v2013_v4 = vld [vmem:[%s2558_s4 + $0x184] ss:$16 sps:$4 sm:$0xff]   ;;  %v2015_v5 = vld [vmem:[%s2558_s4 + $0x18c] ss:$16 sps:$4 sm:$0xff]   ;;  %v2017_v6 = vld [vmem:[%s2558_s4 + $0x180] ss:$16 sps:$4 sm:$0xff]  }
  0x73   : > { %v2018_v7 = vld [vmem:[%s2558_s4 + $0x188] ss:$16 sps:$4 sm:$0xff]   ;;  %v2019_v8 = vld [vmem:[%s2558_s4 + $0x1a4] ss:$16 sps:$4 sm:$0xff]   ;;  %v2021_v9 = vld [vmem:[%s2558_s4 + $0x1ac] ss:$16 sps:$4 sm:$0xff]  }
  0x74   : > { %1487 = vmatpush1.bf16.msra.mxu0 %v1969_v37  ;;  %1631 = vmatpush1.bf16.msra.mxu1 %v1970_v38  ;;  %v2023_v10 = vld [vmem:[%s2558_s4 + $0x1a0] ss:$16 sps:$4 sm:$0xff]   ;;  %v2024_v11 = vld [vmem:[%s2558_s4 + $0x1a8] ss:$16 sps:$4 sm:$0xff]   ;;  %v2025_v12 = vld [vmem:[%s2558_s4 + $0x1c4] ss:$16 sps:$4 sm:$0xff]  }
  0x75   : > { %1489 = vmatprep.subr.bf16.mxu0 %v1971_v39  ;;  %1633 = vmatprep.subr.bf16.mxu1 %v1973_v40  ;;  %v2027_v13 = vld [vmem:[%s2558_s4 + $0x1cc] ss:$16 sps:$4 sm:$0xff]   ;;  %v2029_v14 = vld [vmem:[%s2558_s4 + $0x1c0] ss:$16 sps:$4 sm:$0xff]   ;;  %v2030_v15 = vld [vmem:[%s2558_s4 + $0x1c8] ss:$16 sps:$4 sm:$0xff]  }
  0x76   : > { %v2031_v18 = vld [vmem:[%s2558_s4 + $0x1e4] ss:$16 sps:$4 sm:$0xff]   ;;  %v2033_v19 = vld [vmem:[%s2558_s4 + $0x1ec] ss:$16 sps:$4 sm:$0xff]   ;;  %v2035_v20 = vld [vmem:[%s2558_s4 + $0x1e0] ss:$16 sps:$4 sm:$0xff]  }
  0x77   : > { %v2036_v21 = vld [vmem:[%s2558_s4 + $0x1e8] ss:$16 sps:$4 sm:$0xff]   ;;  %v2037_v22 = vld [vmem:[%s2558_s4 + $0x204] ss:$16 sps:$4 sm:$0xff]   ;;  %v2040_v23 = vld [vmem:[%s2558_s4 + $0x20c] ss:$16 sps:$4 sm:$0xff]  }
  0x78   : > { %1491 = vmatpush1.bf16.msra.mxu0 %v1975_v41  ;;  %1635 = vmatpush1.bf16.msra.mxu1 %v1976_v42  ;;  %v2039_v25 = vld [vmem:[%s2558_s4 + $0x200] ss:$16 sps:$4 sm:$0xff]   ;;  %v2042_v26 = vld [vmem:[%s2558_s4 + $0x208] ss:$16 sps:$4 sm:$0xff]   ;;  %v2043_v27 = vld [vmem:[%s2558_s4 + $0x224] ss:$16 sps:$4 sm:$0xff]  }
  0x79   : > { %1493 = vmatprep.subr.bf16.mxu0 %v1977_v43  ;;  %1637 = vmatprep.subr.bf16.mxu1 %v1979_v44  ;;  %v2046_v28 = vld [vmem:[%s2558_s4 + $0x22c] ss:$16 sps:$4 sm:$0xff]   ;;  %v2045_v16 = vld [vmem:[%s2558_s4 + $0x220] ss:$16 sps:$4 sm:$0xff]   ;;  %v2048_v30 = vld [vmem:[%s2558_s4 + $0x228] ss:$16 sps:$4 sm:$0xff]  }
  0x7a   : > { %v2049_v31 = vld [vmem:[%s2558_s4 + $0x244] ss:$16 sps:$4 sm:$0xff]   ;;  %v2052_v32 = vld [vmem:[%s2558_s4 + $0x24c] ss:$16 sps:$4 sm:$0xff]   ;;  %v2051_v33 = vld [vmem:[%s2558_s4 + $0x240] ss:$16 sps:$4 sm:$0xff]  }
  0x7b   : > { %v2054_v34 = vld [vmem:[%s2558_s4 + $0x248] ss:$16 sps:$4 sm:$0xff]   ;;  %v2058_v35 = vld [vmem:[%s2558_s4 + $0x26c] ss:$16 sps:$4 sm:$0xff]   ;;  %v2057_v36 = vld [vmem:[%s2558_s4 + $0x260] ss:$16 sps:$4 sm:$0xff]  }
  0x7c   : > { %1495 = vmatpush1.bf16.msra.mxu0 %v1981_v46  ;;  %1639 = vmatpush1.bf16.msra.mxu1 %v1982_v47  ;;  %v2060_v37 = vld [vmem:[%s2558_s4 + $0x268] ss:$16 sps:$4 sm:$0xff]   ;;  %v2061_v38 = vld [vmem:[%s2558_s4 + $0x284] ss:$16 sps:$4 sm:$0xff]   ;;  %v2064_v39 = vld [vmem:[%s2558_s4 + $0x28c] ss:$16 sps:$4 sm:$0xff]  }
  0x7d   : > { %1497 = vmatprep.subr.bf16.mxu0 %v1983_v48  ;;  %1641 = vmatprep.subr.bf16.mxu1 %v1985_v49  ;;  %v2063_v40 = vld [vmem:[%s2558_s4 + $0x280] ss:$16 sps:$4 sm:$0xff]   ;;  %v2066_v41 = vld [vmem:[%s2558_s4 + $0x288] ss:$16 sps:$4 sm:$0xff]   ;;  %v2067_v42 = vld [vmem:[%s2558_s4 + $0x2a4] ss:$16 sps:$4 sm:$0xff]  }
  0x7e   : > { %v2070_v43 = vld [vmem:[%s2558_s4 + $0x2ac] ss:$16 sps:$4 sm:$0xff]   ;;  %v2069_v44 = vld [vmem:[%s2558_s4 + $0x2a0] ss:$16 sps:$4 sm:$0xff]   ;;  %v2072_v45 = vld [vmem:[%s2558_s4 + $0x2a8] ss:$16 sps:$4 sm:$0xff]  }
  0x7f   : > { %v2073_v46 = vld [vmem:[%s2558_s4 + $0x2c4] ss:$16 sps:$4 sm:$0xff]   ;;  %v2076_v47 = vld [vmem:[%s2558_s4 + $0x2cc] ss:$16 sps:$4 sm:$0xff]   ;;  %v2075_v48 = vld [vmem:[%s2558_s4 + $0x2c0] ss:$16 sps:$4 sm:$0xff]  }
  0x80   : > { %1499 = vmatpush1.bf16.msra.mxu0 %v1987_v50  ;;  %1643 = vmatpush1.bf16.msra.mxu1 %v1988_v51  ;;  %v2078_v49 = vld [vmem:[%s2558_s4 + $0x2c8] ss:$16 sps:$4 sm:$0xff]   ;;  %v2079_v50 = vld [vmem:[%s2558_s4 + $0x2e4] ss:$16 sps:$4 sm:$0xff]   ;;  %v2082_v51 = vld [vmem:[%s2558_s4 + $0x2ec] ss:$16 sps:$4 sm:$0xff]  }
  0x81   : > { %1501 = vmatprep.subr.bf16.mxu0 %v1989_v52  ;;  %1645 = vmatprep.subr.bf16.mxu1 %v1991_v53  ;;  %v2081_v52 = vld [vmem:[%s2558_s4 + $0x2e0] ss:$16 sps:$4 sm:$0xff]   ;;  %v2084_v53 = vld [vmem:[%s2558_s4 + $0x2e8] ss:$16 sps:$4 sm:$0xff]   ;;  %s2742_s9 = smov (!%p474_p8, %s1461_s9), 15 }
  0x82   : > { %s1462_s10 = sshll.u32 %s2742_s9, 2 }
  0x83   : > { %s477_s14 = scalar_lea.vmem %s2737_s3, %s1462_s10 }
  0x84   : > { %1503 = vmatpush1.bf16.msra.mxu0 %v1993_v54  ;;  %1647 = vmatpush1.bf16.msra.mxu1 %v1994_v55  ;;  %v2085_v54 = vld [vmem:[%s2558_s4 + $0x304] ss:$16 sps:$4 sm:$0xff]   ;;  %v2088_v55 = vld [vmem:[%s2558_s4 + $0x30c] ss:$16 sps:$4 sm:$0xff]  }
  0x85   : > { %1505 = vmatprep.subr.bf16.mxu0 %v1995_v56  ;;  %1649 = vmatprep.subr.bf16.mxu1 %v1997_v57  ;;  %v2087_v56 = vld [vmem:[%s2558_s4 + $0x300] ss:$16 sps:$4 sm:$0xff]   ;;  %v2090_v57 = vld [vmem:[%s2558_s4 + $0x308] ss:$16 sps:$4 sm:$0xff]  }
  0x88   : > { %1507 = vmatpush1.bf16.msra.mxu0 %v1999_v58  ;;  %1651 = vmatpush1.bf16.msra.mxu1 %v2000_v59  ;;  %v916_v58 = vld [vmem:[%s2736_s2] sm:$0x7]  ;;  %v2091_v59 = vld [vmem:[%s2558_s4 + $0x324] ss:$16 sps:$4 sm:$0xff]  }
  0x89   : > { %1509 = vmatprep.subr.bf16.mxu0 %v2001_v60  ;;  %1653 = vmatprep.subr.bf16.mxu1 %v2003_v61  ;;  %v2094_v60 = vld [vmem:[%s2558_s4 + $0x32c] ss:$16 sps:$4 sm:$0xff]   ;;  %v2093_v61 = vld [vmem:[%s2558_s4 + $0x320] ss:$16 sps:$4 sm:$0xff]  }
  0x8a   : > { %919 = vperm.xlu0 %1940, %v916_v58  }
  0x8c   : > { %1511 = vmatpush1.bf16.msra.mxu0 %v2005_v62  ;;  %1655 = vmatpush1.bf16.msra.mxu1 %v2006_v63  ;;  %v2096_v62 = vld [vmem:[%s2558_s4 + $0x328] ss:$16 sps:$4 sm:$0xff]   ;;  %v2097_v63 = vld [vmem:[%s2558_s4 + $0x344] ss:$16 sps:$4 sm:$0xff]  }
  0x8d   : > { %1513 = vmatprep.subr.bf16.mxu0 %v2007_v0  ;;  %1657 = vmatprep.subr.bf16.mxu1 %v2009_v1  ;;  %v2100_v0 = vld [vmem:[%s2558_s4 + $0x34c] ss:$16 sps:$4 sm:$0xff]   ;;  %v2099_v1 = vld [vmem:[%s2558_s4 + $0x340] ss:$16 sps:$4 sm:$0xff]  }
  0x90   : > { %1515 = vmatpush1.bf16.msra.mxu0 %v2011_v2  ;;  %1659 = vmatpush1.bf16.msra.mxu1 %v2012_v3  ;;  %v2102_v2 = vld [vmem:[%s2558_s4 + $0x348] ss:$16 sps:$4 sm:$0xff]   ;;  %v2103_v3 = vld [vmem:[%s2558_s4 + $0x364] ss:$16 sps:$4 sm:$0xff]  }
  0x91   : > { %1517 = vmatprep.subr.bf16.mxu0 %v2013_v4  ;;  %1661 = vmatprep.subr.bf16.mxu1 %v2015_v5  ;;  %v2106_v4 = vld [vmem:[%s2558_s4 + $0x36c] ss:$16 sps:$4 sm:$0xff]   ;;  %v2105_v5 = vld [vmem:[%s2558_s4 + $0x360] ss:$16 sps:$4 sm:$0xff]  }
  0x94   : > { %1519 = vmatpush1.bf16.msra.mxu0 %v2017_v6  ;;  %1663 = vmatpush1.bf16.msra.mxu1 %v2018_v7  ;;  %v2108_v6 = vld [vmem:[%s2558_s4 + $0x368] ss:$16 sps:$4 sm:$0xff]   ;;  %v2109_v7 = vld [vmem:[%s2558_s4 + $0x384] ss:$16 sps:$4 sm:$0xff]  }
  0x95   : > { %1521 = vmatprep.subr.bf16.mxu0 %v2019_v8  ;;  %1665 = vmatprep.subr.bf16.mxu1 %v2021_v9  ;;  %v2112_v8 = vld [vmem:[%s2558_s4 + $0x38c] ss:$16 sps:$4 sm:$0xff]   ;;  %v2111_v9 = vld [vmem:[%s2558_s4 + $0x380] ss:$16 sps:$4 sm:$0xff]  }
  0x98   : > { %1523 = vmatpush1.bf16.msra.mxu0 %v2023_v10  ;;  %1667 = vmatpush1.bf16.msra.mxu1 %v2024_v11  ;;  %v2114_v10 = vld [vmem:[%s2558_s4 + $0x388] ss:$16 sps:$4 sm:$0xff]   ;;  %v2115_v11 = vld [vmem:[%s2558_s4 + $0x3a4] ss:$16 sps:$4 sm:$0xff]  }
  0x99   : > { %1525 = vmatprep.subr.bf16.mxu0 %v2025_v12  ;;  %1669 = vmatprep.subr.bf16.mxu1 %v2027_v13  ;;  %v2118_v12 = vld [vmem:[%s2558_s4 + $0x3ac] ss:$16 sps:$4 sm:$0xff]   ;;  %v2117_v13 = vld [vmem:[%s2558_s4 + $0x3a0] ss:$16 sps:$4 sm:$0xff]  }
  0x9c   : > { %1527 = vmatpush1.bf16.msra.mxu0 %v2029_v14  ;;  %1671 = vmatpush1.bf16.msra.mxu1 %v2030_v15  ;;  %v2120_v14 = vld [vmem:[%s2558_s4 + $0x3a8] ss:$16 sps:$4 sm:$0xff]   ;;  %v2121_v15 = vld [vmem:[%s2558_s4 + $0x3c4] ss:$16 sps:$4 sm:$0xff]  }
  0x9d   : > { %1529 = vmatprep.subr.bf16.mxu0 %v2031_v18  ;;  %1673 = vmatprep.subr.bf16.mxu1 %v2033_v19  ;;  %v2124_v18 = vld [vmem:[%s2558_s4 + $0x3cc] ss:$16 sps:$4 sm:$0xff]   ;;  %v2123_v19 = vld [vmem:[%s2558_s4 + $0x3c0] ss:$16 sps:$4 sm:$0xff]  }
  0xa0   : > { %1531 = vmatpush1.bf16.msra.mxu0 %v2035_v20  ;;  %1675 = vmatpush1.bf16.msra.mxu1 %v2036_v21  ;;  %v2126_v20 = vld [vmem:[%s2558_s4 + $0x3c8] ss:$16 sps:$4 sm:$0xff]   ;;  %v2127_v21 = vld [vmem:[%s2558_s4 + $0x3e4] ss:$16 sps:$4 sm:$0xff]  }
  0xa1   : > { %1533 = vmatprep.subr.bf16.mxu0 %v2037_v22  ;;  %1677 = vmatprep.subr.bf16.mxu1 %v2040_v23  ;;  %v2130_v22 = vld [vmem:[%s2558_s4 + $0x3ec] ss:$16 sps:$4 sm:$0xff]   ;;  %v2129_v23 = vld [vmem:[%s2558_s4 + $0x3e0] ss:$16 sps:$4 sm:$0xff]  }
  0xa3   : > { %997 = vmatmul.mubr.f32.vlgmr.msra.gmra.mrb[0].mxu0 %v2554_v17  ;;  %1210 = vmatmul.mubr.f32.vlgmr.msra.gmra.mrb[0].mxu1 %v2554_v17  ;;  %v2055_v17 = vld [vmem:[%s2558_s4 + $0x264] ss:$16 sps:$4 sm:$0xff]  }
  0xa4   : > { %1535 = vmatpush1.bf16.msra.mxu0 %v2039_v25  ;;  %1679 = vmatpush1.bf16.msra.mxu1 %v2042_v26  ;;  %v2132_v25 = vld [vmem:[%s2558_s4 + $0x3e8] ss:$16 sps:$4 sm:$0xff]   ;;  %v2133_v26 = vld [vmem:[%s2558_s4 + $0x404] ss:$16 sps:$4 sm:$0xff]  }
  0xa5   : > { %1537 = vmatprep.subr.bf16.mxu0 %v2043_v27  ;;  %1681 = vmatprep.subr.bf16.mxu1 %v2046_v28  ;;  %v2136_v27 = vld [vmem:[%s2558_s4 + $0x40c] ss:$16 sps:$4 sm:$0xff]   ;;  %v2135_v28 = vld [vmem:[%s2558_s4 + $0x400] ss:$16 sps:$4 sm:$0xff]  }
  0xa6   : > { %1067 = vmatprep.mubr.f32.mxu0 %v926_v29  ;;  %1280 = vmatprep.mubr.f32.mxu1 %v926_v29  ;;  %v2138_v29 = vld [vmem:[%s2558_s4 + $0x408] ss:$16 sps:$4 sm:$0xff]  }
  0xa8   : > { %1539 = vmatpush1.bf16.msra.mxu0 %v2045_v16  ;;  %1683 = vmatpush1.bf16.msra.mxu1 %v2048_v30  ;;  %v2139_v16 = vld [vmem:[%s2558_s4 + $0x424] ss:$16 sps:$4 sm:$0xff]   ;;  %v2142_v30 = vld [vmem:[%s2558_s4 + $0x42c] ss:$16 sps:$4 sm:$0xff]  }
  0xa9   : > { %1541 = vmatprep.subr.bf16.mxu0 %v2049_v31  ;;  %1685 = vmatprep.subr.bf16.mxu1 %v2052_v32  ;;  %v2141_v31 = vld [vmem:[%s2558_s4 + $0x420] ss:$16 sps:$4 sm:$0xff]   ;;  %v2144_v32 = vld [vmem:[%s2558_s4 + $0x428] ss:$16 sps:$4 sm:$0xff]  }
  0xac   : > { %1543 = vmatpush1.bf16.msra.mxu0 %v2051_v33  ;;  %1687 = vmatpush1.bf16.msra.mxu1 %v2054_v34  ;;  %v2145_v33 = vld [vmem:[%s2558_s4 + $0x444] ss:$16 sps:$4 sm:$0xff]   ;;  %v2148_v34 = vld [vmem:[%s2558_s4 + $0x44c] ss:$16 sps:$4 sm:$0xff]  }
  0xad   : > { %1545 = vmatprep.subr.bf16.mxu0 %v2055_v17  ;;  %1689 = vmatprep.subr.bf16.mxu1 %v2058_v35  ;;  %v2198_v17 = vmov 0.0   ;;  %v2147_v35 = vld [vmem:[%s2558_s4 + $0x440] ss:$16 sps:$4 sm:$0xff]  }
  0xb0   : > { %1547 = vmatpush1.bf16.msra.mxu0 %v2057_v36  ;;  %1691 = vmatpush1.bf16.msra.mxu1 %v2060_v37  ;;  %v2150_v36 = vld [vmem:[%s2558_s4 + $0x448] ss:$16 sps:$4 sm:$0xff]   ;;  %v2154_v37 = vld [vmem:[%s2558_s4 + $0x46c] ss:$16 sps:$4 sm:$0xff]  }
  0xb1   : > { %1549 = vmatprep.subr.bf16.mxu0 %v2061_v38  ;;  %1693 = vmatprep.subr.bf16.mxu1 %v2064_v39  ;;  %v2153_v38 = vld [vmem:[%s2558_s4 + $0x460] ss:$16 sps:$4 sm:$0xff]   ;;  %v2156_v39 = vld [vmem:[%s2558_s4 + $0x468] ss:$16 sps:$4 sm:$0xff]  }
  0xb4   : > { %1551 = vmatpush1.bf16.msra.mxu0 %v2063_v40  ;;  %1695 = vmatpush1.bf16.msra.mxu1 %v2066_v41  ;;  %v912_v40 = vld [vmem:[%s2735_s1 + $0x8] sm:$0x3] }
  0xb5   : > { %1553 = vmatprep.subr.bf16.mxu0 %v2067_v42  ;;  %1697 = vmatprep.subr.bf16.mxu1 %v2070_v43  ;;  %v915_v41 = vunpack.c.l.bf16 %v912_v40 }
  0xb8   : > { %1555 = vmatpush1.bf16.msra.mxu0 %v2069_v44  ;;  %1699 = vmatpush1.bf16.msra.mxu1 %v2072_v45 }
  0xb9   : > { %1557 = vmatprep.subr.bf16.mxu0 %v2073_v46  ;;  %1701 = vmatprep.subr.bf16.mxu1 %v2076_v47 }
  0xbc   : > { %1559 = vmatpush1.bf16.msra.mxu0 %v2075_v48  ;;  %1703 = vmatpush1.bf16.msra.mxu1 %v2078_v49 }
  0xbd   : > { %1561 = vmatprep.subr.bf16.mxu0 %v2079_v50  ;;  %1705 = vmatprep.subr.bf16.mxu1 %v2082_v51 }
  0xc0   : > { %1563 = vmatpush1.bf16.msra.mxu0 %v2081_v52  ;;  %1707 = vmatpush1.bf16.msra.mxu1 %v2084_v53 }
  0xc1   : > { %1565 = vmatprep.subr.bf16.mxu0 %v2085_v54  ;;  %1709 = vmatprep.subr.bf16.mxu1 %v2088_v55 }
  0xc4   : > { %1567 = vmatpush1.bf16.msra.mxu0 %v2087_v56  ;;  %1711 = vmatpush1.bf16.msra.mxu1 %v2090_v57 }
  0xc5   : > { %1569 = vmatprep.subr.bf16.mxu0 %v2091_v59  ;;  %1713 = vmatprep.subr.bf16.mxu1 %v2094_v60 }
  0xc8   : > { %1571 = vmatpush1.bf16.msra.mxu0 %v2093_v61  ;;  %1715 = vmatpush1.bf16.msra.mxu1 %v2096_v62 }
  0xc9   : > { %1573 = vmatprep.subr.bf16.mxu0 %v2097_v63  ;;  %1717 = vmatprep.subr.bf16.mxu1 %v2100_v0 }
  0xcc   : > { %1575 = vmatpush1.bf16.msra.mxu0 %v2099_v1  ;;  %1719 = vmatpush1.bf16.msra.mxu1 %v2102_v2 }
  0xcd   : > { %1577 = vmatprep.subr.bf16.mxu0 %v2103_v3  ;;  %1721 = vmatprep.subr.bf16.mxu1 %v2106_v4 }
  0xd0   : > { %1579 = vmatpush1.bf16.msra.mxu0 %v2105_v5  ;;  %1723 = vmatpush1.bf16.msra.mxu1 %v2108_v6 }
  0xd1   : > { %1581 = vmatprep.subr.bf16.mxu0 %v2109_v7  ;;  %1725 = vmatprep.subr.bf16.mxu1 %v2112_v8 }
  0xd4   : > { %1583 = vmatpush1.bf16.msra.mxu0 %v2111_v9  ;;  %1727 = vmatpush1.bf16.msra.mxu1 %v2114_v10 }
  0xd5   : > { %1585 = vmatprep.subr.bf16.mxu0 %v2115_v11  ;;  %1729 = vmatprep.subr.bf16.mxu1 %v2118_v12 }
  0xd8   : > { %1587 = vmatpush1.bf16.msra.mxu0 %v2117_v13  ;;  %1731 = vmatpush1.bf16.msra.mxu1 %v2120_v14 }
  0xd9   : > { %1589 = vmatprep.subr.bf16.mxu0 %v2121_v15  ;;  %1733 = vmatprep.subr.bf16.mxu1 %v2124_v18 }
  0xdc   : > { %1591 = vmatpush1.bf16.msra.mxu0 %v2123_v19  ;;  %1735 = vmatpush1.bf16.msra.mxu1 %v2126_v20 }
  0xdd   : > { %1593 = vmatprep.subr.bf16.mxu0 %v2127_v21  ;;  %1737 = vmatprep.subr.bf16.mxu1 %v2130_v22 }
  0xe0   : > { %1595 = vmatpush1.bf16.msra.mxu0 %v2129_v23  ;;  %1739 = vmatpush1.bf16.msra.mxu1 %v2132_v25 }
  0xe1   : > { %1597 = vmatprep.subr.bf16.mxu0 %v2133_v26  ;;  %1741 = vmatprep.subr.bf16.mxu1 %v2136_v27 }
  0xe3   : > { %1068 = vmatmul.mubr.f32.vlgmr.msra.gmra.mrb[0].mxu0 %v2627_v24  ;;  %1281 = vmatmul.mubr.f32.vlgmr.msra.gmra.mrb[0].mxu1 %v2627_v24  ;;  %v2151_v24 = vld [vmem:[%s2558_s4 + $0x464] ss:$16 sps:$4 sm:$0xff]  }
  0xe4   : > { %1599 = vmatpush1.bf16.msra.mxu0 %v2135_v28  ;;  %1743 = vmatpush1.bf16.msra.mxu1 %v2138_v29 }
  0xe5   : > { %1601 = vmatprep.subr.bf16.mxu0 %v2139_v16  ;;  %1745 = vmatprep.subr.bf16.mxu1 %v2142_v30 }
  0xe6   : > { %1138 = vmatprep.mubr.f32.mxu0 %v2198_v17  ;;  %1351 = vmatprep.mubr.f32.mxu1 %v2198_v17 }
  0xe8   : > { %1603 = vmatpush1.bf16.msra.mxu0 %v2141_v31  ;;  %1747 = vmatpush1.bf16.msra.mxu1 %v2144_v32 }
  0xe9   : > { %1605 = vmatprep.subr.bf16.mxu0 %v2145_v33  ;;  %1749 = vmatprep.subr.bf16.mxu1 %v2148_v34 }
  0xec   : > { %1607 = vmatpush1.bf16.msra.mxu0 %v2147_v35  ;;  %1751 = vmatpush1.bf16.msra.mxu1 %v2150_v36 }
  0xed   : > { %1609 = vmatprep.subr.bf16.mxu0 %v2151_v24  ;;  %1753 = vmatprep.subr.bf16.mxu1 %v2154_v37 }
  0xf0   : > { %1611 = vmatpush1.bf16.msra.mxu0 %v2153_v38  ;;  %1755 = vmatpush1.bf16.msra.mxu1 %v2156_v39 }
  0xf3   : > { %1463 = vmatmul.mubr.msk.f32.vlgmr.msra.gmra.mrb[0].mxu0 %vm929_vm0, %v915_v41  ;;  %1464 = vmatmul.mubr.msk.f32.vlgmr.msra.gmra.mrb[0].mxu1 %vm929_vm0, %v915_v41 }
 0x109   : > { %v920_v42 = vpop.permute.xlu0 %919 }
 0x1c6   : > { %v1140_v43 = vpop.f32.mrb[0].mxu0  ;;  %v1353_v44 = vpop.f32.mrb[0].mxu1 }
 0x1c7   : > { %v1756_v45 = vadd.f32 %v1140_v43, %v920_v42  ;;  %v1758_v46 = vadd.f32 %v1353_v44, %v920_v42  ;;  %v1142_v47 = vpop.f32.mrb[1].mxu0  ;;  %v1355_v48 = vpop.f32.mrb[1].mxu1 }
 0x1c8   : > { %v1757_v49 = vadd.f32 %v1142_v47, %v920_v42  ;;  %v1759_v50 = vadd.f32 %v1355_v48, %v920_v42 }
 0x1c9   : > { %v1358_v51 = vsub.f32 0.0, %v1756_v45  ;;  %v1360_v52 = vsub.f32 0.0, %v1758_v46 }
 0x1ca   : > { %v1359_v53 = vsub.f32 0.0, %v1757_v49  ;;  %v1361_v54 = vsub.f32 0.0, %v1759_v50 }
 0x1cb   : > { %v1362_v55 = vmul.f32 1.442695, %v1358_v51  ;;  %v1366_v56 = vmul.f32 1.442695, %v1360_v52 }
 0x1cc   : > { %v1364_v57 = vmul.f32 1.442695, %v1359_v53  ;;  %v1368_v58 = vmul.f32 1.442695, %v1361_v54 }
 0x1cd   : > { %2157 = vpow2.f32 %v1362_v55 }
 0x1ce   : > { %2159 = vpow2.f32 %v1366_v56 }
 0x1cf   : > { %2161 = vpow2.f32 %v1364_v57 }
 0x1d0   : > { %2163 = vpow2.f32 %v1368_v58 }
 0x1d7   : > { %v2158_v59 = vpop.eup %2157 }
 0x1d8   : > { %v2160_v60 = vpop.eup %2159  ;;  %v1370_v61 = vadd.f32 1.0, %v2158_v59 }
 0x1d9   : > { %v2162_v62 = vpop.eup %2161  ;;  %v1372_v63 = vadd.f32 1.0, %v2160_v60 }
 0x1da   : > { %v2164_v0 = vpop.eup %2163  ;;  %2165 = vrcp.f32 %v1370_v61  ;;  %v1371_v1 = vadd.f32 1.0, %v2162_v62 }
 0x1db   : > { %2167 = vrcp.f32 %v1372_v63  ;;  %v1373_v2 = vadd.f32 1.0, %v2164_v0 }
 0x1dc   : > { %2169 = vrcp.f32 %v1371_v1 }
 0x1dd   : > { %2171 = vrcp.f32 %v1373_v2 }
 0x1e4   : > { %v2166_v3 = vpop.eup %2165 }
 0x1e5   : > { %v2168_v4 = vpop.eup %2167 }
 0x1e6   : > { %v2170_v5 = vpop.eup %2169 }
 0x1e7   : > { %v2172_v6 = vpop.eup %2171  ;;  %v1386_v7 = vcombine.low %v2166_v3, %v2170_v5 }
 0x1e8   : > { %v1387_v8 = vcombine.low %v2168_v4, %v2172_v6 }
 0x1e9   : > { %1390 = vst [vmem:[%s477_s14] sm:$0x77] %v1386_v7 }
 0x1ea   : > { %1391 = vst [vmem:[%s477_s14 + $0x8] sm:$0x77] %v1387_v8 }
 0x1eb PF: > { %p10_p9 = scmp.ge.s32.totalorder %s2236_s16, 6   ;;  %s2738_s12 = smov %s2191_s13 }
 0x1ec   : > { %s2739_s13 = smov %s2245_s19  ;;  %s2740_s14 = smov %s2236_s16 }
 0x1ed   :  { %12 = sbr.rel (!%p10_p9) target bundleno = 2 (0x2), region = 90 }

</bundles_post_ra>
